<compile_context>
chip_gen: v7x
topology: tpu7x:2x2x1
jax: 0.10.0
libtpu: 0.0.40
codegen_flags: <defaults>
</compile_context>

<pallas_src>
import functools
import math

import jax
import jax.numpy as jnp
from jax.experimental import pallas as pl
from jax.experimental.pallas import tpu as pltpu

_VMEM = pltpu.MemorySpace.VMEM
_SQRT2 = math.sqrt(2.0)


def _round_up(x, m):
  return (x + m - 1) // m * m


def _l2n(x):
  """L2-normalize rows via rsqrt (EUP) instead of sqrt+divide (VPU)."""
  ssq = jnp.sum(x * x, axis=-1, keepdims=True)
  return x * jax.lax.rsqrt(jnp.maximum(ssq, 1e-24))


def _sigmoid(x):
  return pl.reciprocal(1.0 + jnp.exp(-x), approx=True)


# ----------------------------------------------------------------------------
# pallas_call helper for the small fused single-block kernels (whole-array VMEM)
# ----------------------------------------------------------------------------
def _call(kernel, out_shape, *args):
  multi = isinstance(out_shape, (tuple, list))
  if multi:
    out_shape = tuple(out_shape)
    out_specs = tuple(pl.BlockSpec(memory_space=_VMEM) for _ in out_shape)
  else:
    out_specs = pl.BlockSpec(memory_space=_VMEM)
  return pl.pallas_call(
      kernel,
      out_shape=out_shape,
      in_specs=[pl.BlockSpec(memory_space=_VMEM) for _ in args],
      out_specs=out_specs,
  )(*args)


# ----------------------------------------------------------------------------
# Backbone stand-in: tiled, pipelined matmul + bias + ReLU (bf16 MXU operands,
# bf16 writeback of the big visual-feature intermediate)
# ----------------------------------------------------------------------------
def _backbone_kernel(x_ref, w_ref, b_ref, o_ref):
  acc = jnp.dot(x_ref[...], w_ref[...], preferred_element_type=jnp.float32)
  o_ref[...] = jnp.maximum(acc + b_ref[...], 0.0).astype(o_ref.dtype)


def backbone_matmul(patches, w, b, *, tile_m=512):
  """relu(patches @ w + b); grid over rows, double-buffered, bf16 in/out."""
  m, k = patches.shape
  n = w.shape[1]
  tm = tile_m if m >= tile_m else _round_up(m, 8)
  m_pad = _round_up(m, tm)
  x = patches.astype(jnp.bfloat16)
  if m_pad != m:
    x = jnp.pad(x, ((0, m_pad - m), (0, 0)))
  out = pl.pallas_call(
      _backbone_kernel,
      out_shape=jax.ShapeDtypeStruct((m_pad, n), jnp.bfloat16),
      grid=(m_pad // tm,),
      in_specs=[
          pl.BlockSpec((tm, k), lambda i: (i, 0)),
          pl.BlockSpec((k, n), lambda i: (0, 0)),
          pl.BlockSpec((1, n), lambda i: (0, 0)),
      ],
      out_specs=pl.BlockSpec((tm, n), lambda i: (i, 0)),
      compiler_params=pltpu.CompilerParams(
          dimension_semantics=("parallel",),
          vmem_limit_bytes=32 * 1024 * 1024),
  )(x, w.astype(jnp.bfloat16), b)
  return out[:m] if m_pad != m else out


# ----------------------------------------------------------------------------
# Fused: LKD visual_proj (pool+Linear+LN+GELU+Linear) + ASE sparsity predictor
# ----------------------------------------------------------------------------
def _embed_kernel(vf_ref, w1_ref, b1_ref, g_ref, be_ref, w2_ref, b2_ref,
                  aw1_ref, ab1_ref, aw2_ref, ab2_ref,
                  emb_ref, sp_ref):
  # TODO(synk): for very large spatial extents the mean-pool could be folded
  #             into the backbone kernel instead of re-reading bf16 features.
  pooled = jnp.mean(vf_ref[...].astype(jnp.float32), axis=1)        # [B, C]
  h = jnp.dot(pooled.astype(jnp.bfloat16), w1_ref[...],
              preferred_element_type=jnp.float32) + b1_ref[...]
  mu = jnp.mean(h, axis=-1, keepdims=True)
  var = jnp.mean((h - mu) * (h - mu), axis=-1, keepdims=True)
  hn = (h - mu) * jax.lax.rsqrt(var + 1e-5)
  hn = hn * g_ref[...] + be_ref[...]
  hg = 0.5 * hn * (1.0 + jax.lax.erf(hn / _SQRT2))                  # exact GELU
  emb = jnp.dot(hg.astype(jnp.bfloat16), w2_ref[...],
                preferred_element_type=jnp.float32) + b2_ref[...]
  emb_ref[...] = emb
  # ASE sparsity predictor: Linear + ReLU -> Linear(->1) + Sigmoid
  ah = jnp.maximum(
      jnp.dot(emb.astype(jnp.bfloat16), aw1_ref[...],
              preferred_element_type=jnp.float32) + ab1_ref[...], 0.0)
  logit = jnp.sum(ah * aw2_ref[...], axis=-1, keepdims=True) + ab2_ref[...]
  sp_ref[...] = 0.05 + (0.3 - 0.05) * _sigmoid(logit)


# ----------------------------------------------------------------------------
# Fused: ASE mask + SPQ (importance MLP + fake quant) + output proj + L2-norm
# ----------------------------------------------------------------------------
def _sparse_quant_proj_kernel(x_ref, thr_ref, sw1_ref, sb1_ref, sw2_ref,
                              sb2_ref, scale_ref, zp_ref, ow_ref, ob_ref,
                              xq_ref, out_ref, stats_ref,
                              *, min_bits, max_bits, semantic_weight):
  x = x_ref[...]                                                    # [B, E]
  b_rows, e_dim = x.shape
  mask = (jnp.abs(x) > thr_ref[...]).astype(jnp.float32)
  sx = x * mask
  # SPQ importance estimator (bf16 MXU operands, fp32 accumulation/elementwise)
  h = jnp.maximum(
      jnp.dot(sx.astype(jnp.bfloat16), sw1_ref[...],
              preferred_element_type=jnp.float32) + sb1_ref[...], 0.0)
  imp = _sigmoid(jnp.dot(h.astype(jnp.bfloat16), sw2_ref[...],
                         preferred_element_type=jnp.float32) + sb2_ref[...])
  bits = jnp.round(min_bits + (max_bits - min_bits) * imp)
  scale = jnp.abs(scale_ref[...]) + 1e-6
  inv_scale = 1.0 / scale                      # tiny [1,1]; broadcast multiply
  zp = zp_ref[...]
  qmax = jnp.exp2(bits) - 1.0
  x_deq = (jnp.round(jnp.clip(sx * inv_scale + zp, 0.0, qmax)) - zp) * scale
  xq_ref[...] = x_deq                       # STE: forward value == dequantized
  # output projection + L2 normalize (bf16 MXU operands, fp32 math)
  y = jnp.dot(x_deq.astype(jnp.bfloat16), ow_ref[...],
              preferred_element_type=jnp.float32) + ob_ref[...]
  out_ref[...] = _l2n(y)
  # scalar losses packed lane-dense into a single [1, 128] stats output
  diff = x_deq - sx
  row_l1 = jnp.sum(jnp.abs(sx), axis=-1, keepdims=True)
  row_sq = jnp.sum(diff * diff, axis=-1, keepdims=True)
  row_sem = jnp.sum(imp * jnp.abs(diff), axis=-1, keepdims=True)
  # l1_reg matches torch: |sparse|.sum(dim=1).mean()  -> divide by batch only
  l1_reg = jnp.sum(row_l1, axis=0, keepdims=True) * (1.0 / b_rows)
  recon = jnp.sum(row_sq, axis=0, keepdims=True) * (1.0 / (b_rows * e_dim))
  sem = jnp.sum(row_sem, axis=0, keepdims=True) * (1.0 / b_rows)
  quant = recon + semantic_weight * sem
  lane = jax.lax.broadcasted_iota(jnp.int32, (1, 128), 1)
  stats_ref[...] = (jnp.where(lane == 0, l1_reg, 0.0)
                    + jnp.where(lane == 1, quant, 0.0))


# ----------------------------------------------------------------------------
# IQE kernels (database-sized work gridded over N_db tiles)
# ----------------------------------------------------------------------------
def _db_norm_t_kernel(db_ref, dnt_ref):
  """Normalize DB rows and emit the bf16 transposed block [D, tile_n]."""
  dn = _l2n(db_ref[...])                                  # [tile_n, D] fp32
  dnt_ref[...] = jnp.transpose(dn).astype(jnp.bfloat16)   # [D, tile_n] bf16


def _scores_kernel(q_ref, dnt_ref, s_ref):
  """normalize(q) @ dn^T as a plain NN matmul against the pre-transposed DB."""
  qn = _l2n(q_ref[...]).astype(jnp.bfloat16)               # [B_pad, D]
  s_ref[...] = jnp.dot(qn, dnt_ref[...],
                       preferred_element_type=jnp.float32)


def _expand_mlp_kernel(c_ref, w1_ref, b1_ref, w2_ref, b2_ref, exp_ref, en_ref):
  """IQE expansion MLP + L2-normalized bf16 copy (single small block)."""
  h = jnp.maximum(
      jnp.dot(c_ref[...].astype(jnp.bfloat16), w1_ref[...],
              preferred_element_type=jnp.float32) + b1_ref[...], 0.0)
  expanded = jnp.dot(h.astype(jnp.bfloat16), w2_ref[...],
                     preferred_element_type=jnp.float32) + b2_ref[...]
  exp_ref[...] = expanded
  en_ref[...] = _l2n(expanded).astype(jnp.bfloat16)


def _blend_kernel(en_ref, dnt_ref, s_ref, es_ref, f_ref, *, gamma):
  """expanded scores for one DB tile + gamma-blend with initial scores."""
  es = jnp.dot(en_ref[...], dnt_ref[...],
               preferred_element_type=jnp.float32)
  es_ref[...] = es
  f_ref[...] = gamma * s_ref[...] + (1.0 - gamma) * es


def _pick_db_tiling(n_db):
  tile_n = min(512, _round_up(n_db, 128))
  n_pad = _round_up(n_db, tile_n)
  return tile_n, n_pad


def _iqe_norm_db(db_p, tile_n):
  n_pad, d = db_p.shape
  return pl.pallas_call(
      _db_norm_t_kernel,
      out_shape=jax.ShapeDtypeStruct((d, n_pad), jnp.bfloat16),
      grid=(n_pad // tile_n,),
      in_specs=[pl.BlockSpec((tile_n, d), lambda i: (i, 0))],
      out_specs=pl.BlockSpec((d, tile_n), lambda i: (0, i)),
      compiler_params=pltpu.CompilerParams(
          dimension_semantics=("parallel",)),
  )(db_p)


def _iqe_scores(qp, dnt, tile_n):
  b_pad, d = qp.shape
  n_pad = dnt.shape[1]
  return pl.pallas_call(
      _scores_kernel,
      out_shape=jax.ShapeDtypeStruct((b_pad, n_pad), jnp.float32),
      grid=(n_pad // tile_n,),
      in_specs=[pl.BlockSpec((b_pad, d), lambda i: (0, 0)),
                pl.BlockSpec((d, tile_n), lambda i: (0, i))],
      out_specs=pl.BlockSpec((b_pad, tile_n), lambda i: (0, i)),
      compiler_params=pltpu.CompilerParams(
          dimension_semantics=("parallel",)),
  )(qp, dnt)


def _iqe_blend(en_p, dnt, s_p, tile_n, gamma):
  b_pad, d = en_p.shape
  n_pad = dnt.shape[1]
  kern = functools.partial(_blend_kernel, gamma=gamma)
  return pl.pallas_call(
      kern,
      out_shape=(jax.ShapeDtypeStruct((b_pad, n_pad), jnp.float32),
                 jax.ShapeDtypeStruct((b_pad, n_pad), jnp.float32)),
      grid=(n_pad // tile_n,),
      in_specs=[pl.BlockSpec((b_pad, d), lambda i: (0, 0)),
                pl.BlockSpec((d, tile_n), lambda i: (0, i)),
                pl.BlockSpec((b_pad, tile_n), lambda i: (0, i))],
      out_specs=(pl.BlockSpec((b_pad, tile_n), lambda i: (0, i)),
                 pl.BlockSpec((b_pad, tile_n), lambda i: (0, i))),
      compiler_params=pltpu.CompilerParams(
          dimension_semantics=("parallel",)),
  )(en_p, dnt, s_p)


def _pad_rows(x, rows):
  return x if x.shape[0] == rows else jnp.pad(x, ((0, rows - x.shape[0]), (0, 0)))


def _expand_mlp(combined, p, b_pad, d_out):
  cp = _pad_rows(combined, b_pad)
  return _call(
      _expand_mlp_kernel,
      (jax.ShapeDtypeStruct((b_pad, d_out), jnp.float32),
       jax.ShapeDtypeStruct((b_pad, d_out), jnp.bfloat16)),
      cp,
      p["iqe_w1"].astype(jnp.bfloat16), p["iqe_b1"],
      p["iqe_w2"].astype(jnp.bfloat16), p["iqe_b2"])


def iqe_expand_query(query, db, p, *, top_k=5, gamma=0.6):
  """Two IQE rounds. Round 1's initial scores are bit-identical to round 0's
  expanded scores, so round 1 needs no database matmul at all (dedup)."""
  b, d_out = query.shape
  n_db = db.shape[0]
  b_pad = _round_up(b, 8)
  tile_n, n_pad = _pick_db_tiling(n_db)
  db_p = db if n_pad == n_db else jnp.pad(db, ((0, n_pad - n_db), (0, 0)))

  # normalized + transposed DB, bf16, computed once and reused by every matmul
  dnt = _iqe_norm_db(db_p, tile_n)                           # [D, n_pad] bf16

  # ---- round 0: initial scores ----
  qp = _pad_rows(query, b_pad)
  s0_p = _iqe_scores(qp, dnt, tile_n)                        # [B_pad, n_pad]
  s0 = s0_p[:b, :n_db]

  k = min(top_k, n_db)
  _, idx0 = jax.lax.top_k(s0, k)                             # glue
  avg0 = jnp.mean(jnp.take(db, idx0, axis=0), axis=1)        # [B, D]  glue
  comb0 = jnp.concatenate([query, avg0], axis=1)             # [B, 2D]
  exp0_p, en0_p = _expand_mlp(comb0, p, b_pad, d_out)

  es0_p, f0_p = _iqe_blend(en0_p, dnt, s0_p, tile_n, gamma)
  e0 = es0_p[:b, :n_db]
  f0 = f0_p[:b, :n_db]

  # ---- round 1: initial scores == e0 (dedup); only the expansion MLP runs ----
  _, idx1 = jax.lax.top_k(e0, k)
  avg1 = jnp.mean(jnp.take(db, idx1, axis=0), axis=1)
  comb1 = jnp.concatenate([exp0_p[:b], avg1], axis=1)
  exp1_p, _ = _expand_mlp(comb1, p, b_pad, d_out)

  return {
      "expanded_query": exp1_p[:b],
      "initial_scores": s0,
      "expanded_scores": e0,
      "final_scores": f0,
      "iteration": 0,
  }


# ----------------------------------------------------------------------------
# Parameter init (deterministic, matches PyTorch nn.Linear default ranges)
# ----------------------------------------------------------------------------
def _init_linear(key, fan_in, fan_out):
  kw, kb = jax.random.split(key)
  bound = 1.0 / math.sqrt(fan_in)
  w = jax.random.uniform(kw, (fan_in, fan_out), jnp.float32, -bound, bound)
  b = jax.random.uniform(kb, (1, fan_out), jnp.float32, -bound, bound)
  return w, b


def init_params(key, *, backbone_dim=512, embed_dim=256, output_dim=128,
                patch=32, in_ch=3):
  keys = jax.random.split(key, 16)
  p = {}
  # backbone stand-in: patchify conv (kernel=stride=32) as matmul
  p["bb_w"], p["bb_b"] = _init_linear(keys[0], patch * patch * in_ch,
                                      backbone_dim)
  # LKD visual_proj: Linear(512,512) -> LN(512) -> GELU -> Linear(512,256)
  p["vp_w1"], p["vp_b1"] = _init_linear(keys[1], backbone_dim, embed_dim * 2)
  p["vp_g"] = jnp.ones((1, embed_dim * 2), jnp.float32)
  p["vp_be"] = jnp.zeros((1, embed_dim * 2), jnp.float32)
  p["vp_w2"], p["vp_b2"] = _init_linear(keys[2], embed_dim * 2, embed_dim)
  # ASE sparsity predictor: Linear(256,64)+ReLU -> Linear(64,1)+Sigmoid
  p["ase_w1"], p["ase_b1"] = _init_linear(keys[3], embed_dim, embed_dim // 4)
  p["ase_w2"], p["ase_b2"] = _init_linear(keys[4], embed_dim // 4, 1)
  # SPQ importance estimator: Linear(256,128)+ReLU -> Linear(128,256)+Sigmoid
  p["spq_w1"], p["spq_b1"] = _init_linear(keys[5], embed_dim, embed_dim // 2)
  p["spq_w2"], p["spq_b2"] = _init_linear(keys[6], embed_dim // 2, embed_dim)
  p["spq_scale"] = jnp.ones((1, 1), jnp.float32)
  p["spq_zp"] = jnp.zeros((1, 1), jnp.float32)
  # output projection
  p["out_w"], p["out_b"] = _init_linear(keys[7], embed_dim, output_dim)
  # IQE expansion generator: Linear(256,128)+ReLU -> Linear(128,128)
  p["iqe_w1"], p["iqe_b1"] = _init_linear(keys[8], output_dim * 2, output_dim)
  p["iqe_w2"], p["iqe_b2"] = _init_linear(keys[9], output_dim, output_dim)
  return p


# ----------------------------------------------------------------------------
# SPARSE forward
# ----------------------------------------------------------------------------
def sparse_forward(params, images, database_features=None,
                   *, backbone_dim=512, embed_dim=256, patch=32):
  p = params
  B, C, H, W = images.shape
  nh, nw = H // patch, W // patch

  # --- backbone stand-in: NCHW -> NHWC im2col patches -> gridded matmul+ReLU
  x = jnp.transpose(images, (0, 2, 3, 1))                      # NHWC
  patches = x.reshape(B, nh, patch, nw, patch, C)
  patches = patches.transpose(0, 1, 3, 2, 4, 5).reshape(
      B * nh * nw, patch * patch * C)
  feat = backbone_matmul(patches, p["bb_w"], p["bb_b"])        # [B*nh*nw, 512] bf16
  visual_features = feat.reshape(B, nh, nw, backbone_dim).transpose(0, 3, 1, 2)

  # --- LKD (text=None path) visual_proj fused with ASE sparsity predictor
  vf_seq = feat.reshape(B, nh * nw, backbone_dim)
  visual_embed, sparsity = _call(
      _embed_kernel,
      (jax.ShapeDtypeStruct((B, embed_dim), jnp.float32),
       jax.ShapeDtypeStruct((B, 1), jnp.float32)),
      vf_seq,
      p["vp_w1"].astype(jnp.bfloat16), p["vp_b1"], p["vp_g"], p["vp_be"],
      p["vp_w2"].astype(jnp.bfloat16), p["vp_b2"],
      p["ase_w1"].astype(jnp.bfloat16), p["ase_b1"],
      p["ase_w2"].reshape(1, -1), p["ase_b2"])
  distill_loss = jnp.float32(0.0)

  # --- ASE threshold: per-row k-th smallest |x| (selection done in JAX glue,
  #     same as torch.kthvalue)
  E = embed_dim
  abs_sorted = jnp.sort(jnp.abs(visual_embed), axis=1)
  k = jnp.maximum(1, jnp.round(E * (1.0 - sparsity[:, 0])).astype(jnp.int32))
  threshold = jnp.take_along_axis(abs_sorted, (k - 1)[:, None], axis=1)

  # --- fused ASE mask + SPQ importance MLP + fake-quant + output proj + L2
  kern = functools.partial(_sparse_quant_proj_kernel,
                           min_bits=2.0, max_bits=8.0, semantic_weight=0.5)
  out_dim = p["out_w"].shape[1]
  out_shapes = (jax.ShapeDtypeStruct((B, E), jnp.float32),
                jax.ShapeDtypeStruct((B, out_dim), jnp.float32),
                jax.ShapeDtypeStruct((1, 128), jnp.float32))
  sparse_features, output_features, stats = _call(
      kern, out_shapes, visual_embed, threshold,
      p["spq_w1"].astype(jnp.bfloat16), p["spq_b1"],
      p["spq_w2"].astype(jnp.bfloat16), p["spq_b2"],
      p["spq_scale"], p["spq_zp"],
      p["out_w"].astype(jnp.bfloat16), p["out_b"])
  sparsity_loss = stats[0, 0]
  quant_loss = stats[0, 1]

  iqe_out = None
  if database_features is not None:
    iqe_out = iqe_expand_query(output_features, database_features, p)
    # training mode (nn.Module default): output_features is NOT replaced by the
    # expanded query.

  return {
      "output_features": output_features,
      "visual_features": visual_features,
      "sparse_features": sparse_features,
      "distill_loss": distill_loss,
      "sparsity_loss": sparsity_loss,
      "quant_loss": quant_loss,
      "iqe_out": iqe_out,
  }


# ----------------------------------------------------------------------------
if __name__ == "__main__":
  key = jax.random.PRNGKey(0)
  pkey, ikey, dkey = jax.random.split(key, 3)

  params = init_params(pkey)
  images = jax.random.normal(ikey, (2, 3, 64, 64), jnp.float32)      # NCHW
  database_features = jax.random.normal(dkey, (16, 128), jnp.float32)

  fwd = jax.jit(sparse_forward)
  out = fwd(params, images, database_features)
  jax.block_until_ready(out["output_features"])
  jax.block_until_ready(out["iqe_out"]["final_scores"])
  jax.block_until_ready(out["iqe_out"]["expanded_query"])
  print("KERNEL_OK")
</pallas_src>

<mosaic_0001>
module attributes {stable_mosaic.version = 11 : i64} {
  func.func @_backbone_kernel(%arg0: i32, %arg1: memref<8x3072xbf16, #tpu.memory_space<vmem>>, %arg2: memref<3072x512xbf16, #tpu.memory_space<vmem>>, %arg3: memref<1x512xf32, #tpu.memory_space<vmem>>, %arg4: memref<8x512xbf16, #tpu.memory_space<vmem>>) attributes {dimension_semantics = [#tpu.dimension_semantics<parallel>], iteration_bounds = array<i64: 1>, scalar_prefetch = 0 : i64, scratch_operands = 0 : i64, tpu.core_type = #tpu.core_type<tc>, window_params = [{transform_indices = @transform_0, window_bounds = array<i64: 8, 3072>}, {pipeline_mode = #tpu.pipeline_mode<synchronous>, transform_indices = @transform_1, window_bounds = array<i64: 3072, 512>}, {pipeline_mode = #tpu.pipeline_mode<synchronous>, transform_indices = @transform_2, window_bounds = array<i64: 1, 512>}, {transform_indices = @transform_3, window_bounds = array<i64: 8, 512>}]} {
    %c0 = arith.constant 0 : index
    %c0_0 = arith.constant 0 : index
    %0 = vector.load %arg1[%c0, %c0_0] : memref<8x3072xbf16, #tpu.memory_space<vmem>>, vector<8x3072xbf16>
    %c0_1 = arith.constant 0 : index
    %c0_2 = arith.constant 0 : index
    %1 = vector.load %arg2[%c0_1, %c0_2] : memref<3072x512xbf16, #tpu.memory_space<vmem>>, vector<3072x512xbf16>
    %cst = arith.constant dense<0.000000e+00> : vector<8x512xf32>
    %2 = tpu.matmul %0, %1, %cst {dimension_numbers = #tpu.dot_dimension_numbers<[1], [0], [0], [1], [0, 0, 1, 1], [], []>} : vector<8x3072xbf16>, vector<3072x512xbf16>, vector<8x512xf32> -> vector<8x512xf32>
    %c0_3 = arith.constant 0 : index
    %c0_4 = arith.constant 0 : index
    %3 = vector.load %arg3[%c0_3, %c0_4] : memref<1x512xf32, #tpu.memory_space<vmem>>, vector<1x512xf32>
    %4 = vector.broadcast %3 : vector<1x512xf32> to vector<8x512xf32>
    %5 = arith.addf %2, %4 : vector<8x512xf32>
    %cst_5 = arith.constant 0.000000e+00 : f32
    %6 = vector.broadcast %cst_5 : f32 to vector<8x512xf32>
    %7 = arith.maximumf %5, %6 : vector<8x512xf32>
    %8 = arith.truncf %7 : vector<8x512xf32> to vector<8x512xbf16>
    %c0_6 = arith.constant 0 : index
    %c0_7 = arith.constant 0 : index
    %9 = vector.load %arg4[%c0_6, %c0_7] : memref<8x512xbf16, #tpu.memory_space<vmem>>, vector<8x512xbf16>
    tpu.vector_store %arg4[%c0_6, %c0_7], %8 {strides = array<i32>} : memref<8x512xbf16, #tpu.memory_space<vmem>>, vector<8x512xbf16>,
    return
  }
  func.func @transform_0(%arg0: i32) -> (i32, i32) {
    %c0_i32 = arith.constant 0 : i32
    %c0_i32_0 = arith.constant 0 : i32
    return %arg0, %c0_i32 : i32, i32
  }
  func.func @transform_1(%arg0: i32) -> (i32, i32) {
    %c0_i32 = arith.constant 0 : i32
    %c0_i32_0 = arith.constant 0 : i32
    %c0_i32_1 = arith.constant 0 : i32
    return %c0_i32, %c0_i32_0 : i32, i32
  }
  func.func @transform_2(%arg0: i32) -> (i32, i32) {
    %c0_i32 = arith.constant 0 : i32
    %c0_i32_0 = arith.constant 0 : i32
    %c0_i32_1 = arith.constant 0 : i32
    return %c0_i32, %c0_i32_0 : i32, i32
  }
  func.func @transform_3(%arg0: i32) -> (i32, i32) {
    %c0_i32 = arith.constant 0 : i32
    %c0_i32_0 = arith.constant 0 : i32
    return %arg0, %c0_i32 : i32, i32
  }
}

module attributes {stable_mosaic.version = 11 : i64} {
  func.func @_embed_kernel(%arg0: memref<2x4x512xbf16, #tpu.memory_space<vmem>>, %arg1: memref<512x512xbf16, #tpu.memory_space<vmem>>, %arg2: memref<1x512xf32, #tpu.memory_space<vmem>>, %arg3: memref<1x512xf32, #tpu.memory_space<vmem>>, %arg4: memref<1x512xf32, #tpu.memory_space<vmem>>, %arg5: memref<512x256xbf16, #tpu.memory_space<vmem>>, %arg6: memref<1x256xf32, #tpu.memory_space<vmem>>, %arg7: memref<256x64xbf16, #tpu.memory_space<vmem>>, %arg8: memref<1x64xf32, #tpu.memory_space<vmem>>, %arg9: memref<1x64xf32, #tpu.memory_space<vmem>>, %arg10: memref<1x1xf32, #tpu.memory_space<vmem>>, %arg11: memref<2x256xf32, #tpu.memory_space<vmem>>, %arg12: memref<2x1xf32, #tpu.memory_space<vmem>>) attributes {dimension_semantics = [], scalar_prefetch = 0 : i64, scratch_operands = 0 : i64, tpu.core_type = #tpu.core_type<tc>} {
    %c0 = arith.constant 0 : index
    %c0_0 = arith.constant 0 : index
    %c0_1 = arith.constant 0 : index
    %0 = vector.load %arg0[%c0, %c0_0, %c0_1] : memref<2x4x512xbf16, #tpu.memory_space<vmem>>, vector<2x4x512xbf16>
    %1 = arith.extf %0 : vector<2x4x512xbf16> to vector<2x4x512xf32>
    %cst = arith.constant dense<0.000000e+00> : vector<2x512xf32>
    %2 = vector.multi_reduction <add>, %1, %cst [1] : vector<2x4x512xf32> to vector<2x512xf32>
    %cst_2 = arith.constant 4.000000e+00 : f32
    %3 = vector.broadcast %cst_2 : f32 to vector<2x512xf32>
    %4 = arith.divf %2, %3 : vector<2x512xf32>
    %5 = arith.truncf %4 : vector<2x512xf32> to vector<2x512xbf16>
    %c0_3 = arith.constant 0 : index
    %c0_4 = arith.constant 0 : index
    %6 = vector.load %arg1[%c0_3, %c0_4] : memref<512x512xbf16, #tpu.memory_space<vmem>>, vector<512x512xbf16>
    %cst_5 = arith.constant dense<0.000000e+00> : vector<2x512xf32>
    %7 = tpu.matmul %5, %6, %cst_5 {dimension_numbers = #tpu.dot_dimension_numbers<[1], [0], [0], [1], [0, 0, 1, 1], [], []>} : vector<2x512xbf16>, vector<512x512xbf16>, vector<2x512xf32> -> vector<2x512xf32>
    %c0_6 = arith.constant 0 : index
    %c0_7 = arith.constant 0 : index
    %8 = vector.load %arg2[%c0_6, %c0_7] : memref<1x512xf32, #tpu.memory_space<vmem>>, vector<1x512xf32>
    %9 = vector.broadcast %8 : vector<1x512xf32> to vector<2x512xf32>
    %10 = arith.addf %7, %9 : vector<2x512xf32>
    %cst_8 = arith.constant dense<0.000000e+00> : vector<2xf32>
    %11 = vector.multi_reduction <add>, %10, %cst_8 [1] : vector<2x512xf32> to vector<2xf32>
    %12 = vector.shape_cast %11 : vector<2xf32> to vector<2x1xf32>
    %cst_9 = arith.constant 5.120000e+02 : f32
    %13 = vector.broadcast %cst_9 : f32 to vector<2x1xf32>
    %14 = arith.divf %12, %13 : vector<2x1xf32>
    %15 = vector.broadcast %14 : vector<2x1xf32> to vector<2x512xf32>
    %16 = arith.subf %10, %15 : vector<2x512xf32>
    %17 = vector.broadcast %14 : vector<2x1xf32> to vector<2x512xf32>
    %18 = arith.subf %10, %17 : vector<2x512xf32>
    %19 = arith.mulf %16, %18 : vector<2x512xf32>
    %cst_10 = arith.constant dense<0.000000e+00> : vector<2xf32>
    %20 = vector.multi_reduction <add>, %19, %cst_10 [1] : vector<2x512xf32> to vector<2xf32>
    %21 = vector.shape_cast %20 : vector<2xf32> to vector<2x1xf32>
    %cst_11 = arith.constant 5.120000e+02 : f32
    %22 = vector.broadcast %cst_11 : f32 to vector<2x1xf32>
    %23 = arith.divf %21, %22 : vector<2x1xf32>
    %24 = vector.broadcast %14 : vector<2x1xf32> to vector<2x512xf32>
    %25 = arith.subf %10, %24 : vector<2x512xf32>
    %cst_12 = arith.constant 9.99999974E-6 : f32
    %26 = vector.broadcast %cst_12 : f32 to vector<2x1xf32>
    %27 = arith.addf %23, %26 : vector<2x1xf32>
    %28 = math.rsqrt %27 : vector<2x1xf32>
    %29 = vector.broadcast %28 : vector<2x1xf32> to vector<2x512xf32>
    %30 = arith.mulf %25, %29 : vector<2x512xf32>
    %c0_13 = arith.constant 0 : index
    %c0_14 = arith.constant 0 : index
    %31 = vector.load %arg3[%c0_13, %c0_14] : memref<1x512xf32, #tpu.memory_space<vmem>>, vector<1x512xf32>
    %32 = vector.broadcast %31 : vector<1x512xf32> to vector<2x512xf32>
    %33 = arith.mulf %30, %32 : vector<2x512xf32>
    %c0_15 = arith.constant 0 : index
    %c0_16 = arith.constant 0 : index
    %34 = vector.load %arg4[%c0_15, %c0_16] : memref<1x512xf32, #tpu.memory_space<vmem>>, vector<1x512xf32>
    %35 = vector.broadcast %34 : vector<1x512xf32> to vector<2x512xf32>
    %36 = arith.addf %33, %35 : vector<2x512xf32>
    %cst_17 = arith.constant 5.000000e-01 : f32
    %37 = vector.broadcast %cst_17 : f32 to vector<2x512xf32>
    %38 = arith.mulf %37, %36 : vector<2x512xf32>
    %cst_18 = arith.constant 1.41421354 : f32
    %39 = vector.broadcast %cst_18 : f32 to vector<2x512xf32>
    %40 = arith.divf %36, %39 : vector<2x512xf32>
    %41 = math.erf %40 : vector<2x512xf32>
    %cst_19 = arith.constant 1.000000e+00 : f32
    %42 = vector.broadcast %cst_19 : f32 to vector<2x512xf32>
    %43 = arith.addf %42, %41 : vector<2x512xf32>
    %44 = arith.mulf %38, %43 : vector<2x512xf32>
    %45 = arith.truncf %44 : vector<2x512xf32> to vector<2x512xbf16>
    %c0_20 = arith.constant 0 : index
    %c0_21 = arith.constant 0 : index
    %46 = vector.load %arg5[%c0_20, %c0_21] : memref<512x256xbf16, #tpu.memory_space<vmem>>, vector<512x256xbf16>
    %cst_22 = arith.constant dense<0.000000e+00> : vector<2x256xf32>
    %47 = tpu.matmul %45, %46, %cst_22 {dimension_numbers = #tpu.dot_dimension_numbers<[1], [0], [0], [1], [0, 0, 1, 1], [], []>} : vector<2x512xbf16>, vector<512x256xbf16>, vector<2x256xf32> -> vector<2x256xf32>
    %c0_23 = arith.constant 0 : index
    %c0_24 = arith.constant 0 : index
    %48 = vector.load %arg6[%c0_23, %c0_24] : memref<1x256xf32, #tpu.memory_space<vmem>>, vector<1x256xf32>
    %49 = vector.broadcast %48 : vector<1x256xf32> to vector<2x256xf32>
    %50 = arith.addf %47, %49 : vector<2x256xf32>
    %c0_25 = arith.constant 0 : index
    %c0_26 = arith.constant 0 : index
    %51 = vector.load %arg11[%c0_25, %c0_26] : memref<2x256xf32, #tpu.memory_space<vmem>>, vector<2x256xf32>
    tpu.vector_store %arg11[%c0_25, %c0_26], %50 {strides = array<i32>} : memref<2x256xf32, #tpu.memory_space<vmem>>, vector<2x256xf32>,
    %52 = arith.truncf %50 : vector<2x256xf32> to vector<2x256xbf16>
    %c0_27 = arith.constant 0 : index
    %c0_28 = arith.constant 0 : index
    %53 = vector.load %arg7[%c0_27, %c0_28] : memref<256x64xbf16, #tpu.memory_space<vmem>>, vector<256x64xbf16>
    %cst_29 = arith.constant dense<0.000000e+00> : vector<2x64xf32>
    %54 = tpu.matmul %52, %53, %cst_29 {dimension_numbers = #tpu.dot_dimension_numbers<[1], [0], [0], [1], [0, 0, 1, 1], [], []>} : vector<2x256xbf16>, vector<256x64xbf16>, vector<2x64xf32> -> vector<2x64xf32>
    %c0_30 = arith.constant 0 : index
    %c0_31 = arith.constant 0 : index
    %55 = vector.load %arg8[%c0_30, %c0_31] : memref<1x64xf32, #tpu.memory_space<vmem>>, vector<1x64xf32>
    %56 = vector.broadcast %55 : vector<1x64xf32> to vector<2x64xf32>
    %57 = arith.addf %54, %56 : vector<2x64xf32>
    %cst_32 = arith.constant 0.000000e+00 : f32
    %58 = vector.broadcast %cst_32 : f32 to vector<2x64xf32>
    %59 = arith.maximumf %57, %58 : vector<2x64xf32>
    %c0_33 = arith.constant 0 : index
    %c0_34 = arith.constant 0 : index
    %60 = vector.load %arg9[%c0_33, %c0_34] : memref<1x64xf32, #tpu.memory_space<vmem>>, vector<1x64xf32>
    %61 = vector.broadcast %60 : vector<1x64xf32> to vector<2x64xf32>
    %62 = arith.mulf %59, %61 : vector<2x64xf32>
    %cst_35 = arith.constant dense<0.000000e+00> : vector<2xf32>
    %63 = vector.multi_reduction <add>, %62, %cst_35 [1] : vector<2x64xf32> to vector<2xf32>
    %64 = vector.shape_cast %63 : vector<2xf32> to vector<2x1xf32>
    %c0_36 = arith.constant 0 : index
    %c0_37 = arith.constant 0 : index
    %65 = vector.load %arg10[%c0_36, %c0_37] : memref<1x1xf32, #tpu.memory_space<vmem>>, vector<1x1xf32>
    %66 = vector.broadcast %65 : vector<1x1xf32> to vector<2x1xf32>
    %67 = arith.addf %64, %66 : vector<2x1xf32>
    %cst_38 = arith.constant 0.000000e+00 : f32
    %68 = vector.broadcast %cst_38 : f32 to vector<2x1xf32>
    %69 = arith.subf %68, %67 : vector<2x1xf32>
    %70 = math.exp %69 : vector<2x1xf32>
    %cst_39 = arith.constant 1.000000e+00 : f32
    %71 = vector.broadcast %cst_39 : f32 to vector<2x1xf32>
    %72 = arith.addf %71, %70 : vector<2x1xf32>
    %73 = tpu.reciprocal %72 {approx = true} : vector<2x1xf32> -> vector<2x1xf32>
    %cst_40 = arith.constant 2.500000e-01 : f32
    %74 = vector.broadcast %cst_40 : f32 to vector<2x1xf32>
    %75 = arith.mulf %74, %73 : vector<2x1xf32>
    %cst_41 = arith.constant 5.000000e-02 : f32
    %76 = vector.broadcast %cst_41 : f32 to vector<2x1xf32>
    %77 = arith.addf %76, %75 : vector<2x1xf32>
    %c0_42 = arith.constant 0 : index
    %c0_43 = arith.constant 0 : index
    %78 = vector.load %arg12[%c0_42, %c0_43] : memref<2x1xf32, #tpu.memory_space<vmem>>, vector<2x1xf32>
    tpu.vector_store %arg12[%c0_42, %c0_43], %77 {strides = array<i32>} : memref<2x1xf32, #tpu.memory_space<vmem>>, vector<2x1xf32>,
    return
  }
}

module attributes {stable_mosaic.version = 11 : i64} {
  func.func @_sparse_quant_proj_kernel(%arg0: memref<2x256xf32, #tpu.memory_space<vmem>>, %arg1: memref<2x1xf32, #tpu.memory_space<vmem>>, %arg2: memref<256x128xbf16, #tpu.memory_space<vmem>>, %arg3: memref<1x128xf32, #tpu.memory_space<vmem>>, %arg4: memref<128x256xbf16, #tpu.memory_space<vmem>>, %arg5: memref<1x256xf32, #tpu.memory_space<vmem>>, %arg6: memref<1x1xf32, #tpu.memory_space<vmem>>, %arg7: memref<1x1xf32, #tpu.memory_space<vmem>>, %arg8: memref<256x128xbf16, #tpu.memory_space<vmem>>, %arg9: memref<1x128xf32, #tpu.memory_space<vmem>>, %arg10: memref<2x256xf32, #tpu.memory_space<vmem>>, %arg11: memref<2x128xf32, #tpu.memory_space<vmem>>, %arg12: memref<1x128xf32, #tpu.memory_space<vmem>>) attributes {dimension_semantics = [], scalar_prefetch = 0 : i64, scratch_operands = 0 : i64, tpu.core_type = #tpu.core_type<tc>} {
    %c0 = arith.constant 0 : index
    %c0_0 = arith.constant 0 : index
    %0 = vector.load %arg0[%c0, %c0_0] : memref<2x256xf32, #tpu.memory_space<vmem>>, vector<2x256xf32>
    %1 = math.absf %0 : vector<2x256xf32>
    %c0_1 = arith.constant 0 : index
    %c0_2 = arith.constant 0 : index
    %2 = vector.load %arg1[%c0_1, %c0_2] : memref<2x1xf32, #tpu.memory_space<vmem>>, vector<2x1xf32>
    %3 = vector.broadcast %2 : vector<2x1xf32> to vector<2x256xf32>
    %4 = arith.cmpf ogt, %1, %3 : vector<2x256xf32>
    %5 = arith.extui %4 : vector<2x256xi1> to vector<2x256xi32>
    %6 = arith.sitofp %5 : vector<2x256xi32> to vector<2x256xf32>
    %7 = arith.mulf %0, %6 : vector<2x256xf32>
    %8 = arith.truncf %7 : vector<2x256xf32> to vector<2x256xbf16>
    %c0_3 = arith.constant 0 : index
    %c0_4 = arith.constant 0 : index
    %9 = vector.load %arg2[%c0_3, %c0_4] : memref<256x128xbf16, #tpu.memory_space<vmem>>, vector<256x128xbf16>
    %cst = arith.constant dense<0.000000e+00> : vector<2x128xf32>
    %10 = tpu.matmul %8, %9, %cst {dimension_numbers = #tpu.dot_dimension_numbers<[1], [0], [0], [1], [0, 0, 1, 1], [], []>} : vector<2x256xbf16>, vector<256x128xbf16>, vector<2x128xf32> -> vector<2x128xf32>
    %c0_5 = arith.constant 0 : index
    %c0_6 = arith.constant 0 : index
    %11 = vector.load %arg3[%c0_5, %c0_6] : memref<1x128xf32, #tpu.memory_space<vmem>>, vector<1x128xf32>
    %12 = vector.broadcast %11 : vector<1x128xf32> to vector<2x128xf32>
    %13 = arith.addf %10, %12 : vector<2x128xf32>
    %cst_7 = arith.constant 0.000000e+00 : f32
    %14 = vector.broadcast %cst_7 : f32 to vector<2x128xf32>
    %15 = arith.maximumf %13, %14 : vector<2x128xf32>
    %16 = arith.truncf %15 : vector<2x128xf32> to vector<2x128xbf16>
    %c0_8 = arith.constant 0 : index
    %c0_9 = arith.constant 0 : index
    %17 = vector.load %arg4[%c0_8, %c0_9] : memref<128x256xbf16, #tpu.memory_space<vmem>>, vector<128x256xbf16>
    %cst_10 = arith.constant dense<0.000000e+00> : vector<2x256xf32>
    %18 = tpu.matmul %16, %17, %cst_10 {dimension_numbers = #tpu.dot_dimension_numbers<[1], [0], [0], [1], [0, 0, 1, 1], [], []>} : vector<2x128xbf16>, vector<128x256xbf16>, vector<2x256xf32> -> vector<2x256xf32>
    %c0_11 = arith.constant 0 : index
    %c0_12 = arith.constant 0 : index
    %19 = vector.load %arg5[%c0_11, %c0_12] : memref<1x256xf32, #tpu.memory_space<vmem>>, vector<1x256xf32>
    %20 = vector.broadcast %19 : vector<1x256xf32> to vector<2x256xf32>
    %21 = arith.addf %18, %20 : vector<2x256xf32>
    %cst_13 = arith.constant 0.000000e+00 : f32
    %22 = vector.broadcast %cst_13 : f32 to vector<2x256xf32>
    %23 = arith.subf %22, %21 : vector<2x256xf32>
    %24 = math.exp %23 : vector<2x256xf32>
    %cst_14 = arith.constant 1.000000e+00 : f32
    %25 = vector.broadcast %cst_14 : f32 to vector<2x256xf32>
    %26 = arith.addf %25, %24 : vector<2x256xf32>
    %27 = tpu.reciprocal %26 {approx = true} : vector<2x256xf32> -> vector<2x256xf32>
    %cst_15 = arith.constant 6.000000e+00 : f32
    %28 = vector.broadcast %cst_15 : f32 to vector<2x256xf32>
    %29 = arith.mulf %28, %27 : vector<2x256xf32>
    %cst_16 = arith.constant 2.000000e+00 : f32
    %30 = vector.broadcast %cst_16 : f32 to vector<2x256xf32>
    %31 = arith.addf %30, %29 : vector<2x256xf32>
    %32 = math.roundeven %31 : vector<2x256xf32>
    %c0_17 = arith.constant 0 : index
    %c0_18 = arith.constant 0 : index
    %33 = vector.load %arg6[%c0_17, %c0_18] : memref<1x1xf32, #tpu.memory_space<vmem>>, vector<1x1xf32>
    %34 = math.absf %33 : vector<1x1xf32>
    %cst_19 = arith.constant 9.99999997E-7 : f32
    %35 = vector.broadcast %cst_19 : f32 to vector<1x1xf32>
    %36 = arith.addf %34, %35 : vector<1x1xf32>
    %cst_20 = arith.constant 1.000000e+00 : f32
    %37 = vector.broadcast %cst_20 : f32 to vector<1x1xf32>
    %38 = arith.divf %37, %36 : vector<1x1xf32>
    %c0_21 = arith.constant 0 : index
    %c0_22 = arith.constant 0 : index
    %39 = vector.load %arg7[%c0_21, %c0_22] : memref<1x1xf32, #tpu.memory_space<vmem>>, vector<1x1xf32>
    %40 = math.exp2 %32 : vector<2x256xf32>
    %cst_23 = arith.constant 1.000000e+00 : f32
    %41 = vector.broadcast %cst_23 : f32 to vector<2x256xf32>
    %42 = arith.subf %40, %41 : vector<2x256xf32>
    %43 = vector.broadcast %38 : vector<1x1xf32> to vector<2x256xf32>
    %44 = arith.mulf %7, %43 : vector<2x256xf32>
    %45 = vector.broadcast %39 : vector<1x1xf32> to vector<2x256xf32>
    %46 = arith.addf %44, %45 : vector<2x256xf32>
    %cst_24 = arith.constant 0.000000e+00 : f32
    %47 = vector.broadcast %cst_24 : f32 to vector<2x256xf32>
    %48 = arith.maximumf %47, %46 : vector<2x256xf32>
    %49 = arith.minimumf %42, %48 : vector<2x256xf32>
    %50 = math.roundeven %49 : vector<2x256xf32>
    %51 = vector.broadcast %39 : vector<1x1xf32> to vector<2x256xf32>
    %52 = arith.subf %50, %51 : vector<2x256xf32>
    %53 = vector.broadcast %36 : vector<1x1xf32> to vector<2x256xf32>
    %54 = arith.mulf %52, %53 : vector<2x256xf32>
    %c0_25 = arith.constant 0 : index
    %c0_26 = arith.constant 0 : index
    %55 = vector.load %arg10[%c0_25, %c0_26] : memref<2x256xf32, #tpu.memory_space<vmem>>, vector<2x256xf32>
    tpu.vector_store %arg10[%c0_25, %c0_26], %54 {strides = array<i32>} : memref<2x256xf32, #tpu.memory_space<vmem>>, vector<2x256xf32>,
    %56 = arith.truncf %54 : vector<2x256xf32> to vector<2x256xbf16>
    %c0_27 = arith.constant 0 : index
    %c0_28 = arith.constant 0 : index
    %57 = vector.load %arg8[%c0_27, %c0_28] : memref<256x128xbf16, #tpu.memory_space<vmem>>, vector<256x128xbf16>
    %cst_29 = arith.constant dense<0.000000e+00> : vector<2x128xf32>
    %58 = tpu.matmul %56, %57, %cst_29 {dimension_numbers = #tpu.dot_dimension_numbers<[1], [0], [0], [1], [0, 0, 1, 1], [], []>} : vector<2x256xbf16>, vector<256x128xbf16>, vector<2x128xf32> -> vector<2x128xf32>
    %c0_30 = arith.constant 0 : index
    %c0_31 = arith.constant 0 : index
    %59 = vector.load %arg9[%c0_30, %c0_31] : memref<1x128xf32, #tpu.memory_space<vmem>>, vector<1x128xf32>
    %60 = vector.broadcast %59 : vector<1x128xf32> to vector<2x128xf32>
    %61 = arith.addf %58, %60 : vector<2x128xf32>
    %62 = arith.mulf %61, %61 : vector<2x128xf32>
    %cst_32 = arith.constant dense<0.000000e+00> : vector<2xf32>
    %63 = vector.multi_reduction <add>, %62, %cst_32 [1] : vector<2x128xf32> to vector<2xf32>
    %64 = vector.shape_cast %63 : vector<2xf32> to vector<2x1xf32>
    %cst_33 = arith.constant 1.000000e-24 : f32
    %65 = vector.broadcast %cst_33 : f32 to vector<2x1xf32>
    %66 = arith.maximumf %64, %65 : vector<2x1xf32>
    %67 = math.rsqrt %66 : vector<2x1xf32>
    %68 = vector.broadcast %67 : vector<2x1xf32> to vector<2x128xf32>
    %69 = arith.mulf %61, %68 : vector<2x128xf32>
    %c0_34 = arith.constant 0 : index
    %c0_35 = arith.constant 0 : index
    %70 = vector.load %arg11[%c0_34, %c0_35] : memref<2x128xf32, #tpu.memory_space<vmem>>, vector<2x128xf32>
    tpu.vector_store %arg11[%c0_34, %c0_35], %69 {strides = array<i32>} : memref<2x128xf32, #tpu.memory_space<vmem>>, vector<2x128xf32>,
    %71 = arith.subf %54, %7 : vector<2x256xf32>
    %72 = math.absf %7 : vector<2x256xf32>
    %cst_36 = arith.constant dense<0.000000e+00> : vector<2xf32>
    %73 = vector.multi_reduction <add>, %72, %cst_36 [1] : vector<2x256xf32> to vector<2xf32>
    %74 = vector.shape_cast %73 : vector<2xf32> to vector<2x1xf32>
    %75 = arith.mulf %71, %71 : vector<2x256xf32>
    %cst_37 = arith.constant dense<0.000000e+00> : vector<2xf32>
    %76 = vector.multi_reduction <add>, %75, %cst_37 [1] : vector<2x256xf32> to vector<2xf32>
    %77 = vector.shape_cast %76 : vector<2xf32> to vector<2x1xf32>
    %78 = math.absf %71 : vector<2x256xf32>
    %79 = arith.mulf %27, %78 : vector<2x256xf32>
    %cst_38 = arith.constant dense<0.000000e+00> : vector<2xf32>
    %80 = vector.multi_reduction <add>, %79, %cst_38 [1] : vector<2x256xf32> to vector<2xf32>
    %81 = vector.shape_cast %80 : vector<2xf32> to vector<2x1xf32>
    %cst_39 = arith.constant dense<0.000000e+00> : vector<1xf32>
    %82 = vector.multi_reduction <add>, %74, %cst_39 [0] : vector<2x1xf32> to vector<1xf32>
    %83 = vector.shape_cast %82 : vector<1xf32> to vector<1x1xf32>
    %cst_40 = arith.constant 5.000000e-01 : f32
    %84 = vector.broadcast %cst_40 : f32 to vector<1x1xf32>
    %85 = arith.mulf %83, %84 : vector<1x1xf32>
    %cst_41 = arith.constant dense<0.000000e+00> : vector<1xf32>
    %86 = vector.multi_reduction <add>, %77, %cst_41 [0] : vector<2x1xf32> to vector<1xf32>
    %87 = vector.shape_cast %86 : vector<1xf32> to vector<1x1xf32>
    %cst_42 = arith.constant 0.001953125 : f32
    %88 = vector.broadcast %cst_42 : f32 to vector<1x1xf32>
    %89 = arith.mulf %87, %88 : vector<1x1xf32>
    %cst_43 = arith.constant dense<0.000000e+00> : vector<1xf32>
    %90 = vector.multi_reduction <add>, %81, %cst_43 [0] : vector<2x1xf32> to vector<1xf32>
    %91 = vector.shape_cast %90 : vector<1xf32> to vector<1x1xf32>
    %cst_44 = arith.constant 5.000000e-01 : f32
    %92 = vector.broadcast %cst_44 : f32 to vector<1x1xf32>
    %93 = arith.mulf %91, %92 : vector<1x1xf32>
    %cst_45 = arith.constant 5.000000e-01 : f32
    %94 = vector.broadcast %cst_45 : f32 to vector<1x1xf32>
    %95 = arith.mulf %94, %93 : vector<1x1xf32>
    %96 = arith.addf %89, %95 : vector<1x1xf32>
    %97 = tpu.iota {dimensions = array<i32: 1>} : vector<1x128xi32>
    %c0_i32 = arith.constant 0 : i32
    %98 = vector.broadcast %c0_i32 : i32 to vector<1x128xi32>
    %99 = arith.cmpi eq, %97, %98 : vector<1x128xi32>
    %cst_46 = arith.constant 0.000000e+00 : f32
    %100 = vector.shape_cast %85 : vector<1x1xf32> to vector<1x1xf32>
    %101 = vector.broadcast %100 : vector<1x1xf32> to vector<1x128xf32>
    %102 = vector.broadcast %cst_46 : f32 to vector<1x128xf32>
    %103 = arith.select %99, %101, %102 : vector<1x128xi1>, vector<1x128xf32>
    %c1_i32 = arith.constant 1 : i32
    %104 = vector.broadcast %c1_i32 : i32 to vector<1x128xi32>
    %105 = arith.cmpi eq, %97, %104 : vector<1x128xi32>
    %cst_47 = arith.constant 0.000000e+00 : f32
    %106 = vector.shape_cast %96 : vector<1x1xf32> to vector<1x1xf32>
    %107 = vector.broadcast %106 : vector<1x1xf32> to vector<1x128xf32>
    %108 = vector.broadcast %cst_47 : f32 to vector<1x128xf32>
    %109 = arith.select %105, %107, %108 : vector<1x128xi1>, vector<1x128xf32>
    %110 = arith.addf %103, %109 : vector<1x128xf32>
    %c0_48 = arith.constant 0 : index
    %c0_49 = arith.constant 0 : index
    %111 = vector.load %arg12[%c0_48, %c0_49] : memref<1x128xf32, #tpu.memory_space<vmem>>, vector<1x128xf32>
    tpu.vector_store %arg12[%c0_48, %c0_49], %110 {strides = array<i32>} : memref<1x128xf32, #tpu.memory_space<vmem>>, vector<1x128xf32>,
    return
  }
}

module attributes {stable_mosaic.version = 11 : i64} {
  func.func @_db_norm_t_kernel(%arg0: i32, %arg1: memref<128x128xf32, #tpu.memory_space<vmem>>, %arg2: memref<128x128xbf16, #tpu.memory_space<vmem>>) attributes {dimension_semantics = [#tpu.dimension_semantics<parallel>], iteration_bounds = array<i64: 1>, scalar_prefetch = 0 : i64, scratch_operands = 0 : i64, tpu.core_type = #tpu.core_type<tc>, window_params = [{transform_indices = @transform_0, window_bounds = array<i64: 128, 128>}, {transform_indices = @transform_1, window_bounds = array<i64: 128, 128>}]} {
    %c0 = arith.constant 0 : index
    %c0_0 = arith.constant 0 : index
    %0 = vector.load %arg1[%c0, %c0_0] : memref<128x128xf32, #tpu.memory_space<vmem>>, vector<128x128xf32>
    %1 = arith.mulf %0, %0 : vector<128x128xf32>
    %cst = arith.constant dense<0.000000e+00> : vector<128xf32>
    %2 = vector.multi_reduction <add>, %1, %cst [1] : vector<128x128xf32> to vector<128xf32>
    %3 = vector.shape_cast %2 : vector<128xf32> to vector<128x1xf32>
    %cst_1 = arith.constant 1.000000e-24 : f32
    %4 = vector.broadcast %cst_1 : f32 to vector<128x1xf32>
    %5 = arith.maximumf %3, %4 : vector<128x1xf32>
    %6 = math.rsqrt %5 : vector<128x1xf32>
    %7 = vector.broadcast %6 : vector<128x1xf32> to vector<128x128xf32>
    %8 = arith.mulf %0, %7 : vector<128x128xf32>
    %9 = tpu.transpose %8, [1, 0] : vector<128x128xf32> -> vector<128x128xf32>
    %10 = arith.truncf %9 : vector<128x128xf32> to vector<128x128xbf16>
    %c0_2 = arith.constant 0 : index
    %c0_3 = arith.constant 0 : index
    %11 = vector.load %arg2[%c0_2, %c0_3] : memref<128x128xbf16, #tpu.memory_space<vmem>>, vector<128x128xbf16>
    tpu.vector_store %arg2[%c0_2, %c0_3], %10 {strides = array<i32>} : memref<128x128xbf16, #tpu.memory_space<vmem>>, vector<128x128xbf16>,
    return
  }
  func.func @transform_0(%arg0: i32) -> (i32, i32) {
    %c0_i32 = arith.constant 0 : i32
    %c0_i32_0 = arith.constant 0 : i32
    return %arg0, %c0_i32 : i32, i32
  }
  func.func @transform_1(%arg0: i32) -> (i32, i32) {
    %c0_i32 = arith.constant 0 : i32
    %c0_i32_0 = arith.constant 0 : i32
    return %c0_i32, %arg0 : i32, i32
  }
}

module attributes {stable_mosaic.version = 11 : i64} {
  func.func @_scores_kernel(%arg0: i32, %arg1: memref<8x128xf32, #tpu.memory_space<vmem>>, %arg2: memref<128x128xbf16, #tpu.memory_space<vmem>>, %arg3: memref<8x128xf32, #tpu.memory_space<vmem>>) attributes {dimension_semantics = [#tpu.dimension_semantics<parallel>], iteration_bounds = array<i64: 1>, scalar_prefetch = 0 : i64, scratch_operands = 0 : i64, tpu.core_type = #tpu.core_type<tc>, window_params = [{pipeline_mode = #tpu.pipeline_mode<synchronous>, transform_indices = @transform_0, window_bounds = array<i64: 8, 128>}, {transform_indices = @transform_1, window_bounds = array<i64: 128, 128>}, {transform_indices = @transform_2, window_bounds = array<i64: 8, 128>}]} {
    %c0 = arith.constant 0 : index
    %c0_0 = arith.constant 0 : index
    %0 = vector.load %arg1[%c0, %c0_0] : memref<8x128xf32, #tpu.memory_space<vmem>>, vector<8x128xf32>
    %1 = arith.mulf %0, %0 : vector<8x128xf32>
    %cst = arith.constant dense<0.000000e+00> : vector<8xf32>
    %2 = vector.multi_reduction <add>, %1, %cst [1] : vector<8x128xf32> to vector<8xf32>
    %3 = vector.shape_cast %2 : vector<8xf32> to vector<8x1xf32>
    %cst_1 = arith.constant 1.000000e-24 : f32
    %4 = vector.broadcast %cst_1 : f32 to vector<8x1xf32>
    %5 = arith.maximumf %3, %4 : vector<8x1xf32>
    %6 = math.rsqrt %5 : vector<8x1xf32>
    %7 = vector.broadcast %6 : vector<8x1xf32> to vector<8x128xf32>
    %8 = arith.mulf %0, %7 : vector<8x128xf32>
    %9 = arith.truncf %8 : vector<8x128xf32> to vector<8x128xbf16>
    %c0_2 = arith.constant 0 : index
    %c0_3 = arith.constant 0 : index
    %10 = vector.load %arg2[%c0_2, %c0_3] : memref<128x128xbf16, #tpu.memory_space<vmem>>, vector<128x128xbf16>
    %cst_4 = arith.constant dense<0.000000e+00> : vector<8x128xf32>
    %11 = tpu.matmul %9, %10, %cst_4 {dimension_numbers = #tpu.dot_dimension_numbers<[1], [0], [0], [1], [0, 0, 1, 1], [], []>} : vector<8x128xbf16>, vector<128x128xbf16>, vector<8x128xf32> -> vector<8x128xf32>
    %c0_5 = arith.constant 0 : index
    %c0_6 = arith.constant 0 : index
    %12 = vector.load %arg3[%c0_5, %c0_6] : memref<8x128xf32, #tpu.memory_space<vmem>>, vector<8x128xf32>
    tpu.vector_store %arg3[%c0_5, %c0_6], %11 {strides = array<i32>} : memref<8x128xf32, #tpu.memory_space<vmem>>, vector<8x128xf32>,
    return
  }
  func.func @transform_0(%arg0: i32) -> (i32, i32) {
    %c0_i32 = arith.constant 0 : i32
    %c0_i32_0 = arith.constant 0 : i32
    %c0_i32_1 = arith.constant 0 : i32
    return %c0_i32, %c0_i32_0 : i32, i32
  }
  func.func @transform_1(%arg0: i32) -> (i32, i32) {
    %c0_i32 = arith.constant 0 : i32
    %c0_i32_0 = arith.constant 0 : i32
    return %c0_i32, %arg0 : i32, i32
  }
  func.func @transform_2(%arg0: i32) -> (i32, i32) {
    %c0_i32 = arith.constant 0 : i32
    %c0_i32_0 = arith.constant 0 : i32
    return %c0_i32, %arg0 : i32, i32
  }
}

module attributes {stable_mosaic.version = 11 : i64} {
  func.func @_expand_mlp_kernel(%arg0: memref<8x256xf32, #tpu.memory_space<vmem>>, %arg1: memref<256x128xbf16, #tpu.memory_space<vmem>>, %arg2: memref<1x128xf32, #tpu.memory_space<vmem>>, %arg3: memref<128x128xbf16, #tpu.memory_space<vmem>>, %arg4: memref<1x128xf32, #tpu.memory_space<vmem>>, %arg5: memref<8x128xf32, #tpu.memory_space<vmem>>, %arg6: memref<8x128xbf16, #tpu.memory_space<vmem>>) attributes {dimension_semantics = [], scalar_prefetch = 0 : i64, scratch_operands = 0 : i64, tpu.core_type = #tpu.core_type<tc>} {
    %c0 = arith.constant 0 : index
    %c0_0 = arith.constant 0 : index
    %0 = vector.load %arg0[%c0, %c0_0] : memref<8x256xf32, #tpu.memory_space<vmem>>, vector<8x256xf32>
    %1 = arith.truncf %0 : vector<8x256xf32> to vector<8x256xbf16>
    %c0_1 = arith.constant 0 : index
    %c0_2 = arith.constant 0 : index
    %2 = vector.load %arg1[%c0_1, %c0_2] : memref<256x128xbf16, #tpu.memory_space<vmem>>, vector<256x128xbf16>
    %cst = arith.constant dense<0.000000e+00> : vector<8x128xf32>
    %3 = tpu.matmul %1, %2, %cst {dimension_numbers = #tpu.dot_dimension_numbers<[1], [0], [0], [1], [0, 0, 1, 1], [], []>} : vector<8x256xbf16>, vector<256x128xbf16>, vector<8x128xf32> -> vector<8x128xf32>
    %c0_3 = arith.constant 0 : index
    %c0_4 = arith.constant 0 : index
    %4 = vector.load %arg2[%c0_3, %c0_4] : memref<1x128xf32, #tpu.memory_space<vmem>>, vector<1x128xf32>
    %5 = vector.broadcast %4 : vector<1x128xf32> to vector<8x128xf32>
    %6 = arith.addf %3, %5 : vector<8x128xf32>
    %cst_5 = arith.constant 0.000000e+00 : f32
    %7 = vector.broadcast %cst_5 : f32 to vector<8x128xf32>
    %8 = arith.maximumf %6, %7 : vector<8x128xf32>
    %9 = arith.truncf %8 : vector<8x128xf32> to vector<8x128xbf16>
    %c0_6 = arith.constant 0 : index
    %c0_7 = arith.constant 0 : index
    %10 = vector.load %arg3[%c0_6, %c0_7] : memref<128x128xbf16, #tpu.memory_space<vmem>>, vector<128x128xbf16>
    %cst_8 = arith.constant dense<0.000000e+00> : vector<8x128xf32>
    %11 = tpu.matmul %9, %10, %cst_8 {dimension_numbers = #tpu.dot_dimension_numbers<[1], [0], [0], [1], [0, 0, 1, 1], [], []>} : vector<8x128xbf16>, vector<128x128xbf16>, vector<8x128xf32> -> vector<8x128xf32>
    %c0_9 = arith.constant 0 : index
    %c0_10 = arith.constant 0 : index
    %12 = vector.load %arg4[%c0_9, %c0_10] : memref<1x128xf32, #tpu.memory_space<vmem>>, vector<1x128xf32>
    %13 = vector.broadcast %12 : vector<1x128xf32> to vector<8x128xf32>
    %14 = arith.addf %11, %13 : vector<8x128xf32>
    %c0_11 = arith.constant 0 : index
    %c0_12 = arith.constant 0 : index
    %15 = vector.load %arg5[%c0_11, %c0_12] : memref<8x128xf32, #tpu.memory_space<vmem>>, vector<8x128xf32>
    tpu.vector_store %arg5[%c0_11, %c0_12], %14 {strides = array<i32>} : memref<8x128xf32, #tpu.memory_space<vmem>>, vector<8x128xf32>,
    %16 = arith.mulf %14, %14 : vector<8x128xf32>
    %cst_13 = arith.constant dense<0.000000e+00> : vector<8xf32>
    %17 = vector.multi_reduction <add>, %16, %cst_13 [1] : vector<8x128xf32> to vector<8xf32>
    %18 = vector.shape_cast %17 : vector<8xf32> to vector<8x1xf32>
    %cst_14 = arith.constant 1.000000e-24 : f32
    %19 = vector.broadcast %cst_14 : f32 to vector<8x1xf32>
    %20 = arith.maximumf %18, %19 : vector<8x1xf32>
    %21 = math.rsqrt %20 : vector<8x1xf32>
    %22 = vector.broadcast %21 : vector<8x1xf32> to vector<8x128xf32>
    %23 = arith.mulf %14, %22 : vector<8x128xf32>
    %24 = arith.truncf %23 : vector<8x128xf32> to vector<8x128xbf16>
    %c0_15 = arith.constant 0 : index
    %c0_16 = arith.constant 0 : index
    %25 = vector.load %arg6[%c0_15, %c0_16] : memref<8x128xbf16, #tpu.memory_space<vmem>>, vector<8x128xbf16>
    tpu.vector_store %arg6[%c0_15, %c0_16], %24 {strides = array<i32>} : memref<8x128xbf16, #tpu.memory_space<vmem>>, vector<8x128xbf16>,
    return
  }
}

module attributes {stable_mosaic.version = 11 : i64} {
  func.func @_blend_kernel(%arg0: i32, %arg1: memref<8x128xbf16, #tpu.memory_space<vmem>>, %arg2: memref<128x128xbf16, #tpu.memory_space<vmem>>, %arg3: memref<8x128xf32, #tpu.memory_space<vmem>>, %arg4: memref<8x128xf32, #tpu.memory_space<vmem>>, %arg5: memref<8x128xf32, #tpu.memory_space<vmem>>) attributes {dimension_semantics = [#tpu.dimension_semantics<parallel>], iteration_bounds = array<i64: 1>, scalar_prefetch = 0 : i64, scratch_operands = 0 : i64, tpu.core_type = #tpu.core_type<tc>, window_params = [{pipeline_mode = #tpu.pipeline_mode<synchronous>, transform_indices = @transform_0, window_bounds = array<i64: 8, 128>}, {transform_indices = @transform_1, window_bounds = array<i64: 128, 128>}, {transform_indices = @transform_2, window_bounds = array<i64: 8, 128>}, {transform_indices = @transform_3, window_bounds = array<i64: 8, 128>}, {transform_indices = @transform_4, window_bounds = array<i64: 8, 128>}]} {
    %c0 = arith.constant 0 : index
    %c0_0 = arith.constant 0 : index
    %0 = vector.load %arg1[%c0, %c0_0] : memref<8x128xbf16, #tpu.memory_space<vmem>>, vector<8x128xbf16>
    %c0_1 = arith.constant 0 : index
    %c0_2 = arith.constant 0 : index
    %1 = vector.load %arg2[%c0_1, %c0_2] : memref<128x128xbf16, #tpu.memory_space<vmem>>, vector<128x128xbf16>
    %cst = arith.constant dense<0.000000e+00> : vector<8x128xf32>
    %2 = tpu.matmul %0, %1, %cst {dimension_numbers = #tpu.dot_dimension_numbers<[1], [0], [0], [1], [0, 0, 1, 1], [], []>} : vector<8x128xbf16>, vector<128x128xbf16>, vector<8x128xf32> -> vector<8x128xf32>
    %c0_3 = arith.constant 0 : index
    %c0_4 = arith.constant 0 : index
    %3 = vector.load %arg4[%c0_3, %c0_4] : memref<8x128xf32, #tpu.memory_space<vmem>>, vector<8x128xf32>
    tpu.vector_store %arg4[%c0_3, %c0_4], %2 {strides = array<i32>} : memref<8x128xf32, #tpu.memory_space<vmem>>, vector<8x128xf32>,
    %c0_5 = arith.constant 0 : index
    %c0_6 = arith.constant 0 : index
    %4 = vector.load %arg3[%c0_5, %c0_6] : memref<8x128xf32, #tpu.memory_space<vmem>>, vector<8x128xf32>
    %cst_7 = arith.constant 6.000000e-01 : f32
    %5 = vector.broadcast %cst_7 : f32 to vector<8x128xf32>
    %6 = arith.mulf %5, %4 : vector<8x128xf32>
    %cst_8 = arith.constant 4.000000e-01 : f32
    %7 = vector.broadcast %cst_8 : f32 to vector<8x128xf32>
    %8 = arith.mulf %7, %2 : vector<8x128xf32>
    %9 = arith.addf %6, %8 : vector<8x128xf32>
    %c0_9 = arith.constant 0 : index
    %c0_10 = arith.constant 0 : index
    %10 = vector.load %arg5[%c0_9, %c0_10] : memref<8x128xf32, #tpu.memory_space<vmem>>, vector<8x128xf32>
    tpu.vector_store %arg5[%c0_9, %c0_10], %9 {strides = array<i32>} : memref<8x128xf32, #tpu.memory_space<vmem>>, vector<8x128xf32>,
    return
  }
  func.func @transform_0(%arg0: i32) -> (i32, i32) {
    %c0_i32 = arith.constant 0 : i32
    %c0_i32_0 = arith.constant 0 : i32
    %c0_i32_1 = arith.constant 0 : i32
    return %c0_i32, %c0_i32_0 : i32, i32
  }
  func.func @transform_1(%arg0: i32) -> (i32, i32) {
    %c0_i32 = arith.constant 0 : i32
    %c0_i32_0 = arith.constant 0 : i32
    return %c0_i32, %arg0 : i32, i32
  }
  func.func @transform_2(%arg0: i32) -> (i32, i32) {
    %c0_i32 = arith.constant 0 : i32
    %c0_i32_0 = arith.constant 0 : i32
    return %c0_i32, %arg0 : i32, i32
  }
  func.func @transform_3(%arg0: i32) -> (i32, i32) {
    %c0_i32 = arith.constant 0 : i32
    %c0_i32_0 = arith.constant 0 : i32
    return %c0_i32, %arg0 : i32, i32
  }
  func.func @transform_4(%arg0: i32) -> (i32, i32) {
    %c0_i32 = arith.constant 0 : i32
    %c0_i32_0 = arith.constant 0 : i32
    return %c0_i32, %arg0 : i32, i32
  }
}

module attributes {stable_mosaic.version = 11 : i64} {
  func.func @_expand_mlp_kernel(%arg0: memref<8x256xf32, #tpu.memory_space<vmem>>, %arg1: memref<256x128xbf16, #tpu.memory_space<vmem>>, %arg2: memref<1x128xf32, #tpu.memory_space<vmem>>, %arg3: memref<128x128xbf16, #tpu.memory_space<vmem>>, %arg4: memref<1x128xf32, #tpu.memory_space<vmem>>, %arg5: memref<8x128xf32, #tpu.memory_space<vmem>>, %arg6: memref<8x128xbf16, #tpu.memory_space<vmem>>) attributes {dimension_semantics = [], scalar_prefetch = 0 : i64, scratch_operands = 0 : i64, tpu.core_type = #tpu.core_type<tc>} {
    %c0 = arith.constant 0 : index
    %c0_0 = arith.constant 0 : index
    %0 = vector.load %arg0[%c0, %c0_0] : memref<8x256xf32, #tpu.memory_space<vmem>>, vector<8x256xf32>
    %1 = arith.truncf %0 : vector<8x256xf32> to vector<8x256xbf16>
    %c0_1 = arith.constant 0 : index
    %c0_2 = arith.constant 0 : index
    %2 = vector.load %arg1[%c0_1, %c0_2] : memref<256x128xbf16, #tpu.memory_space<vmem>>, vector<256x128xbf16>
    %cst = arith.constant dense<0.000000e+00> : vector<8x128xf32>
    %3 = tpu.matmul %1, %2, %cst {dimension_numbers = #tpu.dot_dimension_numbers<[1], [0], [0], [1], [0, 0, 1, 1], [], []>} : vector<8x256xbf16>, vector<256x128xbf16>, vector<8x128xf32> -> vector<8x128xf32>
    %c0_3 = arith.constant 0 : index
    %c0_4 = arith.constant 0 : index
    %4 = vector.load %arg2[%c0_3, %c0_4] : memref<1x128xf32, #tpu.memory_space<vmem>>, vector<1x128xf32>
    %5 = vector.broadcast %4 : vector<1x128xf32> to vector<8x128xf32>
    %6 = arith.addf %3, %5 : vector<8x128xf32>
    %cst_5 = arith.constant 0.000000e+00 : f32
    %7 = vector.broadcast %cst_5 : f32 to vector<8x128xf32>
    %8 = arith.maximumf %6, %7 : vector<8x128xf32>
    %9 = arith.truncf %8 : vector<8x128xf32> to vector<8x128xbf16>
    %c0_6 = arith.constant 0 : index
    %c0_7 = arith.constant 0 : index
    %10 = vector.load %arg3[%c0_6, %c0_7] : memref<128x128xbf16, #tpu.memory_space<vmem>>, vector<128x128xbf16>
    %cst_8 = arith.constant dense<0.000000e+00> : vector<8x128xf32>
    %11 = tpu.matmul %9, %10, %cst_8 {dimension_numbers = #tpu.dot_dimension_numbers<[1], [0], [0], [1], [0, 0, 1, 1], [], []>} : vector<8x128xbf16>, vector<128x128xbf16>, vector<8x128xf32> -> vector<8x128xf32>
    %c0_9 = arith.constant 0 : index
    %c0_10 = arith.constant 0 : index
    %12 = vector.load %arg4[%c0_9, %c0_10] : memref<1x128xf32, #tpu.memory_space<vmem>>, vector<1x128xf32>
    %13 = vector.broadcast %12 : vector<1x128xf32> to vector<8x128xf32>
    %14 = arith.addf %11, %13 : vector<8x128xf32>
    %c0_11 = arith.constant 0 : index
    %c0_12 = arith.constant 0 : index
    %15 = vector.load %arg5[%c0_11, %c0_12] : memref<8x128xf32, #tpu.memory_space<vmem>>, vector<8x128xf32>
    tpu.vector_store %arg5[%c0_11, %c0_12], %14 {strides = array<i32>} : memref<8x128xf32, #tpu.memory_space<vmem>>, vector<8x128xf32>,
    %16 = arith.mulf %14, %14 : vector<8x128xf32>
    %cst_13 = arith.constant dense<0.000000e+00> : vector<8xf32>
    %17 = vector.multi_reduction <add>, %16, %cst_13 [1] : vector<8x128xf32> to vector<8xf32>
    %18 = vector.shape_cast %17 : vector<8xf32> to vector<8x1xf32>
    %cst_14 = arith.constant 1.000000e-24 : f32
    %19 = vector.broadcast %cst_14 : f32 to vector<8x1xf32>
    %20 = arith.maximumf %18, %19 : vector<8x1xf32>
    %21 = math.rsqrt %20 : vector<8x1xf32>
    %22 = vector.broadcast %21 : vector<8x1xf32> to vector<8x128xf32>
    %23 = arith.mulf %14, %22 : vector<8x128xf32>
    %24 = arith.truncf %23 : vector<8x128xf32> to vector<8x128xbf16>
    %c0_15 = arith.constant 0 : index
    %c0_16 = arith.constant 0 : index
    %25 = vector.load %arg6[%c0_15, %c0_16] : memref<8x128xbf16, #tpu.memory_space<vmem>>, vector<8x128xbf16>
    tpu.vector_store %arg6[%c0_15, %c0_16], %24 {strides = array<i32>} : memref<8x128xbf16, #tpu.memory_space<vmem>>, vector<8x128xbf16>,
    return
  }
}

</mosaic_0001>

<bundles_post_ra>
// kernel: sparse_forward.8
= control target key start
LH: loop header
LB: loop body
LE: loop exit
PB: predicated region body
PF: predicated region fallthrough
CT: control target
= control target key end

     0   :  { %s10249_s1 = inlined_call_operand.vmem [shape: bf16[3072,512], index: 1, kind: input, shape index: {}]   ;;  %s10250_s0 = inlined_call_operand.vmem [shape: bf16[8,3072], index: 0, kind: input, shape index: {}]   ;;  %s10251_s2 = inlined_call_operand.vmem [shape: f32[1,512], index: 2, kind: input, shape index: {}]   ;;  %s10252_s3 = inlined_call_operand.vmem [shape: bf16[8,512], index: 3, kind: output, shape index: {}]  }
   0x1   :  { %v6638_v0 = vld [vmem:[%s10249_s1 + $0x4] ss:$16 sps:$4 sm:$0xff]   ;;  %v6640_v1 = vld [vmem:[%s10249_s1 + $0xc] ss:$16 sps:$4 sm:$0xff]   ;;  %v6642_v2 = vld [vmem:[%s10249_s1] ss:$16 sps:$4 sm:$0xff]  }
   0x2   :  { %4740 = vmatprep.subr.bf16.mxu0 %v6638_v0  ;;  %v6643_v3 = vld [vmem:[%s10249_s1 + $0x8] ss:$16 sps:$4 sm:$0xff]   ;;  %5232 = vmatprep.subr.bf16.mxu1 %v6640_v1  ;;  %v6644_v4 = vld [vmem:[%s10249_s1 + $0x24] ss:$16 sps:$4 sm:$0xff]   ;;  %v6646_v5 = vld [vmem:[%s10249_s1 + $0x2c] ss:$16 sps:$4 sm:$0xff]  }
   0x3   :  { %4741 = vmatpush1.bf16.msra.mxu0 %v6642_v2  ;;  %5233 = vmatpush1.bf16.msra.mxu1 %v6643_v3  ;;  %v6648_v6 = vld [vmem:[%s10249_s1 + $0x20] ss:$16 sps:$4 sm:$0xff]   ;;  %v6649_v7 = vld [vmem:[%s10249_s1 + $0x28] ss:$16 sps:$4 sm:$0xff]   ;;  %v6650_v8 = vld [vmem:[%s10249_s1 + $0x44] ss:$16 sps:$4 sm:$0xff]  }
   0x4   :  { %4742 = vmatprep.subr.bf16.mxu0 %v6644_v4  ;;  %5234 = vmatprep.subr.bf16.mxu1 %v6646_v5  ;;  %v6652_v9 = vld [vmem:[%s10249_s1 + $0x4c] ss:$16 sps:$4 sm:$0xff]   ;;  %v6654_v10 = vld [vmem:[%s10249_s1 + $0x40] ss:$16 sps:$4 sm:$0xff]   ;;  %v6655_v11 = vld [vmem:[%s10249_s1 + $0x48] ss:$16 sps:$4 sm:$0xff]  }
   0x5   :  { %v6656_v12 = vld [vmem:[%s10249_s1 + $0x64] ss:$16 sps:$4 sm:$0xff]   ;;  %v6658_v13 = vld [vmem:[%s10249_s1 + $0x6c] ss:$16 sps:$4 sm:$0xff]   ;;  %v6660_v14 = vld [vmem:[%s10249_s1 + $0x60] ss:$16 sps:$4 sm:$0xff]  }
   0x6   :  { %v6661_v15 = vld [vmem:[%s10249_s1 + $0x68] ss:$16 sps:$4 sm:$0xff]   ;;  %v6662_v16 = vld [vmem:[%s10249_s1 + $0x84] ss:$16 sps:$4 sm:$0xff]   ;;  %v6664_v17 = vld [vmem:[%s10249_s1 + $0x8c] ss:$16 sps:$4 sm:$0xff]  }
   0x7   :  { %4743 = vmatpush1.bf16.msra.mxu0 %v6648_v6  ;;  %5235 = vmatpush1.bf16.msra.mxu1 %v6649_v7  ;;  %v6666_v18 = vld [vmem:[%s10249_s1 + $0x80] ss:$16 sps:$4 sm:$0xff]   ;;  %v6667_v19 = vld [vmem:[%s10249_s1 + $0x88] ss:$16 sps:$4 sm:$0xff]   ;;  %v6668_v20 = vld [vmem:[%s10249_s1 + $0xa4] ss:$16 sps:$4 sm:$0xff]  }
   0x8   :  { %4744 = vmatprep.subr.bf16.mxu0 %v6650_v8  ;;  %5236 = vmatprep.subr.bf16.mxu1 %v6652_v9  ;;  %v6670_v21 = vld [vmem:[%s10249_s1 + $0xac] ss:$16 sps:$4 sm:$0xff]   ;;  %v6672_v22 = vld [vmem:[%s10249_s1 + $0xa0] ss:$16 sps:$4 sm:$0xff]   ;;  %v6673_v23 = vld [vmem:[%s10249_s1 + $0xa8] ss:$16 sps:$4 sm:$0xff]  }
   0x9   :  { %v6674_v24 = vld [vmem:[%s10249_s1 + $0xc4] ss:$16 sps:$4 sm:$0xff]   ;;  %v6676_v25 = vld [vmem:[%s10249_s1 + $0xcc] ss:$16 sps:$4 sm:$0xff]   ;;  %v6678_v26 = vld [vmem:[%s10249_s1 + $0xc0] ss:$16 sps:$4 sm:$0xff]  }
   0xa   :  { %v6679_v27 = vld [vmem:[%s10249_s1 + $0xc8] ss:$16 sps:$4 sm:$0xff]   ;;  %v6680_v28 = vld [vmem:[%s10249_s1 + $0xe4] ss:$16 sps:$4 sm:$0xff]   ;;  %v6682_v29 = vld [vmem:[%s10249_s1 + $0xec] ss:$16 sps:$4 sm:$0xff]  }
   0xb   :  { %4745 = vmatpush1.bf16.msra.mxu0 %v6654_v10  ;;  %5237 = vmatpush1.bf16.msra.mxu1 %v6655_v11  ;;  %v6684_v30 = vld [vmem:[%s10249_s1 + $0xe0] ss:$16 sps:$4 sm:$0xff]   ;;  %v6685_v31 = vld [vmem:[%s10249_s1 + $0xe8] ss:$16 sps:$4 sm:$0xff]   ;;  %v6686_v32 = vld [vmem:[%s10249_s1 + $0x104] ss:$16 sps:$4 sm:$0xff]  }
   0xc   :  { %4746 = vmatprep.subr.bf16.mxu0 %v6656_v12  ;;  %5238 = vmatprep.subr.bf16.mxu1 %v6658_v13  ;;  %v6688_v33 = vld [vmem:[%s10249_s1 + $0x10c] ss:$16 sps:$4 sm:$0xff]   ;;  %v6690_v34 = vld [vmem:[%s10249_s1 + $0x100] ss:$16 sps:$4 sm:$0xff]   ;;  %v6691_v35 = vld [vmem:[%s10249_s1 + $0x108] ss:$16 sps:$4 sm:$0xff]  }
   0xd   :  { %v6692_v36 = vld [vmem:[%s10249_s1 + $0x124] ss:$16 sps:$4 sm:$0xff]   ;;  %v6694_v37 = vld [vmem:[%s10249_s1 + $0x12c] ss:$16 sps:$4 sm:$0xff]   ;;  %v6696_v38 = vld [vmem:[%s10249_s1 + $0x120] ss:$16 sps:$4 sm:$0xff]  }
   0xe   :  { %v6697_v39 = vld [vmem:[%s10249_s1 + $0x128] ss:$16 sps:$4 sm:$0xff]   ;;  %v6698_v40 = vld [vmem:[%s10249_s1 + $0x144] ss:$16 sps:$4 sm:$0xff]   ;;  %v6700_v41 = vld [vmem:[%s10249_s1 + $0x14c] ss:$16 sps:$4 sm:$0xff]  }
   0xf   :  { %4747 = vmatpush1.bf16.msra.mxu0 %v6660_v14  ;;  %5239 = vmatpush1.bf16.msra.mxu1 %v6661_v15  ;;  %v6702_v42 = vld [vmem:[%s10249_s1 + $0x140] ss:$16 sps:$4 sm:$0xff]   ;;  %v6703_v43 = vld [vmem:[%s10249_s1 + $0x148] ss:$16 sps:$4 sm:$0xff]   ;;  %v6704_v44 = vld [vmem:[%s10249_s1 + $0x164] ss:$16 sps:$4 sm:$0xff]  }
  0x10   :  { %4748 = vmatprep.subr.bf16.mxu0 %v6662_v16  ;;  %5240 = vmatprep.subr.bf16.mxu1 %v6664_v17  ;;  %v6706_v45 = vld [vmem:[%s10249_s1 + $0x16c] ss:$16 sps:$4 sm:$0xff]   ;;  %v14_v46 = vld [vmem:[%s10250_s0] sm:$0xff]  ;;  %v6709_v49 = vld [vmem:[%s10249_s1 + $0x168] ss:$16 sps:$4 sm:$0xff]  }
  0x11   :  { %v6708_v47 = vld [vmem:[%s10249_s1 + $0x160] ss:$16 sps:$4 sm:$0xff]   ;;  %v5751_v48 = vcombine.high %v14_v46, %v14_v46  ;;  %v6710_v50 = vld [vmem:[%s10249_s1 + $0x184] ss:$16 sps:$4 sm:$0xff]   ;;  %v6712_v51 = vld [vmem:[%s10249_s1 + $0x18c] ss:$16 sps:$4 sm:$0xff]   ;;  %v5750_v4 = vcombine.low %v14_v46, %v14_v46 }
  0x12   :  { %v6714_v52 = vld [vmem:[%s10249_s1 + $0x180] ss:$16 sps:$4 sm:$0xff]   ;;  %v6715_v53 = vld [vmem:[%s10249_s1 + $0x188] ss:$16 sps:$4 sm:$0xff]   ;;  %v6716_v54 = vld [vmem:[%s10249_s1 + $0x1a4] ss:$16 sps:$4 sm:$0xff]  }
  0x13   :  { %4749 = vmatpush1.bf16.msra.mxu0 %v6666_v18  ;;  %5241 = vmatpush1.bf16.msra.mxu1 %v6667_v19  ;;  %v6718_v55 = vld [vmem:[%s10249_s1 + $0x1ac] ss:$16 sps:$4 sm:$0xff]   ;;  %v6720_v56 = vld [vmem:[%s10249_s1 + $0x1a0] ss:$16 sps:$4 sm:$0xff]   ;;  %v6721_v57 = vld [vmem:[%s10249_s1 + $0x1a8] ss:$16 sps:$4 sm:$0xff]  }
  0x14   :  { %4750 = vmatprep.subr.bf16.mxu0 %v6668_v20  ;;  %5242 = vmatprep.subr.bf16.mxu1 %v6670_v21  ;;  %v6722_v58 = vld [vmem:[%s10249_s1 + $0x1c4] ss:$16 sps:$4 sm:$0xff]   ;;  %v6724_v59 = vld [vmem:[%s10249_s1 + $0x1cc] ss:$16 sps:$4 sm:$0xff]   ;;  %v6726_v60 = vld [vmem:[%s10249_s1 + $0x1c0] ss:$16 sps:$4 sm:$0xff]  }
  0x15   :  { %4772 = vmatprep.mubr.bf16.mxu0 %v5751_v48  ;;  %5264 = vmatprep.mubr.bf16.mxu1 %v5751_v48  ;;  %v6727_v61 = vld [vmem:[%s10249_s1 + $0x1c8] ss:$16 sps:$4 sm:$0xff]   ;;  %v6728_v62 = vld [vmem:[%s10249_s1 + $0x1e4] ss:$16 sps:$4 sm:$0xff]   ;;  %v6730_v63 = vld [vmem:[%s10249_s1 + $0x1ec] ss:$16 sps:$4 sm:$0xff]  }
  0x16   :  { %v6732_v0 = vld [vmem:[%s10249_s1 + $0x1e0] ss:$16 sps:$4 sm:$0xff]   ;;  %v6733_v1 = vld [vmem:[%s10249_s1 + $0x1e8] ss:$16 sps:$4 sm:$0xff]   ;;  %v6738_v2 = vld [vmem:[%s10249_s1 + $0x204] ss:$16 sps:$4 sm:$0xff]  }
  0x17   :  { %4751 = vmatpush1.bf16.msra.mxu0 %v6672_v22  ;;  %5243 = vmatpush1.bf16.msra.mxu1 %v6673_v23  ;;  %v6741_v3 = vld [vmem:[%s10249_s1 + $0x20c] ss:$16 sps:$4 sm:$0xff]   ;;  %v6736_v5 = vld [vmem:[%s10249_s1 + $0x200] ss:$16 sps:$4 sm:$0xff]   ;;  %v6739_v6 = vld [vmem:[%s10249_s1 + $0x208] ss:$16 sps:$4 sm:$0xff]  }
  0x18   :  { %4752 = vmatprep.subr.bf16.mxu0 %v6674_v24  ;;  %5244 = vmatprep.subr.bf16.mxu1 %v6676_v25  ;;  %v6744_v7 = vld [vmem:[%s10249_s1 + $0x224] ss:$16 sps:$4 sm:$0xff]   ;;  %v6747_v8 = vld [vmem:[%s10249_s1 + $0x22c] ss:$16 sps:$4 sm:$0xff]   ;;  %v6742_v9 = vld [vmem:[%s10249_s1 + $0x220] ss:$16 sps:$4 sm:$0xff]  }
  0x19   :  { %v6745_v10 = vld [vmem:[%s10249_s1 + $0x228] ss:$16 sps:$4 sm:$0xff]   ;;  %v6750_v11 = vld [vmem:[%s10249_s1 + $0x244] ss:$16 sps:$4 sm:$0xff]   ;;  %v6753_v12 = vld [vmem:[%s10249_s1 + $0x24c] ss:$16 sps:$4 sm:$0xff]  }
  0x1a   :  { %v6748_v13 = vld [vmem:[%s10249_s1 + $0x240] ss:$16 sps:$4 sm:$0xff]   ;;  %v6751_v14 = vld [vmem:[%s10249_s1 + $0x248] ss:$16 sps:$4 sm:$0xff]   ;;  %v6756_v15 = vld [vmem:[%s10249_s1 + $0x264] ss:$16 sps:$4 sm:$0xff]  }
  0x1b   :  { %4753 = vmatpush1.bf16.msra.mxu0 %v6678_v26  ;;  %5245 = vmatpush1.bf16.msra.mxu1 %v6679_v27  ;;  %v6759_v16 = vld [vmem:[%s10249_s1 + $0x26c] ss:$16 sps:$4 sm:$0xff]   ;;  %v6754_v17 = vld [vmem:[%s10249_s1 + $0x260] ss:$16 sps:$4 sm:$0xff]   ;;  %v6757_v18 = vld [vmem:[%s10249_s1 + $0x268] ss:$16 sps:$4 sm:$0xff]  }
  0x1c   :  { %4754 = vmatprep.subr.bf16.mxu0 %v6680_v28  ;;  %5246 = vmatprep.subr.bf16.mxu1 %v6682_v29  ;;  %v6762_v19 = vld [vmem:[%s10249_s1 + $0x284] ss:$16 sps:$4 sm:$0xff]   ;;  %v6765_v20 = vld [vmem:[%s10249_s1 + $0x28c] ss:$16 sps:$4 sm:$0xff]   ;;  %v6760_v21 = vld [vmem:[%s10249_s1 + $0x280] ss:$16 sps:$4 sm:$0xff]  }
  0x1d   :  { %v6763_v22 = vld [vmem:[%s10249_s1 + $0x288] ss:$16 sps:$4 sm:$0xff]   ;;  %v6768_v23 = vld [vmem:[%s10249_s1 + $0x2a4] ss:$16 sps:$4 sm:$0xff]   ;;  %v6771_v24 = vld [vmem:[%s10249_s1 + $0x2ac] ss:$16 sps:$4 sm:$0xff]  }
  0x1e   :  { %v6766_v25 = vld [vmem:[%s10249_s1 + $0x2a0] ss:$16 sps:$4 sm:$0xff]   ;;  %v6769_v26 = vld [vmem:[%s10249_s1 + $0x2a8] ss:$16 sps:$4 sm:$0xff]   ;;  %v6774_v27 = vld [vmem:[%s10249_s1 + $0x2c4] ss:$16 sps:$4 sm:$0xff]  }
  0x1f   :  { %4755 = vmatpush1.bf16.msra.mxu0 %v6684_v30  ;;  %5247 = vmatpush1.bf16.msra.mxu1 %v6685_v31  ;;  %v6777_v28 = vld [vmem:[%s10249_s1 + $0x2cc] ss:$16 sps:$4 sm:$0xff]   ;;  %v6772_v31 = vld [vmem:[%s10249_s1 + $0x2c0] ss:$16 sps:$4 sm:$0xff]   ;;  %v6799_v48 = vld [vmem:[%s10249_s1 + $0x348] ss:$16 sps:$4 sm:$0xff]  }
  0x20   :  { %4756 = vmatprep.subr.bf16.mxu0 %v6686_v32  ;;  %5248 = vmatprep.subr.bf16.mxu1 %v6688_v33  ;;  %v8110_v29 = vld [vmem:[%s10250_s0 + $0x8] sm:$0xff]  ;;  %v6780_v33 = vld [vmem:[%s10249_s1 + $0x2e4] ss:$16 sps:$4 sm:$0xff]  }
  0x21   :  { %v5753_v30 = vcombine.high %v8110_v29, %v8110_v29  ;;  %v6775_v32 = vld [vmem:[%s10249_s1 + $0x2c8] ss:$16 sps:$4 sm:$0xff]   ;;  %v6801_v46 = vld [vmem:[%s10249_s1 + $0x34c] ss:$16 sps:$4 sm:$0xff]  }
  0x23   :  { %4757 = vmatpush1.bf16.msra.mxu0 %v6690_v34  ;;  %5249 = vmatpush1.bf16.msra.mxu1 %v6691_v35  ;;  %v6783_v34 = vld [vmem:[%s10249_s1 + $0x2ec] ss:$16 sps:$4 sm:$0xff]   ;;  %v6778_v35 = vld [vmem:[%s10249_s1 + $0x2e0] ss:$16 sps:$4 sm:$0xff]  }
  0x24   :  { %4758 = vmatprep.subr.bf16.mxu0 %v6692_v36  ;;  %5250 = vmatprep.subr.bf16.mxu1 %v6694_v37  ;;  %v6781_v36 = vld [vmem:[%s10249_s1 + $0x2e8] ss:$16 sps:$4 sm:$0xff]   ;;  %v6786_v37 = vld [vmem:[%s10249_s1 + $0x304] ss:$16 sps:$4 sm:$0xff]  }
  0x27   :  { %4759 = vmatpush1.bf16.msra.mxu0 %v6696_v38  ;;  %5251 = vmatpush1.bf16.msra.mxu1 %v6697_v39  ;;  %v6789_v38 = vld [vmem:[%s10249_s1 + $0x30c] ss:$16 sps:$4 sm:$0xff]   ;;  %v6784_v39 = vld [vmem:[%s10249_s1 + $0x300] ss:$16 sps:$4 sm:$0xff]  }
  0x28   :  { %4760 = vmatprep.subr.bf16.mxu0 %v6698_v40  ;;  %5252 = vmatprep.subr.bf16.mxu1 %v6700_v41  ;;  %v6787_v40 = vld [vmem:[%s10249_s1 + $0x308] ss:$16 sps:$4 sm:$0xff]   ;;  %v6792_v41 = vld [vmem:[%s10249_s1 + $0x324] ss:$16 sps:$4 sm:$0xff]  }
  0x2b   :  { %4761 = vmatpush1.bf16.msra.mxu0 %v6702_v42  ;;  %5253 = vmatpush1.bf16.msra.mxu1 %v6703_v43  ;;  %v6795_v42 = vld [vmem:[%s10249_s1 + $0x32c] ss:$16 sps:$4 sm:$0xff]   ;;  %v6790_v43 = vld [vmem:[%s10249_s1 + $0x320] ss:$16 sps:$4 sm:$0xff]  }
  0x2c   :  { %4762 = vmatprep.subr.bf16.mxu0 %v6704_v44  ;;  %5254 = vmatprep.subr.bf16.mxu1 %v6706_v45  ;;  %v6793_v44 = vld [vmem:[%s10249_s1 + $0x328] ss:$16 sps:$4 sm:$0xff]   ;;  %v6798_v45 = vld [vmem:[%s10249_s1 + $0x344] ss:$16 sps:$4 sm:$0xff]  }
  0x2f   :  { %4763 = vmatpush1.bf16.msra.mxu0 %v6708_v47  ;;  %5255 = vmatpush1.bf16.msra.mxu1 %v6709_v49  ;;  %v6796_v47 = vld [vmem:[%s10249_s1 + $0x340] ss:$16 sps:$4 sm:$0xff]   ;;  %v6804_v49 = vld [vmem:[%s10249_s1 + $0x364] ss:$16 sps:$4 sm:$0xff]  }
  0x30   :  { %4764 = vmatprep.subr.bf16.mxu0 %v6710_v50  ;;  %5256 = vmatprep.subr.bf16.mxu1 %v6712_v51  ;;  %v6807_v50 = vld [vmem:[%s10249_s1 + $0x36c] ss:$16 sps:$4 sm:$0xff]   ;;  %v6802_v51 = vld [vmem:[%s10249_s1 + $0x360] ss:$16 sps:$4 sm:$0xff]  }
  0x33   :  { %4765 = vmatpush1.bf16.msra.mxu0 %v6714_v52  ;;  %5257 = vmatpush1.bf16.msra.mxu1 %v6715_v53  ;;  %v6805_v52 = vld [vmem:[%s10249_s1 + $0x368] ss:$16 sps:$4 sm:$0xff]   ;;  %v6810_v53 = vld [vmem:[%s10249_s1 + $0x384] ss:$16 sps:$4 sm:$0xff]  }
  0x34   :  { %4766 = vmatprep.subr.bf16.mxu0 %v6716_v54  ;;  %5258 = vmatprep.subr.bf16.mxu1 %v6718_v55  ;;  %v6813_v54 = vld [vmem:[%s10249_s1 + $0x38c] ss:$16 sps:$4 sm:$0xff]   ;;  %v6808_v55 = vld [vmem:[%s10249_s1 + $0x380] ss:$16 sps:$4 sm:$0xff]  }
  0x37   :  { %4767 = vmatpush1.bf16.msra.mxu0 %v6720_v56  ;;  %5259 = vmatpush1.bf16.msra.mxu1 %v6721_v57  ;;  %v6811_v56 = vld [vmem:[%s10249_s1 + $0x388] ss:$16 sps:$4 sm:$0xff]   ;;  %v6816_v57 = vld [vmem:[%s10249_s1 + $0x3a4] ss:$16 sps:$4 sm:$0xff]  }
  0x38   :  { %4768 = vmatprep.subr.bf16.mxu0 %v6722_v58  ;;  %5260 = vmatprep.subr.bf16.mxu1 %v6724_v59  ;;  %v6819_v58 = vld [vmem:[%s10249_s1 + $0x3ac] ss:$16 sps:$4 sm:$0xff]   ;;  %v6814_v59 = vld [vmem:[%s10249_s1 + $0x3a0] ss:$16 sps:$4 sm:$0xff]  }
  0x3b   :  { %4769 = vmatpush1.bf16.msra.mxu0 %v6726_v60  ;;  %5261 = vmatpush1.bf16.msra.mxu1 %v6727_v61  ;;  %v6817_v60 = vld [vmem:[%s10249_s1 + $0x3a8] ss:$16 sps:$4 sm:$0xff]   ;;  %v6822_v61 = vld [vmem:[%s10249_s1 + $0x3c4] ss:$16 sps:$4 sm:$0xff]  }
  0x3c   :  { %4770 = vmatprep.subr.bf16.mxu0 %v6728_v62  ;;  %5262 = vmatprep.subr.bf16.mxu1 %v6730_v63  ;;  %v6825_v62 = vld [vmem:[%s10249_s1 + $0x3cc] ss:$16 sps:$4 sm:$0xff]   ;;  %v6820_v63 = vld [vmem:[%s10249_s1 + $0x3c0] ss:$16 sps:$4 sm:$0xff]  }
  0x3f   :  { %4771 = vmatpush1.bf16.msra.mxu0 %v6732_v0  ;;  %5263 = vmatpush1.bf16.msra.mxu1 %v6733_v1  ;;  %v6823_v0 = vld [vmem:[%s10249_s1 + $0x3c8] ss:$16 sps:$4 sm:$0xff]   ;;  %v6828_v1 = vld [vmem:[%s10249_s1 + $0x3e4] ss:$16 sps:$4 sm:$0xff]  }
  0x40   :  { %4781 = vmatprep.subr.bf16.mxu0 %v6738_v2  ;;  %5273 = vmatprep.subr.bf16.mxu1 %v6741_v3  ;;  %v6831_v2 = vld [vmem:[%s10249_s1 + $0x3ec] ss:$16 sps:$4 sm:$0xff]   ;;  %v6826_v3 = vld [vmem:[%s10249_s1 + $0x3e0] ss:$16 sps:$4 sm:$0xff]  }
  0x42   :  { %4773 = vmatmul.mubr.bf16.vlgmr.msra.gmra.mrb[0].mxu0 %v5750_v4  ;;  %5265 = vmatmul.mubr.bf16.vlgmr.msra.gmra.mrb[0].mxu1 %v5750_v4  ;;  %v6829_v4 = vld [vmem:[%s10249_s1 + $0x3e8] ss:$16 sps:$4 sm:$0xff]  }
  0x43   :  { %4782 = vmatpush1.bf16.msra.mxu0 %v6736_v5  ;;  %5274 = vmatpush1.bf16.msra.mxu1 %v6739_v6  ;;  %v6836_v5 = vld [vmem:[%s10249_s1 + $0x404] ss:$16 sps:$4 sm:$0xff]   ;;  %v6839_v6 = vld [vmem:[%s10249_s1 + $0x40c] ss:$16 sps:$4 sm:$0xff]  }
  0x44   :  { %4783 = vmatprep.subr.bf16.mxu0 %v6744_v7  ;;  %5275 = vmatprep.subr.bf16.mxu1 %v6747_v8  ;;  %v5752_v7 = vcombine.low %v8110_v29, %v8110_v29  ;;  %v6834_v8 = vld [vmem:[%s10249_s1 + $0x400] ss:$16 sps:$4 sm:$0xff]   ;;  %v6869_v29 = vld [vmem:[%s10249_s1 + $0x4ac] ss:$16 sps:$4 sm:$0xff]  }
  0x45   :  { %4813 = vmatprep.mubr.bf16.mxu0 %v5753_v30  ;;  %5305 = vmatprep.mubr.bf16.mxu1 %v5753_v30  ;;  %v6864_v30 = vld [vmem:[%s10249_s1 + $0x4a0] ss:$16 sps:$4 sm:$0xff]  }
  0x47   :  { %4784 = vmatpush1.bf16.msra.mxu0 %v6742_v9  ;;  %5276 = vmatpush1.bf16.msra.mxu1 %v6745_v10  ;;  %v6837_v9 = vld [vmem:[%s10249_s1 + $0x408] ss:$16 sps:$4 sm:$0xff]   ;;  %v6842_v10 = vld [vmem:[%s10249_s1 + $0x424] ss:$16 sps:$4 sm:$0xff]  }
  0x48   :  { %4785 = vmatprep.subr.bf16.mxu0 %v6750_v11  ;;  %5277 = vmatprep.subr.bf16.mxu1 %v6753_v12  ;;  %v8248_v11 = vld [vmem:[%s10250_s0 + $0x10] sm:$0xff]  ;;  %v6845_v12 = vld [vmem:[%s10249_s1 + $0x42c] ss:$16 sps:$4 sm:$0xff]  }
  0x4b   :  { %4786 = vmatpush1.bf16.msra.mxu0 %v6748_v13  ;;  %5278 = vmatpush1.bf16.msra.mxu1 %v6751_v14  ;;  %v5755_v13 = vcombine.high %v8248_v11, %v8248_v11  ;;  %v6840_v14 = vld [vmem:[%s10249_s1 + $0x420] ss:$16 sps:$4 sm:$0xff]  }
  0x4c   :  { %4787 = vmatprep.subr.bf16.mxu0 %v6756_v15  ;;  %5279 = vmatprep.subr.bf16.mxu1 %v6759_v16  ;;  %v6843_v15 = vld [vmem:[%s10249_s1 + $0x428] ss:$16 sps:$4 sm:$0xff]   ;;  %v6848_v16 = vld [vmem:[%s10249_s1 + $0x444] ss:$16 sps:$4 sm:$0xff]  }
  0x4f   :  { %4788 = vmatpush1.bf16.msra.mxu0 %v6754_v17  ;;  %5280 = vmatpush1.bf16.msra.mxu1 %v6757_v18  ;;  %v6851_v17 = vld [vmem:[%s10249_s1 + $0x44c] ss:$16 sps:$4 sm:$0xff]   ;;  %v6846_v18 = vld [vmem:[%s10249_s1 + $0x440] ss:$16 sps:$4 sm:$0xff]  }
  0x50   :  { %4789 = vmatprep.subr.bf16.mxu0 %v6762_v19  ;;  %5281 = vmatprep.subr.bf16.mxu1 %v6765_v20  ;;  %v6849_v19 = vld [vmem:[%s10249_s1 + $0x448] ss:$16 sps:$4 sm:$0xff]   ;;  %v6854_v20 = vld [vmem:[%s10249_s1 + $0x464] ss:$16 sps:$4 sm:$0xff]  }
  0x53   :  { %4790 = vmatpush1.bf16.msra.mxu0 %v6760_v21  ;;  %5282 = vmatpush1.bf16.msra.mxu1 %v6763_v22  ;;  %v6857_v21 = vld [vmem:[%s10249_s1 + $0x46c] ss:$16 sps:$4 sm:$0xff]   ;;  %v6852_v22 = vld [vmem:[%s10249_s1 + $0x460] ss:$16 sps:$4 sm:$0xff]  }
  0x54   :  { %4791 = vmatprep.subr.bf16.mxu0 %v6768_v23  ;;  %5283 = vmatprep.subr.bf16.mxu1 %v6771_v24  ;;  %v6855_v23 = vld [vmem:[%s10249_s1 + $0x468] ss:$16 sps:$4 sm:$0xff]   ;;  %v6860_v24 = vld [vmem:[%s10249_s1 + $0x484] ss:$16 sps:$4 sm:$0xff]  }
  0x57   :  { %4792 = vmatpush1.bf16.msra.mxu0 %v6766_v25  ;;  %5284 = vmatpush1.bf16.msra.mxu1 %v6769_v26  ;;  %v6863_v25 = vld [vmem:[%s10249_s1 + $0x48c] ss:$16 sps:$4 sm:$0xff]   ;;  %v6858_v26 = vld [vmem:[%s10249_s1 + $0x480] ss:$16 sps:$4 sm:$0xff]  }
  0x58   :  { %4793 = vmatprep.subr.bf16.mxu0 %v6774_v27  ;;  %5285 = vmatprep.subr.bf16.mxu1 %v6777_v28  ;;  %v6861_v27 = vld [vmem:[%s10249_s1 + $0x488] ss:$16 sps:$4 sm:$0xff]   ;;  %v6866_v28 = vld [vmem:[%s10249_s1 + $0x4a4] ss:$16 sps:$4 sm:$0xff]  }
  0x5b   :  { %4794 = vmatpush1.bf16.msra.mxu0 %v6772_v31  ;;  %5286 = vmatpush1.bf16.msra.mxu1 %v6775_v32  ;;  %v6867_v31 = vld [vmem:[%s10249_s1 + $0x4a8] ss:$16 sps:$4 sm:$0xff]   ;;  %v6872_v32 = vld [vmem:[%s10249_s1 + $0x4c4] ss:$16 sps:$4 sm:$0xff]  }
  0x5c   :  { %4795 = vmatprep.subr.bf16.mxu0 %v6780_v33  ;;  %5287 = vmatprep.subr.bf16.mxu1 %v6783_v34  ;;  %v6875_v33 = vld [vmem:[%s10249_s1 + $0x4cc] ss:$16 sps:$4 sm:$0xff]   ;;  %v6870_v34 = vld [vmem:[%s10249_s1 + $0x4c0] ss:$16 sps:$4 sm:$0xff]  }
  0x5f   :  { %4796 = vmatpush1.bf16.msra.mxu0 %v6778_v35  ;;  %5288 = vmatpush1.bf16.msra.mxu1 %v6781_v36  ;;  %v6873_v35 = vld [vmem:[%s10249_s1 + $0x4c8] ss:$16 sps:$4 sm:$0xff]   ;;  %v6878_v36 = vld [vmem:[%s10249_s1 + $0x4e4] ss:$16 sps:$4 sm:$0xff]  }
  0x60   :  { %4797 = vmatprep.subr.bf16.mxu0 %v6786_v37  ;;  %5289 = vmatprep.subr.bf16.mxu1 %v6789_v38  ;;  %v6881_v37 = vld [vmem:[%s10249_s1 + $0x4ec] ss:$16 sps:$4 sm:$0xff]   ;;  %v6876_v38 = vld [vmem:[%s10249_s1 + $0x4e0] ss:$16 sps:$4 sm:$0xff]  }
  0x63   :  { %4798 = vmatpush1.bf16.msra.mxu0 %v6784_v39  ;;  %5290 = vmatpush1.bf16.msra.mxu1 %v6787_v40  ;;  %v6879_v39 = vld [vmem:[%s10249_s1 + $0x4e8] ss:$16 sps:$4 sm:$0xff]   ;;  %v6884_v40 = vld [vmem:[%s10249_s1 + $0x504] ss:$16 sps:$4 sm:$0xff]  }
  0x64   :  { %4799 = vmatprep.subr.bf16.mxu0 %v6792_v41  ;;  %5291 = vmatprep.subr.bf16.mxu1 %v6795_v42  ;;  %v6887_v41 = vld [vmem:[%s10249_s1 + $0x50c] ss:$16 sps:$4 sm:$0xff]   ;;  %v6882_v42 = vld [vmem:[%s10249_s1 + $0x500] ss:$16 sps:$4 sm:$0xff]  }
  0x67   :  { %4800 = vmatpush1.bf16.msra.mxu0 %v6790_v43  ;;  %5292 = vmatpush1.bf16.msra.mxu1 %v6793_v44  ;;  %v6885_v43 = vld [vmem:[%s10249_s1 + $0x508] ss:$16 sps:$4 sm:$0xff]   ;;  %v6890_v44 = vld [vmem:[%s10249_s1 + $0x524] ss:$16 sps:$4 sm:$0xff]  }
  0x68   :  { %4801 = vmatprep.subr.bf16.mxu0 %v6798_v45  ;;  %5293 = vmatprep.subr.bf16.mxu1 %v6801_v46  ;;  %v6893_v45 = vld [vmem:[%s10249_s1 + $0x52c] ss:$16 sps:$4 sm:$0xff]   ;;  %v6888_v46 = vld [vmem:[%s10249_s1 + $0x520] ss:$16 sps:$4 sm:$0xff]  }
  0x6b   :  { %4802 = vmatpush1.bf16.msra.mxu0 %v6796_v47  ;;  %5294 = vmatpush1.bf16.msra.mxu1 %v6799_v48  ;;  %v6891_v47 = vld [vmem:[%s10249_s1 + $0x528] ss:$16 sps:$4 sm:$0xff]   ;;  %v6896_v48 = vld [vmem:[%s10249_s1 + $0x544] ss:$16 sps:$4 sm:$0xff]  }
  0x6c   :  { %4803 = vmatprep.subr.bf16.mxu0 %v6804_v49  ;;  %5295 = vmatprep.subr.bf16.mxu1 %v6807_v50  ;;  %v6899_v49 = vld [vmem:[%s10249_s1 + $0x54c] ss:$16 sps:$4 sm:$0xff]   ;;  %v6894_v50 = vld [vmem:[%s10249_s1 + $0x540] ss:$16 sps:$4 sm:$0xff]  }
  0x6f   :  { %4804 = vmatpush1.bf16.msra.mxu0 %v6802_v51  ;;  %5296 = vmatpush1.bf16.msra.mxu1 %v6805_v52  ;;  %v6897_v51 = vld [vmem:[%s10249_s1 + $0x548] ss:$16 sps:$4 sm:$0xff]   ;;  %v6902_v52 = vld [vmem:[%s10249_s1 + $0x564] ss:$16 sps:$4 sm:$0xff]  }
  0x70   :  { %4805 = vmatprep.subr.bf16.mxu0 %v6810_v53  ;;  %5297 = vmatprep.subr.bf16.mxu1 %v6813_v54  ;;  %v6905_v53 = vld [vmem:[%s10249_s1 + $0x56c] ss:$16 sps:$4 sm:$0xff]   ;;  %v6900_v54 = vld [vmem:[%s10249_s1 + $0x560] ss:$16 sps:$4 sm:$0xff]  }
  0x73   :  { %4806 = vmatpush1.bf16.msra.mxu0 %v6808_v55  ;;  %5298 = vmatpush1.bf16.msra.mxu1 %v6811_v56  ;;  %v6903_v55 = vld [vmem:[%s10249_s1 + $0x568] ss:$16 sps:$4 sm:$0xff]   ;;  %v6908_v56 = vld [vmem:[%s10249_s1 + $0x584] ss:$16 sps:$4 sm:$0xff]  }
  0x74   :  { %4807 = vmatprep.subr.bf16.mxu0 %v6816_v57  ;;  %5299 = vmatprep.subr.bf16.mxu1 %v6819_v58  ;;  %v6911_v57 = vld [vmem:[%s10249_s1 + $0x58c] ss:$16 sps:$4 sm:$0xff]   ;;  %v6906_v58 = vld [vmem:[%s10249_s1 + $0x580] ss:$16 sps:$4 sm:$0xff]  }
  0x77   :  { %4808 = vmatpush1.bf16.msra.mxu0 %v6814_v59  ;;  %5300 = vmatpush1.bf16.msra.mxu1 %v6817_v60  ;;  %v6909_v59 = vld [vmem:[%s10249_s1 + $0x588] ss:$16 sps:$4 sm:$0xff]   ;;  %v6914_v60 = vld [vmem:[%s10249_s1 + $0x5a4] ss:$16 sps:$4 sm:$0xff]  }
  0x78   :  { %4809 = vmatprep.subr.bf16.mxu0 %v6822_v61  ;;  %5301 = vmatprep.subr.bf16.mxu1 %v6825_v62  ;;  %v6917_v61 = vld [vmem:[%s10249_s1 + $0x5ac] ss:$16 sps:$4 sm:$0xff]   ;;  %v6912_v62 = vld [vmem:[%s10249_s1 + $0x5a0] ss:$16 sps:$4 sm:$0xff]  }
  0x7b   :  { %4810 = vmatpush1.bf16.msra.mxu0 %v6820_v63  ;;  %5302 = vmatpush1.bf16.msra.mxu1 %v6823_v0  ;;  %v6915_v63 = vld [vmem:[%s10249_s1 + $0x5a8] ss:$16 sps:$4 sm:$0xff]   ;;  %v6920_v0 = vld [vmem:[%s10249_s1 + $0x5c4] ss:$16 sps:$4 sm:$0xff]  }
  0x7c   :  { %4811 = vmatprep.subr.bf16.mxu0 %v6828_v1  ;;  %5303 = vmatprep.subr.bf16.mxu1 %v6831_v2  ;;  %v6923_v1 = vld [vmem:[%s10249_s1 + $0x5cc] ss:$16 sps:$4 sm:$0xff]   ;;  %v6918_v2 = vld [vmem:[%s10249_s1 + $0x5c0] ss:$16 sps:$4 sm:$0xff]  }
  0x7f   :  { %4812 = vmatpush1.bf16.msra.mxu0 %v6826_v3  ;;  %5304 = vmatpush1.bf16.msra.mxu1 %v6829_v4  ;;  %v6921_v3 = vld [vmem:[%s10249_s1 + $0x5c8] ss:$16 sps:$4 sm:$0xff]   ;;  %v6926_v4 = vld [vmem:[%s10249_s1 + $0x5e4] ss:$16 sps:$4 sm:$0xff]  }
  0x80   :  { %4822 = vmatprep.subr.bf16.mxu0 %v6836_v5  ;;  %5314 = vmatprep.subr.bf16.mxu1 %v6839_v6  ;;  %v6929_v5 = vld [vmem:[%s10249_s1 + $0x5ec] ss:$16 sps:$4 sm:$0xff]   ;;  %v6924_v6 = vld [vmem:[%s10249_s1 + $0x5e0] ss:$16 sps:$4 sm:$0xff]  }
  0x82   :  { %4814 = vmatmul.mubr.bf16.vlgmr.msra.gmra.mrb[0].mxu0 %v5752_v7  ;;  %5306 = vmatmul.mubr.bf16.vlgmr.msra.gmra.mrb[0].mxu1 %v5752_v7  ;;  %v6927_v7 = vld [vmem:[%s10249_s1 + $0x5e8] ss:$16 sps:$4 sm:$0xff]  }
  0x83   :  { %4823 = vmatpush1.bf16.msra.mxu0 %v6834_v8  ;;  %5315 = vmatpush1.bf16.msra.mxu1 %v6837_v9  ;;  %v6934_v8 = vld [vmem:[%s10249_s1 + $0x604] ss:$16 sps:$4 sm:$0xff]   ;;  %v6937_v9 = vld [vmem:[%s10249_s1 + $0x60c] ss:$16 sps:$4 sm:$0xff]  }
  0x84   :  { %4824 = vmatprep.subr.bf16.mxu0 %v6842_v10  ;;  %5316 = vmatprep.subr.bf16.mxu1 %v6845_v12  ;;  %v6932_v10 = vld [vmem:[%s10249_s1 + $0x600] ss:$16 sps:$4 sm:$0xff]   ;;  %v5754_v12 = vcombine.low %v8248_v11, %v8248_v11  ;;  %v6943_v11 = vld [vmem:[%s10249_s1 + $0x62c] ss:$16 sps:$4 sm:$0xff]  }
  0x85   :  { %4854 = vmatprep.mubr.bf16.mxu0 %v5755_v13  ;;  %5346 = vmatprep.mubr.bf16.mxu1 %v5755_v13  ;;  %v6935_v13 = vld [vmem:[%s10249_s1 + $0x608] ss:$16 sps:$4 sm:$0xff]  }
  0x87   :  { %4825 = vmatpush1.bf16.msra.mxu0 %v6840_v14  ;;  %5317 = vmatpush1.bf16.msra.mxu1 %v6843_v15  ;;  %v8446_v14 = vld [vmem:[%s10250_s0 + $0x18] sm:$0xff]  ;;  %v6940_v15 = vld [vmem:[%s10249_s1 + $0x624] ss:$16 sps:$4 sm:$0xff]  }
  0x88   :  { %4826 = vmatprep.subr.bf16.mxu0 %v6848_v16  ;;  %5318 = vmatprep.subr.bf16.mxu1 %v6851_v17  ;;  %v5757_v16 = vcombine.high %v8446_v14, %v8446_v14  ;;  %v6938_v17 = vld [vmem:[%s10249_s1 + $0x620] ss:$16 sps:$4 sm:$0xff]  }
  0x8b   :  { %4827 = vmatpush1.bf16.msra.mxu0 %v6846_v18  ;;  %5319 = vmatpush1.bf16.msra.mxu1 %v6849_v19  ;;  %v6941_v18 = vld [vmem:[%s10249_s1 + $0x628] ss:$16 sps:$4 sm:$0xff]   ;;  %v6946_v19 = vld [vmem:[%s10249_s1 + $0x644] ss:$16 sps:$4 sm:$0xff]  }
  0x8c   :  { %4828 = vmatprep.subr.bf16.mxu0 %v6854_v20  ;;  %5320 = vmatprep.subr.bf16.mxu1 %v6857_v21  ;;  %v6949_v20 = vld [vmem:[%s10249_s1 + $0x64c] ss:$16 sps:$4 sm:$0xff]   ;;  %v6944_v21 = vld [vmem:[%s10249_s1 + $0x640] ss:$16 sps:$4 sm:$0xff]  }
  0x8f   :  { %4829 = vmatpush1.bf16.msra.mxu0 %v6852_v22  ;;  %5321 = vmatpush1.bf16.msra.mxu1 %v6855_v23  ;;  %v6947_v22 = vld [vmem:[%s10249_s1 + $0x648] ss:$16 sps:$4 sm:$0xff]   ;;  %v6952_v23 = vld [vmem:[%s10249_s1 + $0x664] ss:$16 sps:$4 sm:$0xff]  }
  0x90   :  { %4830 = vmatprep.subr.bf16.mxu0 %v6860_v24  ;;  %5322 = vmatprep.subr.bf16.mxu1 %v6863_v25  ;;  %v6955_v24 = vld [vmem:[%s10249_s1 + $0x66c] ss:$16 sps:$4 sm:$0xff]   ;;  %v6950_v25 = vld [vmem:[%s10249_s1 + $0x660] ss:$16 sps:$4 sm:$0xff]  }
  0x93   :  { %4831 = vmatpush1.bf16.msra.mxu0 %v6858_v26  ;;  %5323 = vmatpush1.bf16.msra.mxu1 %v6861_v27  ;;  %v6953_v26 = vld [vmem:[%s10249_s1 + $0x668] ss:$16 sps:$4 sm:$0xff]   ;;  %v6958_v27 = vld [vmem:[%s10249_s1 + $0x684] ss:$16 sps:$4 sm:$0xff]  }
  0x94   :  { %4832 = vmatprep.subr.bf16.mxu0 %v6866_v28  ;;  %5324 = vmatprep.subr.bf16.mxu1 %v6869_v29  ;;  %v6961_v28 = vld [vmem:[%s10249_s1 + $0x68c] ss:$16 sps:$4 sm:$0xff]   ;;  %v6956_v29 = vld [vmem:[%s10249_s1 + $0x680] ss:$16 sps:$4 sm:$0xff]  }
  0x97   :  { %4833 = vmatpush1.bf16.msra.mxu0 %v6864_v30  ;;  %5325 = vmatpush1.bf16.msra.mxu1 %v6867_v31  ;;  %v6959_v30 = vld [vmem:[%s10249_s1 + $0x688] ss:$16 sps:$4 sm:$0xff]   ;;  %v6964_v31 = vld [vmem:[%s10249_s1 + $0x6a4] ss:$16 sps:$4 sm:$0xff]  }
  0x98   :  { %4834 = vmatprep.subr.bf16.mxu0 %v6872_v32  ;;  %5326 = vmatprep.subr.bf16.mxu1 %v6875_v33  ;;  %v6967_v32 = vld [vmem:[%s10249_s1 + $0x6ac] ss:$16 sps:$4 sm:$0xff]   ;;  %v6962_v33 = vld [vmem:[%s10249_s1 + $0x6a0] ss:$16 sps:$4 sm:$0xff]  }
  0x9b   :  { %4835 = vmatpush1.bf16.msra.mxu0 %v6870_v34  ;;  %5327 = vmatpush1.bf16.msra.mxu1 %v6873_v35  ;;  %v6965_v34 = vld [vmem:[%s10249_s1 + $0x6a8] ss:$16 sps:$4 sm:$0xff]   ;;  %v6970_v35 = vld [vmem:[%s10249_s1 + $0x6c4] ss:$16 sps:$4 sm:$0xff]  }
  0x9c   :  { %4836 = vmatprep.subr.bf16.mxu0 %v6878_v36  ;;  %5328 = vmatprep.subr.bf16.mxu1 %v6881_v37  ;;  %v6973_v36 = vld [vmem:[%s10249_s1 + $0x6cc] ss:$16 sps:$4 sm:$0xff]   ;;  %v6968_v37 = vld [vmem:[%s10249_s1 + $0x6c0] ss:$16 sps:$4 sm:$0xff]  }
  0x9f   :  { %4837 = vmatpush1.bf16.msra.mxu0 %v6876_v38  ;;  %5329 = vmatpush1.bf16.msra.mxu1 %v6879_v39  ;;  %v6971_v38 = vld [vmem:[%s10249_s1 + $0x6c8] ss:$16 sps:$4 sm:$0xff]   ;;  %v6976_v39 = vld [vmem:[%s10249_s1 + $0x6e4] ss:$16 sps:$4 sm:$0xff]  }
  0xa0   :  { %4838 = vmatprep.subr.bf16.mxu0 %v6884_v40  ;;  %5330 = vmatprep.subr.bf16.mxu1 %v6887_v41  ;;  %v6979_v40 = vld [vmem:[%s10249_s1 + $0x6ec] ss:$16 sps:$4 sm:$0xff]   ;;  %v6974_v41 = vld [vmem:[%s10249_s1 + $0x6e0] ss:$16 sps:$4 sm:$0xff]  }
  0xa3   :  { %4839 = vmatpush1.bf16.msra.mxu0 %v6882_v42  ;;  %5331 = vmatpush1.bf16.msra.mxu1 %v6885_v43  ;;  %v6977_v42 = vld [vmem:[%s10249_s1 + $0x6e8] ss:$16 sps:$4 sm:$0xff]   ;;  %v6982_v43 = vld [vmem:[%s10249_s1 + $0x704] ss:$16 sps:$4 sm:$0xff]  }
  0xa4   :  { %4840 = vmatprep.subr.bf16.mxu0 %v6890_v44  ;;  %5332 = vmatprep.subr.bf16.mxu1 %v6893_v45  ;;  %v6985_v44 = vld [vmem:[%s10249_s1 + $0x70c] ss:$16 sps:$4 sm:$0xff]   ;;  %v6980_v45 = vld [vmem:[%s10249_s1 + $0x700] ss:$16 sps:$4 sm:$0xff]  }
  0xa7   :  { %4841 = vmatpush1.bf16.msra.mxu0 %v6888_v46  ;;  %5333 = vmatpush1.bf16.msra.mxu1 %v6891_v47  ;;  %v6983_v46 = vld [vmem:[%s10249_s1 + $0x708] ss:$16 sps:$4 sm:$0xff]   ;;  %v6988_v47 = vld [vmem:[%s10249_s1 + $0x724] ss:$16 sps:$4 sm:$0xff]  }
  0xa8   :  { %4842 = vmatprep.subr.bf16.mxu0 %v6896_v48  ;;  %5334 = vmatprep.subr.bf16.mxu1 %v6899_v49  ;;  %v6991_v48 = vld [vmem:[%s10249_s1 + $0x72c] ss:$16 sps:$4 sm:$0xff]   ;;  %v6986_v49 = vld [vmem:[%s10249_s1 + $0x720] ss:$16 sps:$4 sm:$0xff]  }
  0xab   :  { %4843 = vmatpush1.bf16.msra.mxu0 %v6894_v50  ;;  %5335 = vmatpush1.bf16.msra.mxu1 %v6897_v51  ;;  %v6989_v50 = vld [vmem:[%s10249_s1 + $0x728] ss:$16 sps:$4 sm:$0xff]   ;;  %v6994_v51 = vld [vmem:[%s10249_s1 + $0x744] ss:$16 sps:$4 sm:$0xff]  }
  0xac   :  { %4844 = vmatprep.subr.bf16.mxu0 %v6902_v52  ;;  %5336 = vmatprep.subr.bf16.mxu1 %v6905_v53  ;;  %v6997_v52 = vld [vmem:[%s10249_s1 + $0x74c] ss:$16 sps:$4 sm:$0xff]   ;;  %v6992_v53 = vld [vmem:[%s10249_s1 + $0x740] ss:$16 sps:$4 sm:$0xff]  }
  0xaf   :  { %4845 = vmatpush1.bf16.msra.mxu0 %v6900_v54  ;;  %5337 = vmatpush1.bf16.msra.mxu1 %v6903_v55  ;;  %v6995_v54 = vld [vmem:[%s10249_s1 + $0x748] ss:$16 sps:$4 sm:$0xff]   ;;  %v7000_v55 = vld [vmem:[%s10249_s1 + $0x764] ss:$16 sps:$4 sm:$0xff]  }
  0xb0   :  { %4846 = vmatprep.subr.bf16.mxu0 %v6908_v56  ;;  %5338 = vmatprep.subr.bf16.mxu1 %v6911_v57  ;;  %v7003_v56 = vld [vmem:[%s10249_s1 + $0x76c] ss:$16 sps:$4 sm:$0xff]   ;;  %v6998_v57 = vld [vmem:[%s10249_s1 + $0x760] ss:$16 sps:$4 sm:$0xff]  }
  0xb3   :  { %4847 = vmatpush1.bf16.msra.mxu0 %v6906_v58  ;;  %5339 = vmatpush1.bf16.msra.mxu1 %v6909_v59  ;;  %v7001_v58 = vld [vmem:[%s10249_s1 + $0x768] ss:$16 sps:$4 sm:$0xff]   ;;  %v7006_v59 = vld [vmem:[%s10249_s1 + $0x784] ss:$16 sps:$4 sm:$0xff]  }
  0xb4   :  { %4848 = vmatprep.subr.bf16.mxu0 %v6914_v60  ;;  %5340 = vmatprep.subr.bf16.mxu1 %v6917_v61  ;;  %v7009_v60 = vld [vmem:[%s10249_s1 + $0x78c] ss:$16 sps:$4 sm:$0xff]   ;;  %v7004_v61 = vld [vmem:[%s10249_s1 + $0x780] ss:$16 sps:$4 sm:$0xff]  }
  0xb7   :  { %4849 = vmatpush1.bf16.msra.mxu0 %v6912_v62  ;;  %5341 = vmatpush1.bf16.msra.mxu1 %v6915_v63  ;;  %v7007_v62 = vld [vmem:[%s10249_s1 + $0x788] ss:$16 sps:$4 sm:$0xff]   ;;  %v7012_v63 = vld [vmem:[%s10249_s1 + $0x7a4] ss:$16 sps:$4 sm:$0xff]  }
  0xb8   :  { %4850 = vmatprep.subr.bf16.mxu0 %v6920_v0  ;;  %5342 = vmatprep.subr.bf16.mxu1 %v6923_v1  ;;  %v7015_v0 = vld [vmem:[%s10249_s1 + $0x7ac] ss:$16 sps:$4 sm:$0xff]   ;;  %v7010_v1 = vld [vmem:[%s10249_s1 + $0x7a0] ss:$16 sps:$4 sm:$0xff]  }
  0xbb   :  { %4851 = vmatpush1.bf16.msra.mxu0 %v6918_v2  ;;  %5343 = vmatpush1.bf16.msra.mxu1 %v6921_v3  ;;  %v7013_v2 = vld [vmem:[%s10249_s1 + $0x7a8] ss:$16 sps:$4 sm:$0xff]   ;;  %v7018_v3 = vld [vmem:[%s10249_s1 + $0x7c4] ss:$16 sps:$4 sm:$0xff]  }
  0xbc   :  { %4852 = vmatprep.subr.bf16.mxu0 %v6926_v4  ;;  %5344 = vmatprep.subr.bf16.mxu1 %v6929_v5  ;;  %v7021_v4 = vld [vmem:[%s10249_s1 + $0x7cc] ss:$16 sps:$4 sm:$0xff]   ;;  %v7016_v5 = vld [vmem:[%s10249_s1 + $0x7c0] ss:$16 sps:$4 sm:$0xff]  }
  0xbf   :  { %4853 = vmatpush1.bf16.msra.mxu0 %v6924_v6  ;;  %5345 = vmatpush1.bf16.msra.mxu1 %v6927_v7  ;;  %v7019_v6 = vld [vmem:[%s10249_s1 + $0x7c8] ss:$16 sps:$4 sm:$0xff]   ;;  %v7024_v7 = vld [vmem:[%s10249_s1 + $0x7e4] ss:$16 sps:$4 sm:$0xff]  }
  0xc0   :  { %4863 = vmatprep.subr.bf16.mxu0 %v6934_v8  ;;  %5355 = vmatprep.subr.bf16.mxu1 %v6937_v9  ;;  %v7027_v8 = vld [vmem:[%s10249_s1 + $0x7ec] ss:$16 sps:$4 sm:$0xff]   ;;  %v7022_v9 = vld [vmem:[%s10249_s1 + $0x7e0] ss:$16 sps:$4 sm:$0xff]  }
  0xc2   :  { %4855 = vmatmul.mubr.bf16.vlgmr.msra.gmra.mrb[0].mxu0 %v5754_v12  ;;  %5347 = vmatmul.mubr.bf16.vlgmr.msra.gmra.mrb[0].mxu1 %v5754_v12  ;;  %v7032_v12 = vld [vmem:[%s10249_s1 + $0x804] ss:$16 sps:$4 sm:$0xff]  }
  0xc3   :  { %4864 = vmatpush1.bf16.msra.mxu0 %v6932_v10  ;;  %5356 = vmatpush1.bf16.msra.mxu1 %v6935_v13  ;;  %v7025_v10 = vld [vmem:[%s10249_s1 + $0x7e8] ss:$16 sps:$4 sm:$0xff]   ;;  %v7035_v13 = vld [vmem:[%s10249_s1 + $0x80c] ss:$16 sps:$4 sm:$0xff]  }
  0xc4   :  { %4865 = vmatprep.subr.bf16.mxu0 %v6940_v15  ;;  %5357 = vmatprep.subr.bf16.mxu1 %v6943_v11  ;;  %v7030_v15 = vld [vmem:[%s10249_s1 + $0x800] ss:$16 sps:$4 sm:$0xff]   ;;  %v5756_v11 = vcombine.low %v8446_v14, %v8446_v14  ;;  %v7041_v14 = vld [vmem:[%s10249_s1 + $0x82c] ss:$16 sps:$4 sm:$0xff]  }
  0xc5   :  { %4895 = vmatprep.mubr.bf16.mxu0 %v5757_v16  ;;  %5387 = vmatprep.mubr.bf16.mxu1 %v5757_v16  ;;  %v8644_v16 = vld [vmem:[%s10250_s0 + $0x20] sm:$0xff] }
  0xc7   :  { %4866 = vmatpush1.bf16.msra.mxu0 %v6938_v17  ;;  %5358 = vmatpush1.bf16.msra.mxu1 %v6941_v18  ;;  %v7033_v17 = vld [vmem:[%s10249_s1 + $0x808] ss:$16 sps:$4 sm:$0xff]   ;;  %v7038_v18 = vld [vmem:[%s10249_s1 + $0x824] ss:$16 sps:$4 sm:$0xff]  }
  0xc8   :  { %4867 = vmatprep.subr.bf16.mxu0 %v6946_v19  ;;  %5359 = vmatprep.subr.bf16.mxu1 %v6949_v20  ;;  %v5759_v19 = vcombine.high %v8644_v16, %v8644_v16  ;;  %v7036_v20 = vld [vmem:[%s10249_s1 + $0x820] ss:$16 sps:$4 sm:$0xff]  }
  0xcb   :  { %4868 = vmatpush1.bf16.msra.mxu0 %v6944_v21  ;;  %5360 = vmatpush1.bf16.msra.mxu1 %v6947_v22  ;;  %v7039_v21 = vld [vmem:[%s10249_s1 + $0x828] ss:$16 sps:$4 sm:$0xff]   ;;  %v7044_v22 = vld [vmem:[%s10249_s1 + $0x844] ss:$16 sps:$4 sm:$0xff]  }
  0xcc   :  { %4869 = vmatprep.subr.bf16.mxu0 %v6952_v23  ;;  %5361 = vmatprep.subr.bf16.mxu1 %v6955_v24  ;;  %v7047_v23 = vld [vmem:[%s10249_s1 + $0x84c] ss:$16 sps:$4 sm:$0xff]   ;;  %v7042_v24 = vld [vmem:[%s10249_s1 + $0x840] ss:$16 sps:$4 sm:$0xff]  }
  0xcf   :  { %4870 = vmatpush1.bf16.msra.mxu0 %v6950_v25  ;;  %5362 = vmatpush1.bf16.msra.mxu1 %v6953_v26  ;;  %v7045_v25 = vld [vmem:[%s10249_s1 + $0x848] ss:$16 sps:$4 sm:$0xff]   ;;  %v7050_v26 = vld [vmem:[%s10249_s1 + $0x864] ss:$16 sps:$4 sm:$0xff]  }
  0xd0   :  { %4871 = vmatprep.subr.bf16.mxu0 %v6958_v27  ;;  %5363 = vmatprep.subr.bf16.mxu1 %v6961_v28  ;;  %v7053_v27 = vld [vmem:[%s10249_s1 + $0x86c] ss:$16 sps:$4 sm:$0xff]   ;;  %v7048_v28 = vld [vmem:[%s10249_s1 + $0x860] ss:$16 sps:$4 sm:$0xff]  }
  0xd3   :  { %4872 = vmatpush1.bf16.msra.mxu0 %v6956_v29  ;;  %5364 = vmatpush1.bf16.msra.mxu1 %v6959_v30  ;;  %v7051_v29 = vld [vmem:[%s10249_s1 + $0x868] ss:$16 sps:$4 sm:$0xff]   ;;  %v7056_v30 = vld [vmem:[%s10249_s1 + $0x884] ss:$16 sps:$4 sm:$0xff]  }
  0xd4   :  { %4873 = vmatprep.subr.bf16.mxu0 %v6964_v31  ;;  %5365 = vmatprep.subr.bf16.mxu1 %v6967_v32  ;;  %v7059_v31 = vld [vmem:[%s10249_s1 + $0x88c] ss:$16 sps:$4 sm:$0xff]   ;;  %v7054_v32 = vld [vmem:[%s10249_s1 + $0x880] ss:$16 sps:$4 sm:$0xff]  }
  0xd7   :  { %4874 = vmatpush1.bf16.msra.mxu0 %v6962_v33  ;;  %5366 = vmatpush1.bf16.msra.mxu1 %v6965_v34  ;;  %v7057_v33 = vld [vmem:[%s10249_s1 + $0x888] ss:$16 sps:$4 sm:$0xff]   ;;  %v7062_v34 = vld [vmem:[%s10249_s1 + $0x8a4] ss:$16 sps:$4 sm:$0xff]  }
  0xd8   :  { %4875 = vmatprep.subr.bf16.mxu0 %v6970_v35  ;;  %5367 = vmatprep.subr.bf16.mxu1 %v6973_v36  ;;  %v7065_v35 = vld [vmem:[%s10249_s1 + $0x8ac] ss:$16 sps:$4 sm:$0xff]   ;;  %v7060_v36 = vld [vmem:[%s10249_s1 + $0x8a0] ss:$16 sps:$4 sm:$0xff]  }
  0xdb   :  { %4876 = vmatpush1.bf16.msra.mxu0 %v6968_v37  ;;  %5368 = vmatpush1.bf16.msra.mxu1 %v6971_v38  ;;  %v7063_v37 = vld [vmem:[%s10249_s1 + $0x8a8] ss:$16 sps:$4 sm:$0xff]   ;;  %v7068_v38 = vld [vmem:[%s10249_s1 + $0x8c4] ss:$16 sps:$4 sm:$0xff]  }
  0xdc   :  { %4877 = vmatprep.subr.bf16.mxu0 %v6976_v39  ;;  %5369 = vmatprep.subr.bf16.mxu1 %v6979_v40  ;;  %v7071_v39 = vld [vmem:[%s10249_s1 + $0x8cc] ss:$16 sps:$4 sm:$0xff]   ;;  %v7066_v40 = vld [vmem:[%s10249_s1 + $0x8c0] ss:$16 sps:$4 sm:$0xff]  }
  0xdf   :  { %4878 = vmatpush1.bf16.msra.mxu0 %v6974_v41  ;;  %5370 = vmatpush1.bf16.msra.mxu1 %v6977_v42  ;;  %v7069_v41 = vld [vmem:[%s10249_s1 + $0x8c8] ss:$16 sps:$4 sm:$0xff]   ;;  %v7074_v42 = vld [vmem:[%s10249_s1 + $0x8e4] ss:$16 sps:$4 sm:$0xff]  }
  0xe0   :  { %4879 = vmatprep.subr.bf16.mxu0 %v6982_v43  ;;  %5371 = vmatprep.subr.bf16.mxu1 %v6985_v44  ;;  %v7077_v43 = vld [vmem:[%s10249_s1 + $0x8ec] ss:$16 sps:$4 sm:$0xff]   ;;  %v7072_v44 = vld [vmem:[%s10249_s1 + $0x8e0] ss:$16 sps:$4 sm:$0xff]  }
  0xe3   :  { %4880 = vmatpush1.bf16.msra.mxu0 %v6980_v45  ;;  %5372 = vmatpush1.bf16.msra.mxu1 %v6983_v46  ;;  %v7075_v45 = vld [vmem:[%s10249_s1 + $0x8e8] ss:$16 sps:$4 sm:$0xff]   ;;  %v7080_v46 = vld [vmem:[%s10249_s1 + $0x904] ss:$16 sps:$4 sm:$0xff]  }
  0xe4   :  { %4881 = vmatprep.subr.bf16.mxu0 %v6988_v47  ;;  %5373 = vmatprep.subr.bf16.mxu1 %v6991_v48  ;;  %v7083_v47 = vld [vmem:[%s10249_s1 + $0x90c] ss:$16 sps:$4 sm:$0xff]   ;;  %v7078_v48 = vld [vmem:[%s10249_s1 + $0x900] ss:$16 sps:$4 sm:$0xff]  }
  0xe7   :  { %4882 = vmatpush1.bf16.msra.mxu0 %v6986_v49  ;;  %5374 = vmatpush1.bf16.msra.mxu1 %v6989_v50  ;;  %v7081_v49 = vld [vmem:[%s10249_s1 + $0x908] ss:$16 sps:$4 sm:$0xff]   ;;  %v7086_v50 = vld [vmem:[%s10249_s1 + $0x924] ss:$16 sps:$4 sm:$0xff]  }
  0xe8   :  { %4883 = vmatprep.subr.bf16.mxu0 %v6994_v51  ;;  %5375 = vmatprep.subr.bf16.mxu1 %v6997_v52  ;;  %v7089_v51 = vld [vmem:[%s10249_s1 + $0x92c] ss:$16 sps:$4 sm:$0xff]   ;;  %v7084_v52 = vld [vmem:[%s10249_s1 + $0x920] ss:$16 sps:$4 sm:$0xff]  }
  0xeb   :  { %4884 = vmatpush1.bf16.msra.mxu0 %v6992_v53  ;;  %5376 = vmatpush1.bf16.msra.mxu1 %v6995_v54  ;;  %v7087_v53 = vld [vmem:[%s10249_s1 + $0x928] ss:$16 sps:$4 sm:$0xff]   ;;  %v7092_v54 = vld [vmem:[%s10249_s1 + $0x944] ss:$16 sps:$4 sm:$0xff]  }
  0xec   :  { %4885 = vmatprep.subr.bf16.mxu0 %v7000_v55  ;;  %5377 = vmatprep.subr.bf16.mxu1 %v7003_v56  ;;  %v7095_v55 = vld [vmem:[%s10249_s1 + $0x94c] ss:$16 sps:$4 sm:$0xff]   ;;  %v7090_v56 = vld [vmem:[%s10249_s1 + $0x940] ss:$16 sps:$4 sm:$0xff]  }
  0xef   :  { %4886 = vmatpush1.bf16.msra.mxu0 %v6998_v57  ;;  %5378 = vmatpush1.bf16.msra.mxu1 %v7001_v58  ;;  %v7093_v57 = vld [vmem:[%s10249_s1 + $0x948] ss:$16 sps:$4 sm:$0xff]   ;;  %v7098_v58 = vld [vmem:[%s10249_s1 + $0x964] ss:$16 sps:$4 sm:$0xff]  }
  0xf0   :  { %4887 = vmatprep.subr.bf16.mxu0 %v7006_v59  ;;  %5379 = vmatprep.subr.bf16.mxu1 %v7009_v60  ;;  %v7101_v59 = vld [vmem:[%s10249_s1 + $0x96c] ss:$16 sps:$4 sm:$0xff]   ;;  %v7096_v60 = vld [vmem:[%s10249_s1 + $0x960] ss:$16 sps:$4 sm:$0xff]  }
  0xf3   :  { %4888 = vmatpush1.bf16.msra.mxu0 %v7004_v61  ;;  %5380 = vmatpush1.bf16.msra.mxu1 %v7007_v62  ;;  %v7099_v61 = vld [vmem:[%s10249_s1 + $0x968] ss:$16 sps:$4 sm:$0xff]   ;;  %v7104_v62 = vld [vmem:[%s10249_s1 + $0x984] ss:$16 sps:$4 sm:$0xff]  }
  0xf4   :  { %4889 = vmatprep.subr.bf16.mxu0 %v7012_v63  ;;  %5381 = vmatprep.subr.bf16.mxu1 %v7015_v0  ;;  %v7107_v63 = vld [vmem:[%s10249_s1 + $0x98c] ss:$16 sps:$4 sm:$0xff]   ;;  %v7102_v0 = vld [vmem:[%s10249_s1 + $0x980] ss:$16 sps:$4 sm:$0xff]  }
  0xf7   :  { %4890 = vmatpush1.bf16.msra.mxu0 %v7010_v1  ;;  %5382 = vmatpush1.bf16.msra.mxu1 %v7013_v2  ;;  %v7105_v1 = vld [vmem:[%s10249_s1 + $0x988] ss:$16 sps:$4 sm:$0xff]   ;;  %v7110_v2 = vld [vmem:[%s10249_s1 + $0x9a4] ss:$16 sps:$4 sm:$0xff]  }
  0xf8   :  { %4891 = vmatprep.subr.bf16.mxu0 %v7018_v3  ;;  %5383 = vmatprep.subr.bf16.mxu1 %v7021_v4  ;;  %v7113_v3 = vld [vmem:[%s10249_s1 + $0x9ac] ss:$16 sps:$4 sm:$0xff]   ;;  %v7108_v4 = vld [vmem:[%s10249_s1 + $0x9a0] ss:$16 sps:$4 sm:$0xff]  }
  0xfb   :  { %4892 = vmatpush1.bf16.msra.mxu0 %v7016_v5  ;;  %5384 = vmatpush1.bf16.msra.mxu1 %v7019_v6  ;;  %v7111_v5 = vld [vmem:[%s10249_s1 + $0x9a8] ss:$16 sps:$4 sm:$0xff]   ;;  %v7116_v6 = vld [vmem:[%s10249_s1 + $0x9c4] ss:$16 sps:$4 sm:$0xff]  }
  0xfc   :  { %4893 = vmatprep.subr.bf16.mxu0 %v7024_v7  ;;  %5385 = vmatprep.subr.bf16.mxu1 %v7027_v8  ;;  %v7119_v7 = vld [vmem:[%s10249_s1 + $0x9cc] ss:$16 sps:$4 sm:$0xff]   ;;  %v7114_v8 = vld [vmem:[%s10249_s1 + $0x9c0] ss:$16 sps:$4 sm:$0xff]  }
  0xff   :  { %4894 = vmatpush1.bf16.msra.mxu0 %v7022_v9  ;;  %5386 = vmatpush1.bf16.msra.mxu1 %v7025_v10  ;;  %v7117_v9 = vld [vmem:[%s10249_s1 + $0x9c8] ss:$16 sps:$4 sm:$0xff]   ;;  %v7122_v10 = vld [vmem:[%s10249_s1 + $0x9e4] ss:$16 sps:$4 sm:$0xff]  }
 0x100   :  { %4904 = vmatprep.subr.bf16.mxu0 %v7032_v12  ;;  %5396 = vmatprep.subr.bf16.mxu1 %v7035_v13  ;;  %v7125_v12 = vld [vmem:[%s10249_s1 + $0x9ec] ss:$16 sps:$4 sm:$0xff]   ;;  %v7120_v13 = vld [vmem:[%s10249_s1 + $0x9e0] ss:$16 sps:$4 sm:$0xff]  }
 0x102   :  { %4896 = vmatmul.mubr.bf16.vlgmr.msra.gmra.mrb[0].mxu0 %v5756_v11  ;;  %5388 = vmatmul.mubr.bf16.vlgmr.msra.gmra.mrb[0].mxu1 %v5756_v11  ;;  %v7130_v11 = vld [vmem:[%s10249_s1 + $0xa04] ss:$16 sps:$4 sm:$0xff]  }
 0x103   :  { %4905 = vmatpush1.bf16.msra.mxu0 %v7030_v15  ;;  %5397 = vmatpush1.bf16.msra.mxu1 %v7033_v17  ;;  %v7123_v15 = vld [vmem:[%s10249_s1 + $0x9e8] ss:$16 sps:$4 sm:$0xff]   ;;  %v7133_v17 = vld [vmem:[%s10249_s1 + $0xa0c] ss:$16 sps:$4 sm:$0xff]  }
 0x104   :  { %4906 = vmatprep.subr.bf16.mxu0 %v7038_v18  ;;  %5398 = vmatprep.subr.bf16.mxu1 %v7041_v14  ;;  %v8840_v18 = vld [vmem:[%s10250_s0 + $0x28] sm:$0xff]  ;;  %v5758_v14 = vcombine.low %v8644_v16, %v8644_v16 }
 0x105   :  { %4936 = vmatprep.mubr.bf16.mxu0 %v5759_v19  ;;  %5428 = vmatprep.mubr.bf16.mxu1 %v5759_v19  ;;  %v7128_v19 = vld [vmem:[%s10249_s1 + $0xa00] ss:$16 sps:$4 sm:$0xff]   ;;  %v7139_v16 = vld [vmem:[%s10249_s1 + $0xa2c] ss:$16 sps:$4 sm:$0xff]  }
 0x107   :  { %4907 = vmatpush1.bf16.msra.mxu0 %v7036_v20  ;;  %5399 = vmatpush1.bf16.msra.mxu1 %v7039_v21  ;;  %v7131_v20 = vld [vmem:[%s10249_s1 + $0xa08] ss:$16 sps:$4 sm:$0xff]   ;;  %v7136_v21 = vld [vmem:[%s10249_s1 + $0xa24] ss:$16 sps:$4 sm:$0xff]  }
 0x108   :  { %4908 = vmatprep.subr.bf16.mxu0 %v7044_v22  ;;  %5400 = vmatprep.subr.bf16.mxu1 %v7047_v23  ;;  %v5761_v22 = vcombine.high %v8840_v18, %v8840_v18  ;;  %v7134_v23 = vld [vmem:[%s10249_s1 + $0xa20] ss:$16 sps:$4 sm:$0xff]  }
 0x10b   :  { %4909 = vmatpush1.bf16.msra.mxu0 %v7042_v24  ;;  %5401 = vmatpush1.bf16.msra.mxu1 %v7045_v25  ;;  %v7137_v24 = vld [vmem:[%s10249_s1 + $0xa28] ss:$16 sps:$4 sm:$0xff]   ;;  %v7142_v25 = vld [vmem:[%s10249_s1 + $0xa44] ss:$16 sps:$4 sm:$0xff]  }
 0x10c   :  { %4910 = vmatprep.subr.bf16.mxu0 %v7050_v26  ;;  %5402 = vmatprep.subr.bf16.mxu1 %v7053_v27  ;;  %v7145_v26 = vld [vmem:[%s10249_s1 + $0xa4c] ss:$16 sps:$4 sm:$0xff]   ;;  %v7140_v27 = vld [vmem:[%s10249_s1 + $0xa40] ss:$16 sps:$4 sm:$0xff]  }
 0x10f   :  { %4911 = vmatpush1.bf16.msra.mxu0 %v7048_v28  ;;  %5403 = vmatpush1.bf16.msra.mxu1 %v7051_v29  ;;  %v7143_v28 = vld [vmem:[%s10249_s1 + $0xa48] ss:$16 sps:$4 sm:$0xff]   ;;  %v7148_v29 = vld [vmem:[%s10249_s1 + $0xa64] ss:$16 sps:$4 sm:$0xff]  }
 0x110   :  { %4912 = vmatprep.subr.bf16.mxu0 %v7056_v30  ;;  %5404 = vmatprep.subr.bf16.mxu1 %v7059_v31  ;;  %v7151_v30 = vld [vmem:[%s10249_s1 + $0xa6c] ss:$16 sps:$4 sm:$0xff]   ;;  %v7146_v31 = vld [vmem:[%s10249_s1 + $0xa60] ss:$16 sps:$4 sm:$0xff]  }
 0x113   :  { %4913 = vmatpush1.bf16.msra.mxu0 %v7054_v32  ;;  %5405 = vmatpush1.bf16.msra.mxu1 %v7057_v33  ;;  %v7149_v32 = vld [vmem:[%s10249_s1 + $0xa68] ss:$16 sps:$4 sm:$0xff]   ;;  %v7154_v33 = vld [vmem:[%s10249_s1 + $0xa84] ss:$16 sps:$4 sm:$0xff]  }
 0x114   :  { %4914 = vmatprep.subr.bf16.mxu0 %v7062_v34  ;;  %5406 = vmatprep.subr.bf16.mxu1 %v7065_v35  ;;  %v7157_v34 = vld [vmem:[%s10249_s1 + $0xa8c] ss:$16 sps:$4 sm:$0xff]   ;;  %v7152_v35 = vld [vmem:[%s10249_s1 + $0xa80] ss:$16 sps:$4 sm:$0xff]  }
 0x117   :  { %4915 = vmatpush1.bf16.msra.mxu0 %v7060_v36  ;;  %5407 = vmatpush1.bf16.msra.mxu1 %v7063_v37  ;;  %v7155_v36 = vld [vmem:[%s10249_s1 + $0xa88] ss:$16 sps:$4 sm:$0xff]   ;;  %v7160_v37 = vld [vmem:[%s10249_s1 + $0xaa4] ss:$16 sps:$4 sm:$0xff]  }
 0x118   :  { %4916 = vmatprep.subr.bf16.mxu0 %v7068_v38  ;;  %5408 = vmatprep.subr.bf16.mxu1 %v7071_v39  ;;  %v7163_v38 = vld [vmem:[%s10249_s1 + $0xaac] ss:$16 sps:$4 sm:$0xff]   ;;  %v7158_v39 = vld [vmem:[%s10249_s1 + $0xaa0] ss:$16 sps:$4 sm:$0xff]  }
 0x11b   :  { %4917 = vmatpush1.bf16.msra.mxu0 %v7066_v40  ;;  %5409 = vmatpush1.bf16.msra.mxu1 %v7069_v41  ;;  %v7161_v40 = vld [vmem:[%s10249_s1 + $0xaa8] ss:$16 sps:$4 sm:$0xff]   ;;  %v7166_v41 = vld [vmem:[%s10249_s1 + $0xac4] ss:$16 sps:$4 sm:$0xff]  }
 0x11c   :  { %4918 = vmatprep.subr.bf16.mxu0 %v7074_v42  ;;  %5410 = vmatprep.subr.bf16.mxu1 %v7077_v43  ;;  %v7169_v42 = vld [vmem:[%s10249_s1 + $0xacc] ss:$16 sps:$4 sm:$0xff]   ;;  %v7164_v43 = vld [vmem:[%s10249_s1 + $0xac0] ss:$16 sps:$4 sm:$0xff]  }
 0x11f   :  { %4919 = vmatpush1.bf16.msra.mxu0 %v7072_v44  ;;  %5411 = vmatpush1.bf16.msra.mxu1 %v7075_v45  ;;  %v7167_v44 = vld [vmem:[%s10249_s1 + $0xac8] ss:$16 sps:$4 sm:$0xff]   ;;  %v7172_v45 = vld [vmem:[%s10249_s1 + $0xae4] ss:$16 sps:$4 sm:$0xff]  }
 0x120   :  { %4920 = vmatprep.subr.bf16.mxu0 %v7080_v46  ;;  %5412 = vmatprep.subr.bf16.mxu1 %v7083_v47  ;;  %v7175_v46 = vld [vmem:[%s10249_s1 + $0xaec] ss:$16 sps:$4 sm:$0xff]   ;;  %v7170_v47 = vld [vmem:[%s10249_s1 + $0xae0] ss:$16 sps:$4 sm:$0xff]  }
 0x123   :  { %4921 = vmatpush1.bf16.msra.mxu0 %v7078_v48  ;;  %5413 = vmatpush1.bf16.msra.mxu1 %v7081_v49  ;;  %v7173_v48 = vld [vmem:[%s10249_s1 + $0xae8] ss:$16 sps:$4 sm:$0xff]   ;;  %v7178_v49 = vld [vmem:[%s10249_s1 + $0xb04] ss:$16 sps:$4 sm:$0xff]  }
 0x124   :  { %4922 = vmatprep.subr.bf16.mxu0 %v7086_v50  ;;  %5414 = vmatprep.subr.bf16.mxu1 %v7089_v51  ;;  %v7181_v50 = vld [vmem:[%s10249_s1 + $0xb0c] ss:$16 sps:$4 sm:$0xff]   ;;  %v7176_v51 = vld [vmem:[%s10249_s1 + $0xb00] ss:$16 sps:$4 sm:$0xff]  }
 0x127   :  { %4923 = vmatpush1.bf16.msra.mxu0 %v7084_v52  ;;  %5415 = vmatpush1.bf16.msra.mxu1 %v7087_v53  ;;  %v7179_v52 = vld [vmem:[%s10249_s1 + $0xb08] ss:$16 sps:$4 sm:$0xff]   ;;  %v7184_v53 = vld [vmem:[%s10249_s1 + $0xb24] ss:$16 sps:$4 sm:$0xff]  }
 0x128   :  { %4924 = vmatprep.subr.bf16.mxu0 %v7092_v54  ;;  %5416 = vmatprep.subr.bf16.mxu1 %v7095_v55  ;;  %v7187_v54 = vld [vmem:[%s10249_s1 + $0xb2c] ss:$16 sps:$4 sm:$0xff]   ;;  %v7182_v55 = vld [vmem:[%s10249_s1 + $0xb20] ss:$16 sps:$4 sm:$0xff]  }
 0x12b   :  { %4925 = vmatpush1.bf16.msra.mxu0 %v7090_v56  ;;  %5417 = vmatpush1.bf16.msra.mxu1 %v7093_v57  ;;  %v7185_v56 = vld [vmem:[%s10249_s1 + $0xb28] ss:$16 sps:$4 sm:$0xff]   ;;  %v7190_v57 = vld [vmem:[%s10249_s1 + $0xb44] ss:$16 sps:$4 sm:$0xff]  }
 0x12c   :  { %4926 = vmatprep.subr.bf16.mxu0 %v7098_v58  ;;  %5418 = vmatprep.subr.bf16.mxu1 %v7101_v59  ;;  %v7193_v58 = vld [vmem:[%s10249_s1 + $0xb4c] ss:$16 sps:$4 sm:$0xff]   ;;  %v7188_v59 = vld [vmem:[%s10249_s1 + $0xb40] ss:$16 sps:$4 sm:$0xff]  }
 0x12f   :  { %4927 = vmatpush1.bf16.msra.mxu0 %v7096_v60  ;;  %5419 = vmatpush1.bf16.msra.mxu1 %v7099_v61  ;;  %v7191_v60 = vld [vmem:[%s10249_s1 + $0xb48] ss:$16 sps:$4 sm:$0xff]   ;;  %v7196_v61 = vld [vmem:[%s10249_s1 + $0xb64] ss:$16 sps:$4 sm:$0xff]  }
 0x130   :  { %4928 = vmatprep.subr.bf16.mxu0 %v7104_v62  ;;  %5420 = vmatprep.subr.bf16.mxu1 %v7107_v63  ;;  %v7199_v62 = vld [vmem:[%s10249_s1 + $0xb6c] ss:$16 sps:$4 sm:$0xff]   ;;  %v7194_v63 = vld [vmem:[%s10249_s1 + $0xb60] ss:$16 sps:$4 sm:$0xff]  }
 0x133   :  { %4929 = vmatpush1.bf16.msra.mxu0 %v7102_v0  ;;  %5421 = vmatpush1.bf16.msra.mxu1 %v7105_v1  ;;  %v7197_v0 = vld [vmem:[%s10249_s1 + $0xb68] ss:$16 sps:$4 sm:$0xff]   ;;  %v7202_v1 = vld [vmem:[%s10249_s1 + $0xb84] ss:$16 sps:$4 sm:$0xff]  }
 0x134   :  { %4930 = vmatprep.subr.bf16.mxu0 %v7110_v2  ;;  %5422 = vmatprep.subr.bf16.mxu1 %v7113_v3  ;;  %v7205_v2 = vld [vmem:[%s10249_s1 + $0xb8c] ss:$16 sps:$4 sm:$0xff]   ;;  %v7200_v3 = vld [vmem:[%s10249_s1 + $0xb80] ss:$16 sps:$4 sm:$0xff]  }
 0x137   :  { %4931 = vmatpush1.bf16.msra.mxu0 %v7108_v4  ;;  %5423 = vmatpush1.bf16.msra.mxu1 %v7111_v5  ;;  %v7203_v4 = vld [vmem:[%s10249_s1 + $0xb88] ss:$16 sps:$4 sm:$0xff]   ;;  %v7208_v5 = vld [vmem:[%s10249_s1 + $0xba4] ss:$16 sps:$4 sm:$0xff]  }
 0x138   :  { %4932 = vmatprep.subr.bf16.mxu0 %v7116_v6  ;;  %5424 = vmatprep.subr.bf16.mxu1 %v7119_v7  ;;  %v7211_v6 = vld [vmem:[%s10249_s1 + $0xbac] ss:$16 sps:$4 sm:$0xff]   ;;  %v7206_v7 = vld [vmem:[%s10249_s1 + $0xba0] ss:$16 sps:$4 sm:$0xff]  }
 0x13b   :  { %4933 = vmatpush1.bf16.msra.mxu0 %v7114_v8  ;;  %5425 = vmatpush1.bf16.msra.mxu1 %v7117_v9  ;;  %v7209_v8 = vld [vmem:[%s10249_s1 + $0xba8] ss:$16 sps:$4 sm:$0xff]   ;;  %v7214_v9 = vld [vmem:[%s10249_s1 + $0xbc4] ss:$16 sps:$4 sm:$0xff]  }
 0x13c   :  { %4934 = vmatprep.subr.bf16.mxu0 %v7122_v10  ;;  %5426 = vmatprep.subr.bf16.mxu1 %v7125_v12  ;;  %v7217_v10 = vld [vmem:[%s10249_s1 + $0xbcc] ss:$16 sps:$4 sm:$0xff]   ;;  %v7212_v12 = vld [vmem:[%s10249_s1 + $0xbc0] ss:$16 sps:$4 sm:$0xff]  }
 0x13f   :  { %4935 = vmatpush1.bf16.msra.mxu0 %v7120_v13  ;;  %5427 = vmatpush1.bf16.msra.mxu1 %v7123_v15  ;;  %v7215_v13 = vld [vmem:[%s10249_s1 + $0xbc8] ss:$16 sps:$4 sm:$0xff]   ;;  %v7220_v15 = vld [vmem:[%s10249_s1 + $0xbe4] ss:$16 sps:$4 sm:$0xff]  }
 0x140   :  { %4945 = vmatprep.subr.bf16.mxu0 %v7130_v11  ;;  %5437 = vmatprep.subr.bf16.mxu1 %v7133_v17  ;;  %v7223_v11 = vld [vmem:[%s10249_s1 + $0xbec] ss:$16 sps:$4 sm:$0xff]   ;;  %v7218_v17 = vld [vmem:[%s10249_s1 + $0xbe0] ss:$16 sps:$4 sm:$0xff]  }
 0x142   :  { %4937 = vmatmul.mubr.bf16.vlgmr.msra.gmra.mrb[0].mxu0 %v5758_v14  ;;  %5429 = vmatmul.mubr.bf16.vlgmr.msra.gmra.mrb[0].mxu1 %v5758_v14  ;;  %v7221_v14 = vld [vmem:[%s10249_s1 + $0xbe8] ss:$16 sps:$4 sm:$0xff]  }
 0x143   :  { %4946 = vmatpush1.bf16.msra.mxu0 %v7128_v19  ;;  %5438 = vmatpush1.bf16.msra.mxu1 %v7131_v20  ;;  %v7228_v19 = vld [vmem:[%s10249_s1 + $0xc04] ss:$16 sps:$4 sm:$0xff]   ;;  %v7231_v20 = vld [vmem:[%s10249_s1 + $0xc0c] ss:$16 sps:$4 sm:$0xff]  }
 0x144   :  { %4947 = vmatprep.subr.bf16.mxu0 %v7136_v21  ;;  %5439 = vmatprep.subr.bf16.mxu1 %v7139_v16  ;;  %v9041_v21 = vld [vmem:[%s10250_s0 + $0x30] sm:$0xff]  ;;  %v5760_v16 = vcombine.low %v8840_v18, %v8840_v18  ;;  %v7237_v18 = vld [vmem:[%s10249_s1 + $0xc2c] ss:$16 sps:$4 sm:$0xff]  }
 0x145   :  { %4977 = vmatprep.mubr.bf16.mxu0 %v5761_v22  ;;  %5469 = vmatprep.mubr.bf16.mxu1 %v5761_v22  ;;  %v7226_v22 = vld [vmem:[%s10249_s1 + $0xc00] ss:$16 sps:$4 sm:$0xff]  }
 0x147   :  { %4948 = vmatpush1.bf16.msra.mxu0 %v7134_v23  ;;  %5440 = vmatpush1.bf16.msra.mxu1 %v7137_v24  ;;  %v7229_v23 = vld [vmem:[%s10249_s1 + $0xc08] ss:$16 sps:$4 sm:$0xff]   ;;  %v7234_v24 = vld [vmem:[%s10249_s1 + $0xc24] ss:$16 sps:$4 sm:$0xff]  }
 0x148   :  { %4949 = vmatprep.subr.bf16.mxu0 %v7142_v25  ;;  %5441 = vmatprep.subr.bf16.mxu1 %v7145_v26  ;;  %v5763_v25 = vcombine.high %v9041_v21, %v9041_v21  ;;  %v7232_v26 = vld [vmem:[%s10249_s1 + $0xc20] ss:$16 sps:$4 sm:$0xff]  }
 0x14b   :  { %4950 = vmatpush1.bf16.msra.mxu0 %v7140_v27  ;;  %5442 = vmatpush1.bf16.msra.mxu1 %v7143_v28  ;;  %v7235_v27 = vld [vmem:[%s10249_s1 + $0xc28] ss:$16 sps:$4 sm:$0xff]   ;;  %v7240_v28 = vld [vmem:[%s10249_s1 + $0xc44] ss:$16 sps:$4 sm:$0xff]  }
 0x14c   :  { %4951 = vmatprep.subr.bf16.mxu0 %v7148_v29  ;;  %5443 = vmatprep.subr.bf16.mxu1 %v7151_v30  ;;  %v7243_v29 = vld [vmem:[%s10249_s1 + $0xc4c] ss:$16 sps:$4 sm:$0xff]   ;;  %v7238_v30 = vld [vmem:[%s10249_s1 + $0xc40] ss:$16 sps:$4 sm:$0xff]  }
 0x14f   :  { %4952 = vmatpush1.bf16.msra.mxu0 %v7146_v31  ;;  %5444 = vmatpush1.bf16.msra.mxu1 %v7149_v32  ;;  %v7241_v31 = vld [vmem:[%s10249_s1 + $0xc48] ss:$16 sps:$4 sm:$0xff]   ;;  %v7246_v32 = vld [vmem:[%s10249_s1 + $0xc64] ss:$16 sps:$4 sm:$0xff]  }
 0x150   :  { %4953 = vmatprep.subr.bf16.mxu0 %v7154_v33  ;;  %5445 = vmatprep.subr.bf16.mxu1 %v7157_v34  ;;  %v7249_v33 = vld [vmem:[%s10249_s1 + $0xc6c] ss:$16 sps:$4 sm:$0xff]   ;;  %v7244_v34 = vld [vmem:[%s10249_s1 + $0xc60] ss:$16 sps:$4 sm:$0xff]  }
 0x153   :  { %4954 = vmatpush1.bf16.msra.mxu0 %v7152_v35  ;;  %5446 = vmatpush1.bf16.msra.mxu1 %v7155_v36  ;;  %v7247_v35 = vld [vmem:[%s10249_s1 + $0xc68] ss:$16 sps:$4 sm:$0xff]   ;;  %v7252_v36 = vld [vmem:[%s10249_s1 + $0xc84] ss:$16 sps:$4 sm:$0xff]  }
 0x154   :  { %4955 = vmatprep.subr.bf16.mxu0 %v7160_v37  ;;  %5447 = vmatprep.subr.bf16.mxu1 %v7163_v38  ;;  %v7255_v37 = vld [vmem:[%s10249_s1 + $0xc8c] ss:$16 sps:$4 sm:$0xff]   ;;  %v7250_v38 = vld [vmem:[%s10249_s1 + $0xc80] ss:$16 sps:$4 sm:$0xff]  }
 0x157   :  { %4956 = vmatpush1.bf16.msra.mxu0 %v7158_v39  ;;  %5448 = vmatpush1.bf16.msra.mxu1 %v7161_v40  ;;  %v7253_v39 = vld [vmem:[%s10249_s1 + $0xc88] ss:$16 sps:$4 sm:$0xff]   ;;  %v7258_v40 = vld [vmem:[%s10249_s1 + $0xca4] ss:$16 sps:$4 sm:$0xff]  }
 0x158   :  { %4957 = vmatprep.subr.bf16.mxu0 %v7166_v41  ;;  %5449 = vmatprep.subr.bf16.mxu1 %v7169_v42  ;;  %v7261_v41 = vld [vmem:[%s10249_s1 + $0xcac] ss:$16 sps:$4 sm:$0xff]   ;;  %v7256_v42 = vld [vmem:[%s10249_s1 + $0xca0] ss:$16 sps:$4 sm:$0xff]  }
 0x15b   :  { %4958 = vmatpush1.bf16.msra.mxu0 %v7164_v43  ;;  %5450 = vmatpush1.bf16.msra.mxu1 %v7167_v44  ;;  %v7259_v43 = vld [vmem:[%s10249_s1 + $0xca8] ss:$16 sps:$4 sm:$0xff]   ;;  %v7264_v44 = vld [vmem:[%s10249_s1 + $0xcc4] ss:$16 sps:$4 sm:$0xff]  }
 0x15c   :  { %4959 = vmatprep.subr.bf16.mxu0 %v7172_v45  ;;  %5451 = vmatprep.subr.bf16.mxu1 %v7175_v46  ;;  %v7267_v45 = vld [vmem:[%s10249_s1 + $0xccc] ss:$16 sps:$4 sm:$0xff]   ;;  %v7262_v46 = vld [vmem:[%s10249_s1 + $0xcc0] ss:$16 sps:$4 sm:$0xff]  }
 0x15f   :  { %4960 = vmatpush1.bf16.msra.mxu0 %v7170_v47  ;;  %5452 = vmatpush1.bf16.msra.mxu1 %v7173_v48  ;;  %v7265_v47 = vld [vmem:[%s10249_s1 + $0xcc8] ss:$16 sps:$4 sm:$0xff]   ;;  %v7270_v48 = vld [vmem:[%s10249_s1 + $0xce4] ss:$16 sps:$4 sm:$0xff]  }
 0x160   :  { %4961 = vmatprep.subr.bf16.mxu0 %v7178_v49  ;;  %5453 = vmatprep.subr.bf16.mxu1 %v7181_v50  ;;  %v7273_v49 = vld [vmem:[%s10249_s1 + $0xcec] ss:$16 sps:$4 sm:$0xff]   ;;  %v7268_v50 = vld [vmem:[%s10249_s1 + $0xce0] ss:$16 sps:$4 sm:$0xff]  }
 0x163   :  { %4962 = vmatpush1.bf16.msra.mxu0 %v7176_v51  ;;  %5454 = vmatpush1.bf16.msra.mxu1 %v7179_v52  ;;  %v7271_v51 = vld [vmem:[%s10249_s1 + $0xce8] ss:$16 sps:$4 sm:$0xff]   ;;  %v7276_v52 = vld [vmem:[%s10249_s1 + $0xd04] ss:$16 sps:$4 sm:$0xff]  }
 0x164   :  { %4963 = vmatprep.subr.bf16.mxu0 %v7184_v53  ;;  %5455 = vmatprep.subr.bf16.mxu1 %v7187_v54  ;;  %v7279_v53 = vld [vmem:[%s10249_s1 + $0xd0c] ss:$16 sps:$4 sm:$0xff]   ;;  %v7274_v54 = vld [vmem:[%s10249_s1 + $0xd00] ss:$16 sps:$4 sm:$0xff]  }
 0x167   :  { %4964 = vmatpush1.bf16.msra.mxu0 %v7182_v55  ;;  %5456 = vmatpush1.bf16.msra.mxu1 %v7185_v56  ;;  %v7277_v55 = vld [vmem:[%s10249_s1 + $0xd08] ss:$16 sps:$4 sm:$0xff]   ;;  %v7282_v56 = vld [vmem:[%s10249_s1 + $0xd24] ss:$16 sps:$4 sm:$0xff]  }
 0x168   :  { %4965 = vmatprep.subr.bf16.mxu0 %v7190_v57  ;;  %5457 = vmatprep.subr.bf16.mxu1 %v7193_v58  ;;  %v7285_v57 = vld [vmem:[%s10249_s1 + $0xd2c] ss:$16 sps:$4 sm:$0xff]   ;;  %v7280_v58 = vld [vmem:[%s10249_s1 + $0xd20] ss:$16 sps:$4 sm:$0xff]  }
 0x16b   :  { %4966 = vmatpush1.bf16.msra.mxu0 %v7188_v59  ;;  %5458 = vmatpush1.bf16.msra.mxu1 %v7191_v60  ;;  %v7283_v59 = vld [vmem:[%s10249_s1 + $0xd28] ss:$16 sps:$4 sm:$0xff]   ;;  %v7288_v60 = vld [vmem:[%s10249_s1 + $0xd44] ss:$16 sps:$4 sm:$0xff]  }
 0x16c   :  { %4967 = vmatprep.subr.bf16.mxu0 %v7196_v61  ;;  %5459 = vmatprep.subr.bf16.mxu1 %v7199_v62  ;;  %v7291_v61 = vld [vmem:[%s10249_s1 + $0xd4c] ss:$16 sps:$4 sm:$0xff]   ;;  %v7286_v62 = vld [vmem:[%s10249_s1 + $0xd40] ss:$16 sps:$4 sm:$0xff]  }
 0x16f   :  { %4968 = vmatpush1.bf16.msra.mxu0 %v7194_v63  ;;  %5460 = vmatpush1.bf16.msra.mxu1 %v7197_v0  ;;  %v7289_v63 = vld [vmem:[%s10249_s1 + $0xd48] ss:$16 sps:$4 sm:$0xff]   ;;  %v7294_v0 = vld [vmem:[%s10249_s1 + $0xd64] ss:$16 sps:$4 sm:$0xff]  }
 0x170   :  { %4969 = vmatprep.subr.bf16.mxu0 %v7202_v1  ;;  %5461 = vmatprep.subr.bf16.mxu1 %v7205_v2  ;;  %v7297_v1 = vld [vmem:[%s10249_s1 + $0xd6c] ss:$16 sps:$4 sm:$0xff]   ;;  %v7292_v2 = vld [vmem:[%s10249_s1 + $0xd60] ss:$16 sps:$4 sm:$0xff]  }
 0x173   :  { %4970 = vmatpush1.bf16.msra.mxu0 %v7200_v3  ;;  %5462 = vmatpush1.bf16.msra.mxu1 %v7203_v4  ;;  %v7295_v3 = vld [vmem:[%s10249_s1 + $0xd68] ss:$16 sps:$4 sm:$0xff]   ;;  %v7300_v4 = vld [vmem:[%s10249_s1 + $0xd84] ss:$16 sps:$4 sm:$0xff]  }
 0x174   :  { %4971 = vmatprep.subr.bf16.mxu0 %v7208_v5  ;;  %5463 = vmatprep.subr.bf16.mxu1 %v7211_v6  ;;  %v7303_v5 = vld [vmem:[%s10249_s1 + $0xd8c] ss:$16 sps:$4 sm:$0xff]   ;;  %v7298_v6 = vld [vmem:[%s10249_s1 + $0xd80] ss:$16 sps:$4 sm:$0xff]  }
 0x177   :  { %4972 = vmatpush1.bf16.msra.mxu0 %v7206_v7  ;;  %5464 = vmatpush1.bf16.msra.mxu1 %v7209_v8  ;;  %v7301_v7 = vld [vmem:[%s10249_s1 + $0xd88] ss:$16 sps:$4 sm:$0xff]   ;;  %v7306_v8 = vld [vmem:[%s10249_s1 + $0xda4] ss:$16 sps:$4 sm:$0xff]  }
 0x178   :  { %4973 = vmatprep.subr.bf16.mxu0 %v7214_v9  ;;  %5465 = vmatprep.subr.bf16.mxu1 %v7217_v10  ;;  %v7309_v9 = vld [vmem:[%s10249_s1 + $0xdac] ss:$16 sps:$4 sm:$0xff]   ;;  %v7304_v10 = vld [vmem:[%s10249_s1 + $0xda0] ss:$16 sps:$4 sm:$0xff]  }
 0x17b   :  { %4974 = vmatpush1.bf16.msra.mxu0 %v7212_v12  ;;  %5466 = vmatpush1.bf16.msra.mxu1 %v7215_v13  ;;  %v7307_v12 = vld [vmem:[%s10249_s1 + $0xda8] ss:$16 sps:$4 sm:$0xff]   ;;  %v7312_v13 = vld [vmem:[%s10249_s1 + $0xdc4] ss:$16 sps:$4 sm:$0xff]  }
 0x17c   :  { %4975 = vmatprep.subr.bf16.mxu0 %v7220_v15  ;;  %5467 = vmatprep.subr.bf16.mxu1 %v7223_v11  ;;  %v7315_v15 = vld [vmem:[%s10249_s1 + $0xdcc] ss:$16 sps:$4 sm:$0xff]   ;;  %v7310_v11 = vld [vmem:[%s10249_s1 + $0xdc0] ss:$16 sps:$4 sm:$0xff]  }
 0x17f   :  { %4976 = vmatpush1.bf16.msra.mxu0 %v7218_v17  ;;  %5468 = vmatpush1.bf16.msra.mxu1 %v7221_v14  ;;  %v7313_v17 = vld [vmem:[%s10249_s1 + $0xdc8] ss:$16 sps:$4 sm:$0xff]   ;;  %v7318_v14 = vld [vmem:[%s10249_s1 + $0xde4] ss:$16 sps:$4 sm:$0xff]  }
 0x180   :  { %4986 = vmatprep.subr.bf16.mxu0 %v7228_v19  ;;  %5478 = vmatprep.subr.bf16.mxu1 %v7231_v20  ;;  %v7321_v19 = vld [vmem:[%s10249_s1 + $0xdec] ss:$16 sps:$4 sm:$0xff]   ;;  %v7316_v20 = vld [vmem:[%s10249_s1 + $0xde0] ss:$16 sps:$4 sm:$0xff]  }
 0x182   :  { %4978 = vmatmul.mubr.bf16.vlgmr.msra.gmra.mrb[0].mxu0 %v5760_v16  ;;  %5470 = vmatmul.mubr.bf16.vlgmr.msra.gmra.mrb[0].mxu1 %v5760_v16  ;;  %v7319_v16 = vld [vmem:[%s10249_s1 + $0xde8] ss:$16 sps:$4 sm:$0xff]  }
 0x183   :  { %4987 = vmatpush1.bf16.msra.mxu0 %v7226_v22  ;;  %5479 = vmatpush1.bf16.msra.mxu1 %v7229_v23  ;;  %v7326_v22 = vld [vmem:[%s10249_s1 + $0xe04] ss:$16 sps:$4 sm:$0xff]   ;;  %v7329_v23 = vld [vmem:[%s10249_s1 + $0xe0c] ss:$16 sps:$4 sm:$0xff]  }
 0x184   :  { %4988 = vmatprep.subr.bf16.mxu0 %v7234_v24  ;;  %5480 = vmatprep.subr.bf16.mxu1 %v7237_v18  ;;  %v9242_v24 = vld [vmem:[%s10250_s0 + $0x38] sm:$0xff]  ;;  %v5762_v18 = vcombine.low %v9041_v21, %v9041_v21 }
 0x185   :  { %5018 = vmatprep.mubr.bf16.mxu0 %v5763_v25  ;;  %5510 = vmatprep.mubr.bf16.mxu1 %v5763_v25  ;;  %v7324_v25 = vld [vmem:[%s10249_s1 + $0xe00] ss:$16 sps:$4 sm:$0xff]   ;;  %v7335_v21 = vld [vmem:[%s10249_s1 + $0xe2c] ss:$16 sps:$4 sm:$0xff]  }
 0x187   :  { %4989 = vmatpush1.bf16.msra.mxu0 %v7232_v26  ;;  %5481 = vmatpush1.bf16.msra.mxu1 %v7235_v27  ;;  %v7327_v26 = vld [vmem:[%s10249_s1 + $0xe08] ss:$16 sps:$4 sm:$0xff]   ;;  %v7332_v27 = vld [vmem:[%s10249_s1 + $0xe24] ss:$16 sps:$4 sm:$0xff]  }
 0x188   :  { %4990 = vmatprep.subr.bf16.mxu0 %v7240_v28  ;;  %5482 = vmatprep.subr.bf16.mxu1 %v7243_v29  ;;  %v5765_v28 = vcombine.high %v9242_v24, %v9242_v24  ;;  %v7330_v29 = vld [vmem:[%s10249_s1 + $0xe20] ss:$16 sps:$4 sm:$0xff]  }
 0x18b   :  { %4991 = vmatpush1.bf16.msra.mxu0 %v7238_v30  ;;  %5483 = vmatpush1.bf16.msra.mxu1 %v7241_v31  ;;  %v7333_v30 = vld [vmem:[%s10249_s1 + $0xe28] ss:$16 sps:$4 sm:$0xff]   ;;  %v7338_v31 = vld [vmem:[%s10249_s1 + $0xe44] ss:$16 sps:$4 sm:$0xff]  }
 0x18c   :  { %4992 = vmatprep.subr.bf16.mxu0 %v7246_v32  ;;  %5484 = vmatprep.subr.bf16.mxu1 %v7249_v33  ;;  %v7341_v32 = vld [vmem:[%s10249_s1 + $0xe4c] ss:$16 sps:$4 sm:$0xff]   ;;  %v7336_v33 = vld [vmem:[%s10249_s1 + $0xe40] ss:$16 sps:$4 sm:$0xff]  }
 0x18f   :  { %4993 = vmatpush1.bf16.msra.mxu0 %v7244_v34  ;;  %5485 = vmatpush1.bf16.msra.mxu1 %v7247_v35  ;;  %v7339_v34 = vld [vmem:[%s10249_s1 + $0xe48] ss:$16 sps:$4 sm:$0xff]   ;;  %v7344_v35 = vld [vmem:[%s10249_s1 + $0xe64] ss:$16 sps:$4 sm:$0xff]  }
 0x190   :  { %4994 = vmatprep.subr.bf16.mxu0 %v7252_v36  ;;  %5486 = vmatprep.subr.bf16.mxu1 %v7255_v37  ;;  %v7347_v36 = vld [vmem:[%s10249_s1 + $0xe6c] ss:$16 sps:$4 sm:$0xff]   ;;  %v7342_v37 = vld [vmem:[%s10249_s1 + $0xe60] ss:$16 sps:$4 sm:$0xff]  }
 0x193   :  { %4995 = vmatpush1.bf16.msra.mxu0 %v7250_v38  ;;  %5487 = vmatpush1.bf16.msra.mxu1 %v7253_v39  ;;  %v7345_v38 = vld [vmem:[%s10249_s1 + $0xe68] ss:$16 sps:$4 sm:$0xff]   ;;  %v7350_v39 = vld [vmem:[%s10249_s1 + $0xe84] ss:$16 sps:$4 sm:$0xff]  }
 0x194   :  { %4996 = vmatprep.subr.bf16.mxu0 %v7258_v40  ;;  %5488 = vmatprep.subr.bf16.mxu1 %v7261_v41  ;;  %v7353_v40 = vld [vmem:[%s10249_s1 + $0xe8c] ss:$16 sps:$4 sm:$0xff]   ;;  %v7348_v41 = vld [vmem:[%s10249_s1 + $0xe80] ss:$16 sps:$4 sm:$0xff]  }
 0x197   :  { %4997 = vmatpush1.bf16.msra.mxu0 %v7256_v42  ;;  %5489 = vmatpush1.bf16.msra.mxu1 %v7259_v43  ;;  %v7351_v42 = vld [vmem:[%s10249_s1 + $0xe88] ss:$16 sps:$4 sm:$0xff]   ;;  %v7356_v43 = vld [vmem:[%s10249_s1 + $0xea4] ss:$16 sps:$4 sm:$0xff]  }
 0x198   :  { %4998 = vmatprep.subr.bf16.mxu0 %v7264_v44  ;;  %5490 = vmatprep.subr.bf16.mxu1 %v7267_v45  ;;  %v7359_v44 = vld [vmem:[%s10249_s1 + $0xeac] ss:$16 sps:$4 sm:$0xff]   ;;  %v7354_v45 = vld [vmem:[%s10249_s1 + $0xea0] ss:$16 sps:$4 sm:$0xff]  }
 0x19b   :  { %4999 = vmatpush1.bf16.msra.mxu0 %v7262_v46  ;;  %5491 = vmatpush1.bf16.msra.mxu1 %v7265_v47  ;;  %v7357_v46 = vld [vmem:[%s10249_s1 + $0xea8] ss:$16 sps:$4 sm:$0xff]   ;;  %v7362_v47 = vld [vmem:[%s10249_s1 + $0xec4] ss:$16 sps:$4 sm:$0xff]  }
 0x19c   :  { %5000 = vmatprep.subr.bf16.mxu0 %v7270_v48  ;;  %5492 = vmatprep.subr.bf16.mxu1 %v7273_v49  ;;  %v7365_v48 = vld [vmem:[%s10249_s1 + $0xecc] ss:$16 sps:$4 sm:$0xff]   ;;  %v7360_v49 = vld [vmem:[%s10249_s1 + $0xec0] ss:$16 sps:$4 sm:$0xff]  }
 0x19f   :  { %5001 = vmatpush1.bf16.msra.mxu0 %v7268_v50  ;;  %5493 = vmatpush1.bf16.msra.mxu1 %v7271_v51  ;;  %v7363_v50 = vld [vmem:[%s10249_s1 + $0xec8] ss:$16 sps:$4 sm:$0xff]   ;;  %v7368_v51 = vld [vmem:[%s10249_s1 + $0xee4] ss:$16 sps:$4 sm:$0xff]  }
 0x1a0   :  { %5002 = vmatprep.subr.bf16.mxu0 %v7276_v52  ;;  %5494 = vmatprep.subr.bf16.mxu1 %v7279_v53  ;;  %v7371_v52 = vld [vmem:[%s10249_s1 + $0xeec] ss:$16 sps:$4 sm:$0xff]   ;;  %v7366_v53 = vld [vmem:[%s10249_s1 + $0xee0] ss:$16 sps:$4 sm:$0xff]  }
 0x1a3   :  { %5003 = vmatpush1.bf16.msra.mxu0 %v7274_v54  ;;  %5495 = vmatpush1.bf16.msra.mxu1 %v7277_v55  ;;  %v7369_v54 = vld [vmem:[%s10249_s1 + $0xee8] ss:$16 sps:$4 sm:$0xff]   ;;  %v7374_v55 = vld [vmem:[%s10249_s1 + $0xf04] ss:$16 sps:$4 sm:$0xff]  }
 0x1a4   :  { %5004 = vmatprep.subr.bf16.mxu0 %v7282_v56  ;;  %5496 = vmatprep.subr.bf16.mxu1 %v7285_v57  ;;  %v7377_v56 = vld [vmem:[%s10249_s1 + $0xf0c] ss:$16 sps:$4 sm:$0xff]   ;;  %v7372_v57 = vld [vmem:[%s10249_s1 + $0xf00] ss:$16 sps:$4 sm:$0xff]  }
 0x1a7   :  { %5005 = vmatpush1.bf16.msra.mxu0 %v7280_v58  ;;  %5497 = vmatpush1.bf16.msra.mxu1 %v7283_v59  ;;  %v7375_v58 = vld [vmem:[%s10249_s1 + $0xf08] ss:$16 sps:$4 sm:$0xff]   ;;  %v7380_v59 = vld [vmem:[%s10249_s1 + $0xf24] ss:$16 sps:$4 sm:$0xff]  }
 0x1a8   :  { %5006 = vmatprep.subr.bf16.mxu0 %v7288_v60  ;;  %5498 = vmatprep.subr.bf16.mxu1 %v7291_v61  ;;  %v7383_v60 = vld [vmem:[%s10249_s1 + $0xf2c] ss:$16 sps:$4 sm:$0xff]   ;;  %v7378_v61 = vld [vmem:[%s10249_s1 + $0xf20] ss:$16 sps:$4 sm:$0xff]  }
 0x1ab   :  { %5007 = vmatpush1.bf16.msra.mxu0 %v7286_v62  ;;  %5499 = vmatpush1.bf16.msra.mxu1 %v7289_v63  ;;  %v7381_v62 = vld [vmem:[%s10249_s1 + $0xf28] ss:$16 sps:$4 sm:$0xff]   ;;  %v7386_v63 = vld [vmem:[%s10249_s1 + $0xf44] ss:$16 sps:$4 sm:$0xff]  }
 0x1ac   :  { %5008 = vmatprep.subr.bf16.mxu0 %v7294_v0  ;;  %5500 = vmatprep.subr.bf16.mxu1 %v7297_v1  ;;  %v7389_v0 = vld [vmem:[%s10249_s1 + $0xf4c] ss:$16 sps:$4 sm:$0xff]   ;;  %v7384_v1 = vld [vmem:[%s10249_s1 + $0xf40] ss:$16 sps:$4 sm:$0xff]  }
 0x1af   :  { %5009 = vmatpush1.bf16.msra.mxu0 %v7292_v2  ;;  %5501 = vmatpush1.bf16.msra.mxu1 %v7295_v3  ;;  %v7387_v2 = vld [vmem:[%s10249_s1 + $0xf48] ss:$16 sps:$4 sm:$0xff]   ;;  %v7392_v3 = vld [vmem:[%s10249_s1 + $0xf64] ss:$16 sps:$4 sm:$0xff]  }
 0x1b0   :  { %5010 = vmatprep.subr.bf16.mxu0 %v7300_v4  ;;  %5502 = vmatprep.subr.bf16.mxu1 %v7303_v5  ;;  %v7395_v4 = vld [vmem:[%s10249_s1 + $0xf6c] ss:$16 sps:$4 sm:$0xff]   ;;  %v7390_v5 = vld [vmem:[%s10249_s1 + $0xf60] ss:$16 sps:$4 sm:$0xff]  }
 0x1b3   :  { %5011 = vmatpush1.bf16.msra.mxu0 %v7298_v6  ;;  %5503 = vmatpush1.bf16.msra.mxu1 %v7301_v7  ;;  %v7393_v6 = vld [vmem:[%s10249_s1 + $0xf68] ss:$16 sps:$4 sm:$0xff]   ;;  %v7398_v7 = vld [vmem:[%s10249_s1 + $0xf84] ss:$16 sps:$4 sm:$0xff]  }
 0x1b4   :  { %5012 = vmatprep.subr.bf16.mxu0 %v7306_v8  ;;  %5504 = vmatprep.subr.bf16.mxu1 %v7309_v9  ;;  %v7401_v8 = vld [vmem:[%s10249_s1 + $0xf8c] ss:$16 sps:$4 sm:$0xff]   ;;  %v7396_v9 = vld [vmem:[%s10249_s1 + $0xf80] ss:$16 sps:$4 sm:$0xff]  }
 0x1b7   :  { %5013 = vmatpush1.bf16.msra.mxu0 %v7304_v10  ;;  %5505 = vmatpush1.bf16.msra.mxu1 %v7307_v12  ;;  %v7399_v10 = vld [vmem:[%s10249_s1 + $0xf88] ss:$16 sps:$4 sm:$0xff]   ;;  %v7404_v12 = vld [vmem:[%s10249_s1 + $0xfa4] ss:$16 sps:$4 sm:$0xff]  }
 0x1b8   :  { %5014 = vmatprep.subr.bf16.mxu0 %v7312_v13  ;;  %5506 = vmatprep.subr.bf16.mxu1 %v7315_v15  ;;  %v7407_v13 = vld [vmem:[%s10249_s1 + $0xfac] ss:$16 sps:$4 sm:$0xff]   ;;  %v7402_v15 = vld [vmem:[%s10249_s1 + $0xfa0] ss:$16 sps:$4 sm:$0xff]  }
 0x1bb   :  { %5015 = vmatpush1.bf16.msra.mxu0 %v7310_v11  ;;  %5507 = vmatpush1.bf16.msra.mxu1 %v7313_v17  ;;  %v7405_v11 = vld [vmem:[%s10249_s1 + $0xfa8] ss:$16 sps:$4 sm:$0xff]   ;;  %v7410_v17 = vld [vmem:[%s10249_s1 + $0xfc4] ss:$16 sps:$4 sm:$0xff]  }
 0x1bc   :  { %5016 = vmatprep.subr.bf16.mxu0 %v7318_v14  ;;  %5508 = vmatprep.subr.bf16.mxu1 %v7321_v19  ;;  %v7413_v14 = vld [vmem:[%s10249_s1 + $0xfcc] ss:$16 sps:$4 sm:$0xff]   ;;  %v7408_v19 = vld [vmem:[%s10249_s1 + $0xfc0] ss:$16 sps:$4 sm:$0xff]  }
 0x1bf   :  { %5017 = vmatpush1.bf16.msra.mxu0 %v7316_v20  ;;  %5509 = vmatpush1.bf16.msra.mxu1 %v7319_v16  ;;  %v7411_v20 = vld [vmem:[%s10249_s1 + $0xfc8] ss:$16 sps:$4 sm:$0xff]   ;;  %v7416_v16 = vld [vmem:[%s10249_s1 + $0xfe4] ss:$16 sps:$4 sm:$0xff]  }
 0x1c0   :  { %5027 = vmatprep.subr.bf16.mxu0 %v7326_v22  ;;  %5519 = vmatprep.subr.bf16.mxu1 %v7329_v23  ;;  %v7419_v22 = vld [vmem:[%s10249_s1 + $0xfec] ss:$16 sps:$4 sm:$0xff]   ;;  %v7414_v23 = vld [vmem:[%s10249_s1 + $0xfe0] ss:$16 sps:$4 sm:$0xff]  }
 0x1c2   :  { %5019 = vmatmul.mubr.bf16.vlgmr.msra.gmra.mrb[0].mxu0 %v5762_v18  ;;  %5511 = vmatmul.mubr.bf16.vlgmr.msra.gmra.mrb[0].mxu1 %v5762_v18  ;;  %v7417_v18 = vld [vmem:[%s10249_s1 + $0xfe8] ss:$16 sps:$4 sm:$0xff]  }
 0x1c3   :  { %5028 = vmatpush1.bf16.msra.mxu0 %v7324_v25  ;;  %5520 = vmatpush1.bf16.msra.mxu1 %v7327_v26  ;;  %v7424_v25 = vld [vmem:[%s10249_s1 + $0x1004] ss:$16 sps:$4 sm:$0xff]   ;;  %v7427_v26 = vld [vmem:[%s10249_s1 + $0x100c] ss:$16 sps:$4 sm:$0xff]  }
 0x1c4   :  { %5029 = vmatprep.subr.bf16.mxu0 %v7332_v27  ;;  %5521 = vmatprep.subr.bf16.mxu1 %v7335_v21  ;;  %v5764_v27 = vcombine.low %v9242_v24, %v9242_v24  ;;  %v9445_v21 = vld [vmem:[%s10250_s0 + $0x40] sm:$0xff] }
 0x1c5   :  { %5059 = vmatprep.mubr.bf16.mxu0 %v5765_v28  ;;  %5551 = vmatprep.mubr.bf16.mxu1 %v5765_v28  ;;  %v7422_v28 = vld [vmem:[%s10249_s1 + $0x1000] ss:$16 sps:$4 sm:$0xff]   ;;  %v7430_v24 = vld [vmem:[%s10249_s1 + $0x1024] ss:$16 sps:$4 sm:$0xff]  }
 0x1c7   :  { %5030 = vmatpush1.bf16.msra.mxu0 %v7330_v29  ;;  %5522 = vmatpush1.bf16.msra.mxu1 %v7333_v30  ;;  %v7425_v29 = vld [vmem:[%s10249_s1 + $0x1008] ss:$16 sps:$4 sm:$0xff]   ;;  %v7433_v30 = vld [vmem:[%s10249_s1 + $0x102c] ss:$16 sps:$4 sm:$0xff]  }
 0x1c8   :  { %5031 = vmatprep.subr.bf16.mxu0 %v7338_v31  ;;  %5523 = vmatprep.subr.bf16.mxu1 %v7341_v32  ;;  %v5767_v31 = vcombine.high %v9445_v21, %v9445_v21  ;;  %v7428_v32 = vld [vmem:[%s10249_s1 + $0x1020] ss:$16 sps:$4 sm:$0xff]  }
 0x1cb   :  { %5032 = vmatpush1.bf16.msra.mxu0 %v7336_v33  ;;  %5524 = vmatpush1.bf16.msra.mxu1 %v7339_v34  ;;  %v7431_v33 = vld [vmem:[%s10249_s1 + $0x1028] ss:$16 sps:$4 sm:$0xff]   ;;  %v7436_v34 = vld [vmem:[%s10249_s1 + $0x1044] ss:$16 sps:$4 sm:$0xff]  }
 0x1cc   :  { %5033 = vmatprep.subr.bf16.mxu0 %v7344_v35  ;;  %5525 = vmatprep.subr.bf16.mxu1 %v7347_v36  ;;  %v7439_v35 = vld [vmem:[%s10249_s1 + $0x104c] ss:$16 sps:$4 sm:$0xff]   ;;  %v7434_v36 = vld [vmem:[%s10249_s1 + $0x1040] ss:$16 sps:$4 sm:$0xff]  }
 0x1cf   :  { %5034 = vmatpush1.bf16.msra.mxu0 %v7342_v37  ;;  %5526 = vmatpush1.bf16.msra.mxu1 %v7345_v38  ;;  %v7437_v37 = vld [vmem:[%s10249_s1 + $0x1048] ss:$16 sps:$4 sm:$0xff]   ;;  %v7442_v38 = vld [vmem:[%s10249_s1 + $0x1064] ss:$16 sps:$4 sm:$0xff]  }
 0x1d0   :  { %5035 = vmatprep.subr.bf16.mxu0 %v7350_v39  ;;  %5527 = vmatprep.subr.bf16.mxu1 %v7353_v40  ;;  %v7445_v39 = vld [vmem:[%s10249_s1 + $0x106c] ss:$16 sps:$4 sm:$0xff]   ;;  %v7440_v40 = vld [vmem:[%s10249_s1 + $0x1060] ss:$16 sps:$4 sm:$0xff]  }
 0x1d3   :  { %5036 = vmatpush1.bf16.msra.mxu0 %v7348_v41  ;;  %5528 = vmatpush1.bf16.msra.mxu1 %v7351_v42  ;;  %v7443_v41 = vld [vmem:[%s10249_s1 + $0x1068] ss:$16 sps:$4 sm:$0xff]   ;;  %v7448_v42 = vld [vmem:[%s10249_s1 + $0x1084] ss:$16 sps:$4 sm:$0xff]  }
 0x1d4   :  { %5037 = vmatprep.subr.bf16.mxu0 %v7356_v43  ;;  %5529 = vmatprep.subr.bf16.mxu1 %v7359_v44  ;;  %v7451_v43 = vld [vmem:[%s10249_s1 + $0x108c] ss:$16 sps:$4 sm:$0xff]   ;;  %v7446_v44 = vld [vmem:[%s10249_s1 + $0x1080] ss:$16 sps:$4 sm:$0xff]  }
 0x1d7   :  { %5038 = vmatpush1.bf16.msra.mxu0 %v7354_v45  ;;  %5530 = vmatpush1.bf16.msra.mxu1 %v7357_v46  ;;  %v7449_v45 = vld [vmem:[%s10249_s1 + $0x1088] ss:$16 sps:$4 sm:$0xff]   ;;  %v7454_v46 = vld [vmem:[%s10249_s1 + $0x10a4] ss:$16 sps:$4 sm:$0xff]  }
 0x1d8   :  { %5039 = vmatprep.subr.bf16.mxu0 %v7362_v47  ;;  %5531 = vmatprep.subr.bf16.mxu1 %v7365_v48  ;;  %v7457_v47 = vld [vmem:[%s10249_s1 + $0x10ac] ss:$16 sps:$4 sm:$0xff]   ;;  %v7452_v48 = vld [vmem:[%s10249_s1 + $0x10a0] ss:$16 sps:$4 sm:$0xff]  }
 0x1db   :  { %5040 = vmatpush1.bf16.msra.mxu0 %v7360_v49  ;;  %5532 = vmatpush1.bf16.msra.mxu1 %v7363_v50  ;;  %v7455_v49 = vld [vmem:[%s10249_s1 + $0x10a8] ss:$16 sps:$4 sm:$0xff]   ;;  %v7460_v50 = vld [vmem:[%s10249_s1 + $0x10c4] ss:$16 sps:$4 sm:$0xff]  }
 0x1dc   :  { %5041 = vmatprep.subr.bf16.mxu0 %v7368_v51  ;;  %5533 = vmatprep.subr.bf16.mxu1 %v7371_v52  ;;  %v7463_v51 = vld [vmem:[%s10249_s1 + $0x10cc] ss:$16 sps:$4 sm:$0xff]   ;;  %v7458_v52 = vld [vmem:[%s10249_s1 + $0x10c0] ss:$16 sps:$4 sm:$0xff]  }
 0x1df   :  { %5042 = vmatpush1.bf16.msra.mxu0 %v7366_v53  ;;  %5534 = vmatpush1.bf16.msra.mxu1 %v7369_v54  ;;  %v7461_v53 = vld [vmem:[%s10249_s1 + $0x10c8] ss:$16 sps:$4 sm:$0xff]   ;;  %v7466_v54 = vld [vmem:[%s10249_s1 + $0x10e4] ss:$16 sps:$4 sm:$0xff]  }
 0x1e0   :  { %5043 = vmatprep.subr.bf16.mxu0 %v7374_v55  ;;  %5535 = vmatprep.subr.bf16.mxu1 %v7377_v56  ;;  %v7469_v55 = vld [vmem:[%s10249_s1 + $0x10ec] ss:$16 sps:$4 sm:$0xff]   ;;  %v7464_v56 = vld [vmem:[%s10249_s1 + $0x10e0] ss:$16 sps:$4 sm:$0xff]  }
 0x1e3   :  { %5044 = vmatpush1.bf16.msra.mxu0 %v7372_v57  ;;  %5536 = vmatpush1.bf16.msra.mxu1 %v7375_v58  ;;  %v7467_v57 = vld [vmem:[%s10249_s1 + $0x10e8] ss:$16 sps:$4 sm:$0xff]   ;;  %v7472_v58 = vld [vmem:[%s10249_s1 + $0x1104] ss:$16 sps:$4 sm:$0xff]  }
 0x1e4   :  { %5045 = vmatprep.subr.bf16.mxu0 %v7380_v59  ;;  %5537 = vmatprep.subr.bf16.mxu1 %v7383_v60  ;;  %v7475_v59 = vld [vmem:[%s10249_s1 + $0x110c] ss:$16 sps:$4 sm:$0xff]   ;;  %v7470_v60 = vld [vmem:[%s10249_s1 + $0x1100] ss:$16 sps:$4 sm:$0xff]  }
 0x1e7   :  { %5046 = vmatpush1.bf16.msra.mxu0 %v7378_v61  ;;  %5538 = vmatpush1.bf16.msra.mxu1 %v7381_v62  ;;  %v7473_v61 = vld [vmem:[%s10249_s1 + $0x1108] ss:$16 sps:$4 sm:$0xff]   ;;  %v7478_v62 = vld [vmem:[%s10249_s1 + $0x1124] ss:$16 sps:$4 sm:$0xff]  }
 0x1e8   :  { %5047 = vmatprep.subr.bf16.mxu0 %v7386_v63  ;;  %5539 = vmatprep.subr.bf16.mxu1 %v7389_v0  ;;  %v7481_v63 = vld [vmem:[%s10249_s1 + $0x112c] ss:$16 sps:$4 sm:$0xff]   ;;  %v7476_v0 = vld [vmem:[%s10249_s1 + $0x1120] ss:$16 sps:$4 sm:$0xff]  }
 0x1eb   :  { %5048 = vmatpush1.bf16.msra.mxu0 %v7384_v1  ;;  %5540 = vmatpush1.bf16.msra.mxu1 %v7387_v2  ;;  %v7479_v1 = vld [vmem:[%s10249_s1 + $0x1128] ss:$16 sps:$4 sm:$0xff]   ;;  %v7484_v2 = vld [vmem:[%s10249_s1 + $0x1144] ss:$16 sps:$4 sm:$0xff]  }
 0x1ec   :  { %5049 = vmatprep.subr.bf16.mxu0 %v7392_v3  ;;  %5541 = vmatprep.subr.bf16.mxu1 %v7395_v4  ;;  %v7487_v3 = vld [vmem:[%s10249_s1 + $0x114c] ss:$16 sps:$4 sm:$0xff]   ;;  %v7482_v4 = vld [vmem:[%s10249_s1 + $0x1140] ss:$16 sps:$4 sm:$0xff]  }
 0x1ef   :  { %5050 = vmatpush1.bf16.msra.mxu0 %v7390_v5  ;;  %5542 = vmatpush1.bf16.msra.mxu1 %v7393_v6  ;;  %v7485_v5 = vld [vmem:[%s10249_s1 + $0x1148] ss:$16 sps:$4 sm:$0xff]   ;;  %v7490_v6 = vld [vmem:[%s10249_s1 + $0x1164] ss:$16 sps:$4 sm:$0xff]  }
 0x1f0   :  { %5051 = vmatprep.subr.bf16.mxu0 %v7398_v7  ;;  %5543 = vmatprep.subr.bf16.mxu1 %v7401_v8  ;;  %v7493_v7 = vld [vmem:[%s10249_s1 + $0x116c] ss:$16 sps:$4 sm:$0xff]   ;;  %v7488_v8 = vld [vmem:[%s10249_s1 + $0x1160] ss:$16 sps:$4 sm:$0xff]  }
 0x1f3   :  { %5052 = vmatpush1.bf16.msra.mxu0 %v7396_v9  ;;  %5544 = vmatpush1.bf16.msra.mxu1 %v7399_v10  ;;  %v7491_v9 = vld [vmem:[%s10249_s1 + $0x1168] ss:$16 sps:$4 sm:$0xff]   ;;  %v7496_v10 = vld [vmem:[%s10249_s1 + $0x1184] ss:$16 sps:$4 sm:$0xff]  }
 0x1f4   :  { %5053 = vmatprep.subr.bf16.mxu0 %v7404_v12  ;;  %5545 = vmatprep.subr.bf16.mxu1 %v7407_v13  ;;  %v7499_v12 = vld [vmem:[%s10249_s1 + $0x118c] ss:$16 sps:$4 sm:$0xff]   ;;  %v7494_v13 = vld [vmem:[%s10249_s1 + $0x1180] ss:$16 sps:$4 sm:$0xff]  }
 0x1f7   :  { %5054 = vmatpush1.bf16.msra.mxu0 %v7402_v15  ;;  %5546 = vmatpush1.bf16.msra.mxu1 %v7405_v11  ;;  %v7497_v15 = vld [vmem:[%s10249_s1 + $0x1188] ss:$16 sps:$4 sm:$0xff]   ;;  %v7502_v11 = vld [vmem:[%s10249_s1 + $0x11a4] ss:$16 sps:$4 sm:$0xff]  }
 0x1f8   :  { %5055 = vmatprep.subr.bf16.mxu0 %v7410_v17  ;;  %5547 = vmatprep.subr.bf16.mxu1 %v7413_v14  ;;  %v7505_v17 = vld [vmem:[%s10249_s1 + $0x11ac] ss:$16 sps:$4 sm:$0xff]   ;;  %v7500_v14 = vld [vmem:[%s10249_s1 + $0x11a0] ss:$16 sps:$4 sm:$0xff]  }
 0x1fb   :  { %5056 = vmatpush1.bf16.msra.mxu0 %v7408_v19  ;;  %5548 = vmatpush1.bf16.msra.mxu1 %v7411_v20  ;;  %v7503_v19 = vld [vmem:[%s10249_s1 + $0x11a8] ss:$16 sps:$4 sm:$0xff]   ;;  %v7508_v20 = vld [vmem:[%s10249_s1 + $0x11c4] ss:$16 sps:$4 sm:$0xff]  }
 0x1fc   :  { %5057 = vmatprep.subr.bf16.mxu0 %v7416_v16  ;;  %5549 = vmatprep.subr.bf16.mxu1 %v7419_v22  ;;  %v7511_v16 = vld [vmem:[%s10249_s1 + $0x11cc] ss:$16 sps:$4 sm:$0xff]   ;;  %v7506_v22 = vld [vmem:[%s10249_s1 + $0x11c0] ss:$16 sps:$4 sm:$0xff]  }
 0x1ff   :  { %5058 = vmatpush1.bf16.msra.mxu0 %v7414_v23  ;;  %5550 = vmatpush1.bf16.msra.mxu1 %v7417_v18  ;;  %v7509_v23 = vld [vmem:[%s10249_s1 + $0x11c8] ss:$16 sps:$4 sm:$0xff]   ;;  %v7514_v18 = vld [vmem:[%s10249_s1 + $0x11e4] ss:$16 sps:$4 sm:$0xff]  }
 0x200   :  { %5068 = vmatprep.subr.bf16.mxu0 %v7424_v25  ;;  %5560 = vmatprep.subr.bf16.mxu1 %v7427_v26  ;;  %v7517_v25 = vld [vmem:[%s10249_s1 + $0x11ec] ss:$16 sps:$4 sm:$0xff]   ;;  %v7512_v26 = vld [vmem:[%s10249_s1 + $0x11e0] ss:$16 sps:$4 sm:$0xff]  }
 0x202   :  { %5060 = vmatmul.mubr.bf16.vlgmr.msra.gmra.mrb[0].mxu0 %v5764_v27  ;;  %5552 = vmatmul.mubr.bf16.vlgmr.msra.gmra.mrb[0].mxu1 %v5764_v27  ;;  %v7515_v27 = vld [vmem:[%s10249_s1 + $0x11e8] ss:$16 sps:$4 sm:$0xff]  }
 0x203   :  { %5069 = vmatpush1.bf16.msra.mxu0 %v7422_v28  ;;  %5561 = vmatpush1.bf16.msra.mxu1 %v7425_v29  ;;  %v7522_v28 = vld [vmem:[%s10249_s1 + $0x1204] ss:$16 sps:$4 sm:$0xff]   ;;  %v7525_v29 = vld [vmem:[%s10249_s1 + $0x120c] ss:$16 sps:$4 sm:$0xff]  }
 0x204   :  { %5070 = vmatprep.subr.bf16.mxu0 %v7430_v24  ;;  %5562 = vmatprep.subr.bf16.mxu1 %v7433_v30  ;;  %v5766_v24 = vcombine.low %v9445_v21, %v9445_v21  ;;  %v9646_v30 = vld [vmem:[%s10250_s0 + $0x48] sm:$0xff]  ;;  %v7528_v21 = vld [vmem:[%s10249_s1 + $0x1224] ss:$16 sps:$4 sm:$0xff]  }
 0x205   :  { %5100 = vmatprep.mubr.bf16.mxu0 %v5767_v31  ;;  %5592 = vmatprep.mubr.bf16.mxu1 %v5767_v31  ;;  %v7520_v31 = vld [vmem:[%s10249_s1 + $0x1200] ss:$16 sps:$4 sm:$0xff]  }
 0x207   :  { %5071 = vmatpush1.bf16.msra.mxu0 %v7428_v32  ;;  %5563 = vmatpush1.bf16.msra.mxu1 %v7431_v33  ;;  %v7523_v32 = vld [vmem:[%s10249_s1 + $0x1208] ss:$16 sps:$4 sm:$0xff]   ;;  %v7531_v33 = vld [vmem:[%s10249_s1 + $0x122c] ss:$16 sps:$4 sm:$0xff]  }
 0x208   :  { %5072 = vmatprep.subr.bf16.mxu0 %v7436_v34  ;;  %5564 = vmatprep.subr.bf16.mxu1 %v7439_v35  ;;  %v5769_v34 = vcombine.high %v9646_v30, %v9646_v30  ;;  %v7526_v35 = vld [vmem:[%s10249_s1 + $0x1220] ss:$16 sps:$4 sm:$0xff]  }
 0x20b   :  { %5073 = vmatpush1.bf16.msra.mxu0 %v7434_v36  ;;  %5565 = vmatpush1.bf16.msra.mxu1 %v7437_v37  ;;  %v7529_v36 = vld [vmem:[%s10249_s1 + $0x1228] ss:$16 sps:$4 sm:$0xff]   ;;  %v7534_v37 = vld [vmem:[%s10249_s1 + $0x1244] ss:$16 sps:$4 sm:$0xff]  }
 0x20c   :  { %5074 = vmatprep.subr.bf16.mxu0 %v7442_v38  ;;  %5566 = vmatprep.subr.bf16.mxu1 %v7445_v39  ;;  %v7537_v38 = vld [vmem:[%s10249_s1 + $0x124c] ss:$16 sps:$4 sm:$0xff]   ;;  %v7532_v39 = vld [vmem:[%s10249_s1 + $0x1240] ss:$16 sps:$4 sm:$0xff]  }
 0x20f   :  { %5075 = vmatpush1.bf16.msra.mxu0 %v7440_v40  ;;  %5567 = vmatpush1.bf16.msra.mxu1 %v7443_v41  ;;  %v7535_v40 = vld [vmem:[%s10249_s1 + $0x1248] ss:$16 sps:$4 sm:$0xff]   ;;  %v7540_v41 = vld [vmem:[%s10249_s1 + $0x1264] ss:$16 sps:$4 sm:$0xff]  }
 0x210   :  { %5076 = vmatprep.subr.bf16.mxu0 %v7448_v42  ;;  %5568 = vmatprep.subr.bf16.mxu1 %v7451_v43  ;;  %v7543_v42 = vld [vmem:[%s10249_s1 + $0x126c] ss:$16 sps:$4 sm:$0xff]   ;;  %v7538_v43 = vld [vmem:[%s10249_s1 + $0x1260] ss:$16 sps:$4 sm:$0xff]  }
 0x213   :  { %5077 = vmatpush1.bf16.msra.mxu0 %v7446_v44  ;;  %5569 = vmatpush1.bf16.msra.mxu1 %v7449_v45  ;;  %v7541_v44 = vld [vmem:[%s10249_s1 + $0x1268] ss:$16 sps:$4 sm:$0xff]   ;;  %v7546_v45 = vld [vmem:[%s10249_s1 + $0x1284] ss:$16 sps:$4 sm:$0xff]  }
 0x214   :  { %5078 = vmatprep.subr.bf16.mxu0 %v7454_v46  ;;  %5570 = vmatprep.subr.bf16.mxu1 %v7457_v47  ;;  %v7549_v46 = vld [vmem:[%s10249_s1 + $0x128c] ss:$16 sps:$4 sm:$0xff]   ;;  %v7544_v47 = vld [vmem:[%s10249_s1 + $0x1280] ss:$16 sps:$4 sm:$0xff]  }
 0x217   :  { %5079 = vmatpush1.bf16.msra.mxu0 %v7452_v48  ;;  %5571 = vmatpush1.bf16.msra.mxu1 %v7455_v49  ;;  %v7547_v48 = vld [vmem:[%s10249_s1 + $0x1288] ss:$16 sps:$4 sm:$0xff]   ;;  %v7552_v49 = vld [vmem:[%s10249_s1 + $0x12a4] ss:$16 sps:$4 sm:$0xff]  }
 0x218   :  { %5080 = vmatprep.subr.bf16.mxu0 %v7460_v50  ;;  %5572 = vmatprep.subr.bf16.mxu1 %v7463_v51  ;;  %v7555_v50 = vld [vmem:[%s10249_s1 + $0x12ac] ss:$16 sps:$4 sm:$0xff]   ;;  %v7550_v51 = vld [vmem:[%s10249_s1 + $0x12a0] ss:$16 sps:$4 sm:$0xff]  }
 0x21b   :  { %5081 = vmatpush1.bf16.msra.mxu0 %v7458_v52  ;;  %5573 = vmatpush1.bf16.msra.mxu1 %v7461_v53  ;;  %v7553_v52 = vld [vmem:[%s10249_s1 + $0x12a8] ss:$16 sps:$4 sm:$0xff]   ;;  %v7558_v53 = vld [vmem:[%s10249_s1 + $0x12c4] ss:$16 sps:$4 sm:$0xff]  }
 0x21c   :  { %5082 = vmatprep.subr.bf16.mxu0 %v7466_v54  ;;  %5574 = vmatprep.subr.bf16.mxu1 %v7469_v55  ;;  %v7561_v54 = vld [vmem:[%s10249_s1 + $0x12cc] ss:$16 sps:$4 sm:$0xff]   ;;  %v7556_v55 = vld [vmem:[%s10249_s1 + $0x12c0] ss:$16 sps:$4 sm:$0xff]  }
 0x21f   :  { %5083 = vmatpush1.bf16.msra.mxu0 %v7464_v56  ;;  %5575 = vmatpush1.bf16.msra.mxu1 %v7467_v57  ;;  %v7559_v56 = vld [vmem:[%s10249_s1 + $0x12c8] ss:$16 sps:$4 sm:$0xff]   ;;  %v7564_v57 = vld [vmem:[%s10249_s1 + $0x12e4] ss:$16 sps:$4 sm:$0xff]  }
 0x220   :  { %5084 = vmatprep.subr.bf16.mxu0 %v7472_v58  ;;  %5576 = vmatprep.subr.bf16.mxu1 %v7475_v59  ;;  %v7567_v58 = vld [vmem:[%s10249_s1 + $0x12ec] ss:$16 sps:$4 sm:$0xff]   ;;  %v7562_v59 = vld [vmem:[%s10249_s1 + $0x12e0] ss:$16 sps:$4 sm:$0xff]  }
 0x223   :  { %5085 = vmatpush1.bf16.msra.mxu0 %v7470_v60  ;;  %5577 = vmatpush1.bf16.msra.mxu1 %v7473_v61  ;;  %v7565_v60 = vld [vmem:[%s10249_s1 + $0x12e8] ss:$16 sps:$4 sm:$0xff]   ;;  %v7570_v61 = vld [vmem:[%s10249_s1 + $0x1304] ss:$16 sps:$4 sm:$0xff]  }
 0x224   :  { %5086 = vmatprep.subr.bf16.mxu0 %v7478_v62  ;;  %5578 = vmatprep.subr.bf16.mxu1 %v7481_v63  ;;  %v7573_v62 = vld [vmem:[%s10249_s1 + $0x130c] ss:$16 sps:$4 sm:$0xff]   ;;  %v7568_v63 = vld [vmem:[%s10249_s1 + $0x1300] ss:$16 sps:$4 sm:$0xff]  }
 0x227   :  { %5087 = vmatpush1.bf16.msra.mxu0 %v7476_v0  ;;  %5579 = vmatpush1.bf16.msra.mxu1 %v7479_v1  ;;  %v7571_v0 = vld [vmem:[%s10249_s1 + $0x1308] ss:$16 sps:$4 sm:$0xff]   ;;  %v7576_v1 = vld [vmem:[%s10249_s1 + $0x1324] ss:$16 sps:$4 sm:$0xff]  }
 0x228   :  { %5088 = vmatprep.subr.bf16.mxu0 %v7484_v2  ;;  %5580 = vmatprep.subr.bf16.mxu1 %v7487_v3  ;;  %v7579_v2 = vld [vmem:[%s10249_s1 + $0x132c] ss:$16 sps:$4 sm:$0xff]   ;;  %v7574_v3 = vld [vmem:[%s10249_s1 + $0x1320] ss:$16 sps:$4 sm:$0xff]  }
 0x22b   :  { %5089 = vmatpush1.bf16.msra.mxu0 %v7482_v4  ;;  %5581 = vmatpush1.bf16.msra.mxu1 %v7485_v5  ;;  %v7577_v4 = vld [vmem:[%s10249_s1 + $0x1328] ss:$16 sps:$4 sm:$0xff]   ;;  %v7582_v5 = vld [vmem:[%s10249_s1 + $0x1344] ss:$16 sps:$4 sm:$0xff]  }
 0x22c   :  { %5090 = vmatprep.subr.bf16.mxu0 %v7490_v6  ;;  %5582 = vmatprep.subr.bf16.mxu1 %v7493_v7  ;;  %v7585_v6 = vld [vmem:[%s10249_s1 + $0x134c] ss:$16 sps:$4 sm:$0xff]   ;;  %v7580_v7 = vld [vmem:[%s10249_s1 + $0x1340] ss:$16 sps:$4 sm:$0xff]  }
 0x22f   :  { %5091 = vmatpush1.bf16.msra.mxu0 %v7488_v8  ;;  %5583 = vmatpush1.bf16.msra.mxu1 %v7491_v9  ;;  %v7583_v8 = vld [vmem:[%s10249_s1 + $0x1348] ss:$16 sps:$4 sm:$0xff]   ;;  %v7588_v9 = vld [vmem:[%s10249_s1 + $0x1364] ss:$16 sps:$4 sm:$0xff]  }
 0x230   :  { %5092 = vmatprep.subr.bf16.mxu0 %v7496_v10  ;;  %5584 = vmatprep.subr.bf16.mxu1 %v7499_v12  ;;  %v7591_v10 = vld [vmem:[%s10249_s1 + $0x136c] ss:$16 sps:$4 sm:$0xff]   ;;  %v7586_v12 = vld [vmem:[%s10249_s1 + $0x1360] ss:$16 sps:$4 sm:$0xff]  }
 0x233   :  { %5093 = vmatpush1.bf16.msra.mxu0 %v7494_v13  ;;  %5585 = vmatpush1.bf16.msra.mxu1 %v7497_v15  ;;  %v7589_v13 = vld [vmem:[%s10249_s1 + $0x1368] ss:$16 sps:$4 sm:$0xff]   ;;  %v7594_v15 = vld [vmem:[%s10249_s1 + $0x1384] ss:$16 sps:$4 sm:$0xff]  }
 0x234   :  { %5094 = vmatprep.subr.bf16.mxu0 %v7502_v11  ;;  %5586 = vmatprep.subr.bf16.mxu1 %v7505_v17  ;;  %v7597_v11 = vld [vmem:[%s10249_s1 + $0x138c] ss:$16 sps:$4 sm:$0xff]   ;;  %v7592_v17 = vld [vmem:[%s10249_s1 + $0x1380] ss:$16 sps:$4 sm:$0xff]  }
 0x237   :  { %5095 = vmatpush1.bf16.msra.mxu0 %v7500_v14  ;;  %5587 = vmatpush1.bf16.msra.mxu1 %v7503_v19  ;;  %v7595_v14 = vld [vmem:[%s10249_s1 + $0x1388] ss:$16 sps:$4 sm:$0xff]   ;;  %v7600_v19 = vld [vmem:[%s10249_s1 + $0x13a4] ss:$16 sps:$4 sm:$0xff]  }
 0x238   :  { %5096 = vmatprep.subr.bf16.mxu0 %v7508_v20  ;;  %5588 = vmatprep.subr.bf16.mxu1 %v7511_v16  ;;  %v7603_v20 = vld [vmem:[%s10249_s1 + $0x13ac] ss:$16 sps:$4 sm:$0xff]   ;;  %v7598_v16 = vld [vmem:[%s10249_s1 + $0x13a0] ss:$16 sps:$4 sm:$0xff]  }
 0x23b   :  { %5097 = vmatpush1.bf16.msra.mxu0 %v7506_v22  ;;  %5589 = vmatpush1.bf16.msra.mxu1 %v7509_v23  ;;  %v7601_v22 = vld [vmem:[%s10249_s1 + $0x13a8] ss:$16 sps:$4 sm:$0xff]   ;;  %v7606_v23 = vld [vmem:[%s10249_s1 + $0x13c4] ss:$16 sps:$4 sm:$0xff]  }
 0x23c   :  { %5098 = vmatprep.subr.bf16.mxu0 %v7514_v18  ;;  %5590 = vmatprep.subr.bf16.mxu1 %v7517_v25  ;;  %v7609_v18 = vld [vmem:[%s10249_s1 + $0x13cc] ss:$16 sps:$4 sm:$0xff]   ;;  %v7604_v25 = vld [vmem:[%s10249_s1 + $0x13c0] ss:$16 sps:$4 sm:$0xff]  }
 0x23f   :  { %5099 = vmatpush1.bf16.msra.mxu0 %v7512_v26  ;;  %5591 = vmatpush1.bf16.msra.mxu1 %v7515_v27  ;;  %v7607_v26 = vld [vmem:[%s10249_s1 + $0x13c8] ss:$16 sps:$4 sm:$0xff]   ;;  %v7612_v27 = vld [vmem:[%s10249_s1 + $0x13e4] ss:$16 sps:$4 sm:$0xff]  }
 0x240   :  { %5109 = vmatprep.subr.bf16.mxu0 %v7522_v28  ;;  %5601 = vmatprep.subr.bf16.mxu1 %v7525_v29  ;;  %v7615_v28 = vld [vmem:[%s10249_s1 + $0x13ec] ss:$16 sps:$4 sm:$0xff]   ;;  %v7610_v29 = vld [vmem:[%s10249_s1 + $0x13e0] ss:$16 sps:$4 sm:$0xff]  }
 0x242   :  { %5101 = vmatmul.mubr.bf16.vlgmr.msra.gmra.mrb[0].mxu0 %v5766_v24  ;;  %5593 = vmatmul.mubr.bf16.vlgmr.msra.gmra.mrb[0].mxu1 %v5766_v24  ;;  %v7613_v24 = vld [vmem:[%s10249_s1 + $0x13e8] ss:$16 sps:$4 sm:$0xff]  }
 0x243   :  { %5110 = vmatpush1.bf16.msra.mxu0 %v7520_v31  ;;  %5602 = vmatpush1.bf16.msra.mxu1 %v7523_v32  ;;  %v7620_v31 = vld [vmem:[%s10249_s1 + $0x1404] ss:$16 sps:$4 sm:$0xff]   ;;  %v7623_v32 = vld [vmem:[%s10249_s1 + $0x140c] ss:$16 sps:$4 sm:$0xff]  }
 0x244   :  { %5111 = vmatprep.subr.bf16.mxu0 %v7528_v21  ;;  %5603 = vmatprep.subr.bf16.mxu1 %v7531_v33  ;;  %v5768_v21 = vcombine.low %v9646_v30, %v9646_v30  ;;  %v9847_v33 = vld [vmem:[%s10250_s0 + $0x50] sm:$0xff] }
 0x245   :  { %5141 = vmatprep.mubr.bf16.mxu0 %v5769_v34  ;;  %5633 = vmatprep.mubr.bf16.mxu1 %v5769_v34  ;;  %v7618_v34 = vld [vmem:[%s10249_s1 + $0x1400] ss:$16 sps:$4 sm:$0xff]   ;;  %v7626_v30 = vld [vmem:[%s10249_s1 + $0x1424] ss:$16 sps:$4 sm:$0xff]  }
 0x247   :  { %5112 = vmatpush1.bf16.msra.mxu0 %v7526_v35  ;;  %5604 = vmatpush1.bf16.msra.mxu1 %v7529_v36  ;;  %v7621_v35 = vld [vmem:[%s10249_s1 + $0x1408] ss:$16 sps:$4 sm:$0xff]   ;;  %v7629_v36 = vld [vmem:[%s10249_s1 + $0x142c] ss:$16 sps:$4 sm:$0xff]  }
 0x248   :  { %5113 = vmatprep.subr.bf16.mxu0 %v7534_v37  ;;  %5605 = vmatprep.subr.bf16.mxu1 %v7537_v38  ;;  %v5771_v37 = vcombine.high %v9847_v33, %v9847_v33  ;;  %v7624_v38 = vld [vmem:[%s10249_s1 + $0x1420] ss:$16 sps:$4 sm:$0xff]  }
 0x24b   :  { %5114 = vmatpush1.bf16.msra.mxu0 %v7532_v39  ;;  %5606 = vmatpush1.bf16.msra.mxu1 %v7535_v40  ;;  %v7627_v39 = vld [vmem:[%s10249_s1 + $0x1428] ss:$16 sps:$4 sm:$0xff]   ;;  %v7632_v40 = vld [vmem:[%s10249_s1 + $0x1444] ss:$16 sps:$4 sm:$0xff]  }
 0x24c   :  { %5115 = vmatprep.subr.bf16.mxu0 %v7540_v41  ;;  %5607 = vmatprep.subr.bf16.mxu1 %v7543_v42  ;;  %v7635_v41 = vld [vmem:[%s10249_s1 + $0x144c] ss:$16 sps:$4 sm:$0xff]   ;;  %v7630_v42 = vld [vmem:[%s10249_s1 + $0x1440] ss:$16 sps:$4 sm:$0xff]  }
 0x24f   :  { %5116 = vmatpush1.bf16.msra.mxu0 %v7538_v43  ;;  %5608 = vmatpush1.bf16.msra.mxu1 %v7541_v44  ;;  %v7633_v43 = vld [vmem:[%s10249_s1 + $0x1448] ss:$16 sps:$4 sm:$0xff]   ;;  %v7638_v44 = vld [vmem:[%s10249_s1 + $0x1464] ss:$16 sps:$4 sm:$0xff]  }
 0x250   :  { %5117 = vmatprep.subr.bf16.mxu0 %v7546_v45  ;;  %5609 = vmatprep.subr.bf16.mxu1 %v7549_v46  ;;  %v7641_v45 = vld [vmem:[%s10249_s1 + $0x146c] ss:$16 sps:$4 sm:$0xff]   ;;  %v7636_v46 = vld [vmem:[%s10249_s1 + $0x1460] ss:$16 sps:$4 sm:$0xff]  }
 0x253   :  { %5118 = vmatpush1.bf16.msra.mxu0 %v7544_v47  ;;  %5610 = vmatpush1.bf16.msra.mxu1 %v7547_v48  ;;  %v7639_v47 = vld [vmem:[%s10249_s1 + $0x1468] ss:$16 sps:$4 sm:$0xff]   ;;  %v7644_v48 = vld [vmem:[%s10249_s1 + $0x1484] ss:$16 sps:$4 sm:$0xff]  }
 0x254   :  { %5119 = vmatprep.subr.bf16.mxu0 %v7552_v49  ;;  %5611 = vmatprep.subr.bf16.mxu1 %v7555_v50  ;;  %v7647_v49 = vld [vmem:[%s10249_s1 + $0x148c] ss:$16 sps:$4 sm:$0xff]   ;;  %v7642_v50 = vld [vmem:[%s10249_s1 + $0x1480] ss:$16 sps:$4 sm:$0xff]  }
 0x257   :  { %5120 = vmatpush1.bf16.msra.mxu0 %v7550_v51  ;;  %5612 = vmatpush1.bf16.msra.mxu1 %v7553_v52  ;;  %v7645_v51 = vld [vmem:[%s10249_s1 + $0x1488] ss:$16 sps:$4 sm:$0xff]   ;;  %v7650_v52 = vld [vmem:[%s10249_s1 + $0x14a4] ss:$16 sps:$4 sm:$0xff]  }
 0x258   :  { %5121 = vmatprep.subr.bf16.mxu0 %v7558_v53  ;;  %5613 = vmatprep.subr.bf16.mxu1 %v7561_v54  ;;  %v7653_v53 = vld [vmem:[%s10249_s1 + $0x14ac] ss:$16 sps:$4 sm:$0xff]   ;;  %v7648_v54 = vld [vmem:[%s10249_s1 + $0x14a0] ss:$16 sps:$4 sm:$0xff]  }
 0x25b   :  { %5122 = vmatpush1.bf16.msra.mxu0 %v7556_v55  ;;  %5614 = vmatpush1.bf16.msra.mxu1 %v7559_v56  ;;  %v7651_v55 = vld [vmem:[%s10249_s1 + $0x14a8] ss:$16 sps:$4 sm:$0xff]   ;;  %v7656_v56 = vld [vmem:[%s10249_s1 + $0x14c4] ss:$16 sps:$4 sm:$0xff]  }
 0x25c   :  { %5123 = vmatprep.subr.bf16.mxu0 %v7564_v57  ;;  %5615 = vmatprep.subr.bf16.mxu1 %v7567_v58  ;;  %v7659_v57 = vld [vmem:[%s10249_s1 + $0x14cc] ss:$16 sps:$4 sm:$0xff]   ;;  %v7654_v58 = vld [vmem:[%s10249_s1 + $0x14c0] ss:$16 sps:$4 sm:$0xff]  }
 0x25f   :  { %5124 = vmatpush1.bf16.msra.mxu0 %v7562_v59  ;;  %5616 = vmatpush1.bf16.msra.mxu1 %v7565_v60  ;;  %v7657_v59 = vld [vmem:[%s10249_s1 + $0x14c8] ss:$16 sps:$4 sm:$0xff]   ;;  %v7662_v60 = vld [vmem:[%s10249_s1 + $0x14e4] ss:$16 sps:$4 sm:$0xff]  }
 0x260   :  { %5125 = vmatprep.subr.bf16.mxu0 %v7570_v61  ;;  %5617 = vmatprep.subr.bf16.mxu1 %v7573_v62  ;;  %v7665_v61 = vld [vmem:[%s10249_s1 + $0x14ec] ss:$16 sps:$4 sm:$0xff]   ;;  %v7660_v62 = vld [vmem:[%s10249_s1 + $0x14e0] ss:$16 sps:$4 sm:$0xff]  }
 0x263   :  { %5126 = vmatpush1.bf16.msra.mxu0 %v7568_v63  ;;  %5618 = vmatpush1.bf16.msra.mxu1 %v7571_v0  ;;  %v7663_v63 = vld [vmem:[%s10249_s1 + $0x14e8] ss:$16 sps:$4 sm:$0xff]   ;;  %v7668_v0 = vld [vmem:[%s10249_s1 + $0x1504] ss:$16 sps:$4 sm:$0xff]  }
 0x264   :  { %5127 = vmatprep.subr.bf16.mxu0 %v7576_v1  ;;  %5619 = vmatprep.subr.bf16.mxu1 %v7579_v2  ;;  %v7671_v1 = vld [vmem:[%s10249_s1 + $0x150c] ss:$16 sps:$4 sm:$0xff]   ;;  %v7666_v2 = vld [vmem:[%s10249_s1 + $0x1500] ss:$16 sps:$4 sm:$0xff]  }
 0x267   :  { %5128 = vmatpush1.bf16.msra.mxu0 %v7574_v3  ;;  %5620 = vmatpush1.bf16.msra.mxu1 %v7577_v4  ;;  %v7669_v3 = vld [vmem:[%s10249_s1 + $0x1508] ss:$16 sps:$4 sm:$0xff]   ;;  %v7674_v4 = vld [vmem:[%s10249_s1 + $0x1524] ss:$16 sps:$4 sm:$0xff]  }
 0x268   :  { %5129 = vmatprep.subr.bf16.mxu0 %v7582_v5  ;;  %5621 = vmatprep.subr.bf16.mxu1 %v7585_v6  ;;  %v7677_v5 = vld [vmem:[%s10249_s1 + $0x152c] ss:$16 sps:$4 sm:$0xff]   ;;  %v7672_v6 = vld [vmem:[%s10249_s1 + $0x1520] ss:$16 sps:$4 sm:$0xff]  }
 0x26b   :  { %5130 = vmatpush1.bf16.msra.mxu0 %v7580_v7  ;;  %5622 = vmatpush1.bf16.msra.mxu1 %v7583_v8  ;;  %v7675_v7 = vld [vmem:[%s10249_s1 + $0x1528] ss:$16 sps:$4 sm:$0xff]   ;;  %v7680_v8 = vld [vmem:[%s10249_s1 + $0x1544] ss:$16 sps:$4 sm:$0xff]  }
 0x26c   :  { %5131 = vmatprep.subr.bf16.mxu0 %v7588_v9  ;;  %5623 = vmatprep.subr.bf16.mxu1 %v7591_v10  ;;  %v7683_v9 = vld [vmem:[%s10249_s1 + $0x154c] ss:$16 sps:$4 sm:$0xff]   ;;  %v7678_v10 = vld [vmem:[%s10249_s1 + $0x1540] ss:$16 sps:$4 sm:$0xff]  }
 0x26f   :  { %5132 = vmatpush1.bf16.msra.mxu0 %v7586_v12  ;;  %5624 = vmatpush1.bf16.msra.mxu1 %v7589_v13  ;;  %v7681_v12 = vld [vmem:[%s10249_s1 + $0x1548] ss:$16 sps:$4 sm:$0xff]   ;;  %v7686_v13 = vld [vmem:[%s10249_s1 + $0x1564] ss:$16 sps:$4 sm:$0xff]  }
 0x270   :  { %5133 = vmatprep.subr.bf16.mxu0 %v7594_v15  ;;  %5625 = vmatprep.subr.bf16.mxu1 %v7597_v11  ;;  %v7689_v15 = vld [vmem:[%s10249_s1 + $0x156c] ss:$16 sps:$4 sm:$0xff]   ;;  %v7684_v11 = vld [vmem:[%s10249_s1 + $0x1560] ss:$16 sps:$4 sm:$0xff]  }
 0x273   :  { %5134 = vmatpush1.bf16.msra.mxu0 %v7592_v17  ;;  %5626 = vmatpush1.bf16.msra.mxu1 %v7595_v14  ;;  %v7687_v17 = vld [vmem:[%s10249_s1 + $0x1568] ss:$16 sps:$4 sm:$0xff]   ;;  %v7692_v14 = vld [vmem:[%s10249_s1 + $0x1584] ss:$16 sps:$4 sm:$0xff]  }
 0x274   :  { %5135 = vmatprep.subr.bf16.mxu0 %v7600_v19  ;;  %5627 = vmatprep.subr.bf16.mxu1 %v7603_v20  ;;  %v7695_v19 = vld [vmem:[%s10249_s1 + $0x158c] ss:$16 sps:$4 sm:$0xff]   ;;  %v7690_v20 = vld [vmem:[%s10249_s1 + $0x1580] ss:$16 sps:$4 sm:$0xff]  }
 0x277   :  { %5136 = vmatpush1.bf16.msra.mxu0 %v7598_v16  ;;  %5628 = vmatpush1.bf16.msra.mxu1 %v7601_v22  ;;  %v7693_v16 = vld [vmem:[%s10249_s1 + $0x1588] ss:$16 sps:$4 sm:$0xff]   ;;  %v7698_v22 = vld [vmem:[%s10249_s1 + $0x15a4] ss:$16 sps:$4 sm:$0xff]  }
 0x278   :  { %5137 = vmatprep.subr.bf16.mxu0 %v7606_v23  ;;  %5629 = vmatprep.subr.bf16.mxu1 %v7609_v18  ;;  %v7701_v23 = vld [vmem:[%s10249_s1 + $0x15ac] ss:$16 sps:$4 sm:$0xff]   ;;  %v7696_v18 = vld [vmem:[%s10249_s1 + $0x15a0] ss:$16 sps:$4 sm:$0xff]  }
 0x27b   :  { %5138 = vmatpush1.bf16.msra.mxu0 %v7604_v25  ;;  %5630 = vmatpush1.bf16.msra.mxu1 %v7607_v26  ;;  %v7699_v25 = vld [vmem:[%s10249_s1 + $0x15a8] ss:$16 sps:$4 sm:$0xff]   ;;  %v7704_v26 = vld [vmem:[%s10249_s1 + $0x15c4] ss:$16 sps:$4 sm:$0xff]  }
 0x27c   :  { %5139 = vmatprep.subr.bf16.mxu0 %v7612_v27  ;;  %5631 = vmatprep.subr.bf16.mxu1 %v7615_v28  ;;  %v7707_v27 = vld [vmem:[%s10249_s1 + $0x15cc] ss:$16 sps:$4 sm:$0xff]   ;;  %v7702_v28 = vld [vmem:[%s10249_s1 + $0x15c0] ss:$16 sps:$4 sm:$0xff]  }
 0x27f   :  { %5140 = vmatpush1.bf16.msra.mxu0 %v7610_v29  ;;  %5632 = vmatpush1.bf16.msra.mxu1 %v7613_v24  ;;  %v7705_v29 = vld [vmem:[%s10249_s1 + $0x15c8] ss:$16 sps:$4 sm:$0xff]   ;;  %v7710_v24 = vld [vmem:[%s10249_s1 + $0x15e4] ss:$16 sps:$4 sm:$0xff]  }
 0x280   :  { %5150 = vmatprep.subr.bf16.mxu0 %v7620_v31  ;;  %5642 = vmatprep.subr.bf16.mxu1 %v7623_v32  ;;  %v7713_v31 = vld [vmem:[%s10249_s1 + $0x15ec] ss:$16 sps:$4 sm:$0xff]   ;;  %v7708_v32 = vld [vmem:[%s10249_s1 + $0x15e0] ss:$16 sps:$4 sm:$0xff]  }
 0x282   :  { %5142 = vmatmul.mubr.bf16.vlgmr.msra.gmra.mrb[0].mxu0 %v5768_v21  ;;  %5634 = vmatmul.mubr.bf16.vlgmr.msra.gmra.mrb[0].mxu1 %v5768_v21  ;;  %v7711_v21 = vld [vmem:[%s10249_s1 + $0x15e8] ss:$16 sps:$4 sm:$0xff]  }
 0x283   :  { %5151 = vmatpush1.bf16.msra.mxu0 %v7618_v34  ;;  %5643 = vmatpush1.bf16.msra.mxu1 %v7621_v35  ;;  %v7718_v34 = vld [vmem:[%s10249_s1 + $0x1604] ss:$16 sps:$4 sm:$0xff]   ;;  %v7721_v35 = vld [vmem:[%s10249_s1 + $0x160c] ss:$16 sps:$4 sm:$0xff]  }
 0x284   :  { %5152 = vmatprep.subr.bf16.mxu0 %v7626_v30  ;;  %5644 = vmatprep.subr.bf16.mxu1 %v7629_v36  ;;  %v5770_v30 = vcombine.low %v9847_v33, %v9847_v33  ;;  %v10048_v36 = vld [vmem:[%s10250_s0 + $0x58] sm:$0xff]  ;;  %v7724_v33 = vld [vmem:[%s10249_s1 + $0x1624] ss:$16 sps:$4 sm:$0xff]  }
 0x285   :  { %5182 = vmatprep.mubr.bf16.mxu0 %v5771_v37  ;;  %5674 = vmatprep.mubr.bf16.mxu1 %v5771_v37  ;;  %v7716_v37 = vld [vmem:[%s10249_s1 + $0x1600] ss:$16 sps:$4 sm:$0xff]  }
 0x287   :  { %5153 = vmatpush1.bf16.msra.mxu0 %v7624_v38  ;;  %5645 = vmatpush1.bf16.msra.mxu1 %v7627_v39  ;;  %v7719_v38 = vld [vmem:[%s10249_s1 + $0x1608] ss:$16 sps:$4 sm:$0xff]   ;;  %v7727_v39 = vld [vmem:[%s10249_s1 + $0x162c] ss:$16 sps:$4 sm:$0xff]  }
 0x288   :  { %5154 = vmatprep.subr.bf16.mxu0 %v7632_v40  ;;  %5646 = vmatprep.subr.bf16.mxu1 %v7635_v41  ;;  %v5773_v40 = vcombine.high %v10048_v36, %v10048_v36  ;;  %v7722_v41 = vld [vmem:[%s10249_s1 + $0x1620] ss:$16 sps:$4 sm:$0xff]  }
 0x28b   :  { %5155 = vmatpush1.bf16.msra.mxu0 %v7630_v42  ;;  %5647 = vmatpush1.bf16.msra.mxu1 %v7633_v43  ;;  %v7725_v42 = vld [vmem:[%s10249_s1 + $0x1628] ss:$16 sps:$4 sm:$0xff]   ;;  %v7730_v43 = vld [vmem:[%s10249_s1 + $0x1644] ss:$16 sps:$4 sm:$0xff]  }
 0x28c   :  { %5156 = vmatprep.subr.bf16.mxu0 %v7638_v44  ;;  %5648 = vmatprep.subr.bf16.mxu1 %v7641_v45  ;;  %v7733_v44 = vld [vmem:[%s10249_s1 + $0x164c] ss:$16 sps:$4 sm:$0xff]   ;;  %v7728_v45 = vld [vmem:[%s10249_s1 + $0x1640] ss:$16 sps:$4 sm:$0xff]  }
 0x28f   :  { %5157 = vmatpush1.bf16.msra.mxu0 %v7636_v46  ;;  %5649 = vmatpush1.bf16.msra.mxu1 %v7639_v47  ;;  %v7731_v46 = vld [vmem:[%s10249_s1 + $0x1648] ss:$16 sps:$4 sm:$0xff]   ;;  %v7736_v47 = vld [vmem:[%s10249_s1 + $0x1664] ss:$16 sps:$4 sm:$0xff]  }
 0x290   :  { %5158 = vmatprep.subr.bf16.mxu0 %v7644_v48  ;;  %5650 = vmatprep.subr.bf16.mxu1 %v7647_v49  ;;  %v7739_v48 = vld [vmem:[%s10249_s1 + $0x166c] ss:$16 sps:$4 sm:$0xff]   ;;  %v7734_v49 = vld [vmem:[%s10249_s1 + $0x1660] ss:$16 sps:$4 sm:$0xff]  }
 0x293   :  { %5159 = vmatpush1.bf16.msra.mxu0 %v7642_v50  ;;  %5651 = vmatpush1.bf16.msra.mxu1 %v7645_v51  ;;  %v7737_v50 = vld [vmem:[%s10249_s1 + $0x1668] ss:$16 sps:$4 sm:$0xff]   ;;  %v7742_v51 = vld [vmem:[%s10249_s1 + $0x1684] ss:$16 sps:$4 sm:$0xff]  }
 0x294   :  { %5160 = vmatprep.subr.bf16.mxu0 %v7650_v52  ;;  %5652 = vmatprep.subr.bf16.mxu1 %v7653_v53  ;;  %v7745_v52 = vld [vmem:[%s10249_s1 + $0x168c] ss:$16 sps:$4 sm:$0xff]   ;;  %v7740_v53 = vld [vmem:[%s10249_s1 + $0x1680] ss:$16 sps:$4 sm:$0xff]  }
 0x297   :  { %5161 = vmatpush1.bf16.msra.mxu0 %v7648_v54  ;;  %5653 = vmatpush1.bf16.msra.mxu1 %v7651_v55  ;;  %v7743_v54 = vld [vmem:[%s10249_s1 + $0x1688] ss:$16 sps:$4 sm:$0xff]   ;;  %v7748_v55 = vld [vmem:[%s10249_s1 + $0x16a4] ss:$16 sps:$4 sm:$0xff]  }
 0x298   :  { %5162 = vmatprep.subr.bf16.mxu0 %v7656_v56  ;;  %5654 = vmatprep.subr.bf16.mxu1 %v7659_v57  ;;  %v7751_v56 = vld [vmem:[%s10249_s1 + $0x16ac] ss:$16 sps:$4 sm:$0xff]   ;;  %v7746_v57 = vld [vmem:[%s10249_s1 + $0x16a0] ss:$16 sps:$4 sm:$0xff]  }
 0x29b   :  { %5163 = vmatpush1.bf16.msra.mxu0 %v7654_v58  ;;  %5655 = vmatpush1.bf16.msra.mxu1 %v7657_v59  ;;  %v7749_v58 = vld [vmem:[%s10249_s1 + $0x16a8] ss:$16 sps:$4 sm:$0xff]   ;;  %v7754_v59 = vld [vmem:[%s10249_s1 + $0x16c4] ss:$16 sps:$4 sm:$0xff]  }
 0x29c   :  { %5164 = vmatprep.subr.bf16.mxu0 %v7662_v60  ;;  %5656 = vmatprep.subr.bf16.mxu1 %v7665_v61  ;;  %v7757_v60 = vld [vmem:[%s10249_s1 + $0x16cc] ss:$16 sps:$4 sm:$0xff]   ;;  %v7752_v61 = vld [vmem:[%s10249_s1 + $0x16c0] ss:$16 sps:$4 sm:$0xff]  }
 0x29f   :  { %5165 = vmatpush1.bf16.msra.mxu0 %v7660_v62  ;;  %5657 = vmatpush1.bf16.msra.mxu1 %v7663_v63  ;;  %v7755_v62 = vld [vmem:[%s10249_s1 + $0x16c8] ss:$16 sps:$4 sm:$0xff]   ;;  %v7760_v63 = vld [vmem:[%s10249_s1 + $0x16e4] ss:$16 sps:$4 sm:$0xff]  }
 0x2a0   :  { %5166 = vmatprep.subr.bf16.mxu0 %v7668_v0  ;;  %5658 = vmatprep.subr.bf16.mxu1 %v7671_v1  ;;  %v7763_v0 = vld [vmem:[%s10249_s1 + $0x16ec] ss:$16 sps:$4 sm:$0xff]   ;;  %v7758_v1 = vld [vmem:[%s10249_s1 + $0x16e0] ss:$16 sps:$4 sm:$0xff]  }
 0x2a3   :  { %5167 = vmatpush1.bf16.msra.mxu0 %v7666_v2  ;;  %5659 = vmatpush1.bf16.msra.mxu1 %v7669_v3  ;;  %v7761_v2 = vld [vmem:[%s10249_s1 + $0x16e8] ss:$16 sps:$4 sm:$0xff]   ;;  %v7766_v3 = vld [vmem:[%s10249_s1 + $0x1704] ss:$16 sps:$4 sm:$0xff]  }
 0x2a4   :  { %5168 = vmatprep.subr.bf16.mxu0 %v7674_v4  ;;  %5660 = vmatprep.subr.bf16.mxu1 %v7677_v5  ;;  %v7769_v4 = vld [vmem:[%s10249_s1 + $0x170c] ss:$16 sps:$4 sm:$0xff]   ;;  %v7764_v5 = vld [vmem:[%s10249_s1 + $0x1700] ss:$16 sps:$4 sm:$0xff]  }
 0x2a7   :  { %5169 = vmatpush1.bf16.msra.mxu0 %v7672_v6  ;;  %5661 = vmatpush1.bf16.msra.mxu1 %v7675_v7  ;;  %v7767_v6 = vld [vmem:[%s10249_s1 + $0x1708] ss:$16 sps:$4 sm:$0xff]   ;;  %v7772_v7 = vld [vmem:[%s10249_s1 + $0x1724] ss:$16 sps:$4 sm:$0xff]  }
 0x2a8   :  { %5170 = vmatprep.subr.bf16.mxu0 %v7680_v8  ;;  %5662 = vmatprep.subr.bf16.mxu1 %v7683_v9  ;;  %v7775_v8 = vld [vmem:[%s10249_s1 + $0x172c] ss:$16 sps:$4 sm:$0xff]   ;;  %v7770_v9 = vld [vmem:[%s10249_s1 + $0x1720] ss:$16 sps:$4 sm:$0xff]  }
 0x2ab   :  { %5171 = vmatpush1.bf16.msra.mxu0 %v7678_v10  ;;  %5663 = vmatpush1.bf16.msra.mxu1 %v7681_v12  ;;  %v7773_v10 = vld [vmem:[%s10249_s1 + $0x1728] ss:$16 sps:$4 sm:$0xff]   ;;  %v7778_v12 = vld [vmem:[%s10249_s1 + $0x1744] ss:$16 sps:$4 sm:$0xff]  }
 0x2ac   :  { %5172 = vmatprep.subr.bf16.mxu0 %v7686_v13  ;;  %5664 = vmatprep.subr.bf16.mxu1 %v7689_v15  ;;  %v7781_v13 = vld [vmem:[%s10249_s1 + $0x174c] ss:$16 sps:$4 sm:$0xff]   ;;  %v7776_v15 = vld [vmem:[%s10249_s1 + $0x1740] ss:$16 sps:$4 sm:$0xff]  }
 0x2af   :  { %5173 = vmatpush1.bf16.msra.mxu0 %v7684_v11  ;;  %5665 = vmatpush1.bf16.msra.mxu1 %v7687_v17  ;;  %v7779_v11 = vld [vmem:[%s10249_s1 + $0x1748] ss:$16 sps:$4 sm:$0xff]   ;;  %v7784_v17 = vld [vmem:[%s10249_s1 + $0x1764] ss:$16 sps:$4 sm:$0xff]  }
 0x2b0   :  { %5174 = vmatprep.subr.bf16.mxu0 %v7692_v14  ;;  %5666 = vmatprep.subr.bf16.mxu1 %v7695_v19  ;;  %v7787_v14 = vld [vmem:[%s10249_s1 + $0x176c] ss:$16 sps:$4 sm:$0xff]   ;;  %v7782_v19 = vld [vmem:[%s10249_s1 + $0x1760] ss:$16 sps:$4 sm:$0xff]  }
 0x2b3   :  { %5175 = vmatpush1.bf16.msra.mxu0 %v7690_v20  ;;  %5667 = vmatpush1.bf16.msra.mxu1 %v7693_v16  ;;  %v7785_v20 = vld [vmem:[%s10249_s1 + $0x1768] ss:$16 sps:$4 sm:$0xff]   ;;  %v7790_v16 = vld [vmem:[%s10249_s1 + $0x1784] ss:$16 sps:$4 sm:$0xff]  }
 0x2b4   :  { %5176 = vmatprep.subr.bf16.mxu0 %v7698_v22  ;;  %5668 = vmatprep.subr.bf16.mxu1 %v7701_v23  ;;  %v7793_v22 = vld [vmem:[%s10249_s1 + $0x178c] ss:$16 sps:$4 sm:$0xff]   ;;  %v7788_v23 = vld [vmem:[%s10249_s1 + $0x1780] ss:$16 sps:$4 sm:$0xff]  }
 0x2b7   :  { %5177 = vmatpush1.bf16.msra.mxu0 %v7696_v18  ;;  %5669 = vmatpush1.bf16.msra.mxu1 %v7699_v25  ;;  %v7791_v18 = vld [vmem:[%s10249_s1 + $0x1788] ss:$16 sps:$4 sm:$0xff]   ;;  %v7796_v25 = vld [vmem:[%s10249_s1 + $0x17a4] ss:$16 sps:$4 sm:$0xff]  }
 0x2b8   :  { %5178 = vmatprep.subr.bf16.mxu0 %v7704_v26  ;;  %5670 = vmatprep.subr.bf16.mxu1 %v7707_v27  ;;  %v7799_v26 = vld [vmem:[%s10249_s1 + $0x17ac] ss:$16 sps:$4 sm:$0xff]   ;;  %v7794_v27 = vld [vmem:[%s10249_s1 + $0x17a0] ss:$16 sps:$4 sm:$0xff]  }
 0x2bb   :  { %5179 = vmatpush1.bf16.msra.mxu0 %v7702_v28  ;;  %5671 = vmatpush1.bf16.msra.mxu1 %v7705_v29  ;;  %v7797_v28 = vld [vmem:[%s10249_s1 + $0x17a8] ss:$16 sps:$4 sm:$0xff]   ;;  %v7802_v29 = vld [vmem:[%s10249_s1 + $0x17c4] ss:$16 sps:$4 sm:$0xff]  }
 0x2bc   :  { %5180 = vmatprep.subr.bf16.mxu0 %v7710_v24  ;;  %5672 = vmatprep.subr.bf16.mxu1 %v7713_v31  ;;  %v7805_v24 = vld [vmem:[%s10249_s1 + $0x17cc] ss:$16 sps:$4 sm:$0xff]   ;;  %v7800_v31 = vld [vmem:[%s10249_s1 + $0x17c0] ss:$16 sps:$4 sm:$0xff]  }
 0x2bf   :  { %5181 = vmatpush1.bf16.msra.mxu0 %v7708_v32  ;;  %5673 = vmatpush1.bf16.msra.mxu1 %v7711_v21  ;;  %v7803_v32 = vld [vmem:[%s10249_s1 + $0x17c8] ss:$16 sps:$4 sm:$0xff]   ;;  %v7808_v21 = vld [vmem:[%s10249_s1 + $0x17e4] ss:$16 sps:$4 sm:$0xff]  }
 0x2c0   :  { %5191 = vmatprep.subr.bf16.mxu0 %v7718_v34  ;;  %5683 = vmatprep.subr.bf16.mxu1 %v7721_v35  ;;  %v7811_v34 = vld [vmem:[%s10249_s1 + $0x17ec] ss:$16 sps:$4 sm:$0xff]   ;;  %v7806_v35 = vld [vmem:[%s10249_s1 + $0x17e0] ss:$16 sps:$4 sm:$0xff]  }
 0x2c2   :  { %5183 = vmatmul.mubr.bf16.vlgmr.msra.gmra.mrb[0].mxu0 %v5770_v30  ;;  %5675 = vmatmul.mubr.bf16.vlgmr.msra.gmra.mrb[0].mxu1 %v5770_v30  ;;  %v7809_v30 = vld [vmem:[%s10249_s1 + $0x17e8] ss:$16 sps:$4 sm:$0xff]  }
 0x2c3   :  { %5192 = vmatpush1.bf16.msra.mxu0 %v7716_v37  ;;  %5684 = vmatpush1.bf16.msra.mxu1 %v7719_v38  ;;  %v5772_v37 = vcombine.low %v10048_v36, %v10048_v36  ;;  %v796_v38 = vlaneseq }
 0x2c4   :  { %5193 = vmatprep.subr.bf16.mxu0 %v7724_v33  ;;  %5685 = vmatprep.subr.bf16.mxu1 %v7727_v39 }
 0x2c5   :  { %5223 = vmatprep.mubr.bf16.mxu0 %v5773_v40  ;;  %5715 = vmatprep.mubr.bf16.mxu1 %v5773_v40  ;;  %v797_v33 = vshrl.u32 %v796_v38, 7 }
 0x2c7   :  { %5194 = vmatpush1.bf16.msra.mxu0 %v7722_v41  ;;  %5686 = vmatpush1.bf16.msra.mxu1 %v7725_v42  ;;  %v798_v39 = vsub.s32 0, %v797_v33  ;;  %v806_v40 = vsub.s32 2, %v797_v33  ;;  %v794_v41 = vld [vmem:[%s10251_s2] sm:$0xf]  ;;  %v802_v42 = vsub.s32 1, %v797_v33 }
 0x2c8   :  { %5195 = vmatprep.subr.bf16.mxu0 %v7730_v43  ;;  %5687 = vmatprep.subr.bf16.mxu1 %v7733_v44  ;;  %v810_v43 = vsub.s32 3, %v797_v33 }
 0x2c9   :  { %v799_v44 = vrot.slane %v794_v41, %v798_v39 }
 0x2cb   :  { %5196 = vmatpush1.bf16.msra.mxu0 %v7728_v45  ;;  %5688 = vmatpush1.bf16.msra.mxu1 %v7731_v46  ;;  %v807_v45 = vrot.slane %v794_v41, %v806_v40  ;;  %v803_v46 = vrot.slane %v794_v41, %v802_v42 }
 0x2cc   :  { %5197 = vmatprep.subr.bf16.mxu0 %v7736_v47  ;;  %5689 = vmatprep.subr.bf16.mxu1 %v7739_v48  ;;  %v811_v47 = vrot.slane %v794_v41, %v810_v43 }
 0x2cf   :  { %5198 = vmatpush1.bf16.msra.mxu0 %v7734_v49  ;;  %5690 = vmatpush1.bf16.msra.mxu1 %v7737_v50 }
 0x2d0   :  { %5199 = vmatprep.subr.bf16.mxu0 %v7742_v51  ;;  %5691 = vmatprep.subr.bf16.mxu1 %v7745_v52 }
 0x2d3   :  { %5200 = vmatpush1.bf16.msra.mxu0 %v7740_v53  ;;  %5692 = vmatpush1.bf16.msra.mxu1 %v7743_v54 }
 0x2d4   :  { %5201 = vmatprep.subr.bf16.mxu0 %v7748_v55  ;;  %5693 = vmatprep.subr.bf16.mxu1 %v7751_v56 }
 0x2d7   :  { %5202 = vmatpush1.bf16.msra.mxu0 %v7746_v57  ;;  %5694 = vmatpush1.bf16.msra.mxu1 %v7749_v58 }
 0x2d8   :  { %5203 = vmatprep.subr.bf16.mxu0 %v7754_v59  ;;  %5695 = vmatprep.subr.bf16.mxu1 %v7757_v60 }
 0x2db   :  { %5204 = vmatpush1.bf16.msra.mxu0 %v7752_v61  ;;  %5696 = vmatpush1.bf16.msra.mxu1 %v7755_v62 }
 0x2dc   :  { %5205 = vmatprep.subr.bf16.mxu0 %v7760_v63  ;;  %5697 = vmatprep.subr.bf16.mxu1 %v7763_v0 }
 0x2df   :  { %5206 = vmatpush1.bf16.msra.mxu0 %v7758_v1  ;;  %5698 = vmatpush1.bf16.msra.mxu1 %v7761_v2 }
 0x2e0   :  { %5207 = vmatprep.subr.bf16.mxu0 %v7766_v3  ;;  %5699 = vmatprep.subr.bf16.mxu1 %v7769_v4 }
 0x2e3   :  { %5208 = vmatpush1.bf16.msra.mxu0 %v7764_v5  ;;  %5700 = vmatpush1.bf16.msra.mxu1 %v7767_v6 }
 0x2e4   :  { %5209 = vmatprep.subr.bf16.mxu0 %v7772_v7  ;;  %5701 = vmatprep.subr.bf16.mxu1 %v7775_v8 }
 0x2e7   :  { %5210 = vmatpush1.bf16.msra.mxu0 %v7770_v9  ;;  %5702 = vmatpush1.bf16.msra.mxu1 %v7773_v10 }
 0x2e8   :  { %5211 = vmatprep.subr.bf16.mxu0 %v7778_v12  ;;  %5703 = vmatprep.subr.bf16.mxu1 %v7781_v13 }
 0x2eb   :  { %5212 = vmatpush1.bf16.msra.mxu0 %v7776_v15  ;;  %5704 = vmatpush1.bf16.msra.mxu1 %v7779_v11 }
 0x2ec   :  { %5213 = vmatprep.subr.bf16.mxu0 %v7784_v17  ;;  %5705 = vmatprep.subr.bf16.mxu1 %v7787_v14 }
 0x2ef   :  { %5214 = vmatpush1.bf16.msra.mxu0 %v7782_v19  ;;  %5706 = vmatpush1.bf16.msra.mxu1 %v7785_v20 }
 0x2f0   :  { %5215 = vmatprep.subr.bf16.mxu0 %v7790_v16  ;;  %5707 = vmatprep.subr.bf16.mxu1 %v7793_v22 }
 0x2f3   :  { %5216 = vmatpush1.bf16.msra.mxu0 %v7788_v23  ;;  %5708 = vmatpush1.bf16.msra.mxu1 %v7791_v18 }
 0x2f4   :  { %5217 = vmatprep.subr.bf16.mxu0 %v7796_v25  ;;  %5709 = vmatprep.subr.bf16.mxu1 %v7799_v26 }
 0x2f7   :  { %5218 = vmatpush1.bf16.msra.mxu0 %v7794_v27  ;;  %5710 = vmatpush1.bf16.msra.mxu1 %v7797_v28 }
 0x2f8   :  { %5219 = vmatprep.subr.bf16.mxu0 %v7802_v29  ;;  %5711 = vmatprep.subr.bf16.mxu1 %v7805_v24 }
 0x2fb   :  { %5220 = vmatpush1.bf16.msra.mxu0 %v7800_v31  ;;  %5712 = vmatpush1.bf16.msra.mxu1 %v7803_v32 }
 0x2fc   :  { %5221 = vmatprep.subr.bf16.mxu0 %v7808_v21  ;;  %5713 = vmatprep.subr.bf16.mxu1 %v7811_v34 }
 0x2ff   :  { %5222 = vmatpush1.bf16.msra.mxu0 %v7806_v35  ;;  %5714 = vmatpush1.bf16.msra.mxu1 %v7809_v30 }
 0x302   :  { %5224 = vmatmul.mubr.bf16.vlgmr.msra.gmra.mrb[0].mxu0 %v5772_v37  ;;  %5716 = vmatmul.mubr.bf16.vlgmr.msra.gmra.mrb[0].mxu1 %v5772_v37 }
 0x3d5   :  { %v5225_v48 = vpop.f32.mrb[0].mxu0  ;;  %v5717_v36 = vpop.f32.mrb[0].mxu1 }
 0x3d6   :  { %v6546_v49 = vadd.f32 %v5225_v48, %v799_v44  ;;  %v6548_v50 = vadd.f32 %v5717_v36, %v807_v45  ;;  %v5227_v51 = vpop.f32.mrb[1].mxu0  ;;  %v5719_v52 = vpop.f32.mrb[1].mxu1 }
 0x3d7   :  { %v6547_v53 = vadd.f32 %v5227_v51, %v803_v46  ;;  %v6549_v54 = vadd.f32 %v5719_v52, %v811_v47  ;;  %v5229_v55 = vpop.f32.mrb[2].mxu0  ;;  %v5721_v56 = vpop.f32.mrb[2].mxu1 }
 0x3d8   :  { %v5724_v57 = vmax.f32 %v6546_v49, 0.0  ;;  %v5726_v58 = vmax.f32 %v6548_v50, 0.0  ;;  %v5230_v59 = vpop.f32.mrb[3].mxu0  ;;  %v5722_v60 = vpop.f32.mrb[3].mxu1 }
 0x3d9   :  { %v5725_v61 = vmax.f32 %v6547_v53, 0.0  ;;  %v5727_v62 = vmax.f32 %v6549_v54, 0.0 }
 0x3db   :  { %v6544_v63 = vpack.c.bf16 %v5725_v61, %v5724_v57  ;;  %v6545_v0 = vpack.c.bf16 %v5727_v62, %v5726_v58 }
 0x3dd   :  { %5744 = vst [vmem:[%s10252_s3] sm:$0xff] %v6544_v63  ;;  %5745 = vst [vmem:[%s10252_s3 + $0x8] sm:$0xff] %v6545_v0 }

// kernel: sparse_forward.9
= control target key start
LH: loop header
LB: loop body
LE: loop exit
PB: predicated region body
PF: predicated region fallthrough
CT: control target
= control target key end

     0   :  { %vm61_vm0 = vcmask 1043456   ;;  %vm301_vm1 = vcmask 1041409   ;;  %vm1118_vm2 = vcmask 1041408   ;;  %vm1907_vm3 = vcmask 517120   ;;  %s3318_s1 = inlined_call_operand.vmem [shape: bf16[512,512], index: 1, kind: input, shape index: {}]   ;;  %s3319_s0 = inlined_call_operand.vmem [shape: bf16[2,4,512], index: 0, kind: input, shape index: {}]   ;;  %s3320_s2 = inlined_call_operand.vmem [shape: f32[1,512], index: 2, kind: input, shape index: {}]   ;;  %s3321_s5 = inlined_call_operand.vmem [shape: bf16[512,256], index: 5, kind: input, shape index: {}]   ;;  %s3322_s7 = inlined_call_operand.vmem [shape: bf16[256,64], index: 7, kind: input, shape index: {}]   ;;  %s3323_s3 = inlined_call_operand.vmem [shape: f32[1,512], index: 3, kind: input, shape index: {}]   ;;  %s3324_s4 = inlined_call_operand.vmem [shape: f32[1,512], index: 4, kind: input, shape index: {}]   ;;  %s3325_s6 = inlined_call_operand.vmem [shape: f32[1,256], index: 6, kind: input, shape index: {}]   ;;  %s3326_s11 = inlined_call_operand.vmem [shape: f32[2,256], index: 11, kind: output, shape index: {0}]   ;;  %s3327_s10 = inlined_call_operand.<no memory space> [shape: f32[1,1], index: 10, kind: input, shape index: {}]   ;;  %s3328_s8 = inlined_call_operand.vmem [shape: f32[1,64], index: 8, kind: input, shape index: {}]   ;;  %s3329_s9 = inlined_call_operand.vmem [shape: f32[1,64], index: 9, kind: input, shape index: {}]   ;;  %s3330_s12 = inlined_call_operand.vmem [shape: f32[2,1], index: 12, kind: output, shape index: {1}]  }
   0x1   :  { %v2186_v0 = vld [vmem:[%s3318_s1 + $0x4] ss:$16 sps:$4 sm:$0xff]   ;;  %v2188_v1 = vld [vmem:[%s3318_s1] ss:$16 sps:$4 sm:$0xff]   ;;  %v44_v47 = vld [vmem:[%s3319_s0 + $0x8] sm:$0xff]  ;;  %vm1926_vm4 = vcmask 1024  }
   0x2   :  { %954 = vmatprep.subr.bf16.mxu1 %v2186_v0  ;;  %v2189_v2 = vld [vmem:[%s3318_s1 + $0x204] ss:$16 sps:$4 sm:$0xff]   ;;  %v2191_v3 = vld [vmem:[%s3318_s1 + $0x200] ss:$16 sps:$4 sm:$0xff]   ;;  %v47_v50 = vunpack.c.l.bf16 %v44_v47  ;;  %v48_v52 = vunpack.c.h.bf16 %v44_v47 }
   0x3   :  { %955 = vmatpush1.bf16.msra.mxu1 %v2188_v1  ;;  %v2192_v4 = vld [vmem:[%s3318_s1 + $0x24] ss:$16 sps:$4 sm:$0xff]   ;;  %v2194_v5 = vld [vmem:[%s3318_s1 + $0x20] ss:$16 sps:$4 sm:$0xff]   ;;  %995 = vmatprep.subr.bf16.mxu0 %v2189_v2 }
   0x4   :  { %v2195_v6 = vld [vmem:[%s3318_s1 + $0x224] ss:$16 sps:$4 sm:$0xff]   ;;  %996 = vmatpush1.bf16.msra.mxu0 %v2191_v3  ;;  %956 = vmatprep.subr.bf16.mxu1 %v2192_v4  ;;  %v2197_v7 = vld [vmem:[%s3318_s1 + $0x220] ss:$16 sps:$4 sm:$0xff]   ;;  %v55_v56 = vcombine.high %v47_v50, %v47_v50  ;;  %v90_v58 = vsel %vm61_vm0, %v47_v50, 0.0  ;;  %v56_v63 = vcombine.high %v48_v52, %v48_v52  ;;  %v104_v4 = vsel %vm61_vm0, %v48_v52, 0.0 }
   0x5   :  { %997 = vmatprep.subr.bf16.mxu0 %v2195_v6  ;;  %v2198_v8 = vld [vmem:[%s3318_s1 + $0x44] ss:$16 sps:$4 sm:$0xff]   ;;  %v2200_v9 = vld [vmem:[%s3318_s1 + $0x40] ss:$16 sps:$4 sm:$0xff]   ;;  %v91_v61 = vrot.slane %v90_v58, 4 }
   0x6   :  { %v2201_v10 = vld [vmem:[%s3318_s1 + $0x244] ss:$16 sps:$4 sm:$0xff]   ;;  %v2203_v12 = vld [vmem:[%s3318_s1 + $0x240] ss:$16 sps:$4 sm:$0xff]   ;;  %v97_v2 = vsel %vm61_vm0, %v55_v56, 0.0 }
   0x7   :  { %957 = vmatpush1.bf16.msra.mxu1 %v2194_v5  ;;  %v2204_v11 = vld [vmem:[%s3318_s1 + $0x64] ss:$16 sps:$4 sm:$0xff]   ;;  %v2206_v14 = vld [vmem:[%s3318_s1 + $0x60] ss:$16 sps:$4 sm:$0xff]  }
   0x8   :  { %958 = vmatprep.subr.bf16.mxu1 %v2198_v8  ;;  %998 = vmatpush1.bf16.msra.mxu0 %v2197_v7  ;;  %v2207_v13 = vld [vmem:[%s3318_s1 + $0x264] ss:$16 sps:$4 sm:$0xff]   ;;  %v2209_v16 = vld [vmem:[%s3318_s1 + $0x260] ss:$16 sps:$4 sm:$0xff]   ;;  %v98_v7 = vrot.slane %v97_v2, 4 }
   0x9   :  { %999 = vmatprep.subr.bf16.mxu0 %v2201_v10  ;;  %v2210_v15 = vld [vmem:[%s3318_s1 + $0x84] ss:$16 sps:$4 sm:$0xff]   ;;  %v2212_v18 = vld [vmem:[%s3318_s1 + $0x80] ss:$16 sps:$4 sm:$0xff]  }
   0xa   :  { %v2213_v17 = vld [vmem:[%s3318_s1 + $0x284] ss:$16 sps:$4 sm:$0xff]   ;;  %v2215_v20 = vld [vmem:[%s3318_s1 + $0x280] ss:$16 sps:$4 sm:$0xff]  }
   0xb   :  { %959 = vmatpush1.bf16.msra.mxu1 %v2200_v9  ;;  %v2216_v19 = vld [vmem:[%s3318_s1 + $0xa4] ss:$16 sps:$4 sm:$0xff]   ;;  %v2218_v22 = vld [vmem:[%s3318_s1 + $0xa0] ss:$16 sps:$4 sm:$0xff]   ;;  %v92_v9 = vadd.f32 %v91_v61, %v90_v58 }
   0xc   :  { %960 = vmatprep.subr.bf16.mxu1 %v2204_v11  ;;  %1000 = vmatpush1.bf16.msra.mxu0 %v2203_v12  ;;  %v2219_v21 = vld [vmem:[%s3318_s1 + $0x2a4] ss:$16 sps:$4 sm:$0xff]   ;;  %v2221_v24 = vld [vmem:[%s3318_s1 + $0x2a0] ss:$16 sps:$4 sm:$0xff]   ;;  %v111_v12 = vsel %vm61_vm0, %v56_v63, 0.0 }
   0xd   :  { %1001 = vmatprep.subr.bf16.mxu0 %v2207_v13  ;;  %v2222_v23 = vld [vmem:[%s3318_s1 + $0xc4] ss:$16 sps:$4 sm:$0xff]   ;;  %v2224_v26 = vld [vmem:[%s3318_s1 + $0xc0] ss:$16 sps:$4 sm:$0xff]  }
   0xe   :  { %v2225_v25 = vld [vmem:[%s3318_s1 + $0x2c4] ss:$16 sps:$4 sm:$0xff]   ;;  %v2227_v28 = vld [vmem:[%s3318_s1 + $0x2c0] ss:$16 sps:$4 sm:$0xff]  }
   0xf   :  { %961 = vmatpush1.bf16.msra.mxu1 %v2206_v14  ;;  %v2228_v27 = vld [vmem:[%s3318_s1 + $0xe4] ss:$16 sps:$4 sm:$0xff]   ;;  %v2230_v30 = vld [vmem:[%s3318_s1 + $0xe0] ss:$16 sps:$4 sm:$0xff]   ;;  %v105_v14 = vrot.slane %v104_v4, 4 }
  0x10   :  { %962 = vmatprep.subr.bf16.mxu1 %v2210_v15  ;;  %1002 = vmatpush1.bf16.msra.mxu0 %v2209_v16  ;;  %v2231_v29 = vld [vmem:[%s3318_s1 + $0x2e4] ss:$16 sps:$4 sm:$0xff]   ;;  %v2233_v32 = vld [vmem:[%s3318_s1 + $0x2e0] ss:$16 sps:$4 sm:$0xff]  }
  0x11   :  { %1003 = vmatprep.subr.bf16.mxu0 %v2213_v17  ;;  %v2234_v31 = vld [vmem:[%s3318_s1 + $0x104] ss:$16 sps:$4 sm:$0xff]   ;;  %v2236_v34 = vld [vmem:[%s3318_s1 + $0x100] ss:$16 sps:$4 sm:$0xff]   ;;  %v99_v17 = vadd.f32 %v98_v7, %v97_v2 }
  0x12   :  { %v2237_v33 = vld [vmem:[%s3318_s1 + $0x304] ss:$16 sps:$4 sm:$0xff]   ;;  %v2239_v36 = vld [vmem:[%s3318_s1 + $0x300] ss:$16 sps:$4 sm:$0xff]  }
  0x13   :  { %963 = vmatpush1.bf16.msra.mxu1 %v2212_v18  ;;  %v2240_v35 = vld [vmem:[%s3318_s1 + $0x124] ss:$16 sps:$4 sm:$0xff]   ;;  %v2242_v38 = vld [vmem:[%s3318_s1 + $0x120] ss:$16 sps:$4 sm:$0xff]  }
  0x14   :  { %964 = vmatprep.subr.bf16.mxu1 %v2216_v19  ;;  %1004 = vmatpush1.bf16.msra.mxu0 %v2215_v20  ;;  %v2243_v37 = vld [vmem:[%s3318_s1 + $0x324] ss:$16 sps:$4 sm:$0xff]   ;;  %v2245_v40 = vld [vmem:[%s3318_s1 + $0x320] ss:$16 sps:$4 sm:$0xff]   ;;  %v93_v19 = vrot.slane %v92_v9, 2 }
  0x15   :  { %1005 = vmatprep.subr.bf16.mxu0 %v2219_v21  ;;  %v2246_v39 = vld [vmem:[%s3318_s1 + $0x144] ss:$16 sps:$4 sm:$0xff]   ;;  %v2248_v42 = vld [vmem:[%s3318_s1 + $0x140] ss:$16 sps:$4 sm:$0xff]  }
  0x16   :  { %v2249_v41 = vld [vmem:[%s3318_s1 + $0x344] ss:$16 sps:$4 sm:$0xff]   ;;  %v2251_v44 = vld [vmem:[%s3318_s1 + $0x340] ss:$16 sps:$4 sm:$0xff]  }
  0x17   :  { %965 = vmatpush1.bf16.msra.mxu1 %v2218_v22  ;;  %v2252_v43 = vld [vmem:[%s3318_s1 + $0x164] ss:$16 sps:$4 sm:$0xff]   ;;  %v2254_v48 = vld [vmem:[%s3318_s1 + $0x160] ss:$16 sps:$4 sm:$0xff]   ;;  %v112_v22 = vrot.slane %v111_v12, 4 }
  0x18   :  { %966 = vmatprep.subr.bf16.mxu1 %v2222_v23  ;;  %1006 = vmatpush1.bf16.msra.mxu0 %v2221_v24  ;;  %v2255_v45 = vld [vmem:[%s3318_s1 + $0x364] ss:$16 sps:$4 sm:$0xff]   ;;  %v2257_v54 = vld [vmem:[%s3318_s1 + $0x360] ss:$16 sps:$4 sm:$0xff]   ;;  %v106_v24 = vadd.f32 %v105_v14, %v104_v4 }
  0x19   :  { %1007 = vmatprep.subr.bf16.mxu0 %v2225_v25  ;;  %v43_v46 = vld [vmem:[%s3319_s0] sm:$0xff] }
  0x1a   :  { %v45_v49 = vunpack.c.l.bf16 %v43_v46  ;;  %v46_v51 = vunpack.c.h.bf16 %v43_v46  ;;  %v2258_v53 = vld [vmem:[%s3318_s1 + $0x184] ss:$16 sps:$4 sm:$0xff]   ;;  %v2260_v0 = vld [vmem:[%s3318_s1 + $0x180] ss:$16 sps:$4 sm:$0xff]  }
  0x1b   :  { %967 = vmatpush1.bf16.msra.mxu1 %v2224_v26  ;;  %v2261_v59 = vld [vmem:[%s3318_s1 + $0x384] ss:$16 sps:$4 sm:$0xff]   ;;  %v2263_v10 = vld [vmem:[%s3318_s1 + $0x380] ss:$16 sps:$4 sm:$0xff]  }
  0x1c   :  { %968 = vmatprep.subr.bf16.mxu1 %v2228_v27  ;;  %1008 = vmatpush1.bf16.msra.mxu0 %v2227_v28  ;;  %v53_v55 = vcombine.high %v45_v49, %v45_v49  ;;  %v62_v57 = vsel %vm61_vm0, %v45_v49, 0.0  ;;  %v54_v62 = vcombine.high %v46_v51, %v46_v51  ;;  %v76_v3 = vsel %vm61_vm0, %v46_v51, 0.0  ;;  %v2264_v5 = vld [vmem:[%s3318_s1 + $0x1a4] ss:$16 sps:$4 sm:$0xff]   ;;  %v2266_v20 = vld [vmem:[%s3318_s1 + $0x1a0] ss:$16 sps:$4 sm:$0xff]  }
  0x1d   :  { %1009 = vmatprep.subr.bf16.mxu0 %v2231_v29  ;;  %v63_v60 = vrot.slane %v62_v57, 4  ;;  %v77_v13 = vrot.slane %v76_v3, 4  ;;  %v2267_v15 = vld [vmem:[%s3318_s1 + $0x3a4] ss:$16 sps:$4 sm:$0xff]   ;;  %v100_v27 = vrot.slane %v99_v17, 2  ;;  %v94_v29 = vadd.f32 %v93_v19, %v92_v9 }
  0x1e   :  { %v69_v1 = vsel %vm61_vm0, %v53_v55, 0.0  ;;  %v83_v11 = vsel %vm61_vm0, %v54_v62, 0.0  ;;  %v2270_v25 = vld [vmem:[%s3318_s1 + $0x1c4] ss:$16 sps:$4 sm:$0xff]   ;;  %v2275_v50 = vld [vmem:[%s3318_s1 + $0x3c0] ss:$16 sps:$4 sm:$0xff]  }
  0x1f   :  { %969 = vmatpush1.bf16.msra.mxu1 %v2230_v30  ;;  %v70_v6 = vrot.slane %v69_v1, 4  ;;  %v64_v8 = vadd.f32 %v63_v60, %v62_v57  ;;  %v84_v21 = vrot.slane %v83_v11, 4  ;;  %v78_v23 = vadd.f32 %v77_v13, %v76_v3  ;;  %v2269_v30 = vld [vmem:[%s3318_s1 + $0x3a0] ss:$16 sps:$4 sm:$0xff]   ;;  %v2279_v55 = vld [vmem:[%s3318_s1 + $0x3e4] ss:$16 sps:$4 sm:$0xff]  }
  0x20   :  { %970 = vmatprep.subr.bf16.mxu1 %v2234_v31  ;;  %1010 = vmatpush1.bf16.msra.mxu0 %v2233_v32  ;;  %v113_v32 = vadd.f32 %v112_v22, %v111_v12  ;;  %v2278_v60 = vld [vmem:[%s3318_s1 + $0x1e0] ss:$16 sps:$4 sm:$0xff]  }
  0x21   :  { %1011 = vmatprep.subr.bf16.mxu0 %v2237_v33  ;;  %v71_v16 = vadd.f32 %v70_v6, %v69_v1  ;;  %v65_v18 = vrot.slane %v64_v8, 2  ;;  %v85_v31 = vadd.f32 %v84_v21, %v83_v11  ;;  %v79_v33 = vrot.slane %v78_v23, 2  ;;  %v2281_v6 = vld [vmem:[%s3318_s1 + $0x3e0] ss:$16 sps:$4 sm:$0xff]  }
  0x23   :  { %971 = vmatpush1.bf16.msra.mxu1 %v2236_v34  ;;  %v72_v26 = vrot.slane %v71_v16, 2  ;;  %v66_v28 = vadd.f32 %v65_v18, %v64_v8  ;;  %v107_v34 = vrot.slane %v106_v24, 2 }
  0x24   :  { %972 = vmatprep.subr.bf16.mxu1 %v2240_v35  ;;  %1012 = vmatpush1.bf16.msra.mxu0 %v2239_v36  ;;  %v2273_v35 = vld [vmem:[%s3318_s1 + $0x3c4] ss:$16 sps:$4 sm:$0xff]  }
  0x25   :  { %1013 = vmatprep.subr.bf16.mxu0 %v2243_v37  ;;  %v73_v36 = vadd.f32 %v72_v26, %v71_v16  ;;  %v101_v37 = vadd.f32 %v100_v27, %v99_v17 }
  0x27   :  { %973 = vmatpush1.bf16.msra.mxu1 %v2242_v38  ;;  %v67_v38 = vrot.slane %v66_v28, 1  ;;  %v74_v46 = vrot.slane %v73_v36, 1  ;;  %v102_v47 = vrot.slane %v101_v37, 1 }
  0x28   :  { %974 = vmatprep.subr.bf16.mxu1 %v2246_v39  ;;  %1014 = vmatpush1.bf16.msra.mxu0 %v2245_v40  ;;  %v95_v39 = vrot.slane %v94_v29, 1  ;;  %v2272_v40 = vld [vmem:[%s3318_s1 + $0x1c0] ss:$16 sps:$4 sm:$0xff]  }
  0x29   :  { %1015 = vmatprep.subr.bf16.mxu0 %v2249_v41  ;;  %v86_v41 = vrot.slane %v85_v31, 2  ;;  %v75_v56 = vadd.f32 %v74_v46, %v73_v36  ;;  %v103_v57 = vadd.f32 %v102_v47, %v101_v37  ;;  %v2285_v37 = vld [vmem:[%s3318_s1 + $0x28] ss:$16 sps:$4 sm:$0xff]   ;;  %v2302_v46 = vld [vmem:[%s3318_s1 + $0xcc] ss:$16 sps:$4 sm:$0xff]  }
  0x2a   :  { %v96_v49 = vadd.f32 %v95_v39, %v94_v29  ;;  %v2282_v29 = vld [vmem:[%s3318_s1 + $0x8] ss:$16 sps:$4 sm:$0xff]  }
  0x2b   :  { %975 = vmatpush1.bf16.msra.mxu1 %v2248_v42  ;;  %v114_v42 = vrot.slane %v113_v32, 2  ;;  %v87_v51 = vadd.f32 %v86_v41, %v85_v31  ;;  %v120_v1 = vmul.f32 0.25, %v75_v56  ;;  %v124_v2 = vmul.f32 0.25, %v103_v57  ;;  %v2288_v39 = vld [vmem:[%s3318_s1 + $0x48] ss:$16 sps:$4 sm:$0xff]  }
  0x2c   :  { %976 = vmatprep.subr.bf16.mxu1 %v2252_v43  ;;  %1016 = vmatpush1.bf16.msra.mxu0 %v2251_v44  ;;  %v80_v43 = vadd.f32 %v79_v33, %v78_v23  ;;  %v108_v44 = vadd.f32 %v107_v34, %v106_v24  ;;  %v2287_v33 = vld [vmem:[%s3318_s1 + $0x2c] ss:$16 sps:$4 sm:$0xff]   ;;  %v2291_v41 = vld [vmem:[%s3318_s1 + $0x68] ss:$16 sps:$4 sm:$0xff]  }
  0x2d   :  { %1017 = vmatprep.subr.bf16.mxu0 %v2255_v45  ;;  %v2276_v45 = vld [vmem:[%s3318_s1 + $0x1e4] ss:$16 sps:$4 sm:$0xff]   ;;  %v115_v52 = vadd.f32 %v114_v42, %v113_v32  ;;  %v88_v61 = vrot.slane %v87_v51, 1  ;;  %v128_v11 = vpack.c.bf16 %v120_v1, %v120_v1  ;;  %v132_v12 = vpack.c.bf16 %v124_v2, %v124_v2  ;;  %v2296_v42 = vld [vmem:[%s3318_s1 + $0x8c] ss:$16 sps:$4 sm:$0xff]  }
  0x2e   :  { %v2300_v47 = vld [vmem:[%s3318_s1 + $0xc8] ss:$16 sps:$4 sm:$0xff]   ;;  %v2317_v56 = vld [vmem:[%s3318_s1 + $0x16c] ss:$16 sps:$4 sm:$0xff]  }
  0x2f   :  { %977 = vmatpush1.bf16.msra.mxu1 %v2254_v48  ;;  %v68_v48 = vadd.f32 %v67_v38, %v66_v28  ;;  %v116_v62 = vrot.slane %v115_v52, 1  ;;  %v89_v7 = vadd.f32 %v88_v61, %v87_v51  ;;  %v294_v19 = vunpack.c.l.b16 %v128_v11  ;;  %v2290_v38 = vld [vmem:[%s3318_s1 + $0x4c] ss:$16 sps:$4 sm:$0xff]   ;;  %v2306_v51 = vld [vmem:[%s3318_s1 + $0x108] ss:$16 sps:$4 sm:$0xff]  }
  0x30   :  { %978 = vmatprep.subr.bf16.mxu1 %v2258_v53  ;;  %1018 = vmatpush1.bf16.msra.mxu0 %v2257_v54  ;;  %v81_v53 = vrot.slane %v80_v43, 1  ;;  %v109_v54 = vrot.slane %v108_v44, 1  ;;  %v2315_v57 = vld [vmem:[%s3318_s1 + $0x168] ss:$16 sps:$4 sm:$0xff]   ;;  %v2332_v2 = vld [vmem:[%s3318_s1 + $0x20c] ss:$16 sps:$4 sm:$0xff]  }
  0x31   :  { %1019 = vmatprep.subr.bf16.mxu0 %v2261_v59  ;;  %v119_v58 = vmul.f32 0.25, %v68_v48  ;;  %v123_v59 = vmul.f32 0.25, %v96_v49  ;;  %v117_v8 = vadd.f32 %v116_v62, %v115_v52  ;;  %v2305_v48 = vld [vmem:[%s3318_s1 + $0xec] ss:$16 sps:$4 sm:$0xff]   ;;  %v2303_v49 = vld [vmem:[%s3318_s1 + $0xe8] ss:$16 sps:$4 sm:$0xff]  }
  0x32   :  { %v82_v63 = vadd.f32 %v81_v53, %v80_v43  ;;  %v2294_v43 = vld [vmem:[%s3318_s1 + $0x88] ss:$16 sps:$4 sm:$0xff]   ;;  %v2311_v52 = vld [vmem:[%s3318_s1 + $0x12c] ss:$16 sps:$4 sm:$0xff]  }
  0x33   :  { %979 = vmatpush1.bf16.msra.mxu1 %v2260_v0  ;;  %v110_v0 = vadd.f32 %v109_v54, %v108_v44  ;;  %v127_v3 = vpack.c.bf16 %v119_v58, %v119_v58  ;;  %v131_v4 = vpack.c.bf16 %v123_v59, %v123_v59  ;;  %v126_v16 = vmul.f32 0.25, %v117_v8  ;;  %v2299_v44 = vld [vmem:[%s3318_s1 + $0xac] ss:$16 sps:$4 sm:$0xff]   ;;  %v2309_v53 = vld [vmem:[%s3318_s1 + $0x128] ss:$16 sps:$4 sm:$0xff]  }
  0x34   :  { %980 = vmatprep.subr.bf16.mxu1 %v2264_v5  ;;  %1020 = vmatpush1.bf16.msra.mxu0 %v2263_v10  ;;  %v2284_v5 = vld [vmem:[%s3318_s1 + $0xc] ss:$16 sps:$4 sm:$0xff]   ;;  %v121_v9 = vmul.f32 0.25, %v82_v63  ;;  %v2318_v59 = vld [vmem:[%s3318_s1 + $0x188] ss:$16 sps:$4 sm:$0xff]  }
  0x35   :  { %1021 = vmatprep.subr.bf16.mxu0 %v2267_v15  ;;  %v125_v10 = vmul.f32 0.25, %v110_v0  ;;  %v293_v13 = vunpack.c.l.b16 %v127_v3  ;;  %v297_v14 = vunpack.c.l.b16 %v131_v4  ;;  %v122_v15 = vmul.f32 0.25, %v89_v7  ;;  %v2314_v54 = vld [vmem:[%s3318_s1 + $0x14c] ss:$16 sps:$4 sm:$0xff]   ;;  %v2321_v61 = vld [vmem:[%s3318_s1 + $0x1a8] ss:$16 sps:$4 sm:$0xff]  }
  0x36   :  { %v129_v17 = vpack.c.bf16 %v121_v9, %v121_v9  ;;  %v134_v23 = vpack.c.bf16 %v126_v16, %v126_v16  ;;  %v2320_v58 = vld [vmem:[%s3318_s1 + $0x18c] ss:$16 sps:$4 sm:$0xff]   ;;  %v2324_v63 = vld [vmem:[%s3318_s1 + $0x1c8] ss:$16 sps:$4 sm:$0xff]  }
  0x37   :  { %981 = vmatpush1.bf16.msra.mxu1 %v2266_v20  ;;  %v133_v18 = vpack.c.bf16 %v125_v10, %v125_v10  ;;  %v298_v20 = vunpack.c.l.b16 %v132_v12  ;;  %v302_v21 = vsel %vm301_vm1, %v297_v14, %v293_v13  ;;  %v130_v22 = vpack.c.bf16 %v122_v15, %v122_v15  ;;  %v2326_v62 = vld [vmem:[%s3318_s1 + $0x1cc] ss:$16 sps:$4 sm:$0xff]   ;;  %v2327_v1 = vld [vmem:[%s3318_s1 + $0x1e8] ss:$16 sps:$4 sm:$0xff]  }
  0x38   :  { %982 = vmatprep.subr.bf16.mxu1 %v2270_v25  ;;  %1022 = vmatpush1.bf16.msra.mxu0 %v2269_v30  ;;  %v295_v24 = vunpack.c.l.b16 %v129_v17  ;;  %v2780_v26 = vpack.c.b16 %v302_v21, %v302_v21  ;;  %v300_v31 = vunpack.c.l.b16 %v134_v23  ;;  %v2329_v0 = vld [vmem:[%s3318_s1 + $0x1ec] ss:$16 sps:$4 sm:$0xff]   ;;  %v2330_v3 = vld [vmem:[%s3318_s1 + $0x208] ss:$16 sps:$4 sm:$0xff]  }
  0x39   :  { %1023 = vmatprep.subr.bf16.mxu0 %v2273_v35  ;;  %v303_v25 = vsel %vm301_vm1, %v298_v20, %v294_v19  ;;  %v299_v27 = vunpack.c.l.b16 %v133_v18  ;;  %v296_v30 = vunpack.c.l.b16 %v130_v22  ;;  %v2335_v4 = vld [vmem:[%s3318_s1 + $0x22c] ss:$16 sps:$4 sm:$0xff]   ;;  %v2336_v7 = vld [vmem:[%s3318_s1 + $0x248] ss:$16 sps:$4 sm:$0xff]  }
  0x3a   :  { %v307_v28 = vpack.c.b16 %v303_v25, %v303_v25  ;;  %v2341_v8 = vld [vmem:[%s3318_s1 + $0x26c] ss:$16 sps:$4 sm:$0xff]   ;;  %v2339_v9 = vld [vmem:[%s3318_s1 + $0x268] ss:$16 sps:$4 sm:$0xff]  }
  0x3b   :  { %983 = vmatpush1.bf16.msra.mxu1 %v2272_v40  ;;  %v304_v32 = vsel %vm301_vm1, %v299_v27, %v295_v24  ;;  %v305_v34 = vsel %vm301_vm1, %v300_v31, %v296_v30  ;;  %v2293_v40 = vld [vmem:[%s3318_s1 + $0x6c] ss:$16 sps:$4 sm:$0xff]   ;;  %v2342_v11 = vld [vmem:[%s3318_s1 + $0x288] ss:$16 sps:$4 sm:$0xff]  }
  0x3c   :  { %984 = vmatprep.subr.bf16.mxu1 %v2276_v45  ;;  %1024 = vmatpush1.bf16.msra.mxu0 %v2275_v50  ;;  %v2790_v35 = vpack.c.b16 %v304_v32, %v304_v32  ;;  %v2793_v36 = vpack.c.b16 %v305_v34, %v305_v34  ;;  %v2297_v45 = vld [vmem:[%s3318_s1 + $0xa8] ss:$16 sps:$4 sm:$0xff]   ;;  %v2308_v50 = vld [vmem:[%s3318_s1 + $0x10c] ss:$16 sps:$4 sm:$0xff]   ;;  %v265_v34 = vlaneseq }
  0x3d   :  { %1025 = vmatprep.subr.bf16.mxu0 %v2279_v55  ;;  %986 = vmatprep.mubr.bf16.mxu1 %v307_v28  ;;  %v2312_v55 = vld [vmem:[%s3318_s1 + $0x148] ss:$16 sps:$4 sm:$0xff]   ;;  %v2344_v10 = vld [vmem:[%s3318_s1 + $0x28c] ss:$16 sps:$4 sm:$0xff]  }
  0x3e   :  { %1027 = vmatprep.mubr.bf16.mxu0 %v2793_v36  ;;  %v2347_v12 = vld [vmem:[%s3318_s1 + $0x2ac] ss:$16 sps:$4 sm:$0xff]   ;;  %v2345_v13 = vld [vmem:[%s3318_s1 + $0x2a8] ss:$16 sps:$4 sm:$0xff]  }
  0x3f   :  { %985 = vmatpush1.bf16.msra.mxu1 %v2278_v60  ;;  %v2323_v60 = vld [vmem:[%s3318_s1 + $0x1ac] ss:$16 sps:$4 sm:$0xff]   ;;  %v2348_v15 = vld [vmem:[%s3318_s1 + $0x2c8] ss:$16 sps:$4 sm:$0xff]  }
  0x40   :  { %1036 = vmatprep.subr.bf16.mxu1 %v2284_v5  ;;  %1026 = vmatpush1.bf16.msra.mxu0 %v2281_v6  ;;  %v2333_v5 = vld [vmem:[%s3318_s1 + $0x228] ss:$16 sps:$4 sm:$0xff]   ;;  %v2338_v6 = vld [vmem:[%s3318_s1 + $0x24c] ss:$16 sps:$4 sm:$0xff]  }
  0x41   :  { %v2350_v14 = vld [vmem:[%s3318_s1 + $0x2cc] ss:$16 sps:$4 sm:$0xff]   ;;  %v2351_v17 = vld [vmem:[%s3318_s1 + $0x2e8] ss:$16 sps:$4 sm:$0xff]  }
  0x42   :  { %987 = vmatmul.mubr.bf16.vlgmr.msra.gmra.mrb[0].mxu1 %v2780_v26  ;;  %v2353_v16 = vld [vmem:[%s3318_s1 + $0x2ec] ss:$16 sps:$4 sm:$0xff]   ;;  %v2354_v19 = vld [vmem:[%s3318_s1 + $0x308] ss:$16 sps:$4 sm:$0xff]  }
  0x43   :  { %1037 = vmatpush1.bf16.msra.mxu1 %v2282_v29  ;;  %1068 = vmatprep.mubr.bf16.mxu1 %v307_v28  ;;  %v2356_v18 = vld [vmem:[%s3318_s1 + $0x30c] ss:$16 sps:$4 sm:$0xff]   ;;  %v2357_v21 = vld [vmem:[%s3318_s1 + $0x328] ss:$16 sps:$4 sm:$0xff]  }
  0x44   :  { %1038 = vmatprep.subr.bf16.mxu1 %v2287_v33  ;;  %1028 = vmatmul.mubr.bf16.vlgmr.msra.gmra.mrb[0].mxu0 %v2790_v35  ;;  %v2359_v20 = vld [vmem:[%s3318_s1 + $0x32c] ss:$16 sps:$4 sm:$0xff]   ;;  %v2360_v23 = vld [vmem:[%s3318_s1 + $0x348] ss:$16 sps:$4 sm:$0xff]  }
  0x45   :  { %v2362_v22 = vld [vmem:[%s3318_s1 + $0x34c] ss:$16 sps:$4 sm:$0xff]   ;;  %v2363_v25 = vld [vmem:[%s3318_s1 + $0x368] ss:$16 sps:$4 sm:$0xff]  }
  0x46   :  { %v2365_v24 = vld [vmem:[%s3318_s1 + $0x36c] ss:$16 sps:$4 sm:$0xff]   ;;  %v2366_v27 = vld [vmem:[%s3318_s1 + $0x388] ss:$16 sps:$4 sm:$0xff]  }
  0x47   :  { %1039 = vmatpush1.bf16.msra.mxu1 %v2285_v37  ;;  %v2371_v28 = vld [vmem:[%s3318_s1 + $0x3ac] ss:$16 sps:$4 sm:$0xff]   ;;  %v2369_v29 = vld [vmem:[%s3318_s1 + $0x3a8] ss:$16 sps:$4 sm:$0xff]  }
  0x48   :  { %1040 = vmatprep.subr.bf16.mxu1 %v2290_v38  ;;  %v2374_v30 = vld [vmem:[%s3318_s1 + $0x3cc] ss:$16 sps:$4 sm:$0xff]   ;;  %v2372_v31 = vld [vmem:[%s3318_s1 + $0x3c8] ss:$16 sps:$4 sm:$0xff]   ;;  %v263_v38 = vld [vmem:[%s3320_s2] sm:$0xf] }
  0x49   :  { %v2377_v32 = vld [vmem:[%s3318_s1 + $0x3ec] ss:$16 sps:$4 sm:$0xff]   ;;  %v2375_v33 = vld [vmem:[%s3318_s1 + $0x3e8] ss:$16 sps:$4 sm:$0xff]  }
  0x4b   :  { %1041 = vmatpush1.bf16.msra.mxu1 %v2288_v39 }
  0x4c   :  { %1042 = vmatprep.subr.bf16.mxu1 %v2293_v40 }
  0x4f   :  { %1043 = vmatpush1.bf16.msra.mxu1 %v2291_v41 }
  0x50   :  { %1044 = vmatprep.subr.bf16.mxu1 %v2296_v42 }
  0x53   :  { %1045 = vmatpush1.bf16.msra.mxu1 %v2294_v43 }
  0x54   :  { %1046 = vmatprep.subr.bf16.mxu1 %v2299_v44 }
  0x57   :  { %1047 = vmatpush1.bf16.msra.mxu1 %v2297_v45 }
  0x58   :  { %1048 = vmatprep.subr.bf16.mxu1 %v2302_v46 }
  0x5b   :  { %1049 = vmatpush1.bf16.msra.mxu1 %v2300_v47 }
  0x5c   :  { %1050 = vmatprep.subr.bf16.mxu1 %v2305_v48 }
  0x5f   :  { %1051 = vmatpush1.bf16.msra.mxu1 %v2303_v49 }
  0x60   :  { %1052 = vmatprep.subr.bf16.mxu1 %v2308_v50 }
  0x63   :  { %1053 = vmatpush1.bf16.msra.mxu1 %v2306_v51 }
  0x64   :  { %1054 = vmatprep.subr.bf16.mxu1 %v2311_v52 }
  0x67   :  { %1055 = vmatpush1.bf16.msra.mxu1 %v2309_v53 }
  0x68   :  { %1056 = vmatprep.subr.bf16.mxu1 %v2314_v54 }
  0x6b   :  { %1057 = vmatpush1.bf16.msra.mxu1 %v2312_v55 }
  0x6c   :  { %1058 = vmatprep.subr.bf16.mxu1 %v2317_v56 }
  0x6f   :  { %1059 = vmatpush1.bf16.msra.mxu1 %v2315_v57 }
  0x70   :  { %1060 = vmatprep.subr.bf16.mxu1 %v2320_v58 }
  0x73   :  { %1061 = vmatpush1.bf16.msra.mxu1 %v2318_v59 }
  0x74   :  { %1062 = vmatprep.subr.bf16.mxu1 %v2323_v60 }
  0x77   :  { %1063 = vmatpush1.bf16.msra.mxu1 %v2321_v61 }
  0x78   :  { %1064 = vmatprep.subr.bf16.mxu1 %v2326_v62 }
  0x7b   :  { %1065 = vmatpush1.bf16.msra.mxu1 %v2324_v63 }
  0x7c   :  { %1066 = vmatprep.subr.bf16.mxu1 %v2329_v0 }
  0x7f   :  { %1067 = vmatpush1.bf16.msra.mxu1 %v2327_v1 }
  0x80   :  { %1077 = vmatprep.subr.bf16.mxu1 %v2332_v2 }
  0x82   :  { %1069 = vmatmul.mubr.bf16.vlgmr.msra.gmra.mrb[4].mxu1 %v2780_v26  ;;  %v2368_v26 = vld [vmem:[%s3318_s1 + $0x38c] ss:$16 sps:$4 sm:$0xff]  }
  0x83   :  { %1078 = vmatpush1.bf16.msra.mxu1 %v2330_v3  ;;  %1109 = vmatprep.mubr.bf16.mxu1 %v2793_v36  ;;  %v266_v36 = vshrl.u32 %v265_v34, 7 }
  0x84   :  { %1079 = vmatprep.subr.bf16.mxu1 %v2335_v4 }
  0x85   :  { %v2983_v37 = vsub.s32 0, %v266_v36  ;;  %v2988_v39 = vsub.s32 1, %v266_v36  ;;  %v2992_v53 = vsub.s32 2, %v266_v36  ;;  %v2994_v54 = vsub.s32 3, %v266_v36  ;;  %v2398_v36 = vld [vmem:[%s3321_s5 + $0x64] ss:$8 sps:$4 sm:$0xff]  }
  0x87   :  { %1080 = vmatpush1.bf16.msra.mxu1 %v2333_v5  ;;  %v268_v40 = vrot.slane %v263_v38, %v2983_v37  ;;  %v272_v41 = vrot.slane %v263_v38, %v2988_v39  ;;  %v276_v55 = vrot.slane %v263_v38, %v2992_v53  ;;  %v280_v56 = vrot.slane %v263_v38, %v2994_v54  ;;  %v2396_v38 = vld [vmem:[%s3321_s5 + $0x60] ss:$8 sps:$4 sm:$0xff]  }
  0x88   :  { %1081 = vmatprep.subr.bf16.mxu1 %v2338_v6  ;;  %v2378_v6 = vld [vmem:[%s3321_s5] ss:$8 sps:$4 sm:$0xff]  }
  0x8b   :  { %1082 = vmatpush1.bf16.msra.mxu1 %v2336_v7  ;;  %v2380_v7 = vld [vmem:[%s3321_s5 + $0x4] ss:$8 sps:$4 sm:$0xff]  }
  0x8c   :  { %1083 = vmatprep.subr.bf16.mxu1 %v2341_v8  ;;  %v2383_v8 = vld [vmem:[%s3321_s5 + $0x14] ss:$8 sps:$4 sm:$0xff]   ;;  %1627 = vmatprep.subr.bf16.mxu0 %v2380_v7  ;;  %v2485_v7 = vld [vmem:[%s3322_s7 + $0x28] sm:$0xff]  }
  0x8d   :  { %1628 = vmatpush1.bf16.msra.mxu0 %v2378_v6  ;;  %v2484_v6 = vld [vmem:[%s3322_s7 + $0x68] sm:$0xff]  }
  0x8e   :  { %1629 = vmatprep.subr.bf16.mxu0 %v2383_v8  ;;  %v2486_v8 = vld [vmem:[%s3322_s7 + $0x70] sm:$0xff]  }
  0x8f   :  { %1084 = vmatpush1.bf16.msra.mxu1 %v2339_v9  ;;  %v2381_v9 = vld [vmem:[%s3321_s5 + $0x10] ss:$8 sps:$4 sm:$0xff]  }
  0x90   :  { %1085 = vmatprep.subr.bf16.mxu1 %v2344_v10  ;;  %v2386_v10 = vld [vmem:[%s3321_s5 + $0x24] ss:$8 sps:$4 sm:$0xff]  }
  0x91   :  { %1630 = vmatpush1.bf16.msra.mxu0 %v2381_v9 }
  0x92   :  { %1631 = vmatprep.subr.bf16.mxu0 %v2386_v10 }
  0x93   :  { %1086 = vmatpush1.bf16.msra.mxu1 %v2342_v11  ;;  %v2384_v11 = vld [vmem:[%s3321_s5 + $0x20] ss:$8 sps:$4 sm:$0xff]  }
  0x94   :  { %1087 = vmatprep.subr.bf16.mxu1 %v2347_v12  ;;  %v2389_v12 = vld [vmem:[%s3321_s5 + $0x34] ss:$8 sps:$4 sm:$0xff]  }
  0x95   :  { %1632 = vmatpush1.bf16.msra.mxu0 %v2384_v11 }
  0x96   :  { %1633 = vmatprep.subr.bf16.mxu0 %v2389_v12  ;;  %v3163_v12 = vld [vmem:[%s3323_s3] sm:$0xf] }
  0x97   :  { %1088 = vmatpush1.bf16.msra.mxu1 %v2345_v13  ;;  %v2387_v13 = vld [vmem:[%s3321_s5 + $0x30] ss:$8 sps:$4 sm:$0xff]  }
  0x98   :  { %1089 = vmatprep.subr.bf16.mxu1 %v2350_v14  ;;  %v2392_v14 = vld [vmem:[%s3321_s5 + $0x44] ss:$8 sps:$4 sm:$0xff]  }
  0x99   :  { %1634 = vmatpush1.bf16.msra.mxu0 %v2387_v13  ;;  %v3168_v13 = vld [vmem:[%s3324_s4] sm:$0xf] }
  0x9a   :  { %1635 = vmatprep.subr.bf16.mxu0 %v2392_v14  ;;  %v1171_v14 = vrot.slane %v3163_v12, %v2994_v54 }
  0x9b   :  { %1090 = vmatpush1.bf16.msra.mxu1 %v2348_v15  ;;  %v2390_v15 = vld [vmem:[%s3321_s5 + $0x40] ss:$8 sps:$4 sm:$0xff]  }
  0x9c   :  { %1091 = vmatprep.subr.bf16.mxu1 %v2353_v16  ;;  %v2395_v16 = vld [vmem:[%s3321_s5 + $0x54] ss:$8 sps:$4 sm:$0xff]  }
  0x9d   :  { %1636 = vmatpush1.bf16.msra.mxu0 %v2390_v15  ;;  %v1163_v15 = vrot.slane %v3163_v12, %v2988_v39 }
  0x9e   :  { %1637 = vmatprep.subr.bf16.mxu0 %v2395_v16  ;;  %v1159_v16 = vrot.slane %v3163_v12, %v2983_v37 }
  0x9f   :  { %1092 = vmatpush1.bf16.msra.mxu1 %v2351_v17  ;;  %v2393_v17 = vld [vmem:[%s3321_s5 + $0x50] ss:$8 sps:$4 sm:$0xff]  }
  0xa0   :  { %1093 = vmatprep.subr.bf16.mxu1 %v2356_v18 }
  0xa1   :  { %1638 = vmatpush1.bf16.msra.mxu0 %v2393_v17 }
  0xa2   :  { %1639 = vmatprep.subr.bf16.mxu0 %v2398_v36 }
  0xa3   :  { %1094 = vmatpush1.bf16.msra.mxu1 %v2354_v19 }
  0xa4   :  { %1095 = vmatprep.subr.bf16.mxu1 %v2359_v20 }
  0xa5   :  { %1640 = vmatpush1.bf16.msra.mxu0 %v2396_v38 }
  0xa7   :  { %1096 = vmatpush1.bf16.msra.mxu1 %v2357_v21 }
  0xa8   :  { %1097 = vmatprep.subr.bf16.mxu1 %v2362_v22 }
  0xab   :  { %1098 = vmatpush1.bf16.msra.mxu1 %v2360_v23 }
  0xac   :  { %1099 = vmatprep.subr.bf16.mxu1 %v2365_v24 }
  0xaf   :  { %1100 = vmatpush1.bf16.msra.mxu1 %v2363_v25 }
  0xb0   :  { %1101 = vmatprep.subr.bf16.mxu1 %v2368_v26 }
  0xb3   :  { %1102 = vmatpush1.bf16.msra.mxu1 %v2366_v27 }
  0xb4   :  { %1103 = vmatprep.subr.bf16.mxu1 %v2371_v28 }
  0xb7   :  { %1104 = vmatpush1.bf16.msra.mxu1 %v2369_v29 }
  0xb8   :  { %1105 = vmatprep.subr.bf16.mxu1 %v2374_v30 }
  0xbb   :  { %1106 = vmatpush1.bf16.msra.mxu1 %v2372_v31 }
  0xbc   :  { %1107 = vmatprep.subr.bf16.mxu1 %v2377_v32 }
  0xbf   :  { %1108 = vmatpush1.bf16.msra.mxu1 %v2375_v33 }
  0xc2   :  { %1110 = vmatmul.mubr.bf16.vlgmr.msra.gmra.mrb[4].mxu1 %v2790_v35 }
 0x115   :  { %v988_v42 = vpop.f32.mrb[0].mxu1 }
 0x116   :  { %v989_v43 = vadd.f32 %v988_v42, %v268_v40  ;;  %v990_v44 = vpop.f32.mrb[1].mxu1  ;;  %v2401_v40 = vld [vmem:[%s3321_s5 + $0x74] ss:$8 sps:$4 sm:$0xff]   ;;  %v2404_v42 = vld [vmem:[%s3321_s5 + $0x84] ss:$8 sps:$4 sm:$0xff]  }
 0x117   :  { %v991_v45 = vadd.f32 %v990_v44, %v272_v41  ;;  %v992_v46 = vpop.f32.mrb[2].mxu1  ;;  %v1029_v35 = vpop.f32.mrb[0].mxu0  ;;  %v2399_v41 = vld [vmem:[%s3321_s5 + $0x70] ss:$8 sps:$4 sm:$0xff]   ;;  %1641 = vmatprep.subr.bf16.mxu0 %v2401_v40  ;;  %v2407_v44 = vld [vmem:[%s3321_s5 + $0x94] ss:$8 sps:$4 sm:$0xff]  }
 0x118   :  { %v993_v47 = vpop.f32.mrb[3].mxu1  ;;  %v1030_v48 = vadd.f32 %v1029_v35, %v989_v43  ;;  %v1031_v49 = vpop.f32.mrb[1].mxu0  ;;  %1642 = vmatpush1.bf16.msra.mxu0 %v2399_v41  ;;  %v2402_v43 = vld [vmem:[%s3321_s5 + $0x80] ss:$8 sps:$4 sm:$0xff]   ;;  %v2410_v46 = vld [vmem:[%s3321_s5 + $0xa4] ss:$8 sps:$4 sm:$0xff]  }
 0x119   :  { %v1032_v50 = vadd.f32 %v1031_v49, %v991_v45  ;;  %v1033_v51 = vpop.f32.mrb[2].mxu0  ;;  %1643 = vmatprep.subr.bf16.mxu0 %v2404_v42  ;;  %v2405_v45 = vld [vmem:[%s3321_s5 + $0x90] ss:$8 sps:$4 sm:$0xff]   ;;  %v2408_v35 = vld [vmem:[%s3321_s5 + $0xa0] ss:$8 sps:$4 sm:$0xff]  }
 0x11a   :  { %v1034_v52 = vpop.f32.mrb[3].mxu0  ;;  %v1119_v57 = vsel %vm1118_vm2, %v1030_v48, 0.0  ;;  %v2413_v47 = vld [vmem:[%s3321_s5 + $0xb4] ss:$8 sps:$4 sm:$0xff]   ;;  %v2416_v49 = vld [vmem:[%s3321_s5 + $0xc4] ss:$8 sps:$4 sm:$0xff]  }
 0x11b   :  { %v1120_v58 = vsel %vm1118_vm2, %v1032_v50, 0.0  ;;  %v2419_v51 = vld [vmem:[%s3321_s5 + $0xd4] ss:$8 sps:$4 sm:$0xff]   ;;  %v2417_v52 = vld [vmem:[%s3321_s5 + $0xd0] ss:$8 sps:$4 sm:$0xff]  }
 0x11c   :  { %v1121_v62 = vadd.f32 %v1120_v58, %v1119_v57  ;;  %1644 = vmatpush1.bf16.msra.mxu0 %v2402_v43  ;;  %v2425_v57 = vld [vmem:[%s3321_s5 + $0xf4] ss:$8 sps:$4 sm:$0xff]   ;;  %v2423_v58 = vld [vmem:[%s3321_s5 + $0xf0] ss:$8 sps:$4 sm:$0xff]  }
 0x11d   :  { %1645 = vmatprep.subr.bf16.mxu0 %v2407_v44 }
 0x120   :  { %1646 = vmatpush1.bf16.msra.mxu0 %v2405_v45 }
 0x121   :  { %1647 = vmatprep.subr.bf16.mxu0 %v2410_v46 }
 0x124   :  { %1648 = vmatpush1.bf16.msra.mxu0 %v2408_v35 }
 0x125   :  { %1649 = vmatprep.subr.bf16.mxu0 %v2413_v47  ;;  %v2426_v47 = vld [vmem:[%s3321_s5 + $0x100] ss:$8 sps:$4 sm:$0xff]  }
 0x195   :  { %v1111_v59 = vpop.f32.mrb[4].mxu1 }
 0x196   :  { %v2174_v60 = vadd.f32 %v1111_v59, %v276_v55  ;;  %v1113_v61 = vpop.f32.mrb[5].mxu1  ;;  %v2422_v55 = vld [vmem:[%s3321_s5 + $0xe4] ss:$8 sps:$4 sm:$0xff]  }
 0x197   :  { %v2175_v63 = vadd.f32 %v1113_v61, %v280_v56  ;;  %v1115_v0 = vpop.f32.mrb[6].mxu1  ;;  %v2420_v56 = vld [vmem:[%s3321_s5 + $0xe0] ss:$8 sps:$4 sm:$0xff]   ;;  %v2428_v59 = vld [vmem:[%s3321_s5 + $0x104] ss:$8 sps:$4 sm:$0xff]  }
 0x198   :  { %v1122_v1 = vsel %vm1118_vm2, %v2174_v60, 0.0  ;;  %v1116_v2 = vpop.f32.mrb[7].mxu1  ;;  %v2475_v61 = vld [vmem:[%s3322_s7] sm:$0xff]   ;;  %v2478_v0 = vld [vmem:[%s3322_s7 + $0x50] sm:$0xff]  }
 0x199   :  { %v1123_v3 = vadd.f32 %v1122_v1, %v1121_v62  ;;  %v1124_v4 = vsel %vm1118_vm2, %v2175_v63, 0.0  ;;  %v2476_v62 = vld [vmem:[%s3322_s7 + $0x48] sm:$0xff]   ;;  %v2479_v1 = vld [vmem:[%s3322_s7 + $0x10] sm:$0xff]   ;;  %v2480_v2 = vld [vmem:[%s3322_s7 + $0x58] sm:$0xff]  }
 0x19b   :  { %v1125_v5 = vadd.f32 %v1124_v4, %v1123_v3  ;;  %v2481_v3 = vld [vmem:[%s3322_s7 + $0x18] sm:$0xff]   ;;  %v2482_v4 = vld [vmem:[%s3322_s7 + $0x60] sm:$0xff]  }
 0x19d   :  { %1126 = vadd.xlane.f32.xlu0 %v1125_v5  ;;  %v2483_v5 = vld [vmem:[%s3322_s7 + $0x20] sm:$0xff]  }
 0x22a   :  { %v1127_v18 = vpop.xlane.xlu0 %1126 }
 0x22b   :  { %v1129_v19 = vmul.f32 0.001953125, %v1127_v18  ;;  %v1189_v18 = vrot.slane %v3168_v13, %v2988_v39 }
 0x22d   :  { %v3038_v20 = vsub.f32 %v1030_v48, %v1129_v19  ;;  %v3040_v21 = vsub.f32 %v1032_v50, %v1129_v19  ;;  %v3042_v22 = vsub.f32 %v2174_v60, %v1129_v19  ;;  %v3044_v23 = vsub.f32 %v2175_v63, %v1129_v19  ;;  %v2411_v48 = vld [vmem:[%s3321_s5 + $0xb0] ss:$8 sps:$4 sm:$0xff]   ;;  %v2414_v50 = vld [vmem:[%s3321_s5 + $0xc0] ss:$8 sps:$4 sm:$0xff]  }
 0x22e   :  { %1650 = vmatpush1.bf16.msra.mxu0 %v2411_v48  ;;  %v2474_v60 = vld [vmem:[%s3322_s7 + $0x40] sm:$0xff]   ;;  %v2477_v63 = vld [vmem:[%s3322_s7 + $0x8] sm:$0xff]   ;;  %v1185_v19 = vrot.slane %v3168_v13, %v2983_v37 }
 0x22f   :  { %v1134_v24 = vmul.f32 %v3038_v20, %v3038_v20  ;;  %v1135_v25 = vmul.f32 %v3040_v21, %v3040_v21  ;;  %v1136_v26 = vmul.f32 %v3042_v22, %v3042_v22  ;;  %v1137_v27 = vmul.f32 %v3044_v23, %v3044_v23  ;;  %1651 = vmatprep.subr.bf16.mxu0 %v2416_v49 }
 0x230   :  { %2148 = vmatprep.subr.bf16.mxu1 %v2474_v60  ;;  %v2438_v60 = vld [vmem:[%s3321_s5 + $0x140] ss:$8 sps:$4 sm:$0xff]  }
 0x231   :  { %v1138_v28 = vsel %vm1118_vm2, %v1134_v24, 0.0  ;;  %v1139_v29 = vsel %vm1118_vm2, %v1135_v25, 0.0  ;;  %v1141_v31 = vsel %vm1118_vm2, %v1136_v26, 0.0  ;;  %v1143_v33 = vsel %vm1118_vm2, %v1137_v27, 0.0  ;;  %2149 = vmatpush3.bf16.msra.mxu1 %v2475_v61  ;;  %v2443_v61 = vld [vmem:[%s3321_s5 + $0x154] ss:$8 sps:$4 sm:$0xff]  }
 0x232   :  { %v1140_v30 = vadd.f32 %v1139_v29, %v1138_v28  ;;  %1652 = vmatpush1.bf16.msra.mxu0 %v2414_v50  ;;  %2150 = vmatprep.subr.bf16.mxu1 %v2476_v62  ;;  %v1197_v27 = vrot.slane %v3168_v13, %v2994_v54  ;;  %v2431_v50 = vld [vmem:[%s3321_s5 + $0x114] ss:$8 sps:$4 sm:$0xff]   ;;  %v2441_v62 = vld [vmem:[%s3321_s5 + $0x150] ss:$8 sps:$4 sm:$0xff]  }
 0x233   :  { %1653 = vmatprep.subr.bf16.mxu0 %v2419_v51 }
 0x234   :  { %v1142_v32 = vadd.f32 %v1141_v31, %v1140_v30 }
 0x235   :  { %2151 = vmatpush3.bf16.msra.mxu1 %v2477_v63  ;;  %v2446_v63 = vld [vmem:[%s3321_s5 + $0x164] ss:$8 sps:$4 sm:$0xff]  }
 0x236   :  { %v1144_v34 = vadd.f32 %v1143_v33, %v1142_v32  ;;  %1654 = vmatpush1.bf16.msra.mxu0 %v2417_v52  ;;  %2152 = vmatprep.subr.bf16.mxu1 %v2478_v0  ;;  %v2429_v52 = vld [vmem:[%s3321_s5 + $0x110] ss:$8 sps:$4 sm:$0xff]   ;;  %v2444_v0 = vld [vmem:[%s3321_s5 + $0x160] ss:$8 sps:$4 sm:$0xff]  }
 0x237   :  { %1655 = vmatprep.subr.bf16.mxu0 %v2422_v55  ;;  %v2434_v55 = vld [vmem:[%s3321_s5 + $0x124] ss:$8 sps:$4 sm:$0xff]  }
 0x238   :  { %1145 = vadd.xlane.f32.xlu0 %v1144_v34 }
 0x239   :  { %2153 = vmatpush3.bf16.msra.mxu1 %v2479_v1  ;;  %v2449_v1 = vld [vmem:[%s3321_s5 + $0x174] ss:$8 sps:$4 sm:$0xff]  }
 0x23a   :  { %1656 = vmatpush1.bf16.msra.mxu0 %v2420_v56  ;;  %2154 = vmatprep.subr.bf16.mxu1 %v2480_v2  ;;  %v2432_v56 = vld [vmem:[%s3321_s5 + $0x120] ss:$8 sps:$4 sm:$0xff]   ;;  %v1167_v2 = vrot.slane %v3163_v12, %v2992_v53 }
 0x23b   :  { %1657 = vmatprep.subr.bf16.mxu0 %v2425_v57  ;;  %v2437_v57 = vld [vmem:[%s3321_s5 + $0x134] ss:$8 sps:$4 sm:$0xff]  }
 0x23d   :  { %2155 = vmatpush3.bf16.msra.mxu1 %v2481_v3  ;;  %v2447_v3 = vld [vmem:[%s3321_s5 + $0x170] ss:$8 sps:$4 sm:$0xff]  }
 0x23e   :  { %1658 = vmatpush1.bf16.msra.mxu0 %v2423_v58  ;;  %2156 = vmatprep.subr.bf16.mxu1 %v2482_v4  ;;  %v2435_v58 = vld [vmem:[%s3321_s5 + $0x130] ss:$8 sps:$4 sm:$0xff]  }
 0x23f   :  { %1668 = vmatprep.subr.bf16.mxu0 %v2428_v59  ;;  %v2440_v59 = vld [vmem:[%s3321_s5 + $0x144] ss:$8 sps:$4 sm:$0xff]  }
 0x241   :  { %2157 = vmatpush3.bf16.msra.mxu1 %v2483_v5  ;;  %v2452_v5 = vld [vmem:[%s3321_s5 + $0x184] ss:$8 sps:$4 sm:$0xff]  }
 0x242   :  { %2158 = vmatprep.subr.bf16.mxu1 %v2484_v6  ;;  %v1193_v6 = vrot.slane %v3168_v13, %v2992_v53  ;;  %v2458_v53 = vld [vmem:[%s3321_s5 + $0x1a4] ss:$8 sps:$4 sm:$0xff]   ;;  %v2461_v13 = vld [vmem:[%s3321_s5 + $0x1b4] ss:$8 sps:$4 sm:$0xff]  }
 0x245   :  { %2159 = vmatpush3.bf16.msra.mxu1 %v2485_v7  ;;  %v2450_v7 = vld [vmem:[%s3321_s5 + $0x180] ss:$8 sps:$4 sm:$0xff]  }
 0x246   :  { %2160 = vmatprep.subr.bf16.mxu1 %v2486_v8 }
 0x2c5   :  { %v1146_v9 = vpop.xlane.xlu0 %1145 }
 0x2c6   :  { %v1147_v10 = vmul.f32 0.001953125, %v1146_v9  ;;  %v2455_v9 = vld [vmem:[%s3321_s5 + $0x194] ss:$8 sps:$4 sm:$0xff]  }
 0x2c8   :  { %v1148_v11 = vadd.f32 1e-05, %v1147_v10 }
 0x2ca   :  { %2490 = vrsqrt.f32 %v1148_v11  ;;  %v2456_v11 = vld [vmem:[%s3321_s5 + $0x1a0] ss:$8 sps:$4 sm:$0xff]  }
 0x2d4   :  { %v3176_v17 = vpop.eup %2490 }
 0x2d5   :  { %v1151_v24 = vmul.f32 %v3176_v17, %v3040_v21  ;;  %v1150_v25 = vmul.f32 %v3176_v17, %v3038_v20  ;;  %v1153_v26 = vmul.f32 %v3176_v17, %v3044_v23  ;;  %v1152_v4 = vmul.f32 %v3176_v17, %v3042_v22  ;;  %v2453_v22 = vld [vmem:[%s3321_s5 + $0x190] ss:$8 sps:$4 sm:$0xff]   ;;  %v2467_v17 = vld [vmem:[%s3321_s5 + $0x1d4] ss:$8 sps:$4 sm:$0xff]  }
 0x2d7   :  { %v1177_v28 = vmul.f32 %v1163_v15, %v1151_v24  ;;  %v1176_v29 = vmul.f32 %v1159_v16, %v1150_v25  ;;  %v1179_v30 = vmul.f32 %v1171_v14, %v1153_v26  ;;  %v1178_v8 = vmul.f32 %v1167_v2, %v1152_v4  ;;  %v2459_v14 = vld [vmem:[%s3321_s5 + $0x1b0] ss:$8 sps:$4 sm:$0xff]   ;;  %v2464_v15 = vld [vmem:[%s3321_s5 + $0x1c4] ss:$8 sps:$4 sm:$0xff]   ;;  %v2462_v16 = vld [vmem:[%s3321_s5 + $0x1c0] ss:$8 sps:$4 sm:$0xff]  }
 0x2d8   :  { %v2468_v25 = vld [vmem:[%s3321_s5 + $0x1e0] ss:$8 sps:$4 sm:$0xff]   ;;  %v2473_v26 = vld [vmem:[%s3321_s5 + $0x1f4] ss:$8 sps:$4 sm:$0xff]  }
 0x2d9   :  { %v1203_v31 = vadd.f32 %v1189_v18, %v1177_v28  ;;  %v1202_v32 = vadd.f32 %v1185_v19, %v1176_v29  ;;  %v1205_v33 = vadd.f32 %v1197_v27, %v1179_v30  ;;  %v1204_v10 = vadd.f32 %v1193_v6, %v1178_v8  ;;  %v2465_v18 = vld [vmem:[%s3321_s5 + $0x1d0] ss:$8 sps:$4 sm:$0xff]   ;;  %v2470_v19 = vld [vmem:[%s3321_s5 + $0x1e4] ss:$8 sps:$4 sm:$0xff]  }
 0x2da   :  { %v2471_v29 = vld [vmem:[%s3321_s5 + $0x1f0] ss:$8 sps:$4 sm:$0xff]  }
 0x2db   :  { %v1212_v34 = vmul.f32 0.70710677, %v1203_v31  ;;  %v1211_v36 = vmul.f32 0.70710677, %v1202_v32  ;;  %v1214_v38 = vmul.f32 0.70710677, %v1205_v33 }
 0x2dc   :  { %v1207_v40 = vmul.f32 0.5, %v1203_v31  ;;  %v1206_v42 = vmul.f32 0.5, %v1202_v32  ;;  %v1209_v44 = vmul.f32 0.5, %v1205_v33  ;;  %v1213_v12 = vmul.f32 0.70710677, %v1204_v10  ;;  %v2487_v32 = vld [vmem:[%s3322_s7 + $0x30] sm:$0xff]  }
 0x2dd   :  { %2492 = verf.f32 %v1212_v34  ;;  %v1208_v28 = vmul.f32 0.5, %v1204_v10  ;;  %2161 = vmatpush3.bf16.msra.mxu1 %v2487_v32  ;;  %v2488_v33 = vld [vmem:[%s3322_s7 + $0x78] sm:$0xff]  }
 0x2de   :  { %2494 = verf.f32 %v1211_v36  ;;  %v2489_v34 = vld [vmem:[%s3322_s7 + $0x38] sm:$0xff]   ;;  %2162 = vmatprep.subr.bf16.mxu1 %v2488_v33  ;;  %v1295_v36 = vld [vmem:[%s3325_s6] sm:$0x3] }
 0x2df   :  { %2496 = verf.f32 %v1214_v38  ;;  %v1300_v38 = vrot.slane %v1295_v36, %v2983_v37  ;;  %v18_v37 = vstv %s3327_s10 }
 0x2e0   :  { %2498 = verf.f32 %v1213_v12  ;;  %19 = vst [vmem:[#allocation2] sm:$0x1] %v18_v37 }
 0x2e1   :  { %2163 = vmatpush3.bf16.msra.mxu1 %v2489_v34 }
 0x2e7   :  { %v2493_v21 = vpop.eup %2492 }
 0x2e8   :  { %v2495_v20 = vpop.eup %2494  ;;  %v1220_v41 = vadd.f32 1.0, %v2493_v21  ;;  %v1304_v21 = vrot.slane %v1295_v36, %v2988_v39 }
 0x2e9   :  { %v2497_v23 = vpop.eup %2496  ;;  %v1219_v43 = vadd.f32 1.0, %v2495_v20 }
 0x2ea   :  { %v1224_v54 = vmul.f32 %v1220_v41, %v1207_v40  ;;  %v1222_v45 = vadd.f32 1.0, %v2497_v23  ;;  %v2499_v24 = vpop.eup %2498 }
 0x2eb   :  { %v1223_v46 = vmul.f32 %v1219_v43, %v1206_v42  ;;  %v1221_v27 = vadd.f32 1.0, %v2499_v24 }
 0x2ec   :  { %v1228_v35 = vpack.c.bf16 %v1224_v54, %v1224_v54  ;;  %v1226_v48 = vmul.f32 %v1222_v45, %v1209_v44 }
 0x2ed   :  { %v1227_v49 = vpack.c.bf16 %v1223_v46, %v1223_v46  ;;  %v1225_v30 = vmul.f32 %v1221_v27, %v1208_v28  ;;  %v2129_v46 = vld [vmem:[%s3328_s8] ss:$0 sm:$0xff] }
 0x2ee   :  { %1659 = vmatprep.mubr.bf16.mxu0 %v1228_v35  ;;  %v1230_v51 = vpack.c.bf16 %v1226_v48, %v1226_v48 }
 0x2ef   :  { %1660 = vmatmul.mubr.bf16.vlgmr.msra.gmra.mrb[4].mxu0 %v1227_v49  ;;  %v1229_v31 = vpack.c.bf16 %v1225_v30, %v1225_v30 }
 0x2f0   :  { %1669 = vmatpush1.bf16.msra.mxu0 %v2426_v47  ;;  %1700 = vmatprep.mubr.bf16.mxu0 %v1230_v51  ;;  %v2146_v51 = vld [vmem:[%s3329_s9] ss:$0 sm:$0xff] }
 0x2f1   :  { %1670 = vmatprep.subr.bf16.mxu0 %v2431_v50 }
 0x2f4   :  { %1671 = vmatpush1.bf16.msra.mxu0 %v2429_v52 }
 0x2f5   :  { %1672 = vmatprep.subr.bf16.mxu0 %v2434_v55 }
 0x2f8   :  { %1673 = vmatpush1.bf16.msra.mxu0 %v2432_v56 }
 0x2f9   :  { %1674 = vmatprep.subr.bf16.mxu0 %v2437_v57  ;;  %v2147_v57 = vld [vmem:[#allocation2] ss:$0 sm:$0xff] }
 0x2fc   :  { %1675 = vmatpush1.bf16.msra.mxu0 %v2435_v58 }
 0x2fd   :  { %1676 = vmatprep.subr.bf16.mxu0 %v2440_v59 }
 0x300   :  { %1677 = vmatpush1.bf16.msra.mxu0 %v2438_v60 }
 0x301   :  { %1678 = vmatprep.subr.bf16.mxu0 %v2443_v61 }
 0x304   :  { %1679 = vmatpush1.bf16.msra.mxu0 %v2441_v62 }
 0x305   :  { %1680 = vmatprep.subr.bf16.mxu0 %v2446_v63 }
 0x308   :  { %1681 = vmatpush1.bf16.msra.mxu0 %v2444_v0 }
 0x309   :  { %1682 = vmatprep.subr.bf16.mxu0 %v2449_v1 }
 0x30c   :  { %1683 = vmatpush1.bf16.msra.mxu0 %v2447_v3 }
 0x30d   :  { %1684 = vmatprep.subr.bf16.mxu0 %v2452_v5 }
 0x310   :  { %1685 = vmatpush1.bf16.msra.mxu0 %v2450_v7 }
 0x311   :  { %1686 = vmatprep.subr.bf16.mxu0 %v2455_v9 }
 0x314   :  { %1687 = vmatpush1.bf16.msra.mxu0 %v2453_v22 }
 0x315   :  { %1688 = vmatprep.subr.bf16.mxu0 %v2458_v53 }
 0x318   :  { %1689 = vmatpush1.bf16.msra.mxu0 %v2456_v11 }
 0x319   :  { %1690 = vmatprep.subr.bf16.mxu0 %v2461_v13 }
 0x31c   :  { %1691 = vmatpush1.bf16.msra.mxu0 %v2459_v14 }
 0x31d   :  { %1692 = vmatprep.subr.bf16.mxu0 %v2464_v15 }
 0x320   :  { %1693 = vmatpush1.bf16.msra.mxu0 %v2462_v16 }
 0x321   :  { %1694 = vmatprep.subr.bf16.mxu0 %v2467_v17 }
 0x324   :  { %1695 = vmatpush1.bf16.msra.mxu0 %v2465_v18 }
 0x325   :  { %1696 = vmatprep.subr.bf16.mxu0 %v2470_v19 }
 0x328   :  { %1697 = vmatpush1.bf16.msra.mxu0 %v2468_v25 }
 0x329   :  { %1698 = vmatprep.subr.bf16.mxu0 %v2473_v26 }
 0x32c   :  { %1699 = vmatpush1.bf16.msra.mxu0 %v2471_v29 }
 0x32f   :  { %1701 = vmatmul.mubr.bf16.vlgmr.msra.gmra.mrb[4].mxu0 %v1229_v31 }
 0x402   :  { %v1702_v20 = vpop.f32.mrb[4].mxu0 }
 0x403   :  { %v2176_v40 = vadd.f32 %v1702_v20, %v1300_v38  ;;  %v1704_v41 = vpop.f32.mrb[5].mxu0 }
 0x404   :  { %v2177_v23 = vadd.f32 %v1704_v41, %v1304_v21  ;;  %v1706_v42 = vpop.f32.mrb[6].mxu0 }
 0x405   :  { %v1707_v43 = vpop.f32.mrb[7].mxu0  ;;  %v1721_v45 = vpack.c.bf16 %v2176_v40, %v2176_v40 }
 0x406   :  { %v1711_v54 = vcombine.low %v2176_v40, %v2177_v23  ;;  %v1722_v44 = vpack.c.bf16 %v2177_v23, %v2177_v23 }
 0x408   :  { %2128 = vst.sshfl [vmem:[%s3326_s11] sm:$0x33 pattern:$0x76325410] %v1711_v54  ;;  %1890 = vmatprep.mubr.bf16.mxu1 %v1722_v44 }
 0x409   :  { %1891 = vmatmul.mubr.bf16.vlgmr.msra.gmra.mrb[8].mxu1 %v1721_v45 }
 0x4dc   :  { %v2164_v39 = vpop.f32.mrb[8].mxu1 }
 0x4dd   :  { %v2165_v35 = vpop.f32.mrb[9].mxu1 }
 0x4de   :  { %v2166_v47 = vadd.f32 %v2165_v35, %v2164_v39  ;;  %v2167_v48 = vpop.f32.mrb[10].mxu1 }
 0x4df   :  { %v2168_v49 = vpop.f32.mrb[11].mxu1 }
 0x4e0   :  { %v1893_v50 = vadd.f32 %v2166_v47, %v2129_v46 }
 0x4e2   :  { %v1898_v52 = vmax.f32 %v1893_v50, 0.0 }
 0x4e4   :  { %v1906_v55 = vmul.f32 %v2146_v51, %v1898_v52 }
 0x4e6   :  { %v1908_v56 = vsel %vm1907_vm3, %v1906_v55, 0.0 }
 0x4e7   :  { %1909 = vadd.xlane.f32.xlu1 %v1908_v56 }
 0x574   :  { %v1910_v58 = vpop.xlane.xlu1 %1909 }
 0x575   :  { %v1918_v59 = vadd.f32 %v2147_v57, %v1910_v58 }
 0x577   :  { %v1919_v60 = vsub.f32 0.0, %v1918_v59 }
 0x579   :  { %v1920_v61 = vmul.f32 1.442695, %v1919_v60 }
 0x57b   :  { %2500 = vpow2.f32 %v1920_v61 }
 0x585   :  { %v2501_v62 = vpop.eup %2500 }
 0x586   :  { %v1922_v63 = vadd.f32 1.0, %v2501_v62 }
 0x588   :  { %2502 = vrcp.f32 %v1922_v63 }
 0x592   :  { %v2503_v0 = vpop.eup %2502 }
 0x593   :  { %v1924_v1 = vmul.f32 0.25, %v2503_v0 }
 0x595   :  { %v1925_v2 = vadd.f32 0.05, %v1924_v1 }
 0x597   :  { %1927 = vst.msk [vmem:[%s3330_s12] sm:$0x3] %vm1926_vm4, %v1925_v2 }

// kernel: sparse_forward.10
= control target key start
LH: loop header
LB: loop body
LE: loop exit
PB: predicated region body
PF: predicated region fallthrough
CT: control target
= control target key end

     0   :  { %s1279_s0 = inlined_call_operand.vmem [shape: f32[2,256], index: 0, kind: input, shape index: {}]   ;;  %s1280_s1 = inlined_call_operand.vmem [shape: f32[2,1], index: 1, kind: input, shape index: {}]   ;;  %s1281_s2 = inlined_call_operand.vmem [shape: bf16[256,128], index: 2, kind: input, shape index: {}]   ;;  %s1282_s3 = inlined_call_operand.vmem [shape: f32[1,128], index: 3, kind: input, shape index: {}]   ;;  %s1283_s4 = inlined_call_operand.vmem [shape: bf16[128,256], index: 4, kind: input, shape index: {}]   ;;  %s1284_s5 = inlined_call_operand.vmem [shape: f32[1,256], index: 5, kind: input, shape index: {}]   ;;  %s1285_s6 = inlined_call_operand.<no memory space> [shape: f32[1,1], index: 6, kind: input, shape index: {}]   ;;  %s1286_s8 = inlined_call_operand.vmem [shape: bf16[256,128], index: 8, kind: input, shape index: {}]   ;;  %s1287_s9 = inlined_call_operand.vmem [shape: f32[1,128], index: 9, kind: input, shape index: {}]   ;;  %s1288_s10 = inlined_call_operand.hbm [shape: f32[2,256], index: 10, kind: output, shape index: {0}]   ;;  %s1289_s11 = inlined_call_operand.vmem [shape: f32[2,128], index: 11, kind: output, shape index: {1}]   ;;  %s1290_s12 = inlined_call_operand.vmem [shape: f32[1,128], index: 12, kind: output, shape index: {2}]   ;;  %s1291_s7 = inlined_call_operand.<no memory space> [shape: f32[1,1], index: 7, kind: input, shape index: {}]  }
   0x1   :  { %v18_v0 = vstv %s1285_s6  ;;  %v20_v1 = vstv %s1291_s7 }
   0x2   :  { %19 = vst [vmem:[#allocation2] sm:$0x1] %v18_v0  ;;  %21 = vst [vmem:[#allocation3] sm:$0x1] %v20_v1 }
   0x3   :  { %v46_v2 = vld [vmem:[%s1280_s1] sm:$0x3]  ;;  %v972_v5 = vmov 0   ;;  %v54_v10 = vlaneseq  ;;  %v878_v11 = vld [vmem:[%s1281_s2 + $0x48] sm:$0xff]   ;;  %v880_v13 = vld [vmem:[%s1281_s2 + $0x50] sm:$0xff]  }
   0x4   :  { %v876_v4 = vld [vmem:[%s1281_s2 + $0x40] sm:$0xff]   ;;  %874 = vset.pattern.permute.xlu0 %v972_v5  ;;  %875 = vset.pattern.permute.xlu1 %v972_v5  ;;  %v879_v12 = vld [vmem:[%s1281_s2 + $0x8] sm:$0xff]   ;;  %v881_v15 = vld [vmem:[%s1281_s2 + $0x10] sm:$0xff]  }
   0x5   :  { %49 = vperm.xlu0 %874, %v46_v2   ;;  %v877_v8 = vld [vmem:[%s1281_s2] sm:$0xff]   ;;  %821 = vmatprep.subr.bf16.mxu0 %v876_v4  ;;  %v1070_v14 = vshrl.u32 %v54_v10, 7  ;;  %v882_v16 = vld [vmem:[%s1281_s2 + $0x58] sm:$0xff]   ;;  %v886_v23 = vld [vmem:[%s1281_s2 + $0x68] sm:$0xff]  }
   0x6   :  { %393 = vmatprep.mubr.bf16.mxu1 %v972_v5  ;;  %822 = vmatpush3.bf16.msra.mxu0 %v877_v8  ;;  %v883_v18 = vld [vmem:[%s1281_s2 + $0x18] sm:$0xff]   ;;  %v884_v19 = vld [vmem:[%s1281_s2 + $0x60] sm:$0xff]   ;;  %v887_v24 = vld [vmem:[%s1281_s2 + $0x28] sm:$0xff]  }
   0x7   :  { %823 = vmatprep.subr.bf16.mxu0 %v878_v11  ;;  %v1079_v17 = vsub.s32 0, %v1070_v14  ;;  %v885_v22 = vld [vmem:[%s1281_s2 + $0x20] sm:$0xff]   ;;  %v888_v25 = vld [vmem:[%s1281_s2 + $0x70] sm:$0xff]   ;;  %v890_v27 = vld [vmem:[%s1281_s2 + $0x78] sm:$0xff]  }
   0x8   :  { %v889_v26 = vld [vmem:[%s1281_s2 + $0x30] sm:$0xff]   ;;  %v892_v28 = vld [vmem:[%s1283_s4 + $0x4] ss:$8 sps:$4 sm:$0xff]   ;;  %v894_v29 = vld [vmem:[%s1283_s4] ss:$8 sps:$4 sm:$0xff]  }
   0x9   :  { %v418_v3 = vld [vmem:[#allocation2] sm:$0x1]  ;;  %v802_v7 = vld [vmem:[#allocation3] ss:$0 sm:$0xff]  ;;  %v895_v30 = vld [vmem:[%s1283_s4 + $0x14] ss:$8 sps:$4 sm:$0xff]   ;;  %361 = vmatprep.subr.bf16.mxu1 %v892_v28 }
   0xa   :  { %v419_v6 = vand.u32 2147483647, %v418_v3  ;;  %444 = vperm.xlu1 %875, %v802_v7   ;;  %824 = vmatpush3.bf16.msra.mxu0 %v879_v12  ;;  %v891_v31 = vld [vmem:[%s1281_s2 + $0x38] sm:$0xff]   ;;  %v898_v33 = vld [vmem:[%s1283_s4 + $0x24] ss:$8 sps:$4 sm:$0xff]  }
   0xb   :  { %825 = vmatprep.subr.bf16.mxu0 %v880_v13  ;;  %362 = vmatpush1.bf16.msra.mxu1 %v894_v29  ;;  %v897_v32 = vld [vmem:[%s1283_s4 + $0x10] ss:$8 sps:$4 sm:$0xff]   ;;  %v900_v34 = vld [vmem:[%s1283_s4 + $0x20] ss:$8 sps:$4 sm:$0xff]   ;;  %v901_v35 = vld [vmem:[%s1283_s4 + $0x34] ss:$8 sps:$4 sm:$0xff]  }
   0xc   :  { %v1057_v9 = vadd.f32 1e-06, %v419_v6  ;;  %363 = vmatprep.subr.bf16.mxu1 %v895_v30  ;;  %v903_v36 = vld [vmem:[%s1283_s4 + $0x30] ss:$8 sps:$4 sm:$0xff]   ;;  %v904_v37 = vld [vmem:[%s1283_s4 + $0x44] ss:$8 sps:$4 sm:$0xff]  }
   0xe   :  { %932 = vrcp.f32 %v1057_v9  ;;  %826 = vmatpush3.bf16.msra.mxu0 %v881_v15 }
   0xf   :  { %827 = vmatprep.subr.bf16.mxu0 %v882_v16  ;;  %364 = vmatpush1.bf16.msra.mxu1 %v897_v32 }
  0x10   :  { %365 = vmatprep.subr.bf16.mxu1 %v898_v33 }
  0x12   :  { %828 = vmatpush3.bf16.msra.mxu0 %v883_v18 }
  0x13   :  { %829 = vmatprep.subr.bf16.mxu0 %v884_v19  ;;  %366 = vmatpush1.bf16.msra.mxu1 %v900_v34 }
  0x14   :  { %367 = vmatprep.subr.bf16.mxu1 %v901_v35 }
  0x16   :  { %830 = vmatpush3.bf16.msra.mxu0 %v885_v22 }
  0x17   :  { %831 = vmatprep.subr.bf16.mxu0 %v886_v23 }
  0x18   :  { %v933_v20 = vpop.eup %932 }
  0x19   :  { %v432_v21 = vrot.slane %v933_v20, %v1079_v17 }
  0x1a   :  { %832 = vmatpush3.bf16.msra.mxu0 %v887_v24 }
  0x1b   :  { %434 = vperm.xlu0 %874, %v432_v21   ;;  %833 = vmatprep.subr.bf16.mxu0 %v888_v25 }
  0x1e   :  { %834 = vmatpush3.bf16.msra.mxu0 %v889_v26 }
  0x1f   :  { %835 = vmatprep.subr.bf16.mxu0 %v890_v27 }
  0x22   :  { %836 = vmatpush3.bf16.msra.mxu0 %v891_v31 }
  0x23   :  { %22 = vsyncpa [#allocation5], 0  ;;  %368 = vmatpush1.bf16.msra.mxu1 %v903_v36  ;;  %v906_v38 = vld [vmem:[%s1283_s4 + $0x40] ss:$8 sps:$4 sm:$0xff]   ;;  %v907_v39 = vld [vmem:[%s1283_s4 + $0x54] ss:$8 sps:$4 sm:$0xff]   ;;  %v470_v8 = vrot.slane %v1057_v9, %v1079_v17 }
  0x24   :  { %369 = vmatprep.subr.bf16.mxu1 %v904_v37  ;;  %v909_v40 = vld [vmem:[%s1283_s4 + $0x50] ss:$8 sps:$4 sm:$0xff]   ;;  %v973_v41 = vmov 269488144   ;;  %v974_v44 = vmov 1983009808  }
  0x25   :  { %v52_v42 = vunpack.c.l.s4 %v973_v41  ;;  %v65_v45 = vunpack.c.l.s4 %v974_v44  ;;  %v44_v46 = vld [vmem:[%s1279_s0] sm:$0xf]  ;;  %v975_v53 = vmov 0.0   ;;  %v910_v4 = vld [vmem:[%s1283_s4 + $0x64] ss:$8 sps:$4 sm:$0xff]   ;;  %472 = vperm.xlu1 %875, %v470_v8   ;;  %v920_v25 = vld [vmem:[%s1286_s8 + $0x50] sm:$0xff]  }
  0x26   :  { %v45_v48 = vand.u32 2147483647, %v44_v46  ;;  %v912_v5 = vld [vmem:[%s1283_s4 + $0x60] ss:$8 sps:$4 sm:$0xff]   ;;  %v913_v6 = vld [vmem:[%s1283_s4 + $0x74] ss:$8 sps:$4 sm:$0xff]  }
  0x27   :  { %370 = vmatpush1.bf16.msra.mxu1 %v906_v38  ;;  %v53_v43 = vunpack.c.0.s8 %v52_v42  ;;  %v66_v49 = vunpack.c.0.s8 %v65_v45  ;;  %v915_v7 = vld [vmem:[%s1283_s4 + $0x70] ss:$8 sps:$4 sm:$0xff]   ;;  %v767_v12 = vld [vmem:[%s1282_s3] ss:$0 sm:$0xff]  ;;  %v918_v23 = vld [vmem:[%s1286_s8 + $0x48] sm:$0xff]   ;;  %v277_v38 = vsub.s32 1, %v1070_v14 }
  0x28   :  { %371 = vmatprep.subr.bf16.mxu1 %v907_v39  ;;  %v916_v22 = vld [vmem:[%s1286_s8 + $0x40] sm:$0xff]   ;;  %v919_v24 = vld [vmem:[%s1286_s8 + $0x8] sm:$0xff]   ;;  %v921_v26 = vld [vmem:[%s1286_s8 + $0x10] sm:$0xff]   ;;  %vm667_vm1 = vcmask 1041408   ;;  %s976_s17 = smov [#allocation4]  }
  0x29   :  { %v56_v47 = vsub.s32 %v53_v43, %v1070_v14  ;;  %v69_v52 = vsub.s32 %v66_v49, %v1070_v14  ;;  %v917_v9 = vld [vmem:[%s1286_s8] sm:$0xff]   ;;  %843 = vmatprep.subr.bf16.mxu0 %v916_v22  ;;  %v922_v27 = vld [vmem:[%s1286_s8 + $0x58] sm:$0xff]   ;;  %v926_v31 = vld [vmem:[%s1286_s8 + $0x68] sm:$0xff]   ;;  %s750_s18 = sshll.u32 %s976_s17, 4  ;;  %s751_s18 = int_to_ptr.vmem [resolvable:$true] %s750_s18 }
  0x2a   :  { %v923_v28 = vld [vmem:[%s1286_s8 + $0x18] sm:$0xff]   ;;  %v924_v29 = vld [vmem:[%s1286_s8 + $0x60] sm:$0xff]   ;;  %v927_v32 = vld [vmem:[%s1286_s8 + $0x28] sm:$0xff]   ;;  %s948_s19 = scalar_lea.vmem %s751_s18, 64  ;;  %p953_p1 = scmp.lt.s32.totalorder %s751_s18, %s751_s18 }
  0x2b   :  { %372 = vmatpush1.bf16.msra.mxu1 %v909_v40  ;;  %v925_v30 = vld [vmem:[%s1286_s8 + $0x20] sm:$0xff]   ;;  %v928_v33 = vld [vmem:[%s1286_s8 + $0x70] sm:$0xff]   ;;  %v930_v35 = vld [vmem:[%s1286_s8 + $0x78] sm:$0xff]   ;;  %p949_p0 = scmp.ne.s32.totalorder %s751_s18, %s948_s19  ;;  %p954_p2 = scmp.lt.s32.totalorder %s948_s19, %s948_s19 }
  0x2c   :  { %373 = vmatprep.subr.bf16.mxu1 %v910_v4  ;;  %v929_v34 = vld [vmem:[%s1286_s8 + $0x30] sm:$0xff]   ;;  %v931_v36 = vld [vmem:[%s1286_s8 + $0x38] sm:$0xff]   ;;  %v269_v37 = vld [vmem:[%s1284_s5] sm:$0x3] }
  0x2d   :  { %v274_v39 = vrot.slane %v269_v37, %v1079_v17  ;;  %v278_v40 = vrot.slane %v269_v37, %v277_v38  ;;  %p955_p3 = por %p954_p2, %p953_p1 }
  0x2f   :  { %374 = vmatpush1.bf16.msra.mxu1 %v912_v5  ;;  %p956_p4 = pnand %p955_p3, %p949_p0 }
  0x30   :  { %375 = vmatprep.subr.bf16.mxu1 %v913_v6 }
  0x33   :  { %376 = vmatpush1.bf16.msra.mxu1 %v915_v7 }
  0x84   :  { %v50_v50 = vpop.permute.xlu0 %49 }
  0x85   :  { %v57_v51 = vrot.slane %v50_v50, %v56_v47 }
  0x87   :  { %vm59_vm0 = vcmp.gt.f32.partialorder %v45_v48, %v57_v51 }
  0x88   :  { %v766_v54 = vsel %vm59_vm0, 1.0, %v975_v53 }
  0x89   :  { %v62_v55 = vmul.f32 %v766_v54, %v44_v46  ;;  %v1162_v63 = vpop.permute.xlu1 %444 }
  0x8b   :  { %v1150_v56 = vrot.slane %v62_v55, %v69_v52  ;;  %v677_v57 = vand.u32 2147483647, %v62_v55 }
  0x8d   :  { %v1154_v58 = vcombine.high %v1150_v56, %v1150_v56  ;;  %v1156_v59 = vrot.slane %v677_v57, %v69_v52  ;;  %v74_v61 = vpack.c.bf16 %v1150_v56, %v1150_v56 }
  0x8f   :  { %v75_v60 = vpack.c.bf16 %v1154_v58, %v1154_v58 }
  0x91   :  { %243 = vmatprep.mubr.bf16.mxu0 %v75_v60 }
  0x92   :  { %244 = vmatmul.mubr.bf16.vlgmr.msra.gmra.mrb[0].mxu0 %v74_v61 }
  0x93   :  { %844 = vmatpush3.bf16.msra.mxu0 %v917_v9 }
  0x94   :  { %845 = vmatprep.subr.bf16.mxu0 %v918_v23 }
  0x97   :  { %846 = vmatpush3.bf16.msra.mxu0 %v919_v24 }
  0x98   :  { %847 = vmatprep.subr.bf16.mxu0 %v920_v25 }
  0x9a   :  { %v435_v62 = vpop.permute.xlu0 %434 }
  0x9b   :  { %v437_v0 = vmul.f32 %v435_v62, %v62_v55  ;;  %848 = vmatpush3.bf16.msra.mxu0 %v921_v26 }
  0x9c   :  { %849 = vmatprep.subr.bf16.mxu0 %v922_v27 }
  0x9d   :  { %v447_v1 = vadd.f32 %v1162_v63, %v437_v0 }
  0x9f   :  { %v448_v2 = vmax.f32 %v447_v1, 0.0  ;;  %850 = vmatpush3.bf16.msra.mxu0 %v923_v28 }
  0xa0   :  { %851 = vmatprep.subr.bf16.mxu0 %v924_v29 }
  0xa1   :  { %v1165_v3 = vrot.slane %v448_v2, %v69_v52 }
  0xa3   :  { %852 = vmatpush3.bf16.msra.mxu0 %v925_v30  ;;  %v457_v5 = vcombine.high %v1165_v3, %v1165_v3 }
  0xa4   :  { %853 = vmatprep.subr.bf16.mxu0 %v926_v31 }
  0xa7   :  { %854 = vmatpush3.bf16.msra.mxu0 %v927_v32 }
  0xa8   :  { %855 = vmatprep.subr.bf16.mxu0 %v928_v33 }
  0xab   :  { %856 = vmatpush3.bf16.msra.mxu0 %v929_v34  ;;  %v689_v34 = vsel %vm667_vm1, %v1156_v59, 0.0 }
  0xac   :  { %857 = vmatprep.subr.bf16.mxu0 %v930_v35 }
  0xaf   :  { %858 = vmatpush3.bf16.msra.mxu0 %v931_v36 }
 0x165   :  { %v837_v11 = vpop.f32.mrb[0].mxu0 }
 0x166   :  { %v838_v13 = vpop.f32.mrb[1].mxu0 }
 0x167   :  { %v839_v15 = vadd.f32 %v838_v13, %v837_v11  ;;  %v840_v16 = vpop.f32.mrb[2].mxu0 }
 0x168   :  { %v841_v18 = vpop.f32.mrb[3].mxu0 }
 0x169   :  { %v246_v19 = vadd.f32 %v839_v15, %v767_v12  ;;  %v473_v15 = vpop.permute.xlu1 %472 }
 0x16b   :  { %v251_v20 = vmax.f32 %v246_v19, 0.0 }
 0x16d   :  { %v252_v21 = vpack.c.bf16 %v251_v20, %v251_v20 }
 0x16f   :  { %394 = vmatmul.mubr.bf16.vlgmr.msra.gmra.mrb[0].mxu1 %v252_v21 }
 0x242   :  { %v395_v41 = vpop.f32.mrb[0].mxu1 }
 0x243   :  { %v396_v42 = vadd.f32 %v395_v41, %v274_v39  ;;  %v397_v43 = vpop.f32.mrb[1].mxu1 }
 0x244   :  { %v398_v44 = vadd.f32 %v397_v43, %v278_v40  ;;  %v399_v45 = vpop.f32.mrb[2].mxu1 }
 0x245   :  { %v402_v46 = vsub.f32 0.0, %v396_v42  ;;  %v400_v47 = vpop.f32.mrb[3].mxu1 }
 0x246   :  { %v403_v48 = vsub.f32 0.0, %v398_v44 }
 0x247   :  { %v404_v49 = vmul.f32 1.442695, %v402_v46 }
 0x248   :  { %v406_v50 = vmul.f32 1.442695, %v403_v48 }
 0x249   :  { %934 = vpow2.f32 %v404_v49 }
 0x24a   :  { %936 = vpow2.f32 %v406_v50 }
 0x253   :  { %v935_v51 = vpop.eup %934 }
 0x254   :  { %v937_v52 = vpop.eup %936  ;;  %v408_v53 = vadd.f32 1.0, %v935_v51 }
 0x255   :  { %v409_v54 = vadd.f32 1.0, %v937_v52 }
 0x256   :  { %938 = vrcp.f32 %v408_v53 }
 0x257   :  { %940 = vrcp.f32 %v409_v54 }
 0x260   :  { %v939_v14 = vpop.eup %938 }
 0x261   :  { %v941_v17 = vpop.eup %940  ;;  %v412_v55 = vmul.f32 6.0, %v939_v14 }
 0x262   :  { %v413_v57 = vmul.f32 6.0, %v941_v17 }
 0x263   :  { %v414_v60 = vadd.f32 2.0, %v412_v55  ;;  %v737_v55 = vand.u32 127, %v54_v10  ;;  %v804_v10 = vld [vmem:[%s1287_s9] ss:$0 sm:$0xff] }
 0x264   :  { %v415_v61 = vadd.f32 2.0, %v413_v57 }
 0x265   :  { %v865_v62 = vround.rtne.f32 %v414_v60  ;;  %vm738_vm2 = vcmp.eq.s32.totalorder %v737_v55, 0  ;;  %vm740_vm3 = vcmp.eq.s32.totalorder %v737_v55, 1 }
 0x266   :  { %v866_v0 = vround.rtne.f32 %v415_v61 }
 0x267   :  { %942 = vpow2.f32 %v865_v62 }
 0x268   :  { %944 = vpow2.f32 %v866_v0 }
 0x271   :  { %v943_v1 = vpop.eup %942 }
 0x272   :  { %v945_v2 = vpop.eup %944  ;;  %v800_v4 = vadd.f32 -1.0, %v943_v1 }
 0x273   :  { %v801_v6 = vadd.f32 -1.0, %v945_v2 }
 0x274   :  { %v460_v7 = vmin.f32 %v800_v4, %v1165_v3 }
 0x275   :  { %v461_v8 = vmin.f32 %v801_v6, %v457_v5 }
 0x276   :  { %v867_v11 = vround.rtne.f32 %v460_v7 }
 0x277   :  { %v868_v12 = vround.rtne.f32 %v461_v8 }
 0x278   :  { %v464_v13 = vsub.f32 %v867_v11, %v1162_v63 }
 0x279   :  { %v465_v16 = vsub.f32 %v868_v12, %v1162_v63 }
 0x27a   :  { %v475_v18 = vmul.f32 %v473_v15, %v464_v13 }
 0x27b   :  { %v476_v19 = vmul.f32 %v473_v15, %v465_v16 }
 0x27c   :  { %v675_v20 = vsub.f32 %v475_v18, %v1150_v56  ;;  %v489_v23 = vpack.c.bf16 %v475_v18, %v475_v18  ;;  %v686_v56 = vcombine.high %v1156_v59, %v1156_v59 }
 0x27d   :  { %v676_v21 = vsub.f32 %v476_v19, %v1154_v58  ;;  %v490_v22 = vpack.c.bf16 %v476_v19, %v476_v19  ;;  %v479_v9 = vcombine.low %v475_v18, %v476_v19 }
 0x27e   :  { %v694_v24 = vmul.f32 %v675_v20, %v675_v20  ;;  %v701_v25 = vand.u32 2147483647, %v675_v20  ;;  %v690_v33 = vsel %vm667_vm1, %v686_v56, 0.0 }
 0x27f   :  { %658 = vmatprep.mubr.bf16.mxu0 %v490_v22  ;;  %v695_v3 = vmul.f32 %v676_v21, %v676_v21  ;;  %v702_v26 = vand.u32 2147483647, %v676_v21  ;;  %803 = vst.sshfl [vmem:[#allocation4] sm:$0x33 pattern:$0x76325410] %v479_v9  ;;  %v691_v35 = vadd.f32 %v690_v33, %v689_v34 }
 0x280   :  { %659 = vmatmul.mubr.bf16.vlgmr.msra.gmra.mrb[4].mxu0 %v489_v23  ;;  %v696_v27 = vsel %vm667_vm1, %v694_v24, 0.0  ;;  %v703_v63 = vmul.f32 %v939_v14, %v701_v25 }
 0x281   :  { %v697_v28 = vsel %vm667_vm1, %v695_v3, 0.0  ;;  %v704_v29 = vmul.f32 %v941_v17, %v702_v26 }
 0x282   :  { %v698_v58 = vadd.f32 %v697_v28, %v696_v27  ;;  %v705_v30 = vsel %vm667_vm1, %v703_v63, 0.0 }
 0x283   :  { %v706_v31 = vsel %vm667_vm1, %v704_v29, 0.0 }
 0x284   :  { %699 = vadd.xlane.f32.xlu1 %v698_v58  ;;  %v707_v32 = vadd.f32 %v706_v31, %v705_v30 }
 0x286   :  { %708 = vadd.xlane.f32.xlu0 %v707_v32 }
 0x28a   :  { %692 = vadd.xlane.f32.xlu0 %v691_v35 }
 0x311   :  { %v700_v36 = vpop.xlane.xlu1 %699 }
 0x312   :  { %v718_v37 = vsel %vm667_vm1, %v700_v36, 0.0 }
 0x313   :  { %v719_v38 = vrot.slane %v718_v37, 4  ;;  %v709_v39 = vpop.xlane.xlu0 %708 }
 0x314   :  { %v726_v40 = vsel %vm667_vm1, %v709_v39, 0.0 }
 0x315   :  { %v720_v41 = vadd.f32 %v719_v38, %v718_v37  ;;  %v727_v42 = vrot.slane %v726_v40, 4 }
 0x317   :  { %v721_v43 = vrot.slane %v720_v41, 2  ;;  %v728_v44 = vadd.f32 %v727_v42, %v726_v40  ;;  %v693_v45 = vpop.xlane.xlu0 %692 }
 0x318   :  { %v710_v46 = vsel %vm667_vm1, %v693_v45, 0.0 }
 0x319   :  { %v722_v47 = vadd.f32 %v721_v43, %v720_v41  ;;  %v729_v48 = vrot.slane %v728_v44, 2  ;;  %v711_v49 = vrot.slane %v710_v46, 4 }
 0x31b   :  { %v723_v59 = vrot.slane %v722_v47, 1  ;;  %v730_v50 = vadd.f32 %v729_v48, %v728_v44  ;;  %v712_v51 = vadd.f32 %v711_v49, %v710_v46 }
 0x31d   :  { %v731_v52 = vrot.slane %v730_v50, 1  ;;  %v713_v53 = vrot.slane %v712_v51, 2  ;;  %v724_v54 = vadd.f32 %v723_v59, %v722_v47 }
 0x31f   :  { %v732_v14 = vadd.f32 %v731_v52, %v730_v50  ;;  %v714_v17 = vadd.f32 %v713_v53, %v712_v51  ;;  %v725_v61 = vmul.f32 0.001953125, %v724_v54 }
 0x321   :  { %v733_v57 = vmul.f32 0.5, %v732_v14  ;;  %v715_v60 = vrot.slane %v714_v17, 1 }
 0x323   :  { %v734_v62 = vmul.f32 0.5, %v733_v57  ;;  %v716_v0 = vadd.f32 %v715_v60, %v714_v17 }
 0x325   :  { %v735_v1 = vadd.f32 %v734_v62, %v725_v61  ;;  %v717_v2 = vmul.f32 0.5, %v716_v0 }
 0x327   :  { %v739_v4 = vsel %vm738_vm2, %v717_v2, 0.0  ;;  %v741_v5 = vsel %vm740_vm3, %v735_v1, 0.0 }
 0x328   :  { %v742_v6 = vadd.f32 %v741_v5, %v739_v4 }
 0x32a   :  { %743 = vst [vmem:[%s1290_s12] sm:$0x1] %v742_v6 }
 0x353   :  { %v859_v7 = vpop.f32.mrb[4].mxu0 }
 0x354   :  { %v860_v8 = vpop.f32.mrb[5].mxu0 }
 0x355   :  { %v861_v11 = vadd.f32 %v860_v8, %v859_v7  ;;  %v862_v12 = vpop.f32.mrb[6].mxu0 }
 0x356   :  { %v863_v13 = vpop.f32.mrb[7].mxu0 }
 0x357   :  { %v661_v15 = vadd.f32 %v861_v11, %v804_v10 }
 0x359   :  { %v666_v16 = vmul.f32 %v661_v15, %v661_v15 }
 0x35b   :  { %v668_v18 = vsel %vm667_vm1, %v666_v16, 0.0 }
 0x35c   :  { %669 = vadd.xlane.f32.xlu0 %v668_v18 }
 0x35d   :  { %959 = shalt.err (!%p956_p4)
}
 0x35e   :  { %s960_s20 = scalar_lea.hbm %s1288_s10, 64 }
 0x35f   :  { %p961_p5 = scmp.ne.s32.totalorder %s1288_s10, %s960_s20  ;;  %p964_p6 = scmp.lt.u32.totalorder %s960_s20, %s1288_s10 }
 0x361   :  { %p966_p7 = pnand %p964_p6, %p961_p5 }
 0x363   :  { %969 = shalt.err (!%p966_p7)
}
 0x364   :  { %753 = dma.vmem_to_hbm [thread:$0]  %s751_s18, 64, %s1288_s10, [#allocation5]  }
 0x3e9   :  { %v670_v19 = vpop.xlane.xlu0 %669 }
 0x3ea   :  { %v671_v20 = vmax.f32 %v670_v19, 1e-24 }
 0x3ec   :  { %946 = vrsqrt.f32 %v671_v20 }
 0x3f6   :  { %v947_v21 = vpop.eup %946 }
 0x3f7   :  { %v673_v22 = vmul.f32 %v947_v21, %v661_v15 }
 0x3f9   :  { %674 = vst [vmem:[%s1289_s11] sm:$0x3] %v673_v22 }
 0x3fa   :  { %970 = dma.done.wait [#allocation5], 64  }
 0x3fb   :  { %971 = vsyncadd [#allocation5], 4294967232 }
 0x3fc   :  { %765 = vsyncpa [#allocation5], 1 }

// kernel: sparse_forward.11
= control target key start
LH: loop header
LB: loop body
LE: loop exit
PB: predicated region body
PF: predicated region fallthrough
CT: control target
= control target key end

     0   :  { %s509_s0 = inlined_call_operand.vmem [shape: f32[128,128], index: 0, kind: input, shape index: {}]   ;;  %s510_s1 = inlined_call_operand.vmem [shape: bf16[128,128], index: 1, kind: output, shape index: {}]  }
   0x1   :  { %v360_v0 = vld [vmem:[%s509_s0] sm:$0xff]  ;;  %v365_v1 = vld [vmem:[%s509_s0 + $0x8] sm:$0xff]  ;;  %v370_v2 = vld [vmem:[%s509_s0 + $0x10] sm:$0xff] }
   0x2   :  { %v24_v3 = vmul.f32 %v360_v0, %v360_v0  ;;  %v26_v4 = vmul.f32 %v370_v2, %v370_v2  ;;  %v379_v5 = vld [vmem:[%s509_s0 + $0x18] sm:$0xff]  ;;  %v25_v6 = vmul.f32 %v365_v1, %v365_v1  ;;  %v388_v8 = vld [vmem:[%s509_s0 + $0x20] sm:$0xff]  ;;  %v393_v9 = vld [vmem:[%s509_s0 + $0x28] sm:$0xff] }
   0x3   :  { %v27_v7 = vmul.f32 %v379_v5, %v379_v5  ;;  %v28_v10 = vmul.f32 %v388_v8, %v388_v8  ;;  %v29_v11 = vmul.f32 %v393_v9, %v393_v9  ;;  %v402_v12 = vld [vmem:[%s509_s0 + $0x30] sm:$0xff]  ;;  %v407_v13 = vld [vmem:[%s509_s0 + $0x38] sm:$0xff]  ;;  %v416_v16 = vld [vmem:[%s509_s0 + $0x40] sm:$0xff] }
   0x4   :  { %40 = vadd.xlane.f32.xlu0 %v24_v3  ;;  %44 = vadd.xlane.f32.xlu1 %v26_v4  ;;  %v30_v14 = vmul.f32 %v402_v12, %v402_v12  ;;  %v31_v15 = vmul.f32 %v407_v13, %v407_v13  ;;  %v421_v17 = vld [vmem:[%s509_s0 + $0x48] sm:$0xff]  ;;  %v32_v18 = vmul.f32 %v416_v16, %v416_v16  ;;  %v430_v20 = vld [vmem:[%s509_s0 + $0x50] sm:$0xff]  ;;  %v435_v21 = vld [vmem:[%s509_s0 + $0x58] sm:$0xff] }
   0x5   :  { %v33_v19 = vmul.f32 %v421_v17, %v421_v17  ;;  %v34_v22 = vmul.f32 %v430_v20, %v430_v20  ;;  %v35_v23 = vmul.f32 %v435_v21, %v435_v21  ;;  %v444_v24 = vld [vmem:[%s509_s0 + $0x60] sm:$0xff]  ;;  %v449_v25 = vld [vmem:[%s509_s0 + $0x68] sm:$0xff]  ;;  %v458_v28 = vld [vmem:[%s509_s0 + $0x70] sm:$0xff] }
   0x6   :  { %v36_v26 = vmul.f32 %v444_v24, %v444_v24  ;;  %v37_v27 = vmul.f32 %v449_v25, %v449_v25  ;;  %v463_v29 = vld [vmem:[%s509_s0 + $0x78] sm:$0xff]  ;;  %v38_v30 = vmul.f32 %v458_v28, %v458_v28 }
   0x7   :  { %v39_v31 = vmul.f32 %v463_v29, %v463_v29 }
   0x8   :  { %42 = vadd.xlane.f32.xlu0 %v25_v6  ;;  %46 = vadd.xlane.f32.xlu1 %v27_v7 }
   0xc   :  { %48 = vadd.xlane.f32.xlu0 %v28_v10  ;;  %50 = vadd.xlane.f32.xlu1 %v29_v11 }
  0x10   :  { %52 = vadd.xlane.f32.xlu0 %v30_v14  ;;  %54 = vadd.xlane.f32.xlu1 %v31_v15 }
  0x14   :  { %56 = vadd.xlane.f32.xlu0 %v32_v18  ;;  %58 = vadd.xlane.f32.xlu1 %v33_v19 }
  0x18   :  { %60 = vadd.xlane.f32.xlu0 %v34_v22  ;;  %62 = vadd.xlane.f32.xlu1 %v35_v23 }
  0x1c   :  { %64 = vadd.xlane.f32.xlu0 %v36_v26  ;;  %66 = vadd.xlane.f32.xlu1 %v37_v27 }
  0x20   :  { %68 = vadd.xlane.f32.xlu0 %v38_v30  ;;  %70 = vadd.xlane.f32.xlu1 %v39_v31 }
  0x91   :  { %v41_v32 = vpop.xlane.xlu0 %40  ;;  %v45_v33 = vpop.xlane.xlu1 %44 }
  0x92   :  { %v72_v34 = vmax.f32 %v41_v32, 1e-24  ;;  %v74_v35 = vmax.f32 %v45_v33, 1e-24 }
  0x94   :  { %315 = vrsqrt.f32 %v72_v34 }
  0x95   :  { %v43_v36 = vpop.xlane.xlu0 %42  ;;  %v47_v37 = vpop.xlane.xlu1 %46  ;;  %317 = vrsqrt.f32 %v74_v35 }
  0x96   :  { %v73_v38 = vmax.f32 %v43_v36, 1e-24  ;;  %v75_v39 = vmax.f32 %v47_v37, 1e-24 }
  0x98   :  { %319 = vrsqrt.f32 %v73_v38 }
  0x99   :  { %v49_v40 = vpop.xlane.xlu0 %48  ;;  %321 = vrsqrt.f32 %v75_v39  ;;  %v51_v42 = vpop.xlane.xlu1 %50 }
  0x9a   :  { %v76_v41 = vmax.f32 %v49_v40, 1e-24  ;;  %v77_v45 = vmax.f32 %v51_v42, 1e-24 }
  0x9c   :  { %323 = vrsqrt.f32 %v76_v41 }
  0x9d   :  { %v53_v47 = vpop.xlane.xlu0 %52  ;;  %325 = vrsqrt.f32 %v77_v45  ;;  %v55_v52 = vpop.xlane.xlu1 %54 }
  0x9e   :  { %v316_v43 = vpop.eup %315  ;;  %v78_v50 = vmax.f32 %v53_v47, 1e-24  ;;  %v79_v54 = vmax.f32 %v55_v52, 1e-24 }
  0x9f   :  { %v104_v44 = vmul.f32 %v316_v43, %v360_v0  ;;  %v318_v46 = vpop.eup %317 }
  0xa0   :  { %v106_v51 = vmul.f32 %v318_v46, %v370_v2  ;;  %327 = vrsqrt.f32 %v78_v50 }
  0xa1   :  { %120 = vxpose.xlu0.b32.start [1/16] %v104_v44, 128  ;;  %v57_v56 = vpop.xlane.xlu0 %56  ;;  %329 = vrsqrt.f32 %v79_v54  ;;  %v59_v60 = vpop.xlane.xlu1 %58 }
  0xa2   :  { %v320_v48 = vpop.eup %319  ;;  %v80_v58 = vmax.f32 %v57_v56, 1e-24  ;;  %v81_v62 = vmax.f32 %v59_v60, 1e-24 }
  0xa3   :  { %v105_v49 = vmul.f32 %v320_v48, %v365_v1  ;;  %v322_v53 = vpop.eup %321 }
  0xa4   :  { %v107_v55 = vmul.f32 %v322_v53, %v379_v5  ;;  %331 = vrsqrt.f32 %v80_v58 }
  0xa5   :  { %121 = vxpose.xlu0.b32.cont [2/16] %v105_v49, 128  ;;  %v61_v0 = vpop.xlane.xlu0 %60  ;;  %333 = vrsqrt.f32 %v81_v62  ;;  %v63_v4 = vpop.xlane.xlu1 %62 }
  0xa6   :  { %v324_v57 = vpop.eup %323  ;;  %v82_v2 = vmax.f32 %v61_v0, 1e-24  ;;  %v83_v6 = vmax.f32 %v63_v4, 1e-24 }
  0xa7   :  { %v108_v59 = vmul.f32 %v324_v57, %v388_v8  ;;  %v326_v61 = vpop.eup %325 }
  0xa8   :  { %v109_v63 = vmul.f32 %v326_v61, %v393_v9  ;;  %335 = vrsqrt.f32 %v82_v2 }
  0xa9   :  { %122 = vxpose.xlu0.b32.cont [3/16] %v106_v51, 128  ;;  %v65_v8 = vpop.xlane.xlu0 %64  ;;  %337 = vrsqrt.f32 %v83_v6  ;;  %v67_v14 = vpop.xlane.xlu1 %66 }
  0xaa   :  { %v328_v1 = vpop.eup %327  ;;  %v84_v11 = vmax.f32 %v65_v8, 1e-24  ;;  %v85_v18 = vmax.f32 %v67_v14, 1e-24 }
  0xab   :  { %v110_v3 = vmul.f32 %v328_v1, %v402_v12  ;;  %v330_v5 = vpop.eup %329 }
  0xac   :  { %v111_v7 = vmul.f32 %v330_v5, %v407_v13  ;;  %339 = vrsqrt.f32 %v84_v11 }
  0xad   :  { %123 = vxpose.xlu0.b32.cont [4/16] %v107_v55, 128  ;;  %v69_v19 = vpop.xlane.xlu0 %68  ;;  %341 = vrsqrt.f32 %v85_v18  ;;  %v71_v26 = vpop.xlane.xlu1 %70 }
  0xae   :  { %v332_v10 = vpop.eup %331  ;;  %v86_v23 = vmax.f32 %v69_v19, 1e-24  ;;  %v87_v30 = vmax.f32 %v71_v26, 1e-24 }
  0xaf   :  { %v112_v9 = vmul.f32 %v332_v10, %v416_v16  ;;  %v334_v15 = vpop.eup %333 }
  0xb0   :  { %v113_v12 = vmul.f32 %v334_v15, %v421_v17  ;;  %343 = vrsqrt.f32 %v86_v23 }
  0xb1   :  { %124 = vxpose.xlu0.b32.cont [5/16] %v108_v59, 128  ;;  %345 = vrsqrt.f32 %v87_v30 }
  0xb2   :  { %v336_v22 = vpop.eup %335 }
  0xb3   :  { %v114_v13 = vmul.f32 %v336_v22, %v430_v20  ;;  %v338_v27 = vpop.eup %337 }
  0xb4   :  { %v115_v16 = vmul.f32 %v338_v27, %v435_v21 }
  0xb5   :  { %125 = vxpose.xlu0.b32.cont [6/16] %v109_v63, 128 }
  0xb6   :  { %v340_v31 = vpop.eup %339 }
  0xb7   :  { %v116_v32 = vmul.f32 %v340_v31, %v444_v24  ;;  %v342_v17 = vpop.eup %341 }
  0xb8   :  { %v117_v33 = vmul.f32 %v342_v17, %v449_v25 }
  0xb9   :  { %126 = vxpose.xlu0.b32.cont [7/16] %v110_v3, 128 }
  0xba   :  { %v344_v34 = vpop.eup %343 }
  0xbb   :  { %v118_v20 = vmul.f32 %v344_v34, %v458_v28  ;;  %v346_v35 = vpop.eup %345 }
  0xbc   :  { %v119_v36 = vmul.f32 %v346_v35, %v463_v29 }
  0xbd   :  { %127 = vxpose.xlu0.b32.cont [8/16] %v111_v7, 128 }
  0xc1   :  { %128 = vxpose.xlu0.b32.cont [9/16] %v112_v9, 128 }
  0xc5   :  { %129 = vxpose.xlu0.b32.cont [10/16] %v113_v12, 128 }
  0xc9   :  { %130 = vxpose.xlu0.b32.cont [11/16] %v114_v13, 128 }
  0xcd   :  { %131 = vxpose.xlu0.b32.cont [12/16] %v115_v16, 128 }
  0xd1   :  { %132 = vxpose.xlu0.b32.cont [13/16] %v116_v32, 128 }
  0xd5   :  { %133 = vxpose.xlu0.b32.cont [14/16] %v117_v33, 128 }
  0xd9   :  { %134 = vxpose.xlu0.b32.cont [15/16] %v118_v20, 128 }
  0xdd   :  { %135 = vxpose.xlu0.b32.end [16/16] %v119_v36, 128 }
 0x121   :  { %v136_v37 = vpop.trf.xlu0 }
 0x125   :  { %v137_v21 = vpop.trf.xlu0 }
 0x126   :  { %v271_v38 = vpack.c.bf16 %v137_v21, %v136_v37 }
 0x128   :  { %272 = vst [vmem:[%s510_s1] sm:$0xff] %v271_v38  }
 0x129   :  { %v138_v24 = vpop.trf.xlu0 }
 0x12d   :  { %v139_v39 = vpop.trf.xlu0 }
 0x12e   :  { %v276_v40 = vpack.c.bf16 %v139_v39, %v138_v24 }
 0x130   :  { %308 = vst [vmem:[%s510_s1 + $0x8] sm:$0xff] %v276_v40  }
 0x131   :  { %v140_v25 = vpop.trf.xlu0 }
 0x135   :  { %v141_v28 = vpop.trf.xlu0 }
 0x136   :  { %v281_v41 = vpack.c.bf16 %v141_v28, %v140_v25 }
 0x138   :  { %309 = vst [vmem:[%s510_s1 + $0x10] sm:$0xff] %v281_v41  }
 0x139   :  { %v142_v29 = vpop.trf.xlu0 }
 0x13d   :  { %v143_v42 = vpop.trf.xlu0 }
 0x13e   :  { %v286_v43 = vpack.c.bf16 %v143_v42, %v142_v29 }
 0x140   :  { %310 = vst [vmem:[%s510_s1 + $0x18] sm:$0xff] %v286_v43  }
 0x141   :  { %v144_v44 = vpop.trf.xlu0 }
 0x145   :  { %v145_v45 = vpop.trf.xlu0 }
 0x146   :  { %v291_v46 = vpack.c.bf16 %v145_v45, %v144_v44 }
 0x148   :  { %311 = vst [vmem:[%s510_s1 + $0x20] sm:$0xff] %v291_v46  }
 0x149   :  { %v146_v47 = vpop.trf.xlu0 }
 0x14d   :  { %v147_v48 = vpop.trf.xlu0 }
 0x14e   :  { %v296_v49 = vpack.c.bf16 %v147_v48, %v146_v47 }
 0x150   :  { %312 = vst [vmem:[%s510_s1 + $0x28] sm:$0xff] %v296_v49  }
 0x151   :  { %v148_v50 = vpop.trf.xlu0 }
 0x155   :  { %v149_v51 = vpop.trf.xlu0 }
 0x156   :  { %v301_v52 = vpack.c.bf16 %v149_v51, %v148_v50 }
 0x158   :  { %313 = vst [vmem:[%s510_s1 + $0x30] sm:$0xff] %v301_v52  }
 0x159   :  { %v150_v53 = vpop.trf.xlu0 }
 0x15d   :  { %v151_v54 = vpop.trf.xlu0 }
 0x15e   :  { %v306_v55 = vpack.c.bf16 %v151_v54, %v150_v53 }
 0x160   :  { %314 = vst [vmem:[%s510_s1 + $0x38] sm:$0xff] %v306_v55  }

// kernel: sparse_forward.12
= control target key start
LH: loop header
LB: loop body
LE: loop exit
PB: predicated region body
PF: predicated region fallthrough
CT: control target
= control target key end

     0   :  { %v178_v1 = vmov 0.0   ;;  %vm179_vm0 = vmmov 0   ;;  %s225_s0 = inlined_call_operand.vmem [shape: f32[8,128], index: 0, kind: input, shape index: {}]   ;;  %s226_s1 = inlined_call_operand.vmem [shape: bf16[128,128], index: 1, kind: input, shape index: {}]   ;;  %s227_s2 = inlined_call_operand.vmem [shape: f32[8,128], index: 2, kind: output, shape index: {}]  }
   0x1   :  { %v12_v0 = vld [vmem:[%s225_s0] sm:$0xff]  ;;  %146 = vmatprep.subr.bf16.mxu0 %v178_v1  ;;  %v169_v4 = vld [vmem:[%s226_s1 + $0x8] sm:$0xff]   ;;  %v170_v5 = vld [vmem:[%s226_s1 + $0x10] sm:$0xff]   ;;  %162 = vmatprep.mubr.msk.bf16.mxu0 %vm179_vm0, %v178_v1 }
   0x2   :  { %v13_v2 = vmul.f32 %v12_v0, %v12_v0  ;;  %v168_v3 = vld [vmem:[%s226_s1] sm:$0xff]   ;;  %v171_v6 = vld [vmem:[%s226_s1 + $0x18] sm:$0xff]   ;;  %v173_v8 = vld [vmem:[%s226_s1 + $0x28] sm:$0xff]  }
   0x3   :  { %147 = vmatpush3.bf16.msra.mxu0 %v168_v3  ;;  %v172_v7 = vld [vmem:[%s226_s1 + $0x20] sm:$0xff]   ;;  %v174_v9 = vld [vmem:[%s226_s1 + $0x30] sm:$0xff]   ;;  %v175_v10 = vld [vmem:[%s226_s1 + $0x38] sm:$0xff]  }
   0x4   :  { %14 = vadd.xlane.f32.xlu0 %v13_v2  ;;  %148 = vmatprep.subr.bf16.mxu0 %v178_v1 }
   0x7   :  { %149 = vmatpush3.bf16.msra.mxu0 %v169_v4 }
   0x8   :  { %150 = vmatprep.subr.bf16.mxu0 %v178_v1 }
   0xb   :  { %151 = vmatpush3.bf16.msra.mxu0 %v170_v5 }
   0xc   :  { %152 = vmatprep.subr.bf16.mxu0 %v178_v1 }
   0xf   :  { %153 = vmatpush3.bf16.msra.mxu0 %v171_v6 }
  0x10   :  { %154 = vmatprep.subr.bf16.mxu0 %v178_v1 }
  0x13   :  { %155 = vmatpush3.bf16.msra.mxu0 %v172_v7 }
  0x14   :  { %156 = vmatprep.subr.bf16.mxu0 %v178_v1 }
  0x17   :  { %157 = vmatpush3.bf16.msra.mxu0 %v173_v8 }
  0x18   :  { %158 = vmatprep.subr.bf16.mxu0 %v178_v1 }
  0x1b   :  { %159 = vmatpush3.bf16.msra.mxu0 %v174_v9 }
  0x1c   :  { %160 = vmatprep.subr.bf16.mxu0 %v178_v1 }
  0x1f   :  { %161 = vmatpush3.bf16.msra.mxu0 %v175_v10 }
  0x91   :  { %v15_v11 = vpop.xlane.xlu0 %14 }
  0x92   :  { %v16_v12 = vmax.f32 %v15_v11, 1e-24 }
  0x94   :  { %176 = vrsqrt.f32 %v16_v12 }
  0x9e   :  { %v177_v13 = vpop.eup %176 }
  0x9f   :  { %v18_v14 = vmul.f32 %v177_v13, %v12_v0 }
  0xa1   :  { %v19_v15 = vpack.c.bf16 %v18_v14, %v18_v14 }
  0xa3   :  { %163 = vmatmul.mubr.bf16.vlgmr.msra.gmra.mrb[0].mxu0 %v19_v15 }
 0x176   :  { %v118_v16 = vpop.f32.mrb[0].mxu0 }
 0x177   :  { %124 = vst [vmem:[%s227_s2] sm:$0xff] %v118_v16  ;;  %v164_v17 = vpop.f32.mrb[1].mxu0 }
 0x178   :  { %v121_v18 = vpop.f32.mrb[2].mxu0 }
 0x179   :  { %v165_v19 = vpop.f32.mrb[3].mxu0 }

// kernel: sparse_forward.14
= control target key start
LH: loop header
LB: loop body
LE: loop exit
PB: predicated region body
PF: predicated region fallthrough
CT: control target
= control target key end

     0   :  { %v183_v0 = vmov 0.0   ;;  %vm184_vm0 = vmmov 0   ;;  %s246_s1 = inlined_call_operand.vmem [shape: bf16[128,128], index: 1, kind: input, shape index: {}]   ;;  %s247_s0 = inlined_call_operand.vmem [shape: bf16[8,128], index: 0, kind: input, shape index: {}]   ;;  %s248_s2 = inlined_call_operand.vmem [shape: f32[8,128], index: 2, kind: input, shape index: {}]   ;;  %s249_s3 = inlined_call_operand.vmem [shape: f32[8,128], index: 3, kind: output, shape index: {0}]   ;;  %s250_s4 = inlined_call_operand.vmem [shape: f32[8,128], index: 4, kind: output, shape index: {1}]  }
   0x1   :  { %153 = vmatprep.subr.bf16.mxu0 %v183_v0  ;;  %v175_v1 = vld [vmem:[%s246_s1] sm:$0xff]   ;;  %169 = vmatprep.mubr.msk.bf16.mxu0 %vm184_vm0, %v183_v0  ;;  %v176_v2 = vld [vmem:[%s246_s1 + $0x8] sm:$0xff]   ;;  %v177_v3 = vld [vmem:[%s246_s1 + $0x10] sm:$0xff]  }
   0x2   :  { %154 = vmatpush3.bf16.msra.mxu0 %v175_v1  ;;  %v178_v4 = vld [vmem:[%s246_s1 + $0x18] sm:$0xff]   ;;  %v179_v5 = vld [vmem:[%s246_s1 + $0x20] sm:$0xff]   ;;  %v180_v6 = vld [vmem:[%s246_s1 + $0x28] sm:$0xff]  }
   0x3   :  { %155 = vmatprep.subr.bf16.mxu0 %v183_v0  ;;  %v181_v7 = vld [vmem:[%s246_s1 + $0x30] sm:$0xff]   ;;  %v182_v8 = vld [vmem:[%s246_s1 + $0x38] sm:$0xff]   ;;  %v17_v9 = vld [vmem:[%s247_s0] sm:$0xf] }
   0x4   :  { %v123_v10 = vld [vmem:[%s248_s2] sm:$0xff] }
   0x5   :  { %v124_v11 = vmul.f32 0.6, %v123_v10 }
   0x6   :  { %156 = vmatpush3.bf16.msra.mxu0 %v176_v2 }
   0x7   :  { %157 = vmatprep.subr.bf16.mxu0 %v183_v0 }
   0xa   :  { %158 = vmatpush3.bf16.msra.mxu0 %v177_v3 }
   0xb   :  { %159 = vmatprep.subr.bf16.mxu0 %v183_v0 }
   0xe   :  { %160 = vmatpush3.bf16.msra.mxu0 %v178_v4 }
   0xf   :  { %161 = vmatprep.subr.bf16.mxu0 %v183_v0 }
  0x12   :  { %162 = vmatpush3.bf16.msra.mxu0 %v179_v5 }
  0x13   :  { %163 = vmatprep.subr.bf16.mxu0 %v183_v0 }
  0x16   :  { %164 = vmatpush3.bf16.msra.mxu0 %v180_v6 }
  0x17   :  { %165 = vmatprep.subr.bf16.mxu0 %v183_v0 }
  0x1a   :  { %166 = vmatpush3.bf16.msra.mxu0 %v181_v7 }
  0x1b   :  { %167 = vmatprep.subr.bf16.mxu0 %v183_v0 }
  0x1e   :  { %168 = vmatpush3.bf16.msra.mxu0 %v182_v8 }
  0x21   :  { %170 = vmatmul.mubr.bf16.vlgmr.msra.gmra.mrb[0].mxu0 %v17_v9 }
  0xf4   :  { %v116_v12 = vpop.f32.mrb[0].mxu0 }
  0xf5   :  { %122 = vst [vmem:[%s249_s3] sm:$0xff] %v116_v12  ;;  %v125_v13 = vmul.f32 0.4, %v116_v12  ;;  %v171_v14 = vpop.f32.mrb[1].mxu0 }
  0xf6   :  { %v119_v15 = vpop.f32.mrb[2].mxu0 }
  0xf7   :  { %v126_v16 = vadd.f32 %v125_v13, %v124_v11  ;;  %v172_v17 = vpop.f32.mrb[3].mxu0 }
  0xf9   :  { %127 = vst [vmem:[%s250_s4] sm:$0xff] %v126_v16 }

// kernel: sparse_forward.13
= control target key start
LH: loop header
LB: loop body
LE: loop exit
PB: predicated region body
PF: predicated region fallthrough
CT: control target
= control target key end

     0   :  { %v437_v1 = vmov 0.0   ;;  %vm438_vm0 = vmmov 0   ;;  %s573_s1 = inlined_call_operand.vmem [shape: bf16[256,128], index: 1, kind: input, shape index: {}]   ;;  %s574_s0 = inlined_call_operand.vmem [shape: f32[8,256], index: 0, kind: input, shape index: {}]   ;;  %s575_s3 = inlined_call_operand.vmem [shape: bf16[128,128], index: 3, kind: input, shape index: {}]   ;;  %s576_s2 = inlined_call_operand.vmem [shape: f32[1,128], index: 2, kind: input, shape index: {}]   ;;  %s577_s4 = inlined_call_operand.vmem [shape: f32[1,128], index: 4, kind: input, shape index: {}]   ;;  %s578_s5 = inlined_call_operand.vmem [shape: f32[8,128], index: 5, kind: output, shape index: {0}]   ;;  %s579_s6 = inlined_call_operand.vmem [shape: bf16[8,128], index: 6, kind: output, shape index: {1}]  }
   0x1   :  { %v411_v0 = vld [vmem:[%s573_s1 + $0x40] sm:$0xff]   ;;  %389 = vmatprep.subr.bf16.mxu1 %v437_v1  ;;  %v413_v3 = vld [vmem:[%s573_s1 + $0x48] sm:$0xff]   ;;  %v415_v5 = vld [vmem:[%s573_s1 + $0x50] sm:$0xff]   ;;  %405 = vmatprep.mubr.msk.bf16.mxu1 %vm438_vm0, %v437_v1 }
   0x2   :  { %v412_v2 = vld [vmem:[%s573_s1] sm:$0xff]   ;;  %358 = vmatprep.subr.bf16.mxu0 %v411_v0  ;;  %v414_v4 = vld [vmem:[%s573_s1 + $0x8] sm:$0xff]   ;;  %v416_v6 = vld [vmem:[%s573_s1 + $0x10] sm:$0xff]  }
   0x3   :  { %359 = vmatpush3.bf16.msra.mxu0 %v412_v2  ;;  %v417_v7 = vld [vmem:[%s573_s1 + $0x58] sm:$0xff]   ;;  %v419_v9 = vld [vmem:[%s573_s1 + $0x60] sm:$0xff]   ;;  %v421_v11 = vld [vmem:[%s573_s1 + $0x68] sm:$0xff]  }
   0x4   :  { %360 = vmatprep.subr.bf16.mxu0 %v413_v3  ;;  %v418_v8 = vld [vmem:[%s573_s1 + $0x18] sm:$0xff]   ;;  %v420_v10 = vld [vmem:[%s573_s1 + $0x20] sm:$0xff]   ;;  %v24_v12 = vld [vmem:[%s574_s0 + $0x8] sm:$0xff] }
   0x5   :  { %v26_v13 = vpack.c.bf16 %v24_v12, %v24_v12  ;;  %v427_v14 = vld [vmem:[%s575_s3] sm:$0xff]   ;;  %v422_v15 = vld [vmem:[%s573_s1 + $0x28] sm:$0xff]   ;;  %v423_v16 = vld [vmem:[%s573_s1 + $0x70] sm:$0xff]  }
   0x6   :  { %390 = vmatpush3.bf16.msra.mxu1 %v427_v14  ;;  %v428_v17 = vld [vmem:[%s575_s3 + $0x8] sm:$0xff]   ;;  %v424_v18 = vld [vmem:[%s573_s1 + $0x30] sm:$0xff]   ;;  %v425_v19 = vld [vmem:[%s573_s1 + $0x78] sm:$0xff]  }
   0x7   :  { %361 = vmatpush3.bf16.msra.mxu0 %v414_v4  ;;  %194 = vmatprep.mubr.bf16.mxu0 %v26_v13  ;;  %v429_v20 = vld [vmem:[%s575_s3 + $0x10] sm:$0xff]   ;;  %v426_v21 = vld [vmem:[%s573_s1 + $0x38] sm:$0xff]   ;;  %v23_v22 = vld [vmem:[%s574_s0] sm:$0xff] }
   0x8   :  { %362 = vmatprep.subr.bf16.mxu0 %v415_v5  ;;  %391 = vmatprep.subr.bf16.mxu1 %v437_v1  ;;  %v430_v23 = vld [vmem:[%s575_s3 + $0x18] sm:$0xff]   ;;  %v25_v24 = vpack.c.bf16 %v23_v22, %v23_v22  ;;  %v431_v25 = vld [vmem:[%s575_s3 + $0x20] sm:$0xff]   ;;  %v432_v26 = vld [vmem:[%s575_s3 + $0x28] sm:$0xff]  }
   0x9   :  { %v433_v27 = vld [vmem:[%s575_s3 + $0x30] sm:$0xff]   ;;  %v434_v28 = vld [vmem:[%s575_s3 + $0x38] sm:$0xff]   ;;  %v332_v30 = vld [vmem:[%s576_s2] ss:$0 sm:$0xff] }
   0xa   :  { %392 = vmatpush3.bf16.msra.mxu1 %v428_v17  ;;  %v349_v38 = vld [vmem:[%s577_s4] ss:$0 sm:$0xff] }
   0xb   :  { %363 = vmatpush3.bf16.msra.mxu0 %v416_v6  ;;  %393 = vmatprep.subr.bf16.mxu1 %v437_v1 }
   0xc   :  { %364 = vmatprep.subr.bf16.mxu0 %v417_v7 }
   0xe   :  { %394 = vmatpush3.bf16.msra.mxu1 %v429_v20 }
   0xf   :  { %365 = vmatpush3.bf16.msra.mxu0 %v418_v8  ;;  %395 = vmatprep.subr.bf16.mxu1 %v437_v1 }
  0x10   :  { %366 = vmatprep.subr.bf16.mxu0 %v419_v9 }
  0x12   :  { %396 = vmatpush3.bf16.msra.mxu1 %v430_v23 }
  0x13   :  { %367 = vmatpush3.bf16.msra.mxu0 %v420_v10  ;;  %397 = vmatprep.subr.bf16.mxu1 %v437_v1 }
  0x14   :  { %368 = vmatprep.subr.bf16.mxu0 %v421_v11 }
  0x16   :  { %398 = vmatpush3.bf16.msra.mxu1 %v431_v25 }
  0x17   :  { %369 = vmatpush3.bf16.msra.mxu0 %v422_v15  ;;  %399 = vmatprep.subr.bf16.mxu1 %v437_v1 }
  0x18   :  { %370 = vmatprep.subr.bf16.mxu0 %v423_v16 }
  0x1a   :  { %400 = vmatpush3.bf16.msra.mxu1 %v432_v26 }
  0x1b   :  { %371 = vmatpush3.bf16.msra.mxu0 %v424_v18  ;;  %401 = vmatprep.subr.bf16.mxu1 %v437_v1 }
  0x1c   :  { %372 = vmatprep.subr.bf16.mxu0 %v425_v19 }
  0x1e   :  { %402 = vmatpush3.bf16.msra.mxu1 %v433_v27 }
  0x1f   :  { %373 = vmatpush3.bf16.msra.mxu0 %v426_v21  ;;  %403 = vmatprep.subr.bf16.mxu1 %v437_v1 }
  0x22   :  { %195 = vmatmul.mubr.bf16.vlgmr.msra.gmra.mrb[0].mxu0 %v25_v24  ;;  %404 = vmatpush3.bf16.msra.mxu1 %v434_v28 }
  0xf5   :  { %v374_v29 = vpop.f32.mrb[0].mxu0 }
  0xf6   :  { %v375_v31 = vpop.f32.mrb[1].mxu0 }
  0xf7   :  { %v376_v32 = vadd.f32 %v375_v31, %v374_v29  ;;  %v377_v33 = vpop.f32.mrb[2].mxu0 }
  0xf8   :  { %v378_v34 = vpop.f32.mrb[3].mxu0 }
  0xf9   :  { %v197_v35 = vadd.f32 %v376_v32, %v332_v30 }
  0xfb   :  { %v202_v36 = vmax.f32 %v197_v35, 0.0 }
  0xfd   :  { %v203_v37 = vpack.c.bf16 %v202_v36, %v202_v36 }
  0xff   :  { %406 = vmatmul.mubr.bf16.vlgmr.msra.gmra.mrb[0].mxu1 %v203_v37 }
 0x1d2   :  { %v309_v39 = vpop.f32.mrb[0].mxu1 }
 0x1d3   :  { %v310_v40 = vadd.f32 %v349_v38, %v309_v39  ;;  %v407_v41 = vpop.f32.mrb[1].mxu1 }
 0x1d4   :  { %v312_v42 = vpop.f32.mrb[2].mxu1 }
 0x1d5   :  { %315 = vst [vmem:[%s578_s5] sm:$0xff] %v310_v40  ;;  %v408_v43 = vpop.f32.mrb[3].mxu1  ;;  %v316_v44 = vmul.f32 %v310_v40, %v310_v40 }
 0x1d7   :  { %317 = vadd.xlane.f32.xlu0 %v316_v44 }
 0x264   :  { %v318_v45 = vpop.xlane.xlu0 %317 }
 0x265   :  { %v319_v46 = vmax.f32 %v318_v45, 1e-24 }
 0x267   :  { %435 = vrsqrt.f32 %v319_v46 }
 0x271   :  { %v436_v47 = vpop.eup %435 }
 0x272   :  { %v321_v48 = vmul.f32 %v436_v47, %v310_v40 }
 0x274   :  { %v322_v49 = vpack.c.bf16 %v321_v48, %v321_v48 }
 0x276   :  { %323 = vst [vmem:[%s579_s6] sm:$0xf] %v322_v49 }

// kernel: sparse_forward.15
= control target key start
LH: loop header
LB: loop body
LE: loop exit
PB: predicated region body
PF: predicated region fallthrough
CT: control target
= control target key end

     0   :  { %v473_v2 = vmov 0.0   ;;  %s619_s0 = inlined_call_operand.vmem [shape: f32[8,256], index: 0, kind: input, shape index: {}]   ;;  %s620_s1 = inlined_call_operand.vmem [shape: bf16[256,128], index: 1, kind: input, shape index: {}]   ;;  %s621_s2 = inlined_call_operand.vmem [shape: f32[1,128], index: 2, kind: input, shape index: {}]   ;;  %s622_s3 = inlined_call_operand.vmem [shape: bf16[128,128], index: 3, kind: input, shape index: {}]   ;;  %s623_s4 = inlined_call_operand.vmem [shape: f32[1,128], index: 4, kind: input, shape index: {}]   ;;  %s624_s5 = inlined_call_operand.vmem [shape: f32[8,128], index: 5, kind: output, shape index: {0}]   ;;  %s625_s6 = inlined_call_operand.hbm [shape: bf16[8,128], index: 6, kind: output, shape index: {1}]  }
   0x1   :  { %v423_v0 = vld [vmem:[%s620_s1 + $0x40] sm:$0xff]   ;;  %400 = vmatprep.subr.bf16.mxu1 %v473_v2  ;;  %v425_v3 = vld [vmem:[%s620_s1 + $0x48] sm:$0xff]   ;;  %v427_v5 = vld [vmem:[%s620_s1 + $0x50] sm:$0xff]  }
   0x2   :  { %v424_v1 = vld [vmem:[%s620_s1] sm:$0xff]   ;;  %369 = vmatprep.subr.bf16.mxu0 %v423_v0  ;;  %v426_v4 = vld [vmem:[%s620_s1 + $0x8] sm:$0xff]   ;;  %v428_v6 = vld [vmem:[%s620_s1 + $0x10] sm:$0xff]  }
   0x3   :  { %370 = vmatpush3.bf16.msra.mxu0 %v424_v1  ;;  %v429_v7 = vld [vmem:[%s620_s1 + $0x58] sm:$0xff]   ;;  %v431_v9 = vld [vmem:[%s620_s1 + $0x60] sm:$0xff]   ;;  %v433_v11 = vld [vmem:[%s620_s1 + $0x68] sm:$0xff]  }
   0x4   :  { %371 = vmatprep.subr.bf16.mxu0 %v425_v3  ;;  %v430_v8 = vld [vmem:[%s620_s1 + $0x18] sm:$0xff]   ;;  %v432_v10 = vld [vmem:[%s620_s1 + $0x20] sm:$0xff]   ;;  %v25_v12 = vld [vmem:[%s619_s0 + $0x8] sm:$0xff] }
   0x5   :  { %v27_v13 = vpack.c.bf16 %v25_v12, %v25_v12  ;;  %v439_v14 = vld [vmem:[%s622_s3] sm:$0xff]   ;;  %v434_v15 = vld [vmem:[%s620_s1 + $0x28] sm:$0xff]   ;;  %v435_v16 = vld [vmem:[%s620_s1 + $0x70] sm:$0xff]  }
   0x6   :  { %401 = vmatpush3.bf16.msra.mxu1 %v439_v14  ;;  %v440_v17 = vld [vmem:[%s622_s3 + $0x8] sm:$0xff]   ;;  %v436_v18 = vld [vmem:[%s620_s1 + $0x30] sm:$0xff]   ;;  %v437_v19 = vld [vmem:[%s620_s1 + $0x78] sm:$0xff]  }
   0x7   :  { %372 = vmatpush3.bf16.msra.mxu0 %v426_v4  ;;  %195 = vmatprep.mubr.bf16.mxu0 %v27_v13  ;;  %v441_v20 = vld [vmem:[%s622_s3 + $0x10] sm:$0xff]  }
   0x8   :  { %373 = vmatprep.subr.bf16.mxu0 %v427_v5  ;;  %402 = vmatprep.subr.bf16.mxu1 %v473_v2 }
   0xa   :  { %403 = vmatpush3.bf16.msra.mxu1 %v440_v17 }
   0xb   :  { %374 = vmatpush3.bf16.msra.mxu0 %v428_v6 }
   0xc   :  { %375 = vmatprep.subr.bf16.mxu0 %v429_v7 }
   0xf   :  { %376 = vmatpush3.bf16.msra.mxu0 %v430_v8 }
  0x10   :  { %377 = vmatprep.subr.bf16.mxu0 %v431_v9 }
  0x13   :  { %378 = vmatpush3.bf16.msra.mxu0 %v432_v10 }
  0x14   :  { %379 = vmatprep.subr.bf16.mxu0 %v433_v11 }
  0x17   :  { %380 = vmatpush3.bf16.msra.mxu0 %v434_v15 }
  0x18   :  { %381 = vmatprep.subr.bf16.mxu0 %v435_v16 }
  0x19   :  { %12 = vsyncpa [#allocation3], 0  ;;  %404 = vmatprep.subr.bf16.mxu1 %v473_v2  ;;  %v438_v21 = vld [vmem:[%s620_s1 + $0x38] sm:$0xff]   ;;  %v24_v22 = vld [vmem:[%s619_s0] sm:$0xff]  ;;  %vm474_vm0 = vmmov 0  }
  0x1a   :  { %405 = vmatpush3.bf16.msra.mxu1 %v441_v20  ;;  %v442_v23 = vld [vmem:[%s622_s3 + $0x18] sm:$0xff]   ;;  %v26_v24 = vpack.c.bf16 %v24_v22, %v24_v22  ;;  %v443_v25 = vld [vmem:[%s622_s3 + $0x20] sm:$0xff]   ;;  %v444_v26 = vld [vmem:[%s622_s3 + $0x28] sm:$0xff]   ;;  %416 = vmatprep.mubr.msk.bf16.mxu1 %vm474_vm0, %v473_v2 }
  0x1b   :  { %382 = vmatpush3.bf16.msra.mxu0 %v436_v18  ;;  %406 = vmatprep.subr.bf16.mxu1 %v473_v2  ;;  %v445_v27 = vld [vmem:[%s622_s3 + $0x30] sm:$0xff]   ;;  %v446_v28 = vld [vmem:[%s622_s3 + $0x38] sm:$0xff]   ;;  %v343_v30 = vld [vmem:[%s621_s2] ss:$0 sm:$0xff]  ;;  %s475_s2 = smov [#allocation2]  }
  0x1c   :  { %383 = vmatprep.subr.bf16.mxu0 %v437_v19  ;;  %v360_v38 = vld [vmem:[%s623_s4] ss:$0 sm:$0xff]  ;;  %s333_s28 = sshll.u32 %s475_s2, 4  ;;  %s334_s28 = int_to_ptr.vmem [resolvable:$true] %s333_s28 }
  0x1d   :  { %s449_s4 = scalar_lea.vmem %s334_s28, 64  ;;  %p454_p1 = scmp.lt.s32.totalorder %s334_s28, %s334_s28 }
  0x1e   :  { %407 = vmatpush3.bf16.msra.mxu1 %v442_v23  ;;  %p450_p0 = scmp.ne.s32.totalorder %s334_s28, %s449_s4  ;;  %p455_p2 = scmp.lt.s32.totalorder %s449_s4, %s449_s4 }
  0x1f   :  { %384 = vmatpush3.bf16.msra.mxu0 %v438_v21  ;;  %408 = vmatprep.subr.bf16.mxu1 %v473_v2 }
  0x20   :  { %p456_p3 = por %p455_p2, %p454_p1 }
  0x22   :  { %196 = vmatmul.mubr.bf16.vlgmr.msra.gmra.mrb[0].mxu0 %v26_v24  ;;  %409 = vmatpush3.bf16.msra.mxu1 %v443_v25  ;;  %p457_p4 = pnand %p456_p3, %p450_p0 }
  0x23   :  { %410 = vmatprep.subr.bf16.mxu1 %v473_v2 }
  0x26   :  { %411 = vmatpush3.bf16.msra.mxu1 %v444_v26 }
  0x27   :  { %412 = vmatprep.subr.bf16.mxu1 %v473_v2 }
  0x2a   :  { %413 = vmatpush3.bf16.msra.mxu1 %v445_v27 }
  0x2b   :  { %414 = vmatprep.subr.bf16.mxu1 %v473_v2 }
  0x2e   :  { %415 = vmatpush3.bf16.msra.mxu1 %v446_v28 }
  0xf5   :  { %v385_v29 = vpop.f32.mrb[0].mxu0 }
  0xf6   :  { %v386_v31 = vpop.f32.mrb[1].mxu0 }
  0xf7   :  { %v387_v32 = vadd.f32 %v386_v31, %v385_v29  ;;  %v388_v33 = vpop.f32.mrb[2].mxu0 }
  0xf8   :  { %v389_v34 = vpop.f32.mrb[3].mxu0 }
  0xf9   :  { %v198_v35 = vadd.f32 %v387_v32, %v343_v30 }
  0xfb   :  { %v203_v36 = vmax.f32 %v198_v35, 0.0 }
  0xfd   :  { %v204_v37 = vpack.c.bf16 %v203_v36, %v203_v36 }
  0xff   :  { %417 = vmatmul.mubr.bf16.vlgmr.msra.gmra.mrb[0].mxu1 %v204_v37 }
 0x1d2   :  { %v310_v39 = vpop.f32.mrb[0].mxu1 }
 0x1d3   :  { %v311_v40 = vadd.f32 %v360_v38, %v310_v39  ;;  %v418_v41 = vpop.f32.mrb[1].mxu1 }
 0x1d4   :  { %v313_v42 = vpop.f32.mrb[2].mxu1 }
 0x1d5   :  { %316 = vst [vmem:[%s624_s5] sm:$0xff] %v311_v40  ;;  %v419_v43 = vpop.f32.mrb[3].mxu1  ;;  %v317_v44 = vmul.f32 %v311_v40, %v311_v40 }
 0x1d7   :  { %318 = vadd.xlane.f32.xlu0 %v317_v44 }
 0x264   :  { %v319_v45 = vpop.xlane.xlu0 %318 }
 0x265   :  { %v320_v46 = vmax.f32 %v319_v45, 1e-24 }
 0x267   :  { %447 = vrsqrt.f32 %v320_v46 }
 0x271   :  { %v448_v47 = vpop.eup %447 }
 0x272   :  { %v322_v48 = vmul.f32 %v448_v47, %v311_v40 }
 0x274   :  { %v323_v49 = vpack.c.bf16 %v322_v48, %v322_v48 }
 0x276   :  { %324 = vst [vmem:[#allocation2] sm:$0xf] %v323_v49 }
 0x277   :  { %460 = shalt.err (!%p457_p4)
}
 0x278   :  { %s461_s30 = scalar_lea.hbm %s625_s6, 64 }
 0x279   :  { %p462_p5 = scmp.ne.s32.totalorder %s625_s6, %s461_s30  ;;  %p465_p6 = scmp.lt.u32.totalorder %s461_s30, %s625_s6 }
 0x27b   :  { %p467_p7 = pnand %p465_p6, %p462_p5 }
 0x27d   :  { %470 = shalt.err (!%p467_p7)
}
 0x27e   :  { %336 = dma.vmem_to_hbm [thread:$0]  %s334_s28, 64, %s625_s6, [#allocation3]  }
 0x27f   :  { %471 = dma.done.wait [#allocation3], 64  }
 0x280   :  { %472 = vsyncadd [#allocation3], 4294967232 }
 0x281   :  { %342 = vsyncpa [#allocation3], 1 }

</bundles_post_ra>
